<compile_context>
chip_gen: v5e
topology: v5e:2x2
jax: 0.10.0
libtpu: 0.0.40
codegen_flags: <defaults>
</compile_context>

<pallas_src>
import jax
import jax.numpy as jnp
from jax.experimental import pallas as pl
from jax.experimental.pallas import tpu as pltpu

NEG_SLOPE = 0.01  # nn.LeakyReLU() default

D_IN, D_H1, D_H2, D_H3, D_OUT = 784, 784 * 2, 784, 128, 5


def _ffnn_kernel(x_ref,
                 w1_ref, b1_ref,
                 w2_ref, b2_ref,
                 w3_ref, b3_ref,
                 w4_ref, b4_ref,
                 o_ref):
    """Fused forward for one batch tile: 3x (Linear+LeakyReLU), Linear, softmax."""

    def linear(a, w_ref, b_ref):
        # bf16 operands on the MXU, f32 accumulation; bias add stays in f32.
        return jnp.dot(a.astype(jnp.bfloat16), w_ref[...],
                       preferred_element_type=jnp.float32) + b_ref[...]

    def leaky_relu(z):
        return jnp.where(z > 0, z, NEG_SLOPE * z)

    a = x_ref[...]                                   # bf16 batch tile
    a = leaky_relu(linear(a, w1_ref, b1_ref))
    a = leaky_relu(linear(a, w2_ref, b2_ref))
    a = leaky_relu(linear(a, w3_ref, b3_ref))
    zo = linear(a, w4_ref, b4_ref)

    # softmax over dim=1 (class axis), max-shifted, in f32.
    m = jnp.max(zo, axis=1, keepdims=True)
    e = jnp.exp(zo - m)
    inv = pl.reciprocal(jnp.sum(e, axis=1, keepdims=True), approx=True)
    o_ref[...] = (e * inv).astype(o_ref.dtype)


def ffnn_forward(x, params, *, tb=None):
    (w1, b1), (w2, b2), (w3, b3), (w4, b4) = params

    # bf16 weights + activations on the wire; biases stay f32.
    w1, w2, w3, w4 = (w.astype(jnp.bfloat16) for w in (w1, w2, w3, w4))
    x = x.astype(jnp.bfloat16)

    B = x.shape[0]
    if tb is None:
        tb = B if B <= 512 else 512      # 512 = 4x128 (v5e MXU) = 2x256 (v6e/v7x)
    n_tiles = -(-B // tb)
    b_pad = n_tiles * tb
    if b_pad != B:
        x = jnp.pad(x, ((0, b_pad - B), (0, 0)))

    single = pl.Buffered(1)              # constant blocks: no double buffering

    def w_spec(din, dout):
        return pl.BlockSpec((din, dout), lambda i: (0, 0), pipeline_mode=single)

    def b_spec(d):
        return pl.BlockSpec((1, d), lambda i: (0, 0), pipeline_mode=single)

    # Advisory cost hint for XLA's scheduler.
    n_madds = D_IN * D_H1 + D_H1 * D_H2 + D_H2 * D_H3 + D_H3 * D_OUT
    cost = pl.CostEstimate(
        flops=2 * b_pad * n_madds,
        transcendentals=b_pad * (D_OUT + 1),
        bytes_accessed=2 * n_madds                        # bf16 weights
        + 4 * (D_H1 + D_H2 + D_H3 + D_OUT)                # f32 biases
        + 2 * b_pad * D_IN + 4 * b_pad * D_OUT,           # bf16 x / f32 out
    )

    out = pl.pallas_call(
        _ffnn_kernel,
        out_shape=jax.ShapeDtypeStruct((b_pad, D_OUT), jnp.float32),
        grid_spec=pltpu.PrefetchScalarGridSpec(
            num_scalar_prefetch=0,
            grid=(n_tiles,),
            in_specs=[
                pl.BlockSpec((tb, D_IN), lambda i: (i, 0)),
                w_spec(D_IN, D_H1), b_spec(D_H1),
                w_spec(D_H1, D_H2), b_spec(D_H2),
                w_spec(D_H2, D_H3), b_spec(D_H3),
                w_spec(D_H3, D_OUT), b_spec(D_OUT),
            ],
            out_specs=pl.BlockSpec((tb, D_OUT), lambda i: (i, 0)),
        ),
        compiler_params=pltpu.CompilerParams(
            # Batch tiles are independent -> megacore-shard on v7x (2 TCs).
            dimension_semantics=("parallel",),
            # ~8 MiB resident weights + bf16 x tiles + f32 temps at tb=512:
            # comfortably under 32 MiB, which itself is < v7x's 64 MiB VMEM
            # and above v5e's 16 MiB scoped default.
            vmem_limit_bytes=32 << 20,
        ),
        cost_estimate=cost,
    )(x, w1, b1, w2, b2, w3, b3, w4, b4)
    return out[:B]


def init_params(key):
    """Deterministic init mimicking PyTorch Linear's U(-1/sqrt(fan_in), ...).

    Weights are stored as (in, out) — the transpose of torch's (out, in).
    Biases as (1, out).
    """
    dims = [(D_IN, D_H1), (D_H1, D_H2), (D_H2, D_H3), (D_H3, D_OUT)]
    params = []
    for (din, dout) in dims:
        key, kw, kb = jax.random.split(key, 3)
        bound = 1.0 / jnp.sqrt(jnp.float32(din))
        w = jax.random.uniform(kw, (din, dout), jnp.float32, -bound, bound)
        b = jax.random.uniform(kb, (1, dout), jnp.float32, -bound, bound)
        params.append((w, b))
    return params


def ffnn_reference(x, params):
    """Pure-JAX f32 reference (matches the PyTorch module's forward)."""
    a = x
    for (w, b) in params[:-1]:
        z = a @ w + b
        a = jnp.where(z > 0, z, NEG_SLOPE * z)
    w, b = params[-1]
    zo = a @ w + b
    return jax.nn.softmax(zo, axis=1)


if __name__ == "__main__":
    key = jax.random.PRNGKey(0)
    kx, kp = jax.random.split(key)

    B = 8  # small batch
    x = jax.random.normal(kx, (B, D_IN), jnp.float32)
    params = init_params(kp)

    out = ffnn_forward(x, params)
    out = jax.block_until_ready(out)

    ref = ffnn_reference(x, params)
    assert out.shape == (B, D_OUT)
    # bf16 weights/activations -> looser tolerance vs the f32 reference.
    assert jnp.allclose(out, ref, atol=3e-2, rtol=5e-2), \
        float(jnp.max(jnp.abs(out - ref)))
    # approx-reciprocal softmax -> rows sum to 1 within EUP approx error.
    assert jnp.allclose(jnp.sum(out, axis=1), 1.0, atol=5e-3)

    print("KERNEL_OK")
</pallas_src>

<mosaic_0001>
module attributes {stable_mosaic.version = 11 : i64} {
  func.func @_ffnn_kernel(%arg0: i32, %arg1: memref<8x784xbf16, #tpu.memory_space<vmem>>, %arg2: memref<784x1568xbf16, #tpu.memory_space<vmem>>, %arg3: memref<1x1568xf32, #tpu.memory_space<vmem>>, %arg4: memref<1568x784xbf16, #tpu.memory_space<vmem>>, %arg5: memref<1x784xf32, #tpu.memory_space<vmem>>, %arg6: memref<784x128xbf16, #tpu.memory_space<vmem>>, %arg7: memref<1x128xf32, #tpu.memory_space<vmem>>, %arg8: memref<128x5xbf16, #tpu.memory_space<vmem>>, %arg9: memref<1x5xf32, #tpu.memory_space<vmem>>, %arg10: memref<8x5xf32, #tpu.memory_space<vmem>>) attributes {dimension_semantics = [#tpu.dimension_semantics<parallel>], iteration_bounds = array<i64: 1>, scalar_prefetch = 0 : i64, scratch_operands = 0 : i64, tpu.core_type = #tpu.core_type<tc>, window_params = [{transform_indices = @transform_0, window_bounds = array<i64: 8, 784>}, {pipeline_mode = #tpu.pipeline_mode<synchronous>, transform_indices = @transform_1, window_bounds = array<i64: 784, 1568>}, {pipeline_mode = #tpu.pipeline_mode<synchronous>, transform_indices = @transform_2, window_bounds = array<i64: 1, 1568>}, {pipeline_mode = #tpu.pipeline_mode<synchronous>, transform_indices = @transform_3, window_bounds = array<i64: 1568, 784>}, {pipeline_mode = #tpu.pipeline_mode<synchronous>, transform_indices = @transform_4, window_bounds = array<i64: 1, 784>}, {pipeline_mode = #tpu.pipeline_mode<synchronous>, transform_indices = @transform_5, window_bounds = array<i64: 784, 128>}, {pipeline_mode = #tpu.pipeline_mode<synchronous>, transform_indices = @transform_6, window_bounds = array<i64: 1, 128>}, {pipeline_mode = #tpu.pipeline_mode<synchronous>, transform_indices = @transform_7, window_bounds = array<i64: 128, 5>}, {pipeline_mode = #tpu.pipeline_mode<synchronous>, transform_indices = @transform_8, window_bounds = array<i64: 1, 5>}, {transform_indices = @transform_9, window_bounds = array<i64: 8, 5>}]} {
    %c0 = arith.constant 0 : index
    %c0_0 = arith.constant 0 : index
    %0 = vector.load %arg1[%c0, %c0_0] : memref<8x784xbf16, #tpu.memory_space<vmem>>, vector<8x784xbf16>
    %c0_1 = arith.constant 0 : index
    %c0_2 = arith.constant 0 : index
    %1 = vector.load %arg2[%c0_1, %c0_2] : memref<784x1568xbf16, #tpu.memory_space<vmem>>, vector<784x1568xbf16>
    %cst = arith.constant dense<0.000000e+00> : vector<8x1568xf32>
    %2 = tpu.matmul %0, %1, %cst {dimension_numbers = #tpu.dot_dimension_numbers<[1], [0], [0], [1], [0, 0, 1, 1], [], []>} : vector<8x784xbf16>, vector<784x1568xbf16>, vector<8x1568xf32> -> vector<8x1568xf32>
    %c0_3 = arith.constant 0 : index
    %c0_4 = arith.constant 0 : index
    %3 = vector.load %arg3[%c0_3, %c0_4] : memref<1x1568xf32, #tpu.memory_space<vmem>>, vector<1x1568xf32>
    %4 = vector.broadcast %3 : vector<1x1568xf32> to vector<8x1568xf32>
    %5 = arith.addf %2, %4 : vector<8x1568xf32>
    %cst_5 = arith.constant 0.000000e+00 : f32
    %6 = vector.broadcast %cst_5 : f32 to vector<8x1568xf32>
    %7 = arith.cmpf ogt, %5, %6 : vector<8x1568xf32>
    %cst_6 = arith.constant 0.00999999977 : f32
    %8 = vector.broadcast %cst_6 : f32 to vector<8x1568xf32>
    %9 = arith.mulf %8, %5 : vector<8x1568xf32>
    %10 = arith.select %7, %5, %9 : vector<8x1568xi1>, vector<8x1568xf32>
    %11 = arith.truncf %10 : vector<8x1568xf32> to vector<8x1568xbf16>
    %c0_7 = arith.constant 0 : index
    %c0_8 = arith.constant 0 : index
    %12 = vector.load %arg4[%c0_7, %c0_8] : memref<1568x784xbf16, #tpu.memory_space<vmem>>, vector<1568x784xbf16>
    %cst_9 = arith.constant dense<0.000000e+00> : vector<8x784xf32>
    %13 = tpu.matmul %11, %12, %cst_9 {dimension_numbers = #tpu.dot_dimension_numbers<[1], [0], [0], [1], [0, 0, 1, 1], [], []>} : vector<8x1568xbf16>, vector<1568x784xbf16>, vector<8x784xf32> -> vector<8x784xf32>
    %c0_10 = arith.constant 0 : index
    %c0_11 = arith.constant 0 : index
    %14 = vector.load %arg5[%c0_10, %c0_11] : memref<1x784xf32, #tpu.memory_space<vmem>>, vector<1x784xf32>
    %15 = vector.broadcast %14 : vector<1x784xf32> to vector<8x784xf32>
    %16 = arith.addf %13, %15 : vector<8x784xf32>
    %cst_12 = arith.constant 0.000000e+00 : f32
    %17 = vector.broadcast %cst_12 : f32 to vector<8x784xf32>
    %18 = arith.cmpf ogt, %16, %17 : vector<8x784xf32>
    %cst_13 = arith.constant 0.00999999977 : f32
    %19 = vector.broadcast %cst_13 : f32 to vector<8x784xf32>
    %20 = arith.mulf %19, %16 : vector<8x784xf32>
    %21 = arith.select %18, %16, %20 : vector<8x784xi1>, vector<8x784xf32>
    %22 = arith.truncf %21 : vector<8x784xf32> to vector<8x784xbf16>
    %c0_14 = arith.constant 0 : index
    %c0_15 = arith.constant 0 : index
    %23 = vector.load %arg6[%c0_14, %c0_15] : memref<784x128xbf16, #tpu.memory_space<vmem>>, vector<784x128xbf16>
    %cst_16 = arith.constant dense<0.000000e+00> : vector<8x128xf32>
    %24 = tpu.matmul %22, %23, %cst_16 {dimension_numbers = #tpu.dot_dimension_numbers<[1], [0], [0], [1], [0, 0, 1, 1], [], []>} : vector<8x784xbf16>, vector<784x128xbf16>, vector<8x128xf32> -> vector<8x128xf32>
    %c0_17 = arith.constant 0 : index
    %c0_18 = arith.constant 0 : index
    %25 = vector.load %arg7[%c0_17, %c0_18] : memref<1x128xf32, #tpu.memory_space<vmem>>, vector<1x128xf32>
    %26 = vector.broadcast %25 : vector<1x128xf32> to vector<8x128xf32>
    %27 = arith.addf %24, %26 : vector<8x128xf32>
    %cst_19 = arith.constant 0.000000e+00 : f32
    %28 = vector.broadcast %cst_19 : f32 to vector<8x128xf32>
    %29 = arith.cmpf ogt, %27, %28 : vector<8x128xf32>
    %cst_20 = arith.constant 0.00999999977 : f32
    %30 = vector.broadcast %cst_20 : f32 to vector<8x128xf32>
    %31 = arith.mulf %30, %27 : vector<8x128xf32>
    %32 = arith.select %29, %27, %31 : vector<8x128xi1>, vector<8x128xf32>
    %33 = arith.truncf %32 : vector<8x128xf32> to vector<8x128xbf16>
    %c0_21 = arith.constant 0 : index
    %c0_22 = arith.constant 0 : index
    %34 = vector.load %arg8[%c0_21, %c0_22] : memref<128x5xbf16, #tpu.memory_space<vmem>>, vector<128x5xbf16>
    %cst_23 = arith.constant dense<0.000000e+00> : vector<8x5xf32>
    %35 = tpu.matmul %33, %34, %cst_23 {dimension_numbers = #tpu.dot_dimension_numbers<[1], [0], [0], [1], [0, 0, 1, 1], [], []>} : vector<8x128xbf16>, vector<128x5xbf16>, vector<8x5xf32> -> vector<8x5xf32>
    %c0_24 = arith.constant 0 : index
    %c0_25 = arith.constant 0 : index
    %36 = vector.load %arg9[%c0_24, %c0_25] : memref<1x5xf32, #tpu.memory_space<vmem>>, vector<1x5xf32>
    %37 = vector.broadcast %36 : vector<1x5xf32> to vector<8x5xf32>
    %38 = arith.addf %35, %37 : vector<8x5xf32>
    %cst_26 = arith.constant dense<0xFF800000> : vector<8xf32>
    %39 = vector.multi_reduction <maximumf>, %38, %cst_26 [1] : vector<8x5xf32> to vector<8xf32>
    %40 = vector.shape_cast %39 : vector<8xf32> to vector<8x1xf32>
    %41 = vector.broadcast %40 : vector<8x1xf32> to vector<8x5xf32>
    %42 = arith.subf %38, %41 : vector<8x5xf32>
    %43 = math.exp %42 : vector<8x5xf32>
    %cst_27 = arith.constant dense<0.000000e+00> : vector<8xf32>
    %44 = vector.multi_reduction <add>, %43, %cst_27 [1] : vector<8x5xf32> to vector<8xf32>
    %45 = vector.shape_cast %44 : vector<8xf32> to vector<8x1xf32>
    %46 = tpu.reciprocal %45 {approx = true} : vector<8x1xf32> -> vector<8x1xf32>
    %47 = vector.broadcast %46 : vector<8x1xf32> to vector<8x5xf32>
    %48 = arith.mulf %43, %47 : vector<8x5xf32>
    %c0_28 = arith.constant 0 : index
    %c0_29 = arith.constant 0 : index
    %49 = vector.load %arg10[%c0_28, %c0_29] : memref<8x5xf32, #tpu.memory_space<vmem>>, vector<8x5xf32>
    tpu.vector_store %arg10[%c0_28, %c0_29], %48 {strides = array<i32>} : memref<8x5xf32, #tpu.memory_space<vmem>>, vector<8x5xf32>,
    return
  }
  func.func @transform_0(%arg0: i32) -> (i32, i32) {
    %c0_i32 = arith.constant 0 : i32
    %c0_i32_0 = arith.constant 0 : i32
    return %arg0, %c0_i32 : i32, i32
  }
  func.func @transform_1(%arg0: i32) -> (i32, i32) {
    %c0_i32 = arith.constant 0 : i32
    %c0_i32_0 = arith.constant 0 : i32
    %c0_i32_1 = arith.constant 0 : i32
    return %c0_i32, %c0_i32_0 : i32, i32
  }
  func.func @transform_2(%arg0: i32) -> (i32, i32) {
    %c0_i32 = arith.constant 0 : i32
    %c0_i32_0 = arith.constant 0 : i32
    %c0_i32_1 = arith.constant 0 : i32
    return %c0_i32, %c0_i32_0 : i32, i32
  }
  func.func @transform_3(%arg0: i32) -> (i32, i32) {
    %c0_i32 = arith.constant 0 : i32
    %c0_i32_0 = arith.constant 0 : i32
    %c0_i32_1 = arith.constant 0 : i32
    return %c0_i32, %c0_i32_0 : i32, i32
  }
  func.func @transform_4(%arg0: i32) -> (i32, i32) {
    %c0_i32 = arith.constant 0 : i32
    %c0_i32_0 = arith.constant 0 : i32
    %c0_i32_1 = arith.constant 0 : i32
    return %c0_i32, %c0_i32_0 : i32, i32
  }
  func.func @transform_5(%arg0: i32) -> (i32, i32) {
    %c0_i32 = arith.constant 0 : i32
    %c0_i32_0 = arith.constant 0 : i32
    %c0_i32_1 = arith.constant 0 : i32
    return %c0_i32, %c0_i32_0 : i32, i32
  }
  func.func @transform_6(%arg0: i32) -> (i32, i32) {
    %c0_i32 = arith.constant 0 : i32
    %c0_i32_0 = arith.constant 0 : i32
    %c0_i32_1 = arith.constant 0 : i32
    return %c0_i32, %c0_i32_0 : i32, i32
  }
  func.func @transform_7(%arg0: i32) -> (i32, i32) {
    %c0_i32 = arith.constant 0 : i32
    %c0_i32_0 = arith.constant 0 : i32
    %c0_i32_1 = arith.constant 0 : i32
    return %c0_i32, %c0_i32_0 : i32, i32
  }
  func.func @transform_8(%arg0: i32) -> (i32, i32) {
    %c0_i32 = arith.constant 0 : i32
    %c0_i32_0 = arith.constant 0 : i32
    %c0_i32_1 = arith.constant 0 : i32
    return %c0_i32, %c0_i32_0 : i32, i32
  }
  func.func @transform_9(%arg0: i32) -> (i32, i32) {
    %c0_i32 = arith.constant 0 : i32
    %c0_i32_0 = arith.constant 0 : i32
    return %arg0, %c0_i32 : i32, i32
  }
}

</mosaic_0001>

<bundles_post_ra>
// kernel: tpu_custom_call.1
= control target key start
LH: loop header
LB: loop body
LE: loop exit
PB: predicated region body
PF: predicated region fallthrough
CT: control target
= control target key end

     0   :  { %vm4012_vm0 = vcmask 130048   ;;  %s27189_s0 = inlined_call_operand.vmem [shape: bf16[8,784], index: 0, kind: input, shape index: {}]   ;;  %s27190_s1 = inlined_call_operand.vmem [shape: bf16[784,1568], index: 1, kind: input, shape index: {}]   ;;  %s27191_s2 = inlined_call_operand.vmem [shape: f32[1,1568], index: 2, kind: input, shape index: {}]   ;;  %s27192_s3 = inlined_call_operand.vmem [shape: bf16[1568,784], index: 3, kind: input, shape index: {}]   ;;  %s27193_s4 = inlined_call_operand.vmem [shape: f32[1,784], index: 4, kind: input, shape index: {}]   ;;  %s27194_s5 = inlined_call_operand.vmem [shape: bf16[784,128], index: 5, kind: input, shape index: {}]   ;;  %s27195_s6 = inlined_call_operand.vmem [shape: f32[1,128], index: 6, kind: input, shape index: {}]   ;;  %s27196_s7 = inlined_call_operand.vmem [shape: bf16[128,5], index: 7, kind: input, shape index: {}]   ;;  %s27197_s8 = inlined_call_operand.vmem [shape: f32[1,5], index: 8, kind: input, shape index: {}]   ;;  %s27198_s9 = inlined_call_operand.hbm [shape: f32[8,5], index: 9, kind: output, shape index: {}]  }
   0x1   :  { %v11764_v0 = vld [vmem:[%s27190_s1 + $0x2d8] sm:$0xf]  ;;  %v17036_v1 = vld [vmem:[%s27190_s1 + $0x308] sm:$0xf0]  ;;  %v11712_v11 = vld [vmem:[%s27190_s1 + $0x270] sm:$0xf] }
   0x2   :  { %v12180_v2 = vld [vmem:[%s27190_s1 + $0x618] sm:$0xf]  ;;  %v11765_v3 = vor.u32 %v17036_v1, %v11764_v0  ;;  %v17140_v4 = vld [vmem:[%s27190_s1 + $0x648] sm:$0xf0]  ;;  %v17023_v13 = vld [vmem:[%s27190_s1 + $0x2a0] sm:$0xf0] }
   0x3   :  { %v12596_v5 = vld [vmem:[%s27190_s1 + $0x958] sm:$0xf]  ;;  %v17244_v6 = vld [vmem:[%s27190_s1 + $0x988] sm:$0xf0]  ;;  %v12181_v7 = vor.u32 %v17140_v4, %v12180_v2  ;;  %v12128_v14 = vld [vmem:[%s27190_s1 + $0x5b0] sm:$0xf]  ;;  %v11713_v16 = vor.u32 %v17023_v13, %v11712_v11 }
   0x4   :  { %v12597_v8 = vor.u32 %v17244_v6, %v12596_v5  ;;  %v13012_v9 = vld [vmem:[%s27190_s1 + $0xc98] sm:$0xf]  ;;  %v17348_v10 = vld [vmem:[%s27190_s1 + $0xcc8] sm:$0xf0]  ;;  %4016 = vmatpush.bf16.msra.mxu0 %v11765_v3  ;;  %v17127_v15 = vld [vmem:[%s27190_s1 + $0x5e0] sm:$0xf0] }
   0x5   :  { %v13013_v12 = vor.u32 %v17348_v10, %v13012_v9  ;;  %4029 = vmatpush.bf16.msra.mxu1 %v12181_v7  ;;  %v12129_v17 = vor.u32 %v17127_v15, %v12128_v14  ;;  %v12544_v18 = vld [vmem:[%s27190_s1 + $0x8f0] sm:$0xf]  ;;  %v17231_v19 = vld [vmem:[%s27190_s1 + $0x920] sm:$0xf0]  ;;  %v11660_v23 = vld [vmem:[%s27190_s1 + $0x208] sm:$0xf] }
   0x6   :  { %4042 = vmatpush.bf16.msra.mxu2 %v12597_v8  ;;  %v12960_v20 = vld [vmem:[%s27190_s1 + $0xc30] sm:$0xf]  ;;  %v12545_v21 = vor.u32 %v17231_v19, %v12544_v18  ;;  %v17335_v22 = vld [vmem:[%s27190_s1 + $0xc60] sm:$0xf0]  ;;  %v17010_v24 = vld [vmem:[%s27190_s1 + $0x238] sm:$0xf0] }
   0x7   :  { %4055 = vmatpush.bf16.msra.mxu3 %v13013_v12  ;;  %v12961_v25 = vor.u32 %v17335_v22, %v12960_v20  ;;  %v12076_v26 = vld [vmem:[%s27190_s1 + $0x548] sm:$0xf]  ;;  %v17114_v27 = vld [vmem:[%s27190_s1 + $0x578] sm:$0xf0]  ;;  %v11661_v29 = vor.u32 %v17010_v24, %v11660_v23  ;;  %v11608_v35 = vld [vmem:[%s27190_s1 + $0x1a0] sm:$0xf] }
   0x8   :  { %v12492_v28 = vld [vmem:[%s27190_s1 + $0x888] sm:$0xf]  ;;  %4017 = vmatpush.bf16.msra.mxu0 %v11713_v16  ;;  %v17218_v30 = vld [vmem:[%s27190_s1 + $0x8b8] sm:$0xf0]  ;;  %v12077_v33 = vor.u32 %v17114_v27, %v12076_v26  ;;  %v16997_v36 = vld [vmem:[%s27190_s1 + $0x1d0] sm:$0xf0] }
   0x9   :  { %v12908_v31 = vld [vmem:[%s27190_s1 + $0xbc8] sm:$0xf]  ;;  %v17322_v32 = vld [vmem:[%s27190_s1 + $0xbf8] sm:$0xf0]  ;;  %4030 = vmatpush.bf16.msra.mxu1 %v12129_v17  ;;  %v12493_v34 = vor.u32 %v17218_v30, %v12492_v28  ;;  %v12024_v37 = vld [vmem:[%s27190_s1 + $0x4e0] sm:$0xf]  ;;  %v11609_v44 = vor.u32 %v16997_v36, %v11608_v35 }
   0xa   :  { %4043 = vmatpush.bf16.msra.mxu2 %v12545_v21  ;;  %v12909_v38 = vor.u32 %v17322_v32, %v12908_v31  ;;  %v17101_v39 = vld [vmem:[%s27190_s1 + $0x510] sm:$0xf0]  ;;  %v12440_v40 = vld [vmem:[%s27190_s1 + $0x820] sm:$0xf]  ;;  %v11556_v47 = vld [vmem:[%s27190_s1 + $0x138] sm:$0xf] }
   0xb   :  { %4056 = vmatpush.bf16.msra.mxu3 %v12961_v25  ;;  %v17205_v41 = vld [vmem:[%s27190_s1 + $0x850] sm:$0xf0]  ;;  %v12856_v42 = vld [vmem:[%s27190_s1 + $0xb60] sm:$0xf]  ;;  %v12025_v45 = vor.u32 %v17101_v39, %v12024_v37  ;;  %v16984_v48 = vld [vmem:[%s27190_s1 + $0x168] sm:$0xf0] }
   0xc   :  { %v17309_v43 = vld [vmem:[%s27190_s1 + $0xb90] sm:$0xf0]  ;;  %4018 = vmatpush.bf16.msra.mxu0 %v11661_v29  ;;  %v12441_v46 = vor.u32 %v17205_v41, %v12440_v40  ;;  %v11972_v49 = vld [vmem:[%s27190_s1 + $0x478] sm:$0xf]  ;;  %v17088_v51 = vld [vmem:[%s27190_s1 + $0x4a8] sm:$0xf0]  ;;  %v11557_v56 = vor.u32 %v16984_v48, %v11556_v47 }
   0xd   :  { %4031 = vmatpush.bf16.msra.mxu1 %v12077_v33  ;;  %v12857_v50 = vor.u32 %v17309_v43, %v12856_v42  ;;  %v12388_v52 = vld [vmem:[%s27190_s1 + $0x7b8] sm:$0xf]  ;;  %v17192_v53 = vld [vmem:[%s27190_s1 + $0x7e8] sm:$0xf0]  ;;  %v11973_v57 = vor.u32 %v17088_v51, %v11972_v49  ;;  %v11504_v59 = vld [vmem:[%s27190_s1 + $0xd0] sm:$0xf] }
   0xe   :  { %4044 = vmatpush.bf16.msra.mxu2 %v12493_v34  ;;  %v12804_v54 = vld [vmem:[%s27190_s1 + $0xaf8] sm:$0xf]  ;;  %v17296_v55 = vld [vmem:[%s27190_s1 + $0xb28] sm:$0xf0]  ;;  %v12389_v58 = vor.u32 %v17192_v53, %v12388_v52  ;;  %v16971_v60 = vld [vmem:[%s27190_s1 + $0x100] sm:$0xf0] }
   0xf   :  { %4057 = vmatpush.bf16.msra.mxu3 %v12909_v38  ;;  %v11920_v61 = vld [vmem:[%s27190_s1 + $0x410] sm:$0xf]  ;;  %v12805_v62 = vor.u32 %v17296_v55, %v12804_v54  ;;  %v17075_v63 = vld [vmem:[%s27190_s1 + $0x440] sm:$0xf0]  ;;  %v11505_v4 = vor.u32 %v16971_v60, %v11504_v59  ;;  %v11452_v7 = vld [vmem:[%s27190_s1 + $0x68] sm:$0xf] }
  0x10   :  { %4019 = vmatpush.bf16.msra.mxu0 %v11609_v44  ;;  %v12336_v0 = vld [vmem:[%s27190_s1 + $0x750] sm:$0xf]  ;;  %v17179_v1 = vld [vmem:[%s27190_s1 + $0x780] sm:$0xf0]  ;;  %v11921_v5 = vor.u32 %v17075_v63, %v11920_v61  ;;  %v16958_v8 = vld [vmem:[%s27190_s1 + $0x98] sm:$0xf0] }
  0x11   :  { %4032 = vmatpush.bf16.msra.mxu1 %v12025_v45  ;;  %v12752_v2 = vld [vmem:[%s27190_s1 + $0xa90] sm:$0xf]  ;;  %v17283_v3 = vld [vmem:[%s27190_s1 + $0xac0] sm:$0xf0]  ;;  %v12337_v6 = vor.u32 %v17179_v1, %v12336_v0  ;;  %v11868_v9 = vld [vmem:[%s27190_s1 + $0x3a8] sm:$0xf]  ;;  %v11453_v16 = vor.u32 %v16958_v8, %v11452_v7 }
  0x12   :  { %4045 = vmatpush.bf16.msra.mxu2 %v12441_v46  ;;  %v12753_v10 = vor.u32 %v17283_v3, %v12752_v2  ;;  %v17062_v11 = vld [vmem:[%s27190_s1 + $0x3d8] sm:$0xf0]  ;;  %v12284_v12 = vld [vmem:[%s27190_s1 + $0x6e8] sm:$0xf]  ;;  %v11400_v17 = vld [vmem:[%s27190_s1] sm:$0xf] }
  0x13   :  { %4058 = vmatpush.bf16.msra.mxu3 %v12857_v50  ;;  %v17166_v13 = vld [vmem:[%s27190_s1 + $0x718] sm:$0xf0]  ;;  %v12700_v14 = vld [vmem:[%s27190_s1 + $0xa28] sm:$0xf]  ;;  %v16945_v18 = vld [vmem:[%s27190_s1 + $0x30] sm:$0xf0]  ;;  %v11869_v20 = vor.u32 %v17062_v11, %v11868_v9 }
  0x14   :  { %4020 = vmatpush.bf16.msra.mxu0 %v11557_v56  ;;  %v17270_v15 = vld [vmem:[%s27190_s1 + $0xa58] sm:$0xf0]  ;;  %v11816_v19 = vld [vmem:[%s27190_s1 + $0x340] sm:$0xf]  ;;  %v12285_v21 = vor.u32 %v17166_v13, %v12284_v12  ;;  %v17049_v22 = vld [vmem:[%s27190_s1 + $0x370] sm:$0xf0]  ;;  %v11401_v32 = vor.u32 %v16945_v18, %v11400_v17 }
  0x15   :  { %4033 = vmatpush.bf16.msra.mxu1 %v11973_v57  ;;  %v12232_v23 = vld [vmem:[%s27190_s1 + $0x680] sm:$0xf]  ;;  %v17153_v24 = vld [vmem:[%s27190_s1 + $0x6b0] sm:$0xf0]  ;;  %v12701_v25 = vor.u32 %v17270_v15, %v12700_v14  ;;  %v35_v28 = vld [vmem:[%s27189_s0 + $0x8] sm:$0xff]  ;;  %v11817_v36 = vor.u32 %v17049_v22, %v11816_v19 }
  0x16   :  { %4046 = vmatpush.bf16.msra.mxu2 %v12389_v58  ;;  %v12648_v26 = vld [vmem:[%s27190_s1 + $0x9c0] sm:$0xf]  ;;  %v17257_v27 = vld [vmem:[%s27190_s1 + $0x9f0] sm:$0xf0]  ;;  %v13428_v29 = vld [vmem:[%s27190_s1 + $0xfd8] sm:$0xf]  ;;  %v12233_v37 = vor.u32 %v17153_v24, %v12232_v23  ;;  %v760_v40 = vunpack.c.l.b16 %v35_v28  ;;  %v761_v41 = vunpack.c.h.b16 %v35_v28 }
  0x17   :  { %4059 = vmatpush.bf16.msra.mxu3 %v12805_v62  ;;  %v17452_v30 = vld [vmem:[%s27190_s1 + $0x1008] sm:$0xf0]  ;;  %v13844_v31 = vld [vmem:[%s27190_s1 + $0x1318] sm:$0xf]  ;;  %v17030_v34 = vld [vmem:[%s27190_s1 + $0x2dc] sm:$0xf]  ;;  %v12649_v42 = vor.u32 %v17257_v27, %v12648_v26 }
  0x18   :  { %4021 = vmatpush.bf16.msra.mxu0 %v11505_v4  ;;  %v17556_v33 = vld [vmem:[%s27190_s1 + $0x1348] sm:$0xf0]  ;;  %v11766_v35 = vld [vmem:[%s27190_s1 + $0x30c] sm:$0xf0]  ;;  %v13896_v38 = vld [vmem:[%s27190_s1 + $0x1380] sm:$0xf]  ;;  %v13429_v43 = vor.u32 %v17452_v30, %v13428_v29  ;;  %v18653_v55 = vpack.c.b16 %v760_v40, %v760_v40  ;;  %v18658_v57 = vpack.c.b16 %v761_v41, %v761_v41 }
  0x19   :  { %4034 = vmatpush.bf16.msra.mxu1 %v11921_v5  ;;  %v17569_v39 = vld [vmem:[%s27190_s1 + $0x13b0] sm:$0xf0]  ;;  %v17134_v44 = vld [vmem:[%s27190_s1 + $0x61c] sm:$0xf]  ;;  %v12182_v45 = vld [vmem:[%s27190_s1 + $0x64c] sm:$0xf0]  ;;  %v13845_v46 = vor.u32 %v17556_v33, %v13844_v31  ;;  %v11769_v47 = vor.u32 %v17030_v34, %v11766_v35 }
  0x1a   :  { %4047 = vmatpush.bf16.msra.mxu2 %v12337_v6  ;;  %v13376_v48 = vld [vmem:[%s27190_s1 + $0xf70] sm:$0xf]  ;;  %v17439_v49 = vld [vmem:[%s27190_s1 + $0xfa0] sm:$0xf0]  ;;  %v13897_v51 = vor.u32 %v17569_v39, %v13896_v38  ;;  %v17017_v53 = vld [vmem:[%s27190_s1 + $0x274] sm:$0xf]  ;;  %v12185_v58 = vor.u32 %v17134_v44, %v12182_v45 }
  0x1b   :  { %4060 = vmatpush.bf16.msra.mxu3 %v12753_v10  ;;  %v13792_v50 = vld [vmem:[%s27190_s1 + $0x12b0] sm:$0xf]  ;;  %v17543_v52 = vld [vmem:[%s27190_s1 + $0x12e0] sm:$0xf0]  ;;  %v11714_v54 = vld [vmem:[%s27190_s1 + $0x2a4] sm:$0xf0]  ;;  %v13377_v59 = vor.u32 %v17439_v49, %v13376_v48 }
  0x1c   :  { %4022 = vmatpush.bf16.msra.mxu0 %v11453_v16  ;;  %v34_v56 = vld [vmem:[%s27189_s0] sm:$0xff]  ;;  %v17121_v60 = vld [vmem:[%s27190_s1 + $0x5b4] sm:$0xf]  ;;  %v12130_v61 = vld [vmem:[%s27190_s1 + $0x5e4] sm:$0xf0]  ;;  %v13793_v0 = vor.u32 %v17543_v52, %v13792_v50  ;;  %v11717_v1 = vor.u32 %v17017_v53, %v11714_v54 }
  0x1d   :  { %4035 = vmatpush.bf16.msra.mxu1 %v11869_v20  ;;  %v758_v62 = vunpack.c.l.b16 %v34_v56  ;;  %v759_v63 = vunpack.c.h.b16 %v34_v56  ;;  %v13324_v2 = vld [vmem:[%s27190_s1 + $0xf08] sm:$0xf]  ;;  %v17426_v3 = vld [vmem:[%s27190_s1 + $0xf38] sm:$0xf0]  ;;  %v17004_v6 = vld [vmem:[%s27190_s1 + $0x20c] sm:$0xf]  ;;  %v12133_v10 = vor.u32 %v17121_v60, %v12130_v61 }
  0x1e   :  { %4048 = vmatpush.bf16.msra.mxu2 %v12285_v21  ;;  %v13740_v4 = vld [vmem:[%s27190_s1 + $0x1248] sm:$0xf]  ;;  %v17530_v5 = vld [vmem:[%s27190_s1 + $0x1278] sm:$0xf0]  ;;  %v11662_v7 = vld [vmem:[%s27190_s1 + $0x23c] sm:$0xf0]  ;;  %v13325_v11 = vor.u32 %v17426_v3, %v13324_v2 }
  0x1f   :  { %4061 = vmatpush.bf16.msra.mxu3 %v12701_v25  ;;  %v18684_v8 = vpack.c.b16 %v758_v62, %v758_v62  ;;  %v18686_v9 = vpack.c.b16 %v759_v63, %v759_v63  ;;  %v17108_v12 = vld [vmem:[%s27190_s1 + $0x54c] sm:$0xf]  ;;  %v12078_v13 = vld [vmem:[%s27190_s1 + $0x57c] sm:$0xf0]  ;;  %v13741_v14 = vor.u32 %v17530_v5, %v13740_v4  ;;  %v11665_v15 = vor.u32 %v17004_v6, %v11662_v7  ;;  %v17413_v17 = vld [vmem:[%s27190_s1 + $0xed0] sm:$0xf0] }
  0x20   :  { %4023 = vmatpush.bf16.msra.mxu0 %v11401_v32  ;;  %v13272_v16 = vld [vmem:[%s27190_s1 + $0xea0] sm:$0xf]  ;;  %v17517_v19 = vld [vmem:[%s27190_s1 + $0x1210] sm:$0xf0]  ;;  %v16991_v20 = vld [vmem:[%s27190_s1 + $0x1a4] sm:$0xf]  ;;  %v12081_v22 = vor.u32 %v17108_v12, %v12078_v13 }
  0x21   :  { %4036 = vmatpush.bf16.msra.mxu1 %v11817_v36  ;;  %v13688_v18 = vld [vmem:[%s27190_s1 + $0x11e0] sm:$0xf]  ;;  %v11610_v21 = vld [vmem:[%s27190_s1 + $0x1d4] sm:$0xf0]  ;;  %v13273_v23 = vor.u32 %v17413_v17, %v13272_v16  ;;  %v17095_v24 = vld [vmem:[%s27190_s1 + $0x4e4] sm:$0xf] }
  0x22   :  { %4049 = vmatpush.bf16.msra.mxu2 %v12233_v37  ;;  %v12026_v25 = vld [vmem:[%s27190_s1 + $0x514] sm:$0xf0]  ;;  %v13689_v27 = vor.u32 %v17517_v19, %v13688_v18  ;;  %v11613_v28 = vor.u32 %v16991_v20, %v11610_v21  ;;  %v17400_v29 = vld [vmem:[%s27190_s1 + $0xe68] sm:$0xf0]  ;;  %v16978_v32 = vld [vmem:[%s27190_s1 + $0x13c] sm:$0xf] }
  0x23   :  { %4062 = vmatpush.bf16.msra.mxu3 %v12649_v42  ;;  %4024 = vmatmul.bf16.vlgmr.msra.gmra.mxu0 %v18684_v8  ;;  %v13220_v26 = vld [vmem:[%s27190_s1 + $0xe38] sm:$0xf]  ;;  %v17504_v31 = vld [vmem:[%s27190_s1 + $0x11a8] sm:$0xf0]  ;;  %v11558_v33 = vld [vmem:[%s27190_s1 + $0x16c] sm:$0xf0]  ;;  %v12029_v36 = vor.u32 %v17095_v24, %v12026_v25 }
  0x24   :  { %4068 = vmatpush.bf16.msrb.mxu0 %v13429_v43  ;;  %4037 = vmatmul.bf16.vlgmr.msra.gmra.mxu1 %v18686_v9  ;;  %v13636_v30 = vld [vmem:[%s27190_s1 + $0x1178] sm:$0xf]  ;;  %v13221_v37 = vor.u32 %v17400_v29, %v13220_v26  ;;  %v17082_v38 = vld [vmem:[%s27190_s1 + $0x47c] sm:$0xf]  ;;  %v11974_v39 = vld [vmem:[%s27190_s1 + $0x4ac] sm:$0xf0]  ;;  %v11561_v41 = vor.u32 %v16978_v32, %v11558_v33 }
  0x25   :  { %4081 = vmatpush.bf16.msrb.mxu1 %v13845_v46  ;;  %4050 = vmatmul.bf16.vlgmr.msra.gmra.mxu2 %v18653_v55  ;;  %v37_v34 = vld [vmem:[%s27189_s0 + $0x18] sm:$0xf]  ;;  %v13637_v40 = vor.u32 %v17504_v31, %v13636_v30  ;;  %v13168_v42 = vld [vmem:[%s27190_s1 + $0xdd0] sm:$0xf]  ;;  %v17387_v43 = vld [vmem:[%s27190_s1 + $0xe00] sm:$0xf0]  ;;  %v11977_v49 = vor.u32 %v17082_v38, %v11974_v39 }
  0x26   :  { %4101 = vmatpush.bf16.msrb.mxu2 %v13897_v51  ;;  %4063 = vmatmul.bf16.vlgmr.msra.gmra.mxu3 %v18658_v57  ;;  %v764_v35 = vunpack.c.l.b16 %v37_v34  ;;  %v13584_v44 = vld [vmem:[%s27190_s1 + $0x1110] sm:$0xf]  ;;  %v17491_v45 = vld [vmem:[%s27190_s1 + $0x1140] sm:$0xf0]  ;;  %v16965_v46 = vld [vmem:[%s27190_s1 + $0xd4] sm:$0xf]  ;;  %v13169_v50 = vor.u32 %v17387_v43, %v13168_v42 }
  0x27   :  { %4107 = vmatpush.bf16.msrb.mxu3 %v11769_v47  ;;  %v11506_v47 = vld [vmem:[%s27190_s1 + $0x104] sm:$0xf0]  ;;  %v17069_v51 = vld [vmem:[%s27190_s1 + $0x414] sm:$0xf]  ;;  %v13585_v53 = vor.u32 %v17491_v45, %v13584_v44  ;;  %v17478_v60 = vld [vmem:[%s27190_s1 + $0x10d8] sm:$0xf0] }
  0x28   :  { %4069 = vmatpush.bf16.msrb.mxu0 %v13377_v59  ;;  %v18767_v48 = vpack.c.b16 %v764_v35, %v764_v35  ;;  %v11922_v52 = vld [vmem:[%s27190_s1 + $0x444] sm:$0xf0]  ;;  %v11509_v54 = vor.u32 %v16965_v46, %v11506_v47  ;;  %v16952_v61 = vld [vmem:[%s27190_s1 + $0x6c] sm:$0xf]  ;;  %v11454_v62 = vld [vmem:[%s27190_s1 + $0x9c] sm:$0xf0] }
  0x29   :  { %4082 = vmatpush.bf16.msrb.mxu1 %v13793_v0  ;;  %v13116_v56 = vld [vmem:[%s27190_s1 + $0xd68] sm:$0xf]  ;;  %v17056_v63 = vld [vmem:[%s27190_s1 + $0x3ac] sm:$0xf]  ;;  %v11925_v0 = vor.u32 %v17069_v51, %v11922_v52  ;;  %v11870_v2 = vld [vmem:[%s27190_s1 + $0x3dc] sm:$0xf0]  ;;  %v11457_v6 = vor.u32 %v16952_v61, %v11454_v62 }
  0x2a   :  { %4120 = vmatpush.bf16.msra.mxu2 %v12185_v58  ;;  %v17374_v58 = vld [vmem:[%s27190_s1 + $0xd98] sm:$0xf0]  ;;  %v13532_v59 = vld [vmem:[%s27190_s1 + $0x10a8] sm:$0xf]  ;;  %v13064_v3 = vld [vmem:[%s27190_s1 + $0xd00] sm:$0xf]  ;;  %v11873_v19 = vor.u32 %v17056_v63, %v11870_v2 }
  0x2b   :  { %4108 = vmatpush.bf16.msrb.mxu3 %v11717_v1  ;;  %v13117_v1 = vor.u32 %v17374_v58, %v13116_v56  ;;  %v36_v4 = vld [vmem:[%s27189_s0 + $0x10] sm:$0xff]  ;;  %v13533_v5 = vor.u32 %v17478_v60, %v13532_v59  ;;  %v16939_v12 = vld [vmem:[%s27190_s1 + $0x4] sm:$0xf]  ;;  %v11402_v13 = vld [vmem:[%s27190_s1 + $0x34] sm:$0xf0] }
  0x2c   :  { %4070 = vmatpush.bf16.msrb.mxu0 %v13325_v11  ;;  %v17361_v7 = vld [vmem:[%s27190_s1 + $0xd30] sm:$0xf0]  ;;  %v17342_v16 = vld [vmem:[%s27190_s1 + $0xc9c] sm:$0xf]  ;;  %v13014_v17 = vld [vmem:[%s27190_s1 + $0xccc] sm:$0xf0]  ;;  %v762_v18 = vunpack.c.l.b16 %v36_v4  ;;  %v11405_v25 = vor.u32 %v16939_v12, %v11402_v13 }
  0x2d   :  { %4083 = vmatpush.bf16.msrb.mxu1 %v13741_v14  ;;  %v17465_v11 = vld [vmem:[%s27190_s1 + $0x1070] sm:$0xf0]  ;;  %v17238_v14 = vld [vmem:[%s27190_s1 + $0x95c] sm:$0xf]  ;;  %v13065_v20 = vor.u32 %v17361_v7, %v13064_v3  ;;  %v17043_v26 = vld [vmem:[%s27190_s1 + $0x344] sm:$0xf]  ;;  %v13017_v29 = vor.u32 %v17342_v16, %v13014_v17 }
  0x2e   :  { %4121 = vmatpush.bf16.msra.mxu2 %v12133_v10  ;;  %v13480_v10 = vld [vmem:[%s27190_s1 + $0x1040] sm:$0xf]  ;;  %v17446_v21 = vld [vmem:[%s27190_s1 + $0xfdc] sm:$0xf]  ;;  %v13846_v31 = vld [vmem:[%s27190_s1 + $0x134c] sm:$0xf0]  ;;  %v18855_v34 = vpack.c.b16 %v762_v18, %v762_v18 }
  0x2f   :  { %4109 = vmatpush.bf16.msrb.mxu3 %v11665_v15  ;;  %v12598_v15 = vld [vmem:[%s27190_s1 + $0x98c] sm:$0xf0]  ;;  %v13481_v24 = vor.u32 %v17465_v11, %v13480_v10  ;;  %v17550_v30 = vld [vmem:[%s27190_s1 + $0x131c] sm:$0xf]  ;;  %v17225_v32 = vld [vmem:[%s27190_s1 + $0x8f4] sm:$0xf] }
  0x30   :  { %4071 = vmatpush.bf16.msrb.mxu0 %v13273_v23  ;;  %v763_v23 = vunpack.c.h.b16 %v36_v4  ;;  %v12546_v35 = vld [vmem:[%s27190_s1 + $0x924] sm:$0xf0]  ;;  %v13849_v42 = vor.u32 %v17550_v30, %v13846_v31  ;;  %v17537_v45 = vld [vmem:[%s27190_s1 + $0x12b4] sm:$0xf]  ;;  %v17212_v47 = vld [vmem:[%s27190_s1 + $0x88c] sm:$0xf] }
  0x31   :  { %4084 = vmatpush.bf16.msrb.mxu1 %v13689_v27  ;;  %v11818_v27 = vld [vmem:[%s27190_s1 + $0x374] sm:$0xf0]  ;;  %v12549_v43 = vor.u32 %v17225_v32, %v12546_v35  ;;  %v13794_v46 = vld [vmem:[%s27190_s1 + $0x12e4] sm:$0xf0]  ;;  %v17316_v51 = vld [vmem:[%s27190_s1 + $0xbcc] sm:$0xf] }
  0x32   :  { %4122 = vmatpush.bf16.msra.mxu2 %v12081_v22  ;;  %v13430_v22 = vld [vmem:[%s27190_s1 + $0x100c] sm:$0xf0]  ;;  %v11821_v38 = vor.u32 %v17043_v26, %v11818_v27  ;;  %v18866_v39 = vpack.c.b16 %v763_v23, %v763_v23  ;;  %v12910_v52 = vld [vmem:[%s27190_s1 + $0xbfc] sm:$0xf0]  ;;  %v13797_v56 = vor.u32 %v17537_v45, %v13794_v46  ;;  %v17524_v60 = vld [vmem:[%s27190_s1 + $0x124c] sm:$0xf] }
  0x33   :  { %4110 = vmatpush.bf16.msrb.mxu3 %v11613_v28  ;;  %v12601_v28 = vor.u32 %v17238_v14, %v12598_v15  ;;  %v13433_v33 = vor.u32 %v17446_v21, %v13430_v22  ;;  %v12913_v59 = vor.u32 %v17316_v51, %v12910_v52  ;;  %v13742_v61 = vld [vmem:[%s27190_s1 + $0x127c] sm:$0xf0]  ;;  %v17199_v62 = vld [vmem:[%s27190_s1 + $0x824] sm:$0xf]  ;;  %v12858_v2 = vld [vmem:[%s27190_s1 + $0xb94] sm:$0xf0] }
  0x34   :  { %4072 = vmatpush.bf16.msrb.mxu0 %v13221_v37  ;;  %v12962_v37 = vld [vmem:[%s27190_s1 + $0xc64] sm:$0xf0]  ;;  %v17407_v3 = vld [vmem:[%s27190_s1 + $0xea4] sm:$0xf]  ;;  %v13274_v4 = vld [vmem:[%s27190_s1 + $0xed4] sm:$0xf0] }
  0x35   :  { %4085 = vmatpush.bf16.msrb.mxu1 %v13637_v40  ;;  %13946 = vmatmul.msk.bf16.vlgmr.msrb.gmra.mxu2 %vm4012_vm0, %v18767_v48  ;;  %v17433_v40 = vld [vmem:[%s27190_s1 + $0xf74] sm:$0xf]  ;;  %v17511_v10 = vld [vmem:[%s27190_s1 + $0x11e4] sm:$0xf]  ;;  %v13690_v11 = vld [vmem:[%s27190_s1 + $0x1214] sm:$0xf0]  ;;  %v13277_v13 = vor.u32 %v17407_v3, %v13274_v4 }
  0x36   :  { %4123 = vmatpush.bf16.msra.mxu2 %v12029_v36  ;;  %v17329_v36 = vld [vmem:[%s27190_s1 + $0xc34] sm:$0xf]  ;;  %v17186_v12 = vld [vmem:[%s27190_s1 + $0x7bc] sm:$0xf]  ;;  %v12390_v14 = vld [vmem:[%s27190_s1 + $0x7ec] sm:$0xf0] }
  0x37   :  { %4111 = vmatpush.bf16.msrb.mxu3 %v11561_v41  ;;  %v13378_v41 = vld [vmem:[%s27190_s1 + $0xfa4] sm:$0xf0]  ;;  %v12965_v44 = vor.u32 %v17329_v36, %v12962_v37  ;;  %v17290_v15 = vld [vmem:[%s27190_s1 + $0xafc] sm:$0xf]  ;;  %v12806_v16 = vld [vmem:[%s27190_s1 + $0xb2c] sm:$0xf0] }
  0x38   :  { %4073 = vmatpush.bf16.msrb.mxu0 %v13169_v50  ;;  %v12494_v50 = vld [vmem:[%s27190_s1 + $0x8bc] sm:$0xf0]  ;;  %v17394_v17 = vld [vmem:[%s27190_s1 + $0xe3c] sm:$0xf]  ;;  %v13222_v18 = vld [vmem:[%s27190_s1 + $0xe6c] sm:$0xf0]  ;;  %v12809_v21 = vor.u32 %v17290_v15, %v12806_v16 }
  0x39   :  { %4086 = vmatpush.bf16.msrb.mxu1 %v13585_v53  ;;  %v17420_v53 = vld [vmem:[%s27190_s1 + $0xf0c] sm:$0xf]  ;;  %v12497_v58 = vor.u32 %v17212_v47, %v12494_v50  ;;  %v17498_v22 = vld [vmem:[%s27190_s1 + $0x117c] sm:$0xf]  ;;  %v13638_v23 = vld [vmem:[%s27190_s1 + $0x11ac] sm:$0xf0] }
  0x3a   :  { %4124 = vmatpush.bf16.msra.mxu2 %v11977_v49  ;;  %v13381_v49 = vor.u32 %v17433_v40, %v13378_v41  ;;  %v12338_v26 = vld [vmem:[%s27190_s1 + $0x784] sm:$0xf0]  ;;  %v17277_v27 = vld [vmem:[%s27190_s1 + $0xa94] sm:$0xf]  ;;  %v13641_v31 = vor.u32 %v17498_v22, %v13638_v23  ;;  %v17160_v37 = vld [vmem:[%s27190_s1 + $0x6ec] sm:$0xf] }
  0x3b   :  { %4112 = vmatpush.bf16.msrb.mxu3 %v11509_v54  ;;  %v13326_v54 = vld [vmem:[%s27190_s1 + $0xf3c] sm:$0xf0]  ;;  %v13170_v30 = vld [vmem:[%s27190_s1 + $0xe04] sm:$0xf0]  ;;  %v17485_v32 = vld [vmem:[%s27190_s1 + $0x1114] sm:$0xf] }
  0x3c   :  { %4074 = vmatpush.bf16.msrb.mxu0 %v13117_v1  ;;  %v13329_v63 = vor.u32 %v17420_v53, %v13326_v54  ;;  %v17303_v1 = vld [vmem:[%s27190_s1 + $0xb64] sm:$0xf]  ;;  %v13586_v36 = vld [vmem:[%s27190_s1 + $0x1144] sm:$0xf0]  ;;  %v17264_v41 = vld [vmem:[%s27190_s1 + $0xa2c] sm:$0xf] }
  0x3d   :  { %4087 = vmatpush.bf16.msrb.mxu1 %v13533_v5  ;;  %v13745_v5 = vor.u32 %v17524_v60, %v13742_v61  ;;  %v12861_v7 = vor.u32 %v17303_v1, %v12858_v2  ;;  %v17472_v45 = vld [vmem:[%s27190_s1 + $0x10ac] sm:$0xf]  ;;  %v13534_v46 = vld [vmem:[%s27190_s1 + $0x10dc] sm:$0xf0]  ;;  %v13589_v47 = vor.u32 %v17485_v32, %v13586_v36  ;;  %v12234_v50 = vld [vmem:[%s27190_s1 + $0x6b4] sm:$0xf0] }
  0x3e   :  { %4125 = vmatpush.bf16.msra.mxu2 %v11925_v0  ;;  %v12442_v0 = vld [vmem:[%s27190_s1 + $0x854] sm:$0xf0]  ;;  %v17251_v51 = vld [vmem:[%s27190_s1 + $0x9c4] sm:$0xf] }
  0x3f   :  { %4113 = vmatpush.bf16.msrb.mxu3 %v11457_v6  ;;  %v12445_v6 = vor.u32 %v17199_v62, %v12442_v0  ;;  %v12650_v54 = vld [vmem:[%s27190_s1 + $0x9f4] sm:$0xf0] }
  0x40   :  { %4075 = vmatpush.bf16.msrb.mxu0 %v13065_v20  ;;  %v12393_v20 = vor.u32 %v17186_v12, %v12390_v14 }
  0x41   :  { %4088 = vmatpush.bf16.msrb.mxu1 %v13481_v24  ;;  %v17173_v24 = vld [vmem:[%s27190_s1 + $0x754] sm:$0xf] }
  0x42   :  { %4126 = vmatpush.bf16.msra.mxu2 %v11873_v19  ;;  %v13693_v19 = vor.u32 %v17511_v10, %v13690_v11 }
  0x43   :  { %4114 = vmatpush.bf16.msrb.mxu3 %v11405_v25  ;;  %4076 = vmatmul.bf16.vlgmr.msrb.gmra.mxu0 %v18855_v34  ;;  %v13225_v25 = vor.u32 %v17394_v17, %v13222_v18 }
  0x44   :  { %4133 = vmatpush.bf16.msra.mxu0 %v12601_v28  ;;  %4089 = vmatmul.bf16.vlgmr.msrb.gmra.mxu1 %v18866_v39  ;;  %v12754_v28 = vld [vmem:[%s27190_s1 + $0xac4] sm:$0xf0] }
  0x45   :  { %4146 = vmatpush.bf16.msra.mxu1 %v13017_v29  ;;  %v17381_v29 = vld [vmem:[%s27190_s1 + $0xdd4] sm:$0xf]  ;;  %v12757_v35 = vor.u32 %v17277_v27, %v12754_v28 }
  0x46   :  { %4127 = vmatpush.bf16.msra.mxu2 %v11821_v38  ;;  %4115 = vmatmul.bf16.vlgmr.msrb.gmra.mxu3 %v18684_v8  ;;  %v12286_v38 = vld [vmem:[%s27190_s1 + $0x71c] sm:$0xf0]  ;;  %v13173_v40 = vor.u32 %v17381_v29, %v13170_v30 }
  0x47   :  { %4159 = vmatpush.bf16.msra.mxu3 %v13433_v33  ;;  %v12341_v33 = vor.u32 %v17173_v24, %v12338_v26  ;;  %v12289_v52 = vor.u32 %v17160_v37, %v12286_v38 }
  0x48   :  { %4134 = vmatpush.bf16.msra.mxu0 %v12549_v43  ;;  %v17368_v43 = vld [vmem:[%s27190_s1 + $0xd6c] sm:$0xf] }
  0x49   :  { %4147 = vmatpush.bf16.msra.mxu1 %v12965_v44  ;;  %4128 = vmatmul.bf16.vlgmr.msra.gmra.mxu2 %v18686_v9  ;;  %v13118_v44 = vld [vmem:[%s27190_s1 + $0xd9c] sm:$0xf0] }
  0x4a   :  { %4172 = vmatpush.bf16.msrb.mxu2 %v13849_v42  ;;  %v12702_v42 = vld [vmem:[%s27190_s1 + $0xa5c] sm:$0xf0] }
  0x4b   :  { %4160 = vmatpush.bf16.msra.mxu3 %v13381_v49  ;;  %v17147_v49 = vld [vmem:[%s27190_s1 + $0x684] sm:$0xf]  ;;  %v12705_v53 = vor.u32 %v17264_v41, %v12702_v42 }
  0x4c   :  { %4135 = vmatpush.bf16.msra.mxu0 %v12497_v58  ;;  %v13066_v58 = vld [vmem:[%s27190_s1 + $0xd34] sm:$0xf0] }
  0x4d   :  { %4148 = vmatpush.bf16.msra.mxu1 %v12913_v59  ;;  %v13121_v59 = vor.u32 %v17368_v43, %v13118_v44 }
  0x4e   :  { %4173 = vmatpush.bf16.msrb.mxu2 %v13797_v56  ;;  %v17355_v56 = vld [vmem:[%s27190_s1 + $0xd04] sm:$0xf] }
  0x4f   :  { %4161 = vmatpush.bf16.msra.mxu3 %v13329_v63 }
  0x50   :  { %4136 = vmatpush.bf16.msra.mxu0 %v12445_v6 }
  0x51   :  { %4149 = vmatpush.bf16.msra.mxu1 %v12861_v7 }
  0x52   :  { %4174 = vmatpush.bf16.msrb.mxu2 %v13745_v5 }
  0x53   :  { %4162 = vmatpush.bf16.msra.mxu3 %v13277_v13 }
  0x54   :  { %4137 = vmatpush.bf16.msra.mxu0 %v12393_v20 }
  0x55   :  { %4150 = vmatpush.bf16.msra.mxu1 %v12809_v21 }
  0x56   :  { %4175 = vmatpush.bf16.msrb.mxu2 %v13693_v19 }
  0x57   :  { %4163 = vmatpush.bf16.msra.mxu3 %v13225_v25 }
  0x58   :  { %4138 = vmatpush.bf16.msra.mxu0 %v12341_v33 }
  0x59   :  { %4151 = vmatpush.bf16.msra.mxu1 %v12757_v35 }
  0x5a   :  { %4176 = vmatpush.bf16.msrb.mxu2 %v13641_v31 }
  0x5b   :  { %4164 = vmatpush.bf16.msra.mxu3 %v13173_v40 }
  0x5c   :  { %14 = vsyncpa [#allocation3], 0  ;;  %v11772_v60 = vld [vmem:[%s27190_s1 + $0x2e0] sm:$0xf]  ;;  %v17037_v61 = vld [vmem:[%s27190_s1 + $0x310] sm:$0xf0]  ;;  %v13537_v63 = vor.u32 %v17472_v45, %v13534_v46  ;;  %4139 = vmatpush.bf16.msra.mxu0 %v12289_v52  ;;  %v12237_v3 = vor.u32 %v17147_v49, %v12234_v50  ;;  %v12653_v4 = vor.u32 %v17251_v51, %v12650_v54  ;;  %v13069_v10 = vor.u32 %v17355_v56, %v13066_v58 }
  0x5d   :  { %v12188_v62 = vld [vmem:[%s27190_s1 + $0x620] sm:$0xf]  ;;  %v17141_v0 = vld [vmem:[%s27190_s1 + $0x650] sm:$0xf0]  ;;  %v17563_v1 = vld [vmem:[%s27190_s1 + $0x1384] sm:$0xf]  ;;  %4152 = vmatpush.bf16.msra.mxu1 %v12705_v53  ;;  %v11773_v11 = vor.u32 %v17037_v61, %v11772_v60 }
  0x5e   :  { %4177 = vmatpush.bf16.msrb.mxu2 %v13589_v47  ;;  %v13898_v2 = vld [vmem:[%s27190_s1 + $0x13b4] sm:$0xf0]  ;;  %v17459_v5 = vld [vmem:[%s27190_s1 + $0x1044] sm:$0xf]  ;;  %v12604_v7 = vld [vmem:[%s27190_s1 + $0x960] sm:$0xf]  ;;  %v12189_v15 = vor.u32 %v17141_v0, %v12188_v62 }
  0x5f   :  { %v13482_v6 = vld [vmem:[%s27190_s1 + $0x1074] sm:$0xf0]  ;;  %4165 = vmatpush.bf16.msra.mxu3 %v13121_v59  ;;  %v17245_v12 = vld [vmem:[%s27190_s1 + $0x990] sm:$0xf0]  ;;  %v13020_v13 = vld [vmem:[%s27190_s1 + $0xca0] sm:$0xf]  ;;  %v13901_v16 = vor.u32 %v17563_v1, %v13898_v2 }
  0x60   :  { %v17349_v14 = vld [vmem:[%s27190_s1 + $0xcd0] sm:$0xf0]  ;;  %v11720_v17 = vld [vmem:[%s27190_s1 + $0x278] sm:$0xf]  ;;  %v17024_v18 = vld [vmem:[%s27190_s1 + $0x2a8] sm:$0xf0]  ;;  %v13485_v19 = vor.u32 %v17459_v5, %v13482_v6  ;;  %4140 = vmatpush.bf16.msra.mxu0 %v12237_v3  ;;  %v12605_v22 = vor.u32 %v17245_v12, %v12604_v7 }
  0x61   :  { %v12136_v20 = vld [vmem:[%s27190_s1 + $0x5b8] sm:$0xf]  ;;  %v17128_v21 = vld [vmem:[%s27190_s1 + $0x5e8] sm:$0xf0]  ;;  %4153 = vmatpush.bf16.msra.mxu1 %v12653_v4  ;;  %v13021_v23 = vor.u32 %v17349_v14, %v13020_v13  ;;  %v11721_v25 = vor.u32 %v17024_v18, %v11720_v17  ;;  %v11668_v30 = vld [vmem:[%s27190_s1 + $0x210] sm:$0xf] }
  0x62   :  { %4178 = vmatpush.bf16.msrb.mxu2 %v13537_v63  ;;  %v12552_v24 = vld [vmem:[%s27190_s1 + $0x8f8] sm:$0xf]  ;;  %v17232_v26 = vld [vmem:[%s27190_s1 + $0x928] sm:$0xf0]  ;;  %v12137_v29 = vor.u32 %v17128_v21, %v12136_v20  ;;  %v17011_v31 = vld [vmem:[%s27190_s1 + $0x240] sm:$0xf0] }
  0x63   :  { %4166 = vmatpush.bf16.msra.mxu3 %v13069_v10  ;;  %v12968_v27 = vld [vmem:[%s27190_s1 + $0xc38] sm:$0xf]  ;;  %v17336_v28 = vld [vmem:[%s27190_s1 + $0xc68] sm:$0xf0]  ;;  %4141 = vmatmul.bf16.vlgmr.msra.gmra.mxu0 %v18653_v55  ;;  %v12084_v32 = vld [vmem:[%s27190_s1 + $0x550] sm:$0xf]  ;;  %v12553_v35 = vor.u32 %v17232_v26, %v12552_v24  ;;  %v11669_v38 = vor.u32 %v17011_v31, %v11668_v30 }
  0x64   :  { %4192 = vmatpush.bf16.msrb.mxu0 %v13901_v16  ;;  %v17115_v33 = vld [vmem:[%s27190_s1 + $0x580] sm:$0xf0]  ;;  %v12969_v36 = vor.u32 %v17336_v28, %v12968_v27  ;;  %v12500_v37 = vld [vmem:[%s27190_s1 + $0x890] sm:$0xf]  ;;  %v11616_v44 = vld [vmem:[%s27190_s1 + $0x1a8] sm:$0xf]  ;;  %4154 = vmatmul.bf16.vlgmr.msra.gmra.mxu1 %v18658_v57 }
  0x65   :  { %4198 = vmatpush.bf16.msrb.mxu1 %v11773_v11  ;;  %v17219_v40 = vld [vmem:[%s27190_s1 + $0x8c0] sm:$0xf0]  ;;  %v12916_v41 = vld [vmem:[%s27190_s1 + $0xbd0] sm:$0xf]  ;;  %v12085_v43 = vor.u32 %v17115_v33, %v12084_v32  ;;  %v16998_v45 = vld [vmem:[%s27190_s1 + $0x1d8] sm:$0xf0] }
  0x66   :  { %4179 = vmatpush.bf16.msrb.mxu2 %v13485_v19  ;;  %4167 = vmatmul.bf16.vlgmr.msra.gmra.mxu3 %v18855_v34  ;;  %v17323_v42 = vld [vmem:[%s27190_s1 + $0xc00] sm:$0xf0]  ;;  %v12032_v46 = vld [vmem:[%s27190_s1 + $0x4e8] sm:$0xf]  ;;  %v17102_v47 = vld [vmem:[%s27190_s1 + $0x518] sm:$0xf0]  ;;  %v12501_v49 = vor.u32 %v17219_v40, %v12500_v37  ;;  %v11617_v52 = vor.u32 %v16998_v45, %v11616_v44 }
  0x67   :  { %4211 = vmatpush.bf16.msrb.mxu3 %v12189_v15  ;;  %v12917_v50 = vor.u32 %v17323_v42, %v12916_v41  ;;  %v12448_v51 = vld [vmem:[%s27190_s1 + $0x828] sm:$0xf]  ;;  %v17206_v53 = vld [vmem:[%s27190_s1 + $0x858] sm:$0xf0]  ;;  %v12033_v58 = vor.u32 %v17102_v47, %v12032_v46  ;;  %v11564_v59 = vld [vmem:[%s27190_s1 + $0x140] sm:$0xf] }
  0x68   :  { %4224 = vmatpush.bf16.msra.mxu0 %v12605_v22  ;;  %v12864_v54 = vld [vmem:[%s27190_s1 + $0xb68] sm:$0xf]  ;;  %v17310_v56 = vld [vmem:[%s27190_s1 + $0xb98] sm:$0xf0]  ;;  %v16985_v60 = vld [vmem:[%s27190_s1 + $0x170] sm:$0xf0]  ;;  %v12449_v63 = vor.u32 %v17206_v53, %v12448_v51 }
  0x69   :  { %4199 = vmatpush.bf16.msrb.mxu1 %v11721_v25  ;;  %4180 = vmatmul.bf16.vlgmr.msrb.gmra.mxu2 %v18866_v39  ;;  %v11980_v61 = vld [vmem:[%s27190_s1 + $0x480] sm:$0xf]  ;;  %v17089_v62 = vld [vmem:[%s27190_s1 + $0x4b0] sm:$0xf0]  ;;  %v12865_v0 = vor.u32 %v17310_v56, %v12864_v54  ;;  %v11565_v2 = vor.u32 %v16985_v60, %v11564_v59  ;;  %v11512_v7 = vld [vmem:[%s27190_s1 + $0xd8] sm:$0xf] }
  0x6a   :  { %4237 = vmatpush.bf16.msra.mxu2 %v13021_v23  ;;  %v12396_v1 = vld [vmem:[%s27190_s1 + $0x7c0] sm:$0xf]  ;;  %v17193_v3 = vld [vmem:[%s27190_s1 + $0x7f0] sm:$0xf0]  ;;  %v11981_v6 = vor.u32 %v17089_v62, %v11980_v61  ;;  %v16972_v10 = vld [vmem:[%s27190_s1 + $0x108] sm:$0xf0] }
  0x6b   :  { %4212 = vmatpush.bf16.msrb.mxu3 %v12137_v29  ;;  %v12812_v4 = vld [vmem:[%s27190_s1 + $0xb00] sm:$0xf]  ;;  %v17297_v5 = vld [vmem:[%s27190_s1 + $0xb30] sm:$0xf0]  ;;  %v11928_v11 = vld [vmem:[%s27190_s1 + $0x418] sm:$0xf]  ;;  %v12397_v13 = vor.u32 %v17193_v3, %v12396_v1  ;;  %v11513_v16 = vor.u32 %v16972_v10, %v11512_v7 }
  0x6c   :  { %4225 = vmatpush.bf16.msra.mxu0 %v12553_v35  ;;  %v17076_v12 = vld [vmem:[%s27190_s1 + $0x448] sm:$0xf0]  ;;  %v12813_v14 = vor.u32 %v17297_v5, %v12812_v4  ;;  %v12344_v15 = vld [vmem:[%s27190_s1 + $0x758] sm:$0xf]  ;;  %v11460_v21 = vld [vmem:[%s27190_s1 + $0x70] sm:$0xf] }
  0x6d   :  { %4200 = vmatpush.bf16.msrb.mxu1 %v11669_v38  ;;  %v17180_v17 = vld [vmem:[%s27190_s1 + $0x788] sm:$0xf0]  ;;  %v12760_v18 = vld [vmem:[%s27190_s1 + $0xa98] sm:$0xf]  ;;  %v11929_v20 = vor.u32 %v17076_v12, %v11928_v11  ;;  %v16959_v22 = vld [vmem:[%s27190_s1 + $0xa0] sm:$0xf0] }
  0x6e   :  { %4238 = vmatpush.bf16.msra.mxu2 %v12969_v36  ;;  %v17284_v19 = vld [vmem:[%s27190_s1 + $0xac8] sm:$0xf0]  ;;  %v11876_v23 = vld [vmem:[%s27190_s1 + $0x3b0] sm:$0xf]  ;;  %v17063_v24 = vld [vmem:[%s27190_s1 + $0x3e0] sm:$0xf0]  ;;  %v12345_v25 = vor.u32 %v17180_v17, %v12344_v15  ;;  %v11461_v29 = vor.u32 %v16959_v22, %v11460_v21 }
  0x6f   :  { %4213 = vmatpush.bf16.msrb.mxu3 %v12085_v43  ;;  %v12761_v26 = vor.u32 %v17284_v19, %v12760_v18  ;;  %v12292_v27 = vld [vmem:[%s27190_s1 + $0x6f0] sm:$0xf]  ;;  %v17167_v28 = vld [vmem:[%s27190_s1 + $0x720] sm:$0xf0]  ;;  %v11408_v32 = vld [vmem:[%s27190_s1 + $0x8] sm:$0xf]  ;;  %v11877_v33 = vor.u32 %v17063_v24, %v11876_v23 }
  0x70   :  { %4226 = vmatpush.bf16.msra.mxu0 %v12501_v49  ;;  %v12708_v30 = vld [vmem:[%s27190_s1 + $0xa30] sm:$0xf]  ;;  %v17271_v31 = vld [vmem:[%s27190_s1 + $0xa60] sm:$0xf0]  ;;  %v16946_v35 = vld [vmem:[%s27190_s1 + $0x38] sm:$0xf0]  ;;  %v12293_v42 = vor.u32 %v17167_v28, %v12292_v27 }
  0x71   :  { %4201 = vmatpush.bf16.msrb.mxu1 %v11617_v52  ;;  %v11824_v36 = vld [vmem:[%s27190_s1 + $0x348] sm:$0xf]  ;;  %v17050_v37 = vld [vmem:[%s27190_s1 + $0x378] sm:$0xf0]  ;;  %v13436_v38 = vld [vmem:[%s27190_s1 + $0xfe0] sm:$0xf]  ;;  %v12709_v43 = vor.u32 %v17271_v31, %v12708_v30  ;;  %v11409_v47 = vor.u32 %v16946_v35, %v11408_v32 }
  0x72   :  { %4239 = vmatpush.bf16.msra.mxu2 %v12917_v50  ;;  %v17453_v40 = vld [vmem:[%s27190_s1 + $0x1010] sm:$0xf0]  ;;  %v13852_v41 = vld [vmem:[%s27190_s1 + $0x1320] sm:$0xf]  ;;  %v12240_v45 = vld [vmem:[%s27190_s1 + $0x688] sm:$0xf]  ;;  %v11825_v52 = vor.u32 %v17050_v37, %v11824_v36 }
  0x73   :  { %4214 = vmatpush.bf16.msrb.mxu3 %v12033_v58  ;;  %13947 = vmatmul.msk.bf16.vlgmr.msrb.gmra.mxu0 %vm4012_vm0, %v18767_v48  ;;  %v17557_v44 = vld [vmem:[%s27190_s1 + $0x1350] sm:$0xf0]  ;;  %v17154_v46 = vld [vmem:[%s27190_s1 + $0x6b8] sm:$0xf0]  ;;  %v12656_v49 = vld [vmem:[%s27190_s1 + $0x9c8] sm:$0xf]  ;;  %v13437_v53 = vor.u32 %v17453_v40, %v13436_v38 }
  0x74   :  { %4227 = vmatpush.bf16.msra.mxu0 %v12449_v63  ;;  %v17258_v50 = vld [vmem:[%s27190_s1 + $0x9f8] sm:$0xf0]  ;;  %v17031_v51 = vld [vmem:[%s27190_s1 + $0x2e4] sm:$0xf]  ;;  %v11774_v54 = vld [vmem:[%s27190_s1 + $0x314] sm:$0xf0]  ;;  %v13853_v59 = vor.u32 %v17557_v44, %v13852_v41  ;;  %v12241_v62 = vor.u32 %v17154_v46, %v12240_v45 }
  0x75   :  { %4202 = vmatpush.bf16.msrb.mxu1 %v11565_v2  ;;  %v13904_v56 = vld [vmem:[%s27190_s1 + $0x1388] sm:$0xf]  ;;  %v17570_v58 = vld [vmem:[%s27190_s1 + $0x13b8] sm:$0xf0]  ;;  %v13384_v60 = vld [vmem:[%s27190_s1 + $0xf78] sm:$0xf]  ;;  %v12657_v63 = vor.u32 %v17258_v50, %v12656_v49  ;;  %v11777_v2 = vor.u32 %v17031_v51, %v11774_v54 }
  0x76   :  { %4240 = vmatpush.bf16.msra.mxu2 %v12865_v0  ;;  %v17440_v61 = vld [vmem:[%s27190_s1 + $0xfa8] sm:$0xf0]  ;;  %v13800_v0 = vld [vmem:[%s27190_s1 + $0x12b8] sm:$0xf]  ;;  %v13905_v3 = vor.u32 %v17570_v58, %v13904_v56  ;;  %v17135_v4 = vld [vmem:[%s27190_s1 + $0x624] sm:$0xf] }
  0x77   :  { %4215 = vmatpush.bf16.msrb.mxu3 %v11981_v6  ;;  %v17544_v1 = vld [vmem:[%s27190_s1 + $0x12e8] sm:$0xf0]  ;;  %v12190_v5 = vld [vmem:[%s27190_s1 + $0x654] sm:$0xf0]  ;;  %v13385_v6 = vor.u32 %v17440_v61, %v13384_v60  ;;  %v17018_v7 = vld [vmem:[%s27190_s1 + $0x27c] sm:$0xf] }
  0x78   :  { %4228 = vmatpush.bf16.msra.mxu0 %v12397_v13  ;;  %v11722_v10 = vld [vmem:[%s27190_s1 + $0x2ac] sm:$0xf0]  ;;  %v13801_v11 = vor.u32 %v17544_v1, %v13800_v0  ;;  %v17427_v13 = vld [vmem:[%s27190_s1 + $0xf40] sm:$0xf0]  ;;  %v17122_v18 = vld [vmem:[%s27190_s1 + $0x5bc] sm:$0xf] }
  0x79   :  { %4203 = vmatpush.bf16.msrb.mxu1 %v11513_v16  ;;  %v13332_v12 = vld [vmem:[%s27190_s1 + $0xf10] sm:$0xf]  ;;  %v17531_v16 = vld [vmem:[%s27190_s1 + $0x1280] sm:$0xf0]  ;;  %v11725_v17 = vor.u32 %v17018_v7, %v11722_v10  ;;  %v17005_v21 = vld [vmem:[%s27190_s1 + $0x214] sm:$0xf] }
  0x7a   :  { %4241 = vmatpush.bf16.msra.mxu2 %v12813_v14  ;;  %v12193_v14 = vor.u32 %v17135_v4, %v12190_v5  ;;  %v13748_v15 = vld [vmem:[%s27190_s1 + $0x1250] sm:$0xf]  ;;  %v11670_v22 = vld [vmem:[%s27190_s1 + $0x244] sm:$0xf0]  ;;  %v17518_v28 = vld [vmem:[%s27190_s1 + $0x1218] sm:$0xf0] }
  0x7b   :  { %4216 = vmatpush.bf16.msrb.mxu3 %v11929_v20  ;;  %v12138_v19 = vld [vmem:[%s27190_s1 + $0x5ec] sm:$0xf0]  ;;  %v13333_v20 = vor.u32 %v17427_v13, %v13332_v12  ;;  %v13749_v23 = vor.u32 %v17531_v16, %v13748_v15  ;;  %v13280_v24 = vld [vmem:[%s27190_s1 + $0xea8] sm:$0xf]  ;;  %v17109_v30 = vld [vmem:[%s27190_s1 + $0x554] sm:$0xf] }
  0x7c   :  { %4229 = vmatpush.bf16.msra.mxu0 %v12345_v25  ;;  %v17414_v25 = vld [vmem:[%s27190_s1 + $0xed8] sm:$0xf0]  ;;  %v13696_v27 = vld [vmem:[%s27190_s1 + $0x11e8] sm:$0xf]  ;;  %v11618_v35 = vld [vmem:[%s27190_s1 + $0x1dc] sm:$0xf0] }
  0x7d   :  { %4204 = vmatpush.bf16.msrb.mxu1 %v11461_v29  ;;  %v11673_v29 = vor.u32 %v17005_v21, %v11670_v22  ;;  %v12086_v31 = vld [vmem:[%s27190_s1 + $0x584] sm:$0xf0]  ;;  %v13281_v32 = vor.u32 %v17414_v25, %v13280_v24  ;;  %v13697_v36 = vor.u32 %v17518_v28, %v13696_v27  ;;  %v13228_v37 = vld [vmem:[%s27190_s1 + $0xe40] sm:$0xf]  ;;  %v17401_v38 = vld [vmem:[%s27190_s1 + $0xe70] sm:$0xf0] }
  0x7e   :  { %4242 = vmatpush.bf16.msra.mxu2 %v12761_v26  ;;  %v12141_v26 = vor.u32 %v17122_v18, %v12138_v19  ;;  %v12089_v40 = vor.u32 %v17109_v30, %v12086_v31  ;;  %v13644_v41 = vld [vmem:[%s27190_s1 + $0x1180] sm:$0xf]  ;;  %v17096_v44 = vld [vmem:[%s27190_s1 + $0x4ec] sm:$0xf]  ;;  %v13229_v46 = vor.u32 %v17401_v38, %v13228_v37  ;;  %v11566_v49 = vld [vmem:[%s27190_s1 + $0x174] sm:$0xf0] }
  0x7f   :  { %4217 = vmatpush.bf16.msrb.mxu3 %v11877_v33  ;;  %v16992_v33 = vld [vmem:[%s27190_s1 + $0x1ac] sm:$0xf]  ;;  %v12034_v45 = vld [vmem:[%s27190_s1 + $0x51c] sm:$0xf0]  ;;  %v13176_v51 = vld [vmem:[%s27190_s1 + $0xdd8] sm:$0xf] }
  0x80   :  { %4230 = vmatpush.bf16.msra.mxu0 %v12293_v42  ;;  %v17505_v42 = vld [vmem:[%s27190_s1 + $0x11b0] sm:$0xf0]  ;;  %v13592_v54 = vld [vmem:[%s27190_s1 + $0x1118] sm:$0xf]  ;;  %v17492_v56 = vld [vmem:[%s27190_s1 + $0x1148] sm:$0xf0] }
  0x81   :  { %4205 = vmatpush.bf16.msrb.mxu1 %v11409_v47  ;;  %v16979_v47 = vld [vmem:[%s27190_s1 + $0x144] sm:$0xf]  ;;  %v13645_v50 = vor.u32 %v17505_v42, %v13644_v41  ;;  %v11982_v60 = vld [vmem:[%s27190_s1 + $0x4b4] sm:$0xf0]  ;;  %v13593_v0 = vor.u32 %v17492_v56, %v13592_v54  ;;  %v13124_v1 = vld [vmem:[%s27190_s1 + $0xd70] sm:$0xf] }
  0x82   :  { %4243 = vmatpush.bf16.msra.mxu2 %v12709_v43  ;;  %v11621_v43 = vor.u32 %v16992_v33, %v11618_v35  ;;  %v11569_v58 = vor.u32 %v16979_v47, %v11566_v49  ;;  %v13540_v4 = vld [vmem:[%s27190_s1 + $0x10b0] sm:$0xf]  ;;  %v17479_v5 = vld [vmem:[%s27190_s1 + $0x10e0] sm:$0xf0]  ;;  %v17070_v7 = vld [vmem:[%s27190_s1 + $0x41c] sm:$0xf] }
  0x83   :  { %4218 = vmatpush.bf16.msrb.mxu3 %v11825_v52  ;;  %v17388_v52 = vld [vmem:[%s27190_s1 + $0xe08] sm:$0xf0]  ;;  %v11930_v10 = vld [vmem:[%s27190_s1 + $0x44c] sm:$0xf0]  ;;  %v16953_v12 = vld [vmem:[%s27190_s1 + $0x74] sm:$0xf]  ;;  %v13541_v15 = vor.u32 %v17479_v5, %v13540_v4 }
  0x84   :  { %4231 = vmatpush.bf16.msra.mxu0 %v12241_v62  ;;  %4206 = vmatmul.bf16.vlgmr.msrb.gmra.mxu1 %v18684_v8  ;;  %v13177_v61 = vor.u32 %v17388_v52, %v13176_v51  ;;  %v16966_v62 = vld [vmem:[%s27190_s1 + $0xdc] sm:$0xf]  ;;  %v11462_v13 = vld [vmem:[%s27190_s1 + $0xa4] sm:$0xf0]  ;;  %v11933_v19 = vor.u32 %v17070_v7, %v11930_v10  ;;  %v12606_v21 = vld [vmem:[%s27190_s1 + $0x994] sm:$0xf0] }
  0x85   :  { %4250 = vmatpush.bf16.msra.mxu1 %v13437_v53  ;;  %v12037_v53 = vor.u32 %v17096_v44, %v12034_v45  ;;  %v17362_v16 = vld [vmem:[%s27190_s1 + $0xd38] sm:$0xf0]  ;;  %v17343_v22 = vld [vmem:[%s27190_s1 + $0xca4] sm:$0xf]  ;;  %v13022_v24 = vld [vmem:[%s27190_s1 + $0xcd4] sm:$0xf0] }
  0x86   :  { %4244 = vmatpush.bf16.msra.mxu2 %v12657_v63  ;;  %4219 = vmatmul.bf16.vlgmr.msrb.gmra.mxu3 %v18686_v9  ;;  %v11514_v63 = vld [vmem:[%s27190_s1 + $0x10c] sm:$0xf0]  ;;  %v17466_v18 = vld [vmem:[%s27190_s1 + $0x1078] sm:$0xf0]  ;;  %v17057_v25 = vld [vmem:[%s27190_s1 + $0x3b4] sm:$0xf]  ;;  %v13025_v35 = vor.u32 %v17343_v22, %v13022_v24 }
  0x87   :  { %4263 = vmatpush.bf16.msra.mxu3 %v13853_v59  ;;  %4232 = vmatmul.bf16.vlgmr.msra.gmra.mxu0 %v18653_v55  ;;  %v17083_v59 = vld [vmem:[%s27190_s1 + $0x484] sm:$0xf]  ;;  %v16940_v28 = vld [vmem:[%s27190_s1 + $0xc] sm:$0xf]  ;;  %v13438_v33 = vld [vmem:[%s27190_s1 + $0x1014] sm:$0xf0] }
  0x88   :  { %4283 = vmatpush.bf16.msrb.mxu0 %v13905_v3  ;;  %v11985_v3 = vor.u32 %v17083_v59, %v11982_v60  ;;  %v17226_v37 = vld [vmem:[%s27190_s1 + $0x8fc] sm:$0xf]  ;;  %v12554_v38 = vld [vmem:[%s27190_s1 + $0x92c] sm:$0xf0]  ;;  %v11826_v44 = vld [vmem:[%s27190_s1 + $0x37c] sm:$0xf0] }
  0x89   :  { %4251 = vmatpush.bf16.msra.mxu1 %v13385_v6  ;;  %4245 = vmatmul.bf16.vlgmr.msra.gmra.mxu2 %v18658_v57  ;;  %v11517_v6 = vor.u32 %v16966_v62, %v11514_v63  ;;  %v12970_v42 = vld [vmem:[%s27190_s1 + $0xc6c] sm:$0xf0]  ;;  %v13854_v47 = vld [vmem:[%s27190_s1 + $0x1354] sm:$0xf0]  ;;  %v12557_v49 = vor.u32 %v17226_v37, %v12554_v38  ;;  %v17213_v54 = vld [vmem:[%s27190_s1 + $0x894] sm:$0xf] }
  0x8a   :  { %4289 = vmatpush.bf16.msrb.mxu2 %v11777_v2  ;;  %v17375_v2 = vld [vmem:[%s27190_s1 + $0xda0] sm:$0xf0]  ;;  %v13386_v51 = vld [vmem:[%s27190_s1 + $0xfac] sm:$0xf0]  ;;  %v12502_v56 = vld [vmem:[%s27190_s1 + $0x8c4] sm:$0xf0] }
  0x8b   :  { %4264 = vmatpush.bf16.msra.mxu3 %v13801_v11  ;;  %v13125_v11 = vor.u32 %v17375_v2, %v13124_v1  ;;  %v17317_v59 = vld [vmem:[%s27190_s1 + $0xbd4] sm:$0xf]  ;;  %v12918_v60 = vld [vmem:[%s27190_s1 + $0xc04] sm:$0xf0]  ;;  %v17538_v62 = vld [vmem:[%s27190_s1 + $0x12bc] sm:$0xf] }
  0x8c   :  { %4302 = vmatpush.bf16.msra.mxu0 %v12193_v14  ;;  %v13072_v14 = vld [vmem:[%s27190_s1 + $0xd08] sm:$0xf]  ;;  %v13802_v63 = vld [vmem:[%s27190_s1 + $0x12ec] sm:$0xf0]  ;;  %v17421_v1 = vld [vmem:[%s27190_s1 + $0xf14] sm:$0xf] }
  0x8d   :  { %4252 = vmatpush.bf16.msra.mxu1 %v13333_v20  ;;  %v17239_v20 = vld [vmem:[%s27190_s1 + $0x964] sm:$0xf]  ;;  %v13073_v27 = vor.u32 %v17362_v16, %v13072_v14  ;;  %v13334_v2 = vld [vmem:[%s27190_s1 + $0xf44] sm:$0xf0]  ;;  %v17200_v4 = vld [vmem:[%s27190_s1 + $0x82c] sm:$0xf] }
  0x8e   :  { %4290 = vmatpush.bf16.msrb.mxu2 %v11725_v17  ;;  %v13488_v17 = vld [vmem:[%s27190_s1 + $0x1048] sm:$0xf]  ;;  %v12609_v31 = vor.u32 %v17239_v20, %v12606_v21  ;;  %v12450_v5 = vld [vmem:[%s27190_s1 + $0x85c] sm:$0xf0]  ;;  %v17304_v7 = vld [vmem:[%s27190_s1 + $0xb6c] sm:$0xf] }
  0x8f   :  { %4265 = vmatpush.bf16.msra.mxu3 %v13749_v23  ;;  %v11465_v23 = vor.u32 %v16953_v12, %v11462_v13  ;;  %v13489_v30 = vor.u32 %v17466_v18, %v13488_v17  ;;  %v12866_v10 = vld [vmem:[%s27190_s1 + $0xb9c] sm:$0xf0]  ;;  %v17525_v12 = vld [vmem:[%s27190_s1 + $0x1254] sm:$0xf]  ;;  %v13750_v13 = vld [vmem:[%s27190_s1 + $0x1284] sm:$0xf0]  ;;  %v12453_v14 = vor.u32 %v17200_v4, %v12450_v5 }
  0x90   :  { %4303 = vmatpush.bf16.msra.mxu0 %v12141_v26  ;;  %v11878_v26 = vld [vmem:[%s27190_s1 + $0x3e4] sm:$0xf0]  ;;  %v13282_v16 = vld [vmem:[%s27190_s1 + $0xedc] sm:$0xf0]  ;;  %v12869_v18 = vor.u32 %v17304_v7, %v12866_v10  ;;  %v12398_v20 = vld [vmem:[%s27190_s1 + $0x7f4] sm:$0xf0]  ;;  %v13753_v21 = vor.u32 %v17525_v12, %v13750_v13 }
  0x91   :  { %4253 = vmatpush.bf16.msra.mxu1 %v13281_v32  ;;  %v17447_v32 = vld [vmem:[%s27190_s1 + $0xfe4] sm:$0xf]  ;;  %v12762_v37 = vld [vmem:[%s27190_s1 + $0xacc] sm:$0xf0]  ;;  %v12242_v5 = vld [vmem:[%s27190_s1 + $0x6bc] sm:$0xf0] }
  0x92   :  { %4291 = vmatpush.bf16.msrb.mxu2 %v11673_v29  ;;  %v11410_v29 = vld [vmem:[%s27190_s1 + $0x3c] sm:$0xf0]  ;;  %v13441_v45 = vor.u32 %v17447_v32, %v13438_v33  ;;  %v17291_v22 = vld [vmem:[%s27190_s1 + $0xb04] sm:$0xf]  ;;  %v17174_v32 = vld [vmem:[%s27190_s1 + $0x75c] sm:$0xf] }
  0x93   :  { %4266 = vmatpush.bf16.msra.mxu3 %v13697_v36  ;;  %v11881_v36 = vor.u32 %v17057_v25, %v11878_v26  ;;  %v11413_v41 = vor.u32 %v16940_v28, %v11410_v29  ;;  %v19532_v17 = vld [vmem:[%s27191_s2] sm:$0xff]  ;;  %v17512_v25 = vld [vmem:[%s27190_s1 + $0x11ec] sm:$0xf]  ;;  %v12346_v33 = vld [vmem:[%s27190_s1 + $0x78c] sm:$0xf0]  ;;  %vm9579_vm14 = vcmask 261120  }
  0x94   :  { %4304 = vmatpush.bf16.msra.mxu0 %v12089_v40  ;;  %v17330_v40 = vld [vmem:[%s27190_s1 + $0xc3c] sm:$0xf]  ;;  %v13698_v26 = vld [vmem:[%s27190_s1 + $0x121c] sm:$0xf0]  ;;  %v17395_v29 = vld [vmem:[%s27190_s1 + $0xe44] sm:$0xf] }
  0x95   :  { %4254 = vmatpush.bf16.msra.mxu1 %v13229_v46  ;;  %v17551_v46 = vld [vmem:[%s27190_s1 + $0x1324] sm:$0xf]  ;;  %v12973_v52 = vor.u32 %v17330_v40, %v12970_v42  ;;  %v12658_v7 = vld [vmem:[%s27190_s1 + $0x9fc] sm:$0xf0]  ;;  %v11780_v12 = vld [vmem:[%s27190_s1 + $0x2e8] sm:$0xf] }
  0x96   :  { %4292 = vmatpush.bf16.msrb.mxu2 %v11621_v43  ;;  %v17044_v43 = vld [vmem:[%s27190_s1 + $0x34c] sm:$0xf]  ;;  %v17499_v42 = vld [vmem:[%s27190_s1 + $0x1184] sm:$0xf] }
  0x97   :  { %4267 = vmatpush.bf16.msra.mxu3 %v13645_v50  ;;  %13948 = vmatmul.msk.bf16.vlgmr.msrb.gmra.mxu0 %vm4012_vm0, %v18767_v48  ;;  %v17434_v50 = vld [vmem:[%s27190_s1 + $0xf7c] sm:$0xf]  ;;  %v17564_v13 = vld [vmem:[%s27190_s1 + $0x138c] sm:$0xf] }
  0x98   :  { %4305 = vmatpush.bf16.msra.mxu0 %v12037_v53  ;;  %v11829_v53 = vor.u32 %v17044_v43, %v11826_v44  ;;  %v13646_v43 = vld [vmem:[%s27190_s1 + $0x11b4] sm:$0xf0] }
  0x99   :  { %4255 = vmatpush.bf16.msra.mxu1 %v13177_v61  ;;  %v13389_v61 = vor.u32 %v17434_v50, %v13386_v51  ;;  %v17161_v51 = vld [vmem:[%s27190_s1 + $0x6f4] sm:$0xf] }
  0x9a   :  { %4293 = vmatpush.bf16.msrb.mxu2 %v11569_v58  ;;  %v13857_v58 = vor.u32 %v17551_v46, %v13854_v47  ;;  %v17382_v46 = vld [vmem:[%s27190_s1 + $0xddc] sm:$0xf]  ;;  %v13178_v47 = vld [vmem:[%s27190_s1 + $0xe0c] sm:$0xf0] }
  0x9b   :  { %4268 = vmatpush.bf16.msra.mxu3 %v13593_v0  ;;  %v12505_v0 = vor.u32 %v17213_v54, %v12502_v56  ;;  %v13649_v56 = vor.u32 %v17499_v42, %v13646_v43 }
  0x9c   :  { %4306 = vmatpush.bf16.msra.mxu0 %v11985_v3  ;;  %v12921_v3 = vor.u32 %v17317_v59, %v12918_v60  ;;  %v12710_v59 = vld [vmem:[%s27190_s1 + $0xa64] sm:$0xf0]  ;;  %v13181_v60 = vor.u32 %v17382_v46, %v13178_v47  ;;  %v12144_v46 = vld [vmem:[%s27190_s1 + $0x5c0] sm:$0xf]  ;;  %v17129_v47 = vld [vmem:[%s27190_s1 + $0x5f0] sm:$0xf0] }
  0x9d   :  { %4256 = vmatpush.bf16.msra.mxu1 %v13125_v11  ;;  %v13337_v11 = vor.u32 %v17421_v1, %v13334_v2  ;;  %v17369_v1 = vld [vmem:[%s27190_s1 + $0xd74] sm:$0xf]  ;;  %v13126_v2 = vld [vmem:[%s27190_s1 + $0xda4] sm:$0xf0] }
  0x9e   :  { %4294 = vmatpush.bf16.msrb.mxu2 %v11517_v6  ;;  %v13805_v6 = vor.u32 %v17538_v62, %v13802_v63  ;;  %v13594_v62 = vld [vmem:[%s27190_s1 + $0x114c] sm:$0xf0] }
  0x9f   :  { %4269 = vmatpush.bf16.msra.mxu3 %v13541_v15  ;;  %v17408_v15 = vld [vmem:[%s27190_s1 + $0xeac] sm:$0xf] }
  0xa0   :  { %4307 = vmatpush.bf16.msra.mxu0 %v11933_v19  ;;  %v17187_v19 = vld [vmem:[%s27190_s1 + $0x7c4] sm:$0xf]  ;;  %v13285_v24 = vor.u32 %v17408_v15, %v13282_v16  ;;  %v4025_v38 = vpop.f32.mrf.mxu0 }
  0xa1   :  { %4257 = vmatpush.bf16.msra.mxu1 %v13073_v27  ;;  %v728_v27 = vperm.slane %v19532_v17, 0  ;;  %v12401_v28 = vor.u32 %v17187_v19, %v12398_v20  ;;  %v4038_v40 = vpop.f32.mrf.mxu1  ;;  %v17038_v19 = vld [vmem:[%s27190_s1 + $0x318] sm:$0xf0]  ;;  %v17473_v20 = vld [vmem:[%s27190_s1 + $0x10b4] sm:$0xf] }
  0xa2   :  { %4295 = vmatpush.bf16.msrb.mxu2 %v11465_v23  ;;  %v12814_v23 = vld [vmem:[%s27190_s1 + $0xb34] sm:$0xf0] }
  0xa3   :  { %4270 = vmatpush.bf16.msra.mxu3 %v13489_v30  ;;  %v13230_v30 = vld [vmem:[%s27190_s1 + $0xe74] sm:$0xf0]  ;;  %v4026_v44 = vadd.f32 %v4025_v38, %v728_v27  ;;  %v17025_v38 = vld [vmem:[%s27190_s1 + $0x2b0] sm:$0xf0] }
  0xa4   :  { %4308 = vmatpush.bf16.msra.mxu0 %v11881_v36  ;;  %4258 = vmatmul.bf16.vlgmr.msra.gmra.mxu1 %v18855_v34  ;;  %v17278_v36 = vld [vmem:[%s27190_s1 + $0xa9c] sm:$0xf] }
  0xa5   :  { %4315 = vmatpush.bf16.msrb.mxu1 %v12609_v31  ;;  %v12817_v31 = vor.u32 %v17291_v22, %v12814_v23  ;;  %v17356_v23 = vld [vmem:[%s27190_s1 + $0xd0c] sm:$0xf] }
  0xa6   :  { %4296 = vmatpush.bf16.msrb.mxu2 %v11413_v41  ;;  %4271 = vmatmul.bf16.vlgmr.msra.gmra.mxu3 %v18866_v39  ;;  %v13233_v41 = vor.u32 %v17395_v29, %v13230_v30  ;;  %v17142_v29 = vld [vmem:[%s27190_s1 + $0x658] sm:$0xf0]  ;;  %v12612_v30 = vld [vmem:[%s27190_s1 + $0x968] sm:$0xf] }
  0xa7   :  { %4328 = vmatpush.bf16.msrb.mxu3 %v13025_v35  ;;  %v13701_v35 = vor.u32 %v17512_v25, %v13698_v26  ;;  %v12196_v25 = vld [vmem:[%s27190_s1 + $0x628] sm:$0xf] }
  0xa8   :  { %4309 = vmatpush.bf16.msra.mxu0 %v11829_v53  ;;  %v4051_v50 = vpop.f32.mrf.mxu2  ;;  %v4039_v53 = vadd.f32 %v4038_v40, %v4026_v44  ;;  %v4027_v15 = vpop.f32.mrf.mxu0  ;;  %v17460_v40 = vld [vmem:[%s27190_s1 + $0x104c] sm:$0xf]  ;;  %v12197_v42 = vor.u32 %v17142_v29, %v12196_v25  ;;  %v13028_v44 = vld [vmem:[%s27190_s1 + $0xca8] sm:$0xf]  ;;  %v17311_v29 = vld [vmem:[%s27190_s1 + $0xba0] sm:$0xf0] }
  0xa9   :  { %4316 = vmatpush.bf16.msrb.mxu1 %v12557_v49  ;;  %4297 = vmatmul.bf16.vlgmr.msrb.gmra.mxu2 %v18684_v8  ;;  %v12765_v49 = vor.u32 %v17278_v36, %v12762_v37  ;;  %v4064_v54 = vpop.f32.mrf.mxu3  ;;  %v4040_v16 = vpop.f32.mrf.mxu1  ;;  %v11728_v36 = vld [vmem:[%s27190_s1 + $0x280] sm:$0xf]  ;;  %v17103_v15 = vld [vmem:[%s27190_s1 + $0x520] sm:$0xf0] }
  0xaa   :  { %4341 = vmatpush.bf16.msra.mxu2 %v13441_v45  ;;  %v12349_v45 = vor.u32 %v17174_v32, %v12346_v33  ;;  %v4052_v63 = vadd.f32 %v4051_v50, %v4039_v53  ;;  %v11781_v33 = vor.u32 %v17038_v19, %v11780_v12  ;;  %v17233_v50 = vld [vmem:[%s27190_s1 + $0x930] sm:$0xf0]  ;;  %v12924_v12 = vld [vmem:[%s27190_s1 + $0xbd8] sm:$0xf]  ;;  %v12456_v16 = vld [vmem:[%s27190_s1 + $0x830] sm:$0xf] }
  0xab   :  { %4329 = vmatpush.bf16.msrb.mxu3 %v12973_v52  ;;  %4310 = vmatmul.bf16.vlgmr.msra.gmra.mxu0 %v18686_v9  ;;  %v12294_v52 = vld [vmem:[%s27190_s1 + $0x724] sm:$0xf0] }
  0xac   :  { %4354 = vmatpush.bf16.msrb.mxu0 %v13857_v58  ;;  %v17265_v58 = vld [vmem:[%s27190_s1 + $0xa34] sm:$0xf]  ;;  %v19620_v10 = vadd.f32 %v4064_v54, %v4052_v63  ;;  %v11676_v54 = vld [vmem:[%s27190_s1 + $0x218] sm:$0xf]  ;;  %v17116_v63 = vld [vmem:[%s27190_s1 + $0x588] sm:$0xf0] }
  0xad   :  { %4317 = vmatpush.bf16.msrb.mxu1 %v12505_v0  ;;  %v12297_v0 = vor.u32 %v17161_v51, %v12294_v52  ;;  %v12713_v4 = vor.u32 %v17265_v58, %v12710_v59  ;;  %v11729_v51 = vor.u32 %v17025_v38, %v11728_v36  ;;  %v12145_v58 = vor.u32 %v17129_v47, %v12144_v46  ;;  %v11520_v38 = vld [vmem:[%s27190_s1 + $0xe0] sm:$0xf] }
  0xae   :  { %4342 = vmatpush.bf16.msra.mxu2 %v13389_v61  ;;  %v17486_v61 = vld [vmem:[%s27190_s1 + $0x111c] sm:$0xf]  ;;  %v11936_v46 = vld [vmem:[%s27190_s1 + $0x420] sm:$0xf]  ;;  %v729_v47 = vperm.slane %v19532_v17, 1 }
  0xaf   :  { %4330 = vmatpush.bf16.msrb.mxu3 %v12921_v3  ;;  %v17148_v3 = vld [vmem:[%s27190_s1 + $0x68c] sm:$0xf] }
  0xb0   :  { %4355 = vmatpush.bf16.msrb.mxu0 %v13805_v6  ;;  %v17252_v6 = vld [vmem:[%s27190_s1 + $0x9cc] sm:$0xf]  ;;  %v12245_v22 = vor.u32 %v17148_v3, %v12242_v5  ;;  %v11624_v5 = vld [vmem:[%s27190_s1 + $0x1b0] sm:$0xf] }
  0xb1   :  { %4318 = vmatpush.bf16.msrb.mxu1 %v12453_v14  ;;  %v13906_v14 = vld [vmem:[%s27190_s1 + $0x13bc] sm:$0xf0]  ;;  %v12661_v26 = vor.u32 %v17252_v6, %v12658_v7  ;;  %v4066_v32 = vpop.f32.mrf.mxu3  ;;  %v16999_v6 = vld [vmem:[%s27190_s1 + $0x1e0] sm:$0xf0] }
  0xb2   :  { %4343 = vmatpush.bf16.msra.mxu2 %v13337_v11  ;;  %v13597_v11 = vor.u32 %v17486_v61, %v13594_v62  ;;  %v13909_v27 = vor.u32 %v17564_v13, %v13906_v14  ;;  %v17337_v61 = vld [vmem:[%s27190_s1 + $0xc70] sm:$0xf0]  ;;  %v12092_v62 = vld [vmem:[%s27190_s1 + $0x558] sm:$0xf]  ;;  %v17324_v13 = vld [vmem:[%s27190_s1 + $0xc08] sm:$0xf0]  ;;  %v11625_v19 = vor.u32 %v16999_v6, %v11624_v5 }
  0xb3   :  { %4331 = vmatpush.bf16.msrb.mxu3 %v12869_v18  ;;  %v13129_v18 = vor.u32 %v17369_v1, %v13126_v2  ;;  %v17220_v1 = vld [vmem:[%s27190_s1 + $0x8c8] sm:$0xf0]  ;;  %v12093_v7 = vor.u32 %v17116_v63, %v12092_v62  ;;  %v12040_v14 = vld [vmem:[%s27190_s1 + $0x4f0] sm:$0xf]  ;;  %v17194_v32 = vld [vmem:[%s27190_s1 + $0x7f8] sm:$0xf0] }
  0xb4   :  { %4356 = vmatpush.bf16.msrb.mxu0 %v13753_v21  ;;  %v13542_v21 = vld [vmem:[%s27190_s1 + $0x10e4] sm:$0xf0]  ;;  %v12768_v62 = vld [vmem:[%s27190_s1 + $0xaa0] sm:$0xf]  ;;  %v17285_v63 = vld [vmem:[%s27190_s1 + $0xad0] sm:$0xf0] }
  0xb5   :  { %4319 = vmatpush.bf16.msrb.mxu1 %v12401_v28  ;;  %v4053_v28 = vpop.f32.mrf.mxu2  ;;  %v17168_v5 = vld [vmem:[%s27190_s1 + $0x728] sm:$0xf0] }
  0xb6   :  { %4344 = vmatpush.bf16.msra.mxu2 %v13285_v24  ;;  %v13074_v24 = vld [vmem:[%s27190_s1 + $0xd3c] sm:$0xf0]  ;;  %v12872_v28 = vld [vmem:[%s27190_s1 + $0xb70] sm:$0xf] }
  0xb7   :  { %4332 = vmatpush.bf16.msrb.mxu3 %v12817_v31  ;;  %v17246_v31 = vld [vmem:[%s27190_s1 + $0x998] sm:$0xf0]  ;;  %v13077_v37 = vor.u32 %v17356_v23, %v13074_v24 }
  0xb8   :  { %4357 = vmatpush.bf16.msrb.mxu0 %v13701_v35  ;;  %v13545_v35 = vor.u32 %v17473_v20, %v13542_v21  ;;  %v12613_v43 = vor.u32 %v17246_v31, %v12612_v30  ;;  %v12925_v21 = vor.u32 %v17324_v13, %v12924_v12  ;;  %v16986_v23 = vld [vmem:[%s27190_s1 + $0x178] sm:$0xf0]  ;;  %v11988_v30 = vld [vmem:[%s27190_s1 + $0x488] sm:$0xf]  ;;  %v16947_v12 = vld [vmem:[%s27190_s1 + $0x40] sm:$0xf0] }
  0xb9   :  { %4320 = vmatpush.bf16.msrb.mxu1 %v12349_v45  ;;  %v17350_v45 = vld [vmem:[%s27190_s1 + $0xcd8] sm:$0xf0]  ;;  %v12404_v31 = vld [vmem:[%s27190_s1 + $0x7c8] sm:$0xf] }
  0xba   :  { %4345 = vmatpush.bf16.msra.mxu2 %v13233_v41  ;;  %v13490_v41 = vld [vmem:[%s27190_s1 + $0x107c] sm:$0xf0]  ;;  %v13029_v53 = vor.u32 %v17350_v45, %v13028_v44  ;;  %v12405_v44 = vor.u32 %v17194_v32, %v12404_v31  ;;  %v17298_v45 = vld [vmem:[%s27190_s1 + $0xb38] sm:$0xf0] }
  0xbb   :  { %4333 = vmatpush.bf16.msrb.mxu3 %v12765_v49  ;;  %v12560_v49 = vld [vmem:[%s27190_s1 + $0x900] sm:$0xf]  ;;  %v13493_v52 = vor.u32 %v17460_v40, %v13490_v41  ;;  %v16973_v40 = vld [vmem:[%s27190_s1 + $0x110] sm:$0xf0]  ;;  %v12820_v41 = vld [vmem:[%s27190_s1 + $0xb08] sm:$0xf] }
  0xbc   :  { %4358 = vmatpush.bf16.msrb.mxu0 %v13649_v56  ;;  %v17012_v56 = vld [vmem:[%s27190_s1 + $0x248] sm:$0xf0]  ;;  %v12561_v59 = vor.u32 %v17233_v50, %v12560_v49  ;;  %v17077_v49 = vld [vmem:[%s27190_s1 + $0x450] sm:$0xf0]  ;;  %v12352_v50 = vld [vmem:[%s27190_s1 + $0x760] sm:$0xf] }
  0xbd   :  { %4321 = vmatpush.bf16.msrb.mxu1 %v12297_v0  ;;  %v12508_v0 = vld [vmem:[%s27190_s1 + $0x898] sm:$0xf]  ;;  %v4103_v2 = vpop.f32.mrf.mxu2  ;;  %v11677_v3 = vor.u32 %v17012_v56, %v11676_v54  ;;  %v16960_v56 = vld [vmem:[%s27190_s1 + $0xa8] sm:$0xf0]  ;;  %v13392_v32 = vld [vmem:[%s27190_s1 + $0xf80] sm:$0xf] }
  0xbe   :  { %4346 = vmatpush.bf16.msra.mxu2 %v13181_v60  ;;  %v12976_v60 = vld [vmem:[%s27190_s1 + $0xc40] sm:$0xf]  ;;  %v11468_v54 = vld [vmem:[%s27190_s1 + $0x78] sm:$0xf] }
  0xbf   :  { %4334 = vmatpush.bf16.msrb.mxu3 %v12713_v4  ;;  %v12977_v4 = vor.u32 %v17337_v61, %v12976_v60  ;;  %v11937_v60 = vor.u32 %v17077_v49, %v11936_v46  ;;  %v17136_v46 = vld [vmem:[%s27190_s1 + $0x62c] sm:$0xf]  ;;  %v12198_v49 = vld [vmem:[%s27190_s1 + $0x65c] sm:$0xf0] }
  0xc0   :  { %4359 = vmatpush.bf16.msrb.mxu0 %v13597_v11  ;;  %v12509_v11 = vor.u32 %v17220_v1, %v12508_v0  ;;  %v4077_v20 = vpop.f32.mrf.mxu0  ;;  %v11884_v0 = vld [vmem:[%s27190_s1 + $0x3b8] sm:$0xf] }
  0xc1   :  { %4322 = vmatpush.bf16.msrb.mxu1 %v12245_v22  ;;  %v11572_v22 = vld [vmem:[%s27190_s1 + $0x148] sm:$0xf]  ;;  %v4078_v24 = vadd.f32 %v4077_v20, %v19620_v10  ;;  %v4090_v25 = vpop.f32.mrf.mxu1  ;;  %v17090_v10 = vld [vmem:[%s27190_s1 + $0x4b8] sm:$0xf0] }
  0xc2   :  { %4347 = vmatpush.bf16.msra.mxu2 %v13129_v18  ;;  %v17207_v18 = vld [vmem:[%s27190_s1 + $0x860] sm:$0xf0]  ;;  %v11573_v36 = vor.u32 %v16986_v23, %v11572_v22  ;;  %v11832_v22 = vld [vmem:[%s27190_s1 + $0x350] sm:$0xf] }
  0xc3   :  { %4335 = vmatpush.bf16.msrb.mxu3 %v12661_v26  ;;  %v12041_v26 = vor.u32 %v17103_v15, %v12040_v14  ;;  %v12769_v14 = vor.u32 %v17285_v63, %v12768_v62  ;;  %v13444_v15 = vld [vmem:[%s27190_s1 + $0xfe8] sm:$0xf]  ;;  %v17051_v23 = vld [vmem:[%s27190_s1 + $0x380] sm:$0xf0]  ;;  %v11730_v62 = vld [vmem:[%s27190_s1 + $0x2b4] sm:$0xf0] }
  0xc4   :  { %4360 = vmatpush.bf16.msrb.mxu0 %v13545_v35  ;;  %4323 = vmatmul.bf16.vlgmr.msrb.gmra.mxu1 %v18653_v55  ;;  %v4091_v35 = vadd.f32 %v4090_v25, %v4078_v24  ;;  %v12248_v24 = vld [vmem:[%s27190_s1 + $0x690] sm:$0xf]  ;;  %v17155_v25 = vld [vmem:[%s27190_s1 + $0x6c0] sm:$0xf0] }
  0xc5   :  { %4374 = vmatpush.bf16.msra.mxu1 %v13909_v27  ;;  %v12457_v27 = vor.u32 %v17207_v18, %v12456_v16  ;;  %v17454_v16 = vld [vmem:[%s27190_s1 + $0x1018] sm:$0xf0]  ;;  %v12716_v18 = vld [vmem:[%s27190_s1 + $0xa38] sm:$0xf]  ;;  %v17123_v63 = vld [vmem:[%s27190_s1 + $0x5c4] sm:$0xf] }
  0xc6   :  { %4348 = vmatpush.bf16.msra.mxu2 %v13077_v37  ;;  %4336 = vmatmul.bf16.vlgmr.msrb.gmra.mxu3 %v18658_v57  ;;  %v12873_v37 = vor.u32 %v17311_v29, %v12872_v28  ;;  %v17558_v28 = vld [vmem:[%s27190_s1 + $0x1358] sm:$0xf0]  ;;  %v13912_v29 = vld [vmem:[%s27190_s1 + $0x1390] sm:$0xf] }
  0xc7   :  { %4380 = vmatpush.bf16.msra.mxu3 %v11781_v33  ;;  %v4105_v33 = vpop.f32.mrf.mxu2 }
  0xc8   :  { %4361 = vmatpush.bf16.msrb.mxu0 %v13493_v52  ;;  %v11521_v52 = vor.u32 %v16973_v40, %v11520_v38  ;;  %v12664_v38 = vld [vmem:[%s27190_s1 + $0x9d0] sm:$0xf]  ;;  %v17259_v40 = vld [vmem:[%s27190_s1 + $0xa00] sm:$0xf0] }
  0xc9   :  { %4393 = vmatpush.bf16.msrb.mxu1 %v12197_v42  ;;  %4349 = vmatmul.bf16.vlgmr.msra.gmra.mxu2 %v18855_v34  ;;  %v19774_v42 = vadd.f32 %v4103_v2, %v4091_v35  ;;  %v4092_v2 = vpop.f32.mrf.mxu1  ;;  %v11833_v35 = vor.u32 %v17051_v23, %v11832_v22  ;;  %v13236_v22 = vld [vmem:[%s27190_s1 + $0xe48] sm:$0xf]  ;;  %v17402_v23 = vld [vmem:[%s27190_s1 + $0xe78] sm:$0xf0] }
  0xca   :  { %4406 = vmatpush.bf16.msrb.mxu2 %v12613_v43  ;;  %v11989_v43 = vor.u32 %v17090_v10, %v11988_v30  ;;  %v17571_v30 = vld [vmem:[%s27190_s1 + $0x13c0] sm:$0xf0]  ;;  %v13445_v10 = vor.u32 %v17454_v16, %v13444_v15  ;;  %v17532_v2 = vld [vmem:[%s27190_s1 + $0x1288] sm:$0xf0]  ;;  %v17110_v15 = vld [vmem:[%s27190_s1 + $0x55c] sm:$0xf] }
  0xcb   :  { %4381 = vmatpush.bf16.msra.mxu3 %v11729_v51  ;;  %4362 = vmatmul.bf16.vlgmr.msrb.gmra.mxu0 %v18866_v39  ;;  %v17181_v51 = vld [vmem:[%s27190_s1 + $0x790] sm:$0xf0]  ;;  %v12094_v16 = vld [vmem:[%s27190_s1 + $0x58c] sm:$0xf0]  ;;  %vm5199_vm1 = vcmp.gt.f32.partialorder %v19774_v42, 0.0 }
  0xcc   :  { %4419 = vmatpush.bf16.msra.mxu0 %v13029_v53  ;;  %v12821_v53 = vor.u32 %v17298_v45, %v12820_v41  ;;  %v12353_v61 = vor.u32 %v17181_v51, %v12352_v50  ;;  %v11782_v45 = vld [vmem:[%s27190_s1 + $0x31c] sm:$0xf0]  ;;  %v17545_v51 = vld [vmem:[%s27190_s1 + $0x12f0] sm:$0xf0] }
  0xcd   :  { %4394 = vmatpush.bf16.msrb.mxu1 %v12145_v58  ;;  %v4079_v58 = vpop.f32.mrf.mxu0  ;;  %v13808_v50 = vld [vmem:[%s27190_s1 + $0x12c0] sm:$0xf] }
  0xce   :  { %4407 = vmatpush.bf16.msrb.mxu2 %v12561_v59  ;;  %v4116_v59 = vpop.f32.mrf.mxu3  ;;  %v17428_v58 = vld [vmem:[%s27190_s1 + $0xf48] sm:$0xf0] }
  0xcf   :  { %4382 = vmatpush.bf16.msra.mxu3 %v11677_v3  ;;  %v4117_v1 = vadd.f32 %v4116_v59, %v729_v47  ;;  %v17064_v3 = vld [vmem:[%s27190_s1 + $0x3e8] sm:$0xf0]  ;;  %v4129_v6 = vpop.f32.mrf.mxu2  ;;  %v12201_v59 = vor.u32 %v17136_v46, %v12198_v49  ;;  %v11990_v46 = vld [vmem:[%s27190_s1 + $0x4bc] sm:$0xf0]  ;;  %v17493_v49 = vld [vmem:[%s27190_s1 + $0x1150] sm:$0xf0] }
  0xd0   :  { %4420 = vmatpush.bf16.msra.mxu0 %v12977_v4  ;;  %v12300_v4 = vld [vmem:[%s27190_s1 + $0x6f8] sm:$0xf] }
  0xd1   :  { %4395 = vmatpush.bf16.msrb.mxu1 %v12093_v7  ;;  %v11469_v7 = vor.u32 %v16960_v56, %v11468_v54  ;;  %v19824_v13 = vadd.f32 %v4129_v6, %v4117_v1  ;;  %v12301_v20 = vor.u32 %v17168_v5, %v12300_v4  ;;  %v13340_v56 = vld [vmem:[%s27190_s1 + $0xf18] sm:$0xf]  ;;  %v13288_v5 = vld [vmem:[%s27190_s1 + $0xeb0] sm:$0xf]  ;;  %v17415_v6 = vld [vmem:[%s27190_s1 + $0xee0] sm:$0xf0] }
  0xd2   :  { %4408 = vmatpush.bf16.msrb.mxu2 %v12509_v11  ;;  %v11416_v11 = vld [vmem:[%s27190_s1 + $0x10] sm:$0xf]  ;;  %v13756_v1 = vld [vmem:[%s27190_s1 + $0x1258] sm:$0xf] }
  0xd3   :  { %4383 = vmatpush.bf16.msra.mxu3 %v11625_v19  ;;  %v11885_v19 = vor.u32 %v17064_v3, %v11884_v0  ;;  %v12146_v0 = vld [vmem:[%s27190_s1 + $0x5f4] sm:$0xf0]  ;;  %v13341_v3 = vor.u32 %v17428_v58, %v13340_v56 }
  0xd4   :  { %4421 = vmatpush.bf16.msra.mxu0 %v12925_v21  ;;  %13949 = vmatmul.msk.bf16.vlgmr.msra.gmra.mxu1 %vm4012_vm0, %v18767_v48  ;;  %v17272_v21 = vld [vmem:[%s27190_s1 + $0xa68] sm:$0xf0] }
  0xd5   :  { %4396 = vmatpush.bf16.msrb.mxu1 %v12041_v26  ;;  %v13860_v26 = vld [vmem:[%s27190_s1 + $0x1328] sm:$0xf]  ;;  %v12717_v31 = vor.u32 %v17272_v21, %v12716_v18  ;;  %v13704_v18 = vld [vmem:[%s27190_s1 + $0x11f0] sm:$0xf] }
  0xd6   :  { %4409 = vmatpush.bf16.msrb.mxu2 %v12457_v27  ;;  %v11417_v27 = vor.u32 %v16947_v12, %v11416_v11  ;;  %v4118_v33 = vpop.f32.mrf.mxu3  ;;  %v13861_v41 = vor.u32 %v17558_v28, %v13860_v26  ;;  %v13757_v11 = vor.u32 %v17532_v2, %v13756_v1  ;;  %v17006_v12 = vld [vmem:[%s27190_s1 + $0x21c] sm:$0xf]  ;;  %v11626_v28 = vld [vmem:[%s27190_s1 + $0x1e4] sm:$0xf0]  ;;  %v11938_v1 = vld [vmem:[%s27190_s1 + $0x454] sm:$0xf0] }
  0xd7   :  { %4384 = vmatpush.bf16.msra.mxu3 %v11573_v36  ;;  %v12249_v36 = vor.u32 %v17155_v25, %v12248_v24  ;;  %v4131_v47 = vpop.f32.mrf.mxu2  ;;  %v12097_v25 = vor.u32 %v17110_v15, %v12094_v16  ;;  %v13237_v33 = vor.u32 %v17402_v23, %v13236_v22  ;;  %v13548_v2 = vld [vmem:[%s27190_s1 + $0x10b8] sm:$0xf]  ;;  %v11886_v22 = vld [vmem:[%s27190_s1 + $0x3ec] sm:$0xf0] }
  0xd8   :  { %4422 = vmatpush.bf16.msra.mxu0 %v12873_v37  ;;  %v17441_v37 = vld [vmem:[%s27190_s1 + $0xfb0] sm:$0xf0]  ;;  %v13600_v47 = vld [vmem:[%s27190_s1 + $0x1120] sm:$0xf]  ;;  %v13496_v23 = vld [vmem:[%s27190_s1 + $0x1050] sm:$0xf] }
  0xd9   :  { %4397 = vmatpush.bf16.msrb.mxu1 %v11989_v43  ;;  %v13913_v43 = vor.u32 %v17571_v30, %v13912_v29  ;;  %v17097_v29 = vld [vmem:[%s27190_s1 + $0x4f4] sm:$0xf] }
  0xda   :  { %4410 = vmatpush.bf16.msrb.mxu2 %v12405_v44  ;;  %v17032_v44 = vld [vmem:[%s27190_s1 + $0x2ec] sm:$0xf] }
  0xdb   :  { %4385 = vmatpush.bf16.msra.mxu3 %v11521_v52  ;;  %v13393_v52 = vor.u32 %v17441_v37, %v13392_v32  ;;  %v11785_v54 = vor.u32 %v17032_v44, %v11782_v45  ;;  %v17506_v32 = vld [vmem:[%s27190_s1 + $0x11b8] sm:$0xf0]  ;;  %v17084_v44 = vld [vmem:[%s27190_s1 + $0x48c] sm:$0xf] }
  0xdc   :  { %4423 = vmatpush.bf16.msra.mxu0 %v12821_v53  ;;  %v12665_v53 = vor.u32 %v17259_v40, %v12664_v38  ;;  %v11993_v56 = vor.u32 %v17084_v44, %v11990_v46  ;;  %v13446_v44 = vld [vmem:[%s27190_s1 + $0x101c] sm:$0xf0] }
  0xdd   :  { %4398 = vmatpush.bf16.msrb.mxu1 %v11937_v60  ;;  %v13809_v60 = vor.u32 %v17545_v51, %v13808_v50 }
  0xde   :  { %4411 = vmatpush.bf16.msrb.mxu2 %v12353_v61  ;;  %v17019_v61 = vld [vmem:[%s27190_s1 + $0x284] sm:$0xf] }
  0xdf   :  { %4386 = vmatpush.bf16.msra.mxu3 %v11469_v7  ;;  %v11733_v4 = vor.u32 %v17019_v61, %v11730_v62  ;;  %v12149_v7 = vor.u32 %v17123_v63, %v12146_v0  ;;  %v11522_v61 = vld [vmem:[%s27190_s1 + $0x114] sm:$0xf0]  ;;  %v17071_v62 = vld [vmem:[%s27190_s1 + $0x424] sm:$0xf] }
  0xe0   :  { %4424 = vmatpush.bf16.msra.mxu0 %v12769_v14  ;;  %v11678_v14 = vld [vmem:[%s27190_s1 + $0x24c] sm:$0xf0]  ;;  %v4142_v24 = vpop.f32.mrf.mxu0  ;;  %v11941_v15 = vor.u32 %v17071_v62, %v11938_v1  ;;  %v13394_v62 = vld [vmem:[%s27190_s1 + $0xfb4] sm:$0xf0]  ;;  %v17318_v1 = vld [vmem:[%s27190_s1 + $0xbdc] sm:$0xf] }
  0xe1   :  { %4399 = vmatpush.bf16.msrb.mxu1 %v11885_v19  ;;  %v17519_v19 = vld [vmem:[%s27190_s1 + $0x1220] sm:$0xf0]  ;;  %v11681_v21 = vor.u32 %v17006_v12, %v11678_v14  ;;  %v4143_v30 = vadd.f32 %v4142_v24, %v19824_v13  ;;  %v13184_v13 = vld [vmem:[%s27190_s1 + $0xde0] sm:$0xf]  ;;  %v4155_v40 = vpop.f32.mrf.mxu1  ;;  %v17240_v12 = vld [vmem:[%s27190_s1 + $0x96c] sm:$0xf] }
  0xe2   :  { %4412 = vmatpush.bf16.msrb.mxu2 %v12301_v20  ;;  %v13289_v20 = vor.u32 %v17415_v6, %v13288_v5  ;;  %v13705_v26 = vor.u32 %v17519_v19, %v13704_v18  ;;  %v13080_v5 = vld [vmem:[%s27190_s1 + $0xd10] sm:$0xf]  ;;  %v12614_v14 = vld [vmem:[%s27190_s1 + $0x99c] sm:$0xf0]  ;;  %v16954_v18 = vld [vmem:[%s27190_s1 + $0x7c] sm:$0xf] }
  0xe3   :  { %4387 = vmatpush.bf16.msra.mxu3 %v11417_v27  ;;  %v16993_v27 = vld [vmem:[%s27190_s1 + $0x1b4] sm:$0xf]  ;;  %v4156_v45 = vadd.f32 %v4155_v40, %v4143_v30  ;;  %v11470_v19 = vld [vmem:[%s27190_s1 + $0xac] sm:$0xf0]  ;;  %v17467_v24 = vld [vmem:[%s27190_s1 + $0x1080] sm:$0xf0] }
  0xe4   :  { %4425 = vmatpush.bf16.msra.mxu0 %v12717_v31  ;;  %v13652_v31 = vld [vmem:[%s27190_s1 + $0x1188] sm:$0xf]  ;;  %v17227_v30 = vld [vmem:[%s27190_s1 + $0x904] sm:$0xf] }
  0xe5   :  { %4400 = vmatpush.bf16.msrb.mxu1 %v11833_v35  ;;  %v11629_v35 = vor.u32 %v16993_v27, %v11626_v28  ;;  %v13653_v38 = vor.u32 %v17506_v32, %v13652_v31  ;;  %v13030_v27 = vld [vmem:[%s27190_s1 + $0xcdc] sm:$0xf0]  ;;  %v12617_v28 = vor.u32 %v17240_v12, %v12614_v14  ;;  %v16941_v31 = vld [vmem:[%s27190_s1 + $0x14] sm:$0xf]  ;;  %v17422_v14 = vld [vmem:[%s27190_s1 + $0xf1c] sm:$0xf] }
  0xe6   :  { %4413 = vmatpush.bf16.msrb.mxu2 %v12249_v36  ;;  %4388 = vmatmul.bf16.vlgmr.msra.gmra.mxu3 %v18684_v8  ;;  %v17389_v36 = vld [vmem:[%s27190_s1 + $0xe10] sm:$0xf0] }
  0xe7   :  { %4432 = vmatpush.bf16.msrb.mxu3 %v13445_v10  ;;  %v12042_v10 = vld [vmem:[%s27190_s1 + $0x524] sm:$0xf0]  ;;  %v13185_v50 = vor.u32 %v17389_v36, %v13184_v13  ;;  %v17045_v36 = vld [vmem:[%s27190_s1 + $0x354] sm:$0xf] }
  0xe8   :  { %4426 = vmatpush.bf16.msra.mxu0 %v12665_v53  ;;  %4401 = vmatmul.bf16.vlgmr.msrb.gmra.mxu1 %v18686_v9  ;;  %v12045_v37 = vor.u32 %v17097_v29, %v12042_v10  ;;  %v17376_v53 = vld [vmem:[%s27190_s1 + $0xda8] sm:$0xf0]  ;;  %v11473_v29 = vor.u32 %v16954_v18, %v11470_v19  ;;  %v12562_v10 = vld [vmem:[%s27190_s1 + $0x934] sm:$0xf0]  ;;  %v11418_v13 = vld [vmem:[%s27190_s1 + $0x44] sm:$0xf0] }
  0xe9   :  { %4445 = vmatpush.bf16.msra.mxu1 %v13861_v41  ;;  %4414 = vmatmul.bf16.vlgmr.msrb.gmra.mxu2 %v18653_v55  ;;  %v16980_v41 = vld [vmem:[%s27190_s1 + $0x14c] sm:$0xf]  ;;  %v4168_v58 = vpop.f32.mrf.mxu3  ;;  %v13758_v18 = vld [vmem:[%s27190_s1 + $0x128c] sm:$0xf0]  ;;  %v17305_v19 = vld [vmem:[%s27190_s1 + $0xb74] sm:$0xf] }
  0xea   :  { %4465 = vmatpush.bf16.msra.mxu2 %v13913_v43  ;;  %v11574_v43 = vld [vmem:[%s27190_s1 + $0x17c] sm:$0xf0]  ;;  %v4169_v63 = vadd.f32 %v4168_v58, %v4156_v45  ;;  %v17552_v45 = vld [vmem:[%s27190_s1 + $0x132c] sm:$0xf]  ;;  %v12510_v58 = vld [vmem:[%s27190_s1 + $0x8cc] sm:$0xf0] }
  0xeb   :  { %4433 = vmatpush.bf16.msrb.mxu3 %v13393_v52  ;;  %4427 = vmatmul.bf16.vlgmr.msra.gmra.mxu0 %v18658_v57  ;;  %v11577_v51 = vor.u32 %v16980_v41, %v11574_v43  ;;  %v13132_v52 = vld [vmem:[%s27190_s1 + $0xd78] sm:$0xf]  ;;  %v17448_v43 = vld [vmem:[%s27190_s1 + $0xfec] sm:$0xf] }
  0xec   :  { %4471 = vmatpush.bf16.msrb.mxu0 %v11785_v54  ;;  %v4144_v54 = vpop.f32.mrf.mxu0  ;;  %v4181_v0 = vpop.f32.mrf.mxu2 }
  0xed   :  { %4446 = vmatpush.bf16.msra.mxu1 %v13809_v60  ;;  %v16967_v60 = vld [vmem:[%s27190_s1 + $0xe4] sm:$0xf]  ;;  %v4182_v6 = vadd.f32 %v4181_v0, %v4169_v63  ;;  %v13449_v54 = vor.u32 %v17448_v43, %v13446_v44  ;;  %v13810_v0 = vld [vmem:[%s27190_s1 + $0x12f4] sm:$0xf0]  ;;  %v13238_v43 = vld [vmem:[%s27190_s1 + $0xe7c] sm:$0xf0] }
  0xee   :  { %4484 = vmatpush.bf16.msrb.mxu2 %v12201_v59  ;;  %v13601_v59 = vor.u32 %v17493_v49, %v13600_v47  ;;  %v13862_v47 = vld [vmem:[%s27190_s1 + $0x135c] sm:$0xf0]  ;;  %v17331_v49 = vld [vmem:[%s27190_s1 + $0xc44] sm:$0xf]  ;;  %v17500_v44 = vld [vmem:[%s27190_s1 + $0x118c] sm:$0xf] }
  0xef   :  { %4434 = vmatpush.bf16.msrb.mxu3 %v13341_v3  ;;  %v17480_v3 = vld [vmem:[%s27190_s1 + $0x10e8] sm:$0xf0]  ;;  %v17539_v63 = vld [vmem:[%s27190_s1 + $0x12c4] sm:$0xf] }
  0xf0   :  { %4472 = vmatpush.bf16.msrb.mxu0 %v11733_v4  ;;  %v13133_v4 = vor.u32 %v17376_v53, %v13132_v52  ;;  %v13549_v16 = vor.u32 %v17480_v3, %v13548_v2  ;;  %v11421_v52 = vor.u32 %v16941_v31, %v11418_v13  ;;  %v12926_v2 = vld [vmem:[%s27190_s1 + $0xc0c] sm:$0xf0]  ;;  %v12822_v31 = vld [vmem:[%s27190_s1 + $0xb3c] sm:$0xf0]  ;;  %v17175_v13 = vld [vmem:[%s27190_s1 + $0x764] sm:$0xf] }
  0xf1   :  { %4447 = vmatpush.bf16.msra.mxu1 %v13757_v11  ;;  %v17363_v11 = vld [vmem:[%s27190_s1 + $0xd40] sm:$0xf0]  ;;  %v12929_v12 = vor.u32 %v17318_v1, %v12926_v2  ;;  %v12718_v1 = vld [vmem:[%s27190_s1 + $0xa6c] sm:$0xf0] }
  0xf2   :  { %4485 = vmatpush.bf16.msrb.mxu2 %v12149_v7  ;;  %v11525_v7 = vor.u32 %v16967_v60, %v11522_v61  ;;  %v17435_v61 = vld [vmem:[%s27190_s1 + $0xf84] sm:$0xf] }
  0xf3   :  { %4435 = vmatpush.bf16.msrb.mxu3 %v13289_v20  ;;  %v17058_v20 = vld [vmem:[%s27190_s1 + $0x3bc] sm:$0xf] }
  0xf4   :  { %4473 = vmatpush.bf16.msrb.mxu0 %v11681_v21  ;;  %v4157_v21 = vpop.f32.mrf.mxu1  ;;  %v4194_v32 = vpop.f32.mrf.mxu0 }
  0xf5   :  { %4448 = vmatpush.bf16.msra.mxu1 %v13705_v26  ;;  %v17344_v26 = vld [vmem:[%s27190_s1 + $0xcac] sm:$0xf]  ;;  %v20073_v40 = vadd.f32 %v4194_v32, %v4182_v6  ;;  %v4183_v46 = vpop.f32.mrf.mxu2  ;;  %v12458_v6 = vld [vmem:[%s27190_s1 + $0x864] sm:$0xf0]  ;;  %v730_v32 = vperm.slane %v19532_v17, 2 }
  0xf6   :  { %4486 = vmatpush.bf16.msrb.mxu2 %v12097_v25  ;;  %v13081_v25 = vor.u32 %v17363_v11, %v13080_v5  ;;  %v13033_v41 = vor.u32 %v17344_v26, %v13030_v27  ;;  %v17201_v5 = vld [vmem:[%s27190_s1 + $0x834] sm:$0xf]  ;;  %v13813_v11 = vor.u32 %v17539_v63, %v13810_v0  ;;  %v17396_v17 = vld [vmem:[%s27190_s1 + $0xe4c] sm:$0xf]  ;;  %v13654_v46 = vld [vmem:[%s27190_s1 + $0x11bc] sm:$0xf0] }
  0xf7   :  { %4436 = vmatpush.bf16.msrb.mxu3 %v13237_v33  ;;  %v11889_v33 = vor.u32 %v17058_v20, %v11886_v22  ;;  %v12874_v20 = vld [vmem:[%s27190_s1 + $0xba4] sm:$0xf0]  ;;  %v12461_v21 = vor.u32 %v17201_v5, %v12458_v6  ;;  %v13602_v63 = vld [vmem:[%s27190_s1 + $0x1154] sm:$0xf0]  ;;  %v17266_v0 = vld [vmem:[%s27190_s1 + $0xa3c] sm:$0xf] }
  0xf8   :  { %4474 = vmatpush.bf16.msrb.mxu0 %v11629_v35  ;;  %v13497_v35 = vor.u32 %v17467_v24, %v13496_v23  ;;  %v17188_v23 = vld [vmem:[%s27190_s1 + $0x7cc] sm:$0xf]  ;;  %v12406_v24 = vld [vmem:[%s27190_s1 + $0x7fc] sm:$0xf0]  ;;  %v12877_v27 = vor.u32 %v17305_v19, %v12874_v20  ;;  %v12250_v6 = vld [vmem:[%s27190_s1 + $0x6c4] sm:$0xf0] }
  0xf9   :  { %4449 = vmatpush.bf16.msra.mxu1 %v13653_v38  ;;  %13950 = vmatmul.msk.bf16.vlgmr.msra.gmra.mxu2 %vm4012_vm0, %v18767_v48  ;;  %v4170_v38 = vpop.f32.mrf.mxu3  ;;  %v17565_v19 = vld [vmem:[%s27190_s1 + $0x1394] sm:$0xf]  ;;  %v13914_v20 = vld [vmem:[%s27190_s1 + $0x13c4] sm:$0xf0]  ;;  %vm5200_vm2 = vcmp.gt.f32.partialorder %v20073_v40, 0.0 }
  0xfa   :  { %4487 = vmatpush.bf16.msrb.mxu2 %v12045_v37  ;;  %v11834_v37 = vld [vmem:[%s27190_s1 + $0x384] sm:$0xf0] }
  0xfb   :  { %4437 = vmatpush.bf16.msrb.mxu3 %v13185_v50  ;;  %v12978_v50 = vld [vmem:[%s27190_s1 + $0xc74] sm:$0xf0]  ;;  %v11837_v53 = vor.u32 %v17045_v36, %v11834_v37 }
  0xfc   :  { %4475 = vmatpush.bf16.msrb.mxu0 %v11577_v51  ;;  %v12565_v51 = vor.u32 %v17227_v30, %v12562_v10  ;;  %v12981_v60 = vor.u32 %v17331_v49, %v12978_v50  ;;  %v13706_v30 = vld [vmem:[%s27190_s1 + $0x1224] sm:$0xf0]  ;;  %v17292_v10 = vld [vmem:[%s27190_s1 + $0xb0c] sm:$0xf]  ;;  %v12354_v36 = vld [vmem:[%s27190_s1 + $0x794] sm:$0xf0] }
  0xfd   :  { %4450 = vmatpush.bf16.msra.mxu1 %v13601_v59  ;;  %v13865_v59 = vor.u32 %v17552_v45, %v13862_v47  ;;  %v17279_v47 = vld [vmem:[%s27190_s1 + $0xaa4] sm:$0xf]  ;;  %v12770_v49 = vld [vmem:[%s27190_s1 + $0xad4] sm:$0xf0] }
  0xfe   :  { %4488 = vmatpush.bf16.msrb.mxu2 %v11993_v56  ;;  %v17214_v56 = vld [vmem:[%s27190_s1 + $0x89c] sm:$0xf] }
  0xff   :  { %4438 = vmatpush.bf16.msrb.mxu3 %v13133_v4  ;;  %v12513_v3 = vor.u32 %v17214_v56, %v12510_v58  ;;  %v13397_v4 = vor.u32 %v17435_v61, %v13394_v62  ;;  %v13657_v56 = vor.u32 %v17500_v44, %v13654_v46  ;;  %v12773_v58 = vor.u32 %v17279_v47, %v12770_v49  ;;  %v17487_v61 = vld [vmem:[%s27190_s1 + $0x1124] sm:$0xf]  ;;  %v11736_v49 = vld [vmem:[%s27190_s1 + $0x288] sm:$0xf] }
 0x100   :  { %4476 = vmatpush.bf16.msrb.mxu0 %v11525_v7  ;;  %v4196_v7 = vpop.f32.mrf.mxu0  ;;  %v17247_v44 = vld [vmem:[%s27190_s1 + $0x9a0] sm:$0xf0] }
 0x101   :  { %4451 = vmatpush.bf16.msra.mxu1 %v13549_v16  ;;  %v17526_v16 = vld [vmem:[%s27190_s1 + $0x125c] sm:$0xf]  ;;  %v4207_v45 = vpop.f32.mrf.mxu1  ;;  %v17351_v47 = vld [vmem:[%s27190_s1 + $0xce0] sm:$0xf0] }
 0x102   :  { %4489 = vmatpush.bf16.msrb.mxu2 %v11941_v15  ;;  %v13342_v15 = vld [vmem:[%s27190_s1 + $0xf4c] sm:$0xf0]  ;;  %v13761_v26 = vor.u32 %v17526_v16, %v13758_v18  ;;  %v4208_v50 = vadd.f32 %v4207_v45, %v730_v32  ;;  %v17370_v7 = vld [vmem:[%s27190_s1 + $0xd7c] sm:$0xf]  ;;  %v12721_v16 = vor.u32 %v17266_v0, %v12718_v1  ;;  %v17143_v32 = vld [vmem:[%s27190_s1 + $0x660] sm:$0xf0] }
 0x103   :  { %4439 = vmatpush.bf16.msrb.mxu3 %v13081_v25  ;;  %v13345_v22 = vor.u32 %v17422_v14, %v13342_v15  ;;  %v17409_v25 = vld [vmem:[%s27190_s1 + $0xeb4] sm:$0xf]  ;;  %v13605_v15 = vor.u32 %v17487_v61, %v13602_v63  ;;  %v17474_v18 = vld [vmem:[%s27190_s1 + $0x10bc] sm:$0xf]  ;;  %v13036_v45 = vld [vmem:[%s27190_s1 + $0xcb0] sm:$0xf] }
 0x104   :  { %4477 = vmatpush.bf16.msrb.mxu0 %v11473_v29  ;;  %v17513_v29 = vld [vmem:[%s27190_s1 + $0x11f4] sm:$0xf]  ;;  %v17234_v63 = vld [vmem:[%s27190_s1 + $0x938] sm:$0xf0]  ;;  %v12984_v0 = vld [vmem:[%s27190_s1 + $0xc48] sm:$0xf] }
 0x105   :  { %4452 = vmatpush.bf16.msra.mxu1 %v13497_v35  ;;  %v13709_v38 = vor.u32 %v17513_v29, %v13706_v30  ;;  %v17039_v29 = vld [vmem:[%s27190_s1 + $0x320] sm:$0xf0] }
 0x106   :  { %4490 = vmatpush.bf16.msrb.mxu2 %v11889_v33  ;;  %4440 = vmatmul.bf16.vlgmr.msrb.gmra.mxu3 %v18855_v34  ;;  %v12409_v33 = vor.u32 %v17188_v23, %v12406_v24  ;;  %v13550_v23 = vld [vmem:[%s27190_s1 + $0x10ec] sm:$0xf0]  ;;  %v17253_v24 = vld [vmem:[%s27190_s1 + $0x9d4] sm:$0xf] }
 0x107   :  { %4497 = vmatpush.bf16.msra.mxu3 %v12617_v28  ;;  %v13290_v28 = vld [vmem:[%s27190_s1 + $0xee4] sm:$0xf0] }
 0x108   :  { %4478 = vmatpush.bf16.msrb.mxu0 %v11421_v52  ;;  %4453 = vmatmul.bf16.vlgmr.msra.gmra.mxu1 %v18866_v39  ;;  %v13293_v35 = vor.u32 %v17409_v25, %v13290_v28  ;;  %v4233_v37 = vpop.f32.mrf.mxu0  ;;  %v13241_v52 = vor.u32 %v17396_v17, %v13238_v43  ;;  %v12666_v25 = vld [vmem:[%s27190_s1 + $0xa04] sm:$0xf0]  ;;  %v11788_v28 = vld [vmem:[%s27190_s1 + $0x2f0] sm:$0xf] }
 0x109   :  { %4510 = vmatpush.bf16.msrb.mxu1 %v13033_v41  ;;  %v12825_v41 = vor.u32 %v17292_v10, %v12822_v31  ;;  %v4220_v62 = vpop.f32.mrf.mxu3  ;;  %v13917_v10 = vor.u32 %v17565_v19, %v13914_v20  ;;  %v12204_v31 = vld [vmem:[%s27190_s1 + $0x630] sm:$0xf]  ;;  %v11789_v17 = vor.u32 %v17039_v29, %v11788_v28  ;;  %v17325_v19 = vld [vmem:[%s27190_s1 + $0xc10] sm:$0xf0]  ;;  %v11632_v20 = vld [vmem:[%s27190_s1 + $0x1b8] sm:$0xf] }
 0x10a   :  { %4491 = vmatpush.bf16.msrb.mxu2 %v11837_v53  ;;  %v17162_v53 = vld [vmem:[%s27190_s1 + $0x6fc] sm:$0xf]  ;;  %v4221_v2 = vadd.f32 %v4220_v62, %v4208_v50  ;;  %v12620_v43 = vld [vmem:[%s27190_s1 + $0x970] sm:$0xf]  ;;  %v12205_v46 = vor.u32 %v17143_v32, %v12204_v31  ;;  %v12568_v62 = vld [vmem:[%s27190_s1 + $0x908] sm:$0xf] }
 0x10b   :  { %4498 = vmatpush.bf16.msra.mxu3 %v12565_v51  ;;  %4479 = vmatmul.bf16.vlgmr.msrb.gmra.mxu0 %v18684_v8  ;;  %v12357_v51 = vor.u32 %v17175_v13, %v12354_v36  ;;  %v12669_v13 = vor.u32 %v17253_v24, %v12666_v25  ;;  %v13082_v36 = vld [vmem:[%s27190_s1 + $0xd44] sm:$0xf0]  ;;  %v17026_v50 = vld [vmem:[%s27190_s1 + $0x2b8] sm:$0xf0] }
 0x10c   :  { %4523 = vmatpush.bf16.msra.mxu0 %v13449_v54  ;;  %v12302_v54 = vld [vmem:[%s27190_s1 + $0x72c] sm:$0xf0]  ;;  %v11737_v61 = vor.u32 %v17026_v50, %v11736_v49  ;;  %v11528_v49 = vld [vmem:[%s27190_s1 + $0xe8] sm:$0xf]  ;;  %v16974_v50 = vld [vmem:[%s27190_s1 + $0x118] sm:$0xf0] }
 0x10d   :  { %4511 = vmatpush.bf16.msrb.mxu1 %v12981_v60  ;;  %4492 = vmatmul.bf16.vlgmr.msrb.gmra.mxu2 %v18686_v9  ;;  %v13186_v60 = vld [vmem:[%s27190_s1 + $0xe14] sm:$0xf0] }
 0x10e   :  { %4536 = vmatpush.bf16.msra.mxu2 %v13865_v59  ;;  %v17383_v59 = vld [vmem:[%s27190_s1 + $0xde4] sm:$0xf] }
 0x10f   :  { %4499 = vmatpush.bf16.msra.mxu3 %v12513_v3  ;;  %v12305_v3 = vor.u32 %v17162_v53, %v12302_v54  ;;  %v13189_v5 = vor.u32 %v17383_v59, %v13186_v60  ;;  %v17130_v53 = vld [vmem:[%s27190_s1 + $0x5f8] sm:$0xf0]  ;;  %v13037_v60 = vor.u32 %v17351_v47, %v13036_v45  ;;  %v17299_v47 = vld [vmem:[%s27190_s1 + $0xb40] sm:$0xf0] }
 0x110   :  { %4524 = vmatpush.bf16.msra.mxu0 %v13397_v4  ;;  %v17149_v4 = vld [vmem:[%s27190_s1 + $0x694] sm:$0xf]  ;;  %v4235_v14 = vpop.f32.mrf.mxu0 }
 0x111   :  { %4512 = vmatpush.bf16.msrb.mxu1 %v12929_v12  ;;  %v4234_v12 = vadd.f32 %v4233_v37, %v4221_v2  ;;  %v17461_v37 = vld [vmem:[%s27190_s1 + $0x1054] sm:$0xf]  ;;  %v17338_v2 = vld [vmem:[%s27190_s1 + $0xc78] sm:$0xf0]  ;;  %v12516_v14 = vld [vmem:[%s27190_s1 + $0x8a0] sm:$0xf] }
 0x112   :  { %4537 = vmatpush.bf16.msra.mxu2 %v13813_v11  ;;  %v13134_v11 = vld [vmem:[%s27190_s1 + $0xdac] sm:$0xf0] }
 0x113   :  { %4500 = vmatpush.bf16.msra.mxu3 %v12461_v21  ;;  %v4209_v21 = vpop.f32.mrf.mxu1  ;;  %v13137_v30 = vor.u32 %v17370_v7, %v13134_v11  ;;  %v12569_v7 = vor.u32 %v17234_v63, %v12568_v62  ;;  %v12985_v11 = vor.u32 %v17338_v2, %v12984_v0  ;;  %v12360_v63 = vld [vmem:[%s27190_s1 + $0x768] sm:$0xf]  ;;  %v17182_v0 = vld [vmem:[%s27190_s1 + $0x798] sm:$0xf0]  ;;  %v11529_v2 = vor.u32 %v16974_v50, %v11528_v49  ;;  %v17033_v50 = vld [vmem:[%s27190_s1 + $0x2f4] sm:$0xf] }
 0x114   :  { %4525 = vmatpush.bf16.msra.mxu0 %v13345_v22  ;;  %v4246_v22 = vpop.f32.mrf.mxu2  ;;  %v17000_v21 = vld [vmem:[%s27190_s1 + $0x1e8] sm:$0xf0] }
 0x115   :  { %4513 = vmatpush.bf16.msrb.mxu1 %v12877_v27  ;;  %v12253_v27 = vor.u32 %v17149_v4, %v12250_v6  ;;  %v17013_v4 = vld [vmem:[%s27190_s1 + $0x250] sm:$0xf0]  ;;  %v11633_v29 = vor.u32 %v17000_v21, %v11632_v20  ;;  %v12724_v21 = vld [vmem:[%s27190_s1 + $0xa40] sm:$0xf] }
 0x116   :  { %4538 = vmatpush.bf16.msra.mxu2 %v13761_v26  ;;  %v20248_v26 = vadd.f32 %v4246_v22, %v4234_v12  ;;  %v17117_v6 = vld [vmem:[%s27190_s1 + $0x590] sm:$0xf0]  ;;  %v12048_v22 = vld [vmem:[%s27190_s1 + $0x4f8] sm:$0xf] }
 0x117   :  { %4501 = vmatpush.bf16.msra.mxu3 %v12409_v33  ;;  %v17357_v33 = vld [vmem:[%s27190_s1 + $0xd14] sm:$0xf] }
 0x118   :  { %4526 = vmatpush.bf16.msra.mxu0 %v13293_v35  ;;  %v13553_v35 = vor.u32 %v17474_v18, %v13550_v23  ;;  %v20298_v54 = vpop.f32.mrf.mxu0  ;;  %v17104_v23 = vld [vmem:[%s27190_s1 + $0x528] sm:$0xf0]  ;;  %v17169_v20 = vld [vmem:[%s27190_s1 + $0x730] sm:$0xf0] }
 0x119   :  { %4514 = vmatpush.bf16.msrb.mxu1 %v12825_v41  ;;  %v4222_v41 = vpop.f32.mrf.mxu3  ;;  %v12049_v32 = vor.u32 %v17104_v23, %v12048_v22 }
 0x11a   :  { %4539 = vmatpush.bf16.msra.mxu2 %v13709_v38  ;;  %v13498_v38 = vld [vmem:[%s27190_s1 + $0x1084] sm:$0xf0] }
 0x11b   :  { %4502 = vmatpush.bf16.msra.mxu3 %v12357_v51  ;;  %v13085_v51 = vor.u32 %v17357_v33, %v13082_v36  ;;  %v12880_v33 = vld [vmem:[%s27190_s1 + $0xb78] sm:$0xf]  ;;  %v16987_v36 = vld [vmem:[%s27190_s1 + $0x180] sm:$0xf0] }
 0x11c   :  { %4527 = vmatpush.bf16.msra.mxu0 %v13241_v52  ;;  %v12152_v52 = vld [vmem:[%s27190_s1 + $0x5c8] sm:$0xf]  ;;  %v4248_v59 = vpop.f32.mrf.mxu2 }
 0x11d   :  { %4515 = vmatpush.bf16.msrb.mxu1 %v12773_v58  ;;  %v12621_v58 = vor.u32 %v17247_v44, %v12620_v43  ;;  %v12153_v1 = vor.u32 %v17130_v53, %v12152_v52  ;;  %v17195_v43 = vld [vmem:[%s27190_s1 + $0x800] sm:$0xf0]  ;;  %v17078_v52 = vld [vmem:[%s27190_s1 + $0x458] sm:$0xf0] }
 0x11e   :  { %4540 = vmatpush.bf16.msra.mxu2 %v13657_v56  ;;  %v13501_v56 = vor.u32 %v17461_v37, %v13498_v38  ;;  %v17091_v37 = vld [vmem:[%s27190_s1 + $0x4c0] sm:$0xf0] }
 0x11f   :  { %4503 = vmatpush.bf16.msra.mxu3 %v12305_v3  ;;  %v11684_v3 = vld [vmem:[%s27190_s1 + $0x220] sm:$0xf] }
 0x120   :  { %4528 = vmatpush.bf16.msra.mxu0 %v13189_v5  ;;  %v12100_v5 = vld [vmem:[%s27190_s1 + $0x560] sm:$0xf]  ;;  %v11685_v12 = vor.u32 %v17013_v4, %v11684_v3  ;;  %v4287_v24 = vpop.f32.mrf.mxu0  ;;  %v12776_v4 = vld [vmem:[%s27190_s1 + $0xaa8] sm:$0xf] }
 0x121   :  { %4516 = vmatpush.bf16.msrb.mxu1 %v12721_v16  ;;  %v12932_v16 = vld [vmem:[%s27190_s1 + $0xbe0] sm:$0xf]  ;;  %v12101_v18 = vor.u32 %v17117_v6, %v12100_v5  ;;  %v4259_v28 = vpop.f32.mrf.mxu1  ;;  %v17286_v5 = vld [vmem:[%s27190_s1 + $0xad8] sm:$0xf0]  ;;  %v17273_v24 = vld [vmem:[%s27190_s1 + $0xa70] sm:$0xf0] }
 0x122   :  { %4541 = vmatpush.bf16.msra.mxu2 %v13605_v15  ;;  %v17221_v15 = vld [vmem:[%s27190_s1 + $0x8d0] sm:$0xf0]  ;;  %v4260_v31 = vadd.f32 %v4259_v28, %v20248_v26  ;;  %v11996_v26 = vld [vmem:[%s27190_s1 + $0x490] sm:$0xf]  ;;  %v20404_v59 = vld [vmem:[%s27191_s2] sm:$0xff] }
 0x123   :  { %4504 = vmatpush.bf16.msra.mxu3 %v12253_v27  ;;  %v12517_v25 = vor.u32 %v17221_v15, %v12516_v14  ;;  %v12933_v27 = vor.u32 %v17325_v19, %v12932_v16  ;;  %v11997_v45 = vor.u32 %v17091_v37, %v11996_v26  ;;  %v11476_v6 = vld [vmem:[%s27190_s1 + $0x80] sm:$0xf]  ;;  %v17065_v14 = vld [vmem:[%s27190_s1 + $0x3f0] sm:$0xf0]  ;;  %v12361_v16 = vor.u32 %v17182_v0, %v12360_v63  ;;  %v12256_v37 = vld [vmem:[%s27190_s1 + $0x698] sm:$0xf] }
 0x124   :  { %4529 = vmatpush.bf16.msra.mxu0 %v13137_v30  ;;  %v12464_v30 = vld [vmem:[%s27190_s1 + $0x838] sm:$0xf]  ;;  %v12777_v19 = vor.u32 %v17286_v5, %v12776_v4  ;;  %v12725_v26 = vor.u32 %v17273_v24, %v12724_v21  ;;  %v17020_v5 = vld [vmem:[%s27190_s1 + $0x28c] sm:$0xf] }
 0x125   :  { %4517 = vmatpush.bf16.msrb.mxu1 %v12669_v13  ;;  %v11580_v13 = vld [vmem:[%s27190_s1 + $0x150] sm:$0xf]  ;;  %v13296_v24 = vld [vmem:[%s27190_s1 + $0xeb8] sm:$0xf] }
 0x126   :  { %4542 = vmatpush.bf16.msra.mxu2 %v13553_v35  ;;  %4505 = vmatmul.bf16.vlgmr.msra.gmra.mxu3 %v18653_v55  ;;  %v17312_v35 = vld [vmem:[%s27190_s1 + $0xba8] sm:$0xf0]  ;;  %v11581_v44 = vor.u32 %v16987_v36, %v11580_v13  ;;  %v17559_v13 = vld [vmem:[%s27190_s1 + $0x1360] sm:$0xf0] }
 0x127   :  { %4556 = vmatpush.bf16.msrb.mxu3 %v13917_v10  ;;  %v17208_v10 = vld [vmem:[%s27190_s1 + $0x868] sm:$0xf0]  ;;  %v12881_v41 = vor.u32 %v17312_v35, %v12880_v33  ;;  %v17455_v33 = vld [vmem:[%s27190_s1 + $0x1020] sm:$0xf0]  ;;  %v13868_v35 = vld [vmem:[%s27190_s1 + $0x1330] sm:$0xf] }
 0x128   :  { %4530 = vmatpush.bf16.msra.mxu0 %v13085_v51  ;;  %4518 = vmatmul.bf16.vlgmr.msrb.gmra.mxu1 %v18658_v57  ;;  %v12465_v38 = vor.u32 %v17208_v10, %v12464_v30  ;;  %v11944_v51 = vld [vmem:[%s27190_s1 + $0x428] sm:$0xf]  ;;  %v4311_v53 = vpop.f32.mrf.mxu0  ;;  %v17052_v30 = vld [vmem:[%s27190_s1 + $0x388] sm:$0xf0]  ;;  %v13452_v10 = vld [vmem:[%s27190_s1 + $0xff0] sm:$0xf]  ;;  %v13869_v49 = vor.u32 %v17559_v13, %v13868_v35 }
 0x129   :  { %4562 = vmatpush.bf16.msra.mxu1 %v11789_v17  ;;  %v12412_v17 = vld [vmem:[%s27190_s1 + $0x7d0] sm:$0xf]  ;;  %v11945_v3 = vor.u32 %v17078_v52, %v11944_v51  ;;  %v11790_v51 = vld [vmem:[%s27190_s1 + $0x324] sm:$0xf0] }
 0x12a   :  { %4543 = vmatpush.bf16.msra.mxu2 %v13501_v56  ;;  %v4272_v56 = vpop.f32.mrf.mxu3  ;;  %v13400_v52 = vld [vmem:[%s27190_s1 + $0xf88] sm:$0xf]  ;;  %v11793_v0 = vor.u32 %v17033_v50, %v11790_v51  ;;  %v16981_v50 = vld [vmem:[%s27190_s1 + $0x154] sm:$0xf] }
 0x12b   :  { %4575 = vmatpush.bf16.msra.mxu3 %v12205_v46  ;;  %4531 = vmatmul.bf16.vlgmr.msra.gmra.mxu0 %v18855_v34  ;;  %v12828_v46 = vld [vmem:[%s27190_s1 + $0xb10] sm:$0xf]  ;;  %v11582_v51 = vld [vmem:[%s27190_s1 + $0x184] sm:$0xf0] }
 0x12c   :  { %4588 = vmatpush.bf16.msrb.mxu0 %v12621_v58  ;;  %v12413_v58 = vor.u32 %v17195_v43, %v12412_v17  ;;  %v12829_v62 = vor.u32 %v17299_v47, %v12828_v46  ;;  %v4298_v15 = vpop.f32.mrf.mxu2  ;;  %v17572_v46 = vld [vmem:[%s27190_s1 + $0x13c8] sm:$0xf0]  ;;  %v13453_v47 = vor.u32 %v17455_v33, %v13452_v10  ;;  %v12102_v33 = vld [vmem:[%s27190_s1 + $0x594] sm:$0xf0] }
 0x12d   :  { %4563 = vmatpush.bf16.msra.mxu1 %v11737_v61  ;;  %4544 = vmatmul.bf16.vlgmr.msra.gmra.mxu2 %v18866_v39  ;;  %v4273_v61 = vadd.f32 %v4272_v56, %v4260_v31 }
 0x12e   :  { %4601 = vmatpush.bf16.msrb.mxu2 %v13037_v60  ;;  %v731_v60 = vperm.slane %v20404_v59, 3 }
 0x12f   :  { %4576 = vmatpush.bf16.msra.mxu3 %v12153_v1  ;;  %v4261_v1 = vpop.f32.mrf.mxu1 }
 0x130   :  { %4589 = vmatpush.bf16.msrb.mxu0 %v12569_v7  ;;  %v20425_v7 = vadd.f32 %v20298_v54, %v4273_v61  ;;  %v12308_v54 = vld [vmem:[%s27190_s1 + $0x700] sm:$0xf]  ;;  %v4313_v31 = vpop.f32.mrf.mxu0  ;;  %v17546_v61 = vld [vmem:[%s27190_s1 + $0x12f8] sm:$0xf0]  ;;  %v17137_v1 = vld [vmem:[%s27190_s1 + $0x634] sm:$0xf] }
 0x131   :  { %4564 = vmatpush.bf16.msra.mxu1 %v11685_v12  ;;  %v11892_v12 = vld [vmem:[%s27190_s1 + $0x3c0] sm:$0xf] }
 0x132   :  { %4602 = vmatpush.bf16.msrb.mxu2 %v12985_v11  ;;  %v16961_v11 = vld [vmem:[%s27190_s1 + $0xb0] sm:$0xf0]  ;;  %v11893_v23 = vor.u32 %v17065_v14, %v11892_v12  ;;  %v4274_v36 = vpop.f32.mrf.mxu3  ;;  %v13764_v14 = vld [vmem:[%s27190_s1 + $0x1260] sm:$0xf]  ;;  %vm5201_vm3 = vcmp.gt.f32.partialorder %v20425_v7, 0.0 }
 0x133   :  { %4577 = vmatpush.bf16.msra.mxu3 %v12101_v18  ;;  %v4299_v18 = vadd.f32 %v4298_v15, %v731_v60  ;;  %v11477_v22 = vor.u32 %v16961_v11, %v11476_v6  ;;  %v13816_v60 = vld [vmem:[%s27190_s1 + $0x12c8] sm:$0xf]  ;;  %v11738_v6 = vld [vmem:[%s27190_s1 + $0x2bc] sm:$0xf0]  ;;  %v17429_v12 = vld [vmem:[%s27190_s1 + $0xf50] sm:$0xf0] }
 0x134   :  { %4590 = vmatpush.bf16.msrb.mxu0 %v12517_v25  ;;  %v11424_v25 = vld [vmem:[%s27190_s1 + $0x18] sm:$0xf]  ;;  %v13817_v4 = vor.u32 %v17546_v61, %v13816_v60  ;;  %v13348_v11 = vld [vmem:[%s27190_s1 + $0xf20] sm:$0xf]  ;;  %v17533_v15 = vld [vmem:[%s27190_s1 + $0x1290] sm:$0xf0] }
 0x135   :  { %4565 = vmatpush.bf16.msra.mxu1 %v11633_v29  ;;  %v20454_v28 = vadd.f32 %v4311_v53, %v4299_v18  ;;  %v11840_v29 = vld [vmem:[%s27190_s1 + $0x358] sm:$0xf]  ;;  %v4300_v53 = vpop.f32.mrf.mxu2  ;;  %v11741_v18 = vor.u32 %v17020_v5, %v11738_v6  ;;  %v13765_v21 = vor.u32 %v17533_v15, %v13764_v14  ;;  %v17494_v60 = vld [vmem:[%s27190_s1 + $0x1158] sm:$0xf0]  ;;  %v16968_v6 = vld [vmem:[%s27190_s1 + $0xec] sm:$0xf] }
 0x136   :  { %4603 = vmatpush.bf16.msrb.mxu2 %v12933_v27  ;;  %13951 = vmatmul.msk.bf16.vlgmr.msrb.gmra.mxu3 %vm4012_vm0, %v18767_v48  ;;  %v16948_v27 = vld [vmem:[%s27190_s1 + $0x48] sm:$0xf0]  ;;  %v11841_v43 = vor.u32 %v17052_v30, %v11840_v29  ;;  %v17377_v15 = vld [vmem:[%s27190_s1 + $0xdb0] sm:$0xf0] }
 0x137   :  { %4578 = vmatpush.bf16.msra.mxu3 %v12049_v32  ;;  %v12309_v32 = vor.u32 %v17169_v20, %v12308_v54  ;;  %v11425_v17 = vor.u32 %v16948_v27, %v11424_v25  ;;  %v12154_v54 = vld [vmem:[%s27190_s1 + $0x5fc] sm:$0xf0]  ;;  %v13349_v20 = vor.u32 %v17429_v12, %v13348_v11  ;;  %v17416_v25 = vld [vmem:[%s27190_s1 + $0xee8] sm:$0xf0]  ;;  %v13712_v27 = vld [vmem:[%s27190_s1 + $0x11f8] sm:$0xf] }
 0x138   :  { %4591 = vmatpush.bf16.msrb.mxu0 %v12465_v38  ;;  %v17156_v38 = vld [vmem:[%s27190_s1 + $0x6c8] sm:$0xf0]  ;;  %v13297_v13 = vor.u32 %v17416_v25, %v13296_v24  ;;  %v11530_v11 = vld [vmem:[%s27190_s1 + $0x11c] sm:$0xf0] }
 0x139   :  { %4566 = vmatpush.bf16.msra.mxu1 %v11581_v44  ;;  %v17260_v44 = vld [vmem:[%s27190_s1 + $0xa08] sm:$0xf0]  ;;  %v12257_v56 = vor.u32 %v17156_v38, %v12256_v37  ;;  %v11634_v37 = vld [vmem:[%s27190_s1 + $0x1ec] sm:$0xf0]  ;;  %v13140_v12 = vld [vmem:[%s27190_s1 + $0xd80] sm:$0xf] }
 0x13a   :  { %4604 = vmatpush.bf16.msrb.mxu2 %v12881_v41  ;;  %v12672_v41 = vld [vmem:[%s27190_s1 + $0x9d8] sm:$0xf]  ;;  %v17520_v29 = vld [vmem:[%s27190_s1 + $0x1228] sm:$0xf0]  ;;  %v13244_v38 = vld [vmem:[%s27190_s1 + $0xe50] sm:$0xf]  ;;  %v13141_v25 = vor.u32 %v17377_v15, %v13140_v12 }
 0x13b   :  { %4579 = vmatpush.bf16.msra.mxu3 %v11997_v45  ;;  %v13920_v45 = vld [vmem:[%s27190_s1 + $0x1398] sm:$0xf]  ;;  %v13713_v36 = vor.u32 %v17520_v29, %v13712_v27  ;;  %v17436_v12 = vld [vmem:[%s27190_s1 + $0xf8c] sm:$0xf]  ;;  %v17215_v15 = vld [vmem:[%s27190_s1 + $0x8a4] sm:$0xf] }
 0x13c   :  { %4592 = vmatpush.bf16.msrb.mxu0 %v12413_v58  ;;  %v17442_v58 = vld [vmem:[%s27190_s1 + $0xfb8] sm:$0xf0]  ;;  %v13921_v63 = vor.u32 %v17572_v46, %v13920_v45  ;;  %v12050_v46 = vld [vmem:[%s27190_s1 + $0x52c] sm:$0xf0]  ;;  %v11478_v29 = vld [vmem:[%s27190_s1 + $0xb4] sm:$0xf0] }
 0x13d   :  { %4567 = vmatpush.bf16.msra.mxu1 %v11529_v2  ;;  %v12206_v2 = vld [vmem:[%s27190_s1 + $0x664] sm:$0xf0]  ;;  %v17098_v45 = vld [vmem:[%s27190_s1 + $0x4fc] sm:$0xf] }
 0x13e   :  { %4605 = vmatpush.bf16.msrb.mxu2 %v12829_v62  ;;  %v12673_v62 = vor.u32 %v17260_v44, %v12672_v41  ;;  %v13660_v41 = vld [vmem:[%s27190_s1 + $0x1190] sm:$0xf]  ;;  %v12053_v61 = vor.u32 %v17098_v45, %v12050_v46 }
 0x13f   :  { %4580 = vmatpush.bf16.msra.mxu3 %v11945_v3  ;;  %v13401_v3 = vor.u32 %v17442_v58, %v13400_v52  ;;  %v13192_v52 = vld [vmem:[%s27190_s1 + $0xde8] sm:$0xf] }
 0x140   :  { %4593 = vmatpush.bf16.msrb.mxu0 %v12361_v16  ;;  %v12209_v16 = vor.u32 %v17137_v1, %v12206_v2  ;;  %v13608_v58 = vld [vmem:[%s27190_s1 + $0x1128] sm:$0xf]  ;;  %v17085_v1 = vld [vmem:[%s27190_s1 + $0x494] sm:$0xf] }
 0x141   :  { %4568 = vmatpush.bf16.msra.mxu1 %v11477_v22  ;;  %v17007_v22 = vld [vmem:[%s27190_s1 + $0x224] sm:$0xf]  ;;  %v4324_v10 = vpop.f32.mrf.mxu1  ;;  %v11998_v2 = vld [vmem:[%s27190_s1 + $0x4c4] sm:$0xf0]  ;;  %v13609_v5 = vor.u32 %v17494_v60, %v13608_v58 }
 0x142   :  { %4606 = vmatpush.bf16.msrb.mxu2 %v12777_v19  ;;  %v17124_v19 = vld [vmem:[%s27190_s1 + $0x5cc] sm:$0xf]  ;;  %v4325_v35 = vadd.f32 %v4324_v10, %v20454_v28  ;;  %v17403_v28 = vld [vmem:[%s27190_s1 + $0xe80] sm:$0xf0] }
 0x143   :  { %4581 = vmatpush.bf16.msra.mxu3 %v11893_v23  ;;  %v11686_v23 = vld [vmem:[%s27190_s1 + $0x254] sm:$0xf0]  ;;  %v12157_v30 = vor.u32 %v17124_v19, %v12154_v54  ;;  %v12001_v54 = vor.u32 %v17085_v1, %v11998_v2  ;;  %v17364_v10 = vld [vmem:[%s27190_s1 + $0xd48] sm:$0xf0]  ;;  %v17046_v1 = vld [vmem:[%s27190_s1 + $0x35c] sm:$0xf] }
 0x144   :  { %4594 = vmatpush.bf16.msrb.mxu0 %v12309_v32  ;;  %v11689_v31 = vor.u32 %v17007_v22, %v11686_v23  ;;  %v17111_v32 = vld [vmem:[%s27190_s1 + $0x564] sm:$0xf]  ;;  %v11946_v22 = vld [vmem:[%s27190_s1 + $0x45c] sm:$0xf0]  ;;  %v11842_v2 = vld [vmem:[%s27190_s1 + $0x38c] sm:$0xf0] }
 0x145   :  { %4569 = vmatpush.bf16.msra.mxu1 %v11425_v17  ;;  %v17507_v17 = vld [vmem:[%s27190_s1 + $0x11c0] sm:$0xf0] }
 0x146   :  { %4607 = vmatpush.bf16.msrb.mxu2 %v12725_v26  ;;  %v16994_v26 = vld [vmem:[%s27190_s1 + $0x1bc] sm:$0xf]  ;;  %v16955_v23 = vld [vmem:[%s27190_s1 + $0x84] sm:$0xf] }
 0x147   :  { %4582 = vmatpush.bf16.msra.mxu3 %v11841_v43  ;;  %v12105_v43 = vor.u32 %v17111_v32, %v12102_v33  ;;  %v11637_v44 = vor.u32 %v16994_v26, %v11634_v37  ;;  %v17468_v32 = vld [vmem:[%s27190_s1 + $0x1088] sm:$0xf0]  ;;  %v17241_v33 = vld [vmem:[%s27190_s1 + $0x974] sm:$0xf]  ;;  %v13038_v37 = vld [vmem:[%s27190_s1 + $0xce4] sm:$0xf0] }
 0x148   :  { %4595 = vmatpush.bf16.msrb.mxu0 %v12257_v56  ;;  %4570 = vmatmul.bf16.vlgmr.msra.gmra.mxu1 %v18684_v8  ;;  %v4363_v53 = vpop.f32.mrf.mxu0  ;;  %v17390_v56 = vld [vmem:[%s27190_s1 + $0xe18] sm:$0xf0]  ;;  %v17345_v26 = vld [vmem:[%s27190_s1 + $0xcb4] sm:$0xf] }
 0x149   :  { %4614 = vmatpush.bf16.msrb.mxu1 %v13453_v47  ;;  %v13245_v47 = vor.u32 %v17403_v28, %v13244_v38  ;;  %v11481_v28 = vor.u32 %v16955_v23, %v11478_v29  ;;  %v17540_v23 = vld [vmem:[%s27190_s1 + $0x12cc] sm:$0xf]  ;;  %v17423_v29 = vld [vmem:[%s27190_s1 + $0xf24] sm:$0xf] }
 0x14a   :  { %4608 = vmatpush.bf16.msrb.mxu2 %v12673_v62  ;;  %4583 = vmatmul.bf16.vlgmr.msra.gmra.mxu3 %v18686_v9  ;;  %v4326_v62 = vpop.f32.mrf.mxu1 }
 0x14b   :  { %4627 = vmatpush.bf16.msrb.mxu3 %v13869_v49  ;;  %4596 = vmatmul.bf16.vlgmr.msrb.gmra.mxu0 %v18653_v55  ;;  %v13661_v49 = vor.u32 %v17507_v17, %v13660_v41  ;;  %v17059_v41 = vld [vmem:[%s27190_s1 + $0x3c4] sm:$0xf]  ;;  %v11894_v17 = vld [vmem:[%s27190_s1 + $0x3f4] sm:$0xf0]  ;;  %v17332_v62 = vld [vmem:[%s27190_s1 + $0xc4c] sm:$0xf] }
 0x14c   :  { %4647 = vmatpush.bf16.msra.mxu0 %v13921_v63  ;;  %v4337_v63 = vpop.f32.mrf.mxu3  ;;  %v4350_v14 = vpop.f32.mrf.mxu2  ;;  %v11897_v60 = vor.u32 %v17059_v41, %v11894_v17  ;;  %v13298_v41 = vld [vmem:[%s27190_s1 + $0xeec] sm:$0xf0]  ;;  %v17189_v17 = vld [vmem:[%s27190_s1 + $0x7d4] sm:$0xf] }
 0x14d   :  { %4615 = vmatpush.bf16.msrb.mxu1 %v13401_v3  ;;  %4609 = vmatmul.bf16.vlgmr.msrb.gmra.mxu2 %v18658_v57  ;;  %v4338_v3 = vadd.f32 %v4337_v63, %v4325_v35  ;;  %v12986_v63 = vld [vmem:[%s27190_s1 + $0xc7c] sm:$0xf0] }
 0x14e   :  { %4653 = vmatpush.bf16.msra.mxu2 %v11793_v0  ;;  %v11585_v0 = vor.u32 %v16981_v50, %v11582_v51  ;;  %v13041_v51 = vor.u32 %v17345_v26, %v13038_v37  ;;  %v13766_v26 = vld [vmem:[%s27190_s1 + $0x1294] sm:$0xf0] }
 0x14f   :  { %4628 = vmatpush.bf16.msrb.mxu3 %v13817_v4  ;;  %v13193_v4 = vor.u32 %v17390_v56, %v13192_v52  ;;  %v4351_v19 = vadd.f32 %v4350_v14, %v4338_v3  ;;  %v17449_v52 = vld [vmem:[%s27190_s1 + $0xff4] sm:$0xf]  ;;  %v17228_v56 = vld [vmem:[%s27190_s1 + $0x90c] sm:$0xf]  ;;  %v13402_v14 = vld [vmem:[%s27190_s1 + $0xfbc] sm:$0xf0] }
 0x150   :  { %4666 = vmatpush.bf16.msrb.mxu0 %v12209_v16  ;;  %v13556_v16 = vld [vmem:[%s27190_s1 + $0x10c0] sm:$0xf]  ;;  %v4365_v35 = vpop.f32.mrf.mxu0 }
 0x151   :  { %4616 = vmatpush.bf16.msrb.mxu1 %v13349_v20  ;;  %v11533_v20 = vor.u32 %v16968_v6, %v11530_v11  ;;  %v4364_v24 = vadd.f32 %v4363_v53, %v4351_v19  ;;  %v13454_v53 = vld [vmem:[%s27190_s1 + $0x1024] sm:$0xf0]  ;;  %v12989_v11 = vor.u32 %v17332_v62, %v12986_v63  ;;  %v17319_v19 = vld [vmem:[%s27190_s1 + $0xbe4] sm:$0xf]  ;;  %v12362_v62 = vld [vmem:[%s27190_s1 + $0x79c] sm:$0xf0] }
 0x152   :  { %4654 = vmatpush.bf16.msra.mxu2 %v11741_v18  ;;  %v17481_v18 = vld [vmem:[%s27190_s1 + $0x10f0] sm:$0xf0]  ;;  %v4376_v38 = vpop.f32.mrf.mxu1  ;;  %v13457_v3 = vor.u32 %v17449_v52, %v13454_v53  ;;  %v17280_v63 = vld [vmem:[%s27190_s1 + $0xaac] sm:$0xf] }
 0x153   :  { %4629 = vmatpush.bf16.msrb.mxu3 %v13765_v21  ;;  %v17072_v21 = vld [vmem:[%s27190_s1 + $0x42c] sm:$0xf]  ;;  %v13557_v27 = vor.u32 %v17481_v18, %v13556_v16  ;;  %v11845_v16 = vor.u32 %v17046_v1, %v11842_v2  ;;  %v12518_v18 = vld [vmem:[%s27190_s1 + $0x8d4] sm:$0xf0]  ;;  %v17397_v52 = vld [vmem:[%s27190_s1 + $0xe54] sm:$0xf] }
 0x154   :  { %4667 = vmatpush.bf16.msrb.mxu0 %v12157_v30  ;;  %v13088_v30 = vld [vmem:[%s27190_s1 + $0xd18] sm:$0xf]  ;;  %v4352_v58 = vpop.f32.mrf.mxu2 }
 0x155   :  { %4617 = vmatpush.bf16.msrb.mxu1 %v13297_v13  ;;  %v11949_v13 = vor.u32 %v17072_v21, %v11946_v22  ;;  %v13089_v45 = vor.u32 %v17364_v10, %v13088_v30  ;;  %v13405_v22 = vor.u32 %v17436_v12, %v13402_v14  ;;  %v13350_v30 = vld [vmem:[%s27190_s1 + $0xf54] sm:$0xf0]  ;;  %v17202_v10 = vld [vmem:[%s27190_s1 + $0x83c] sm:$0xf]  ;;  %v13246_v58 = vld [vmem:[%s27190_s1 + $0xe84] sm:$0xf0] }
 0x156   :  { %4655 = vmatpush.bf16.msra.mxu2 %v11689_v31  ;;  %v13504_v31 = vld [vmem:[%s27190_s1 + $0x1058] sm:$0xf] }
 0x157   :  { %4630 = vmatpush.bf16.msrb.mxu3 %v13713_v36  ;;  %v12622_v36 = vld [vmem:[%s27190_s1 + $0x9a4] sm:$0xf0]  ;;  %v13505_v46 = vor.u32 %v17468_v32, %v13504_v31  ;;  %v12466_v31 = vld [vmem:[%s27190_s1 + $0x86c] sm:$0xf0]  ;;  %v17306_v32 = vld [vmem:[%s27190_s1 + $0xb7c] sm:$0xf] }
 0x158   :  { %4668 = vmatpush.bf16.msrb.mxu0 %v12105_v43  ;;  %v4339_v43 = vpop.f32.mrf.mxu3  ;;  %v12625_v50 = vor.u32 %v17241_v33, %v12622_v36  ;;  %v12882_v33 = vld [vmem:[%s27190_s1 + $0xbac] sm:$0xf0]  ;;  %v17527_v36 = vld [vmem:[%s27190_s1 + $0x1264] sm:$0xf]  ;;  %v12469_v37 = vor.u32 %v17202_v10, %v12466_v31 }
 0x159   :  { %4618 = vmatpush.bf16.msrb.mxu1 %v13245_v47  ;;  %v16942_v47 = vld [vmem:[%s27190_s1 + $0x1c] sm:$0xf]  ;;  %v12414_v43 = vld [vmem:[%s27190_s1 + $0x804] sm:$0xf0] }
 0x15a   :  { %4656 = vmatpush.bf16.msra.mxu2 %v11637_v44  ;;  %v20679_v44 = vadd.f32 %v4376_v38, %v4364_v24  ;;  %v4378_v21 = vpop.f32.mrf.mxu1  ;;  %v13818_v24 = vld [vmem:[%s27190_s1 + $0x12fc] sm:$0xf0]  ;;  %v12885_v38 = vor.u32 %v17306_v32, %v12882_v33  ;;  %v12417_v53 = vor.u32 %v17189_v17, %v12414_v43  ;;  %v13142_v32 = vld [vmem:[%s27190_s1 + $0xdb4] sm:$0xf0]  ;;  %v17150_v33 = vld [vmem:[%s27190_s1 + $0x69c] sm:$0xf] }
 0x15b   :  { %4631 = vmatpush.bf16.msrb.mxu3 %v13661_v49  ;;  %13952 = vmatmul.msk.bf16.vlgmr.msra.gmra.mxu0 %vm4012_vm0, %v18767_v48  ;;  %v11426_v49 = vld [vmem:[%s27190_s1 + $0x4c] sm:$0xf0]  ;;  %v13821_v35 = vor.u32 %v17540_v23, %v13818_v24  ;;  %v17267_v21 = vld [vmem:[%s27190_s1 + $0xa44] sm:$0xf]  ;;  %v17040_v17 = vld [vmem:[%s27190_s1 + $0x328] sm:$0xf0] }
 0x15c   :  { %4669 = vmatpush.bf16.msrb.mxu0 %v12053_v61  ;;  %v12570_v61 = vld [vmem:[%s27190_s1 + $0x93c] sm:$0xf0]  ;;  %v17566_v43 = vld [vmem:[%s27190_s1 + $0x139c] sm:$0xf]  ;;  %vm5202_vm4 = vcmp.gt.f32.partialorder %v20679_v44, 0.0 }
 0x15d   :  { %4619 = vmatpush.bf16.msrb.mxu1 %v13193_v4  ;;  %v17553_v4 = vld [vmem:[%s27190_s1 + $0x1334] sm:$0xf]  ;;  %v12573_v6 = vor.u32 %v17228_v56, %v12570_v61  ;;  %v732_v61 = vperm.slane %v20404_v59, 4 }
 0x15e   :  { %4657 = vmatpush.bf16.msra.mxu2 %v11585_v0  ;;  %v11429_v0 = vor.u32 %v16942_v47, %v11426_v49  ;;  %v13769_v47 = vor.u32 %v17527_v36, %v13766_v26  ;;  %v17254_v36 = vld [vmem:[%s27190_s1 + $0x9dc] sm:$0xf]  ;;  %v12674_v26 = vld [vmem:[%s27190_s1 + $0xa0c] sm:$0xf0] }
 0x15f   :  { %4632 = vmatpush.bf16.msrb.mxu3 %v13609_v5  ;;  %v13870_v5 = vld [vmem:[%s27190_s1 + $0x1364] sm:$0xf0] }
 0x160   :  { %4670 = vmatpush.bf16.msrb.mxu0 %v12001_v54  ;;  %v12934_v54 = vld [vmem:[%s27190_s1 + $0xc14] sm:$0xf0] }
 0x161   :  { %4620 = vmatpush.bf16.msrb.mxu1 %v13141_v25  ;;  %v12521_v25 = vor.u32 %v17215_v15, %v12518_v18  ;;  %v17384_v15 = vld [vmem:[%s27190_s1 + $0xdec] sm:$0xf]  ;;  %v17163_v18 = vld [vmem:[%s27190_s1 + $0x704] sm:$0xf] }
 0x162   :  { %4658 = vmatpush.bf16.msra.mxu2 %v11533_v20  ;;  %v13873_v20 = vor.u32 %v17553_v4, %v13870_v5  ;;  %v13249_v4 = vor.u32 %v17397_v52, %v13246_v58  ;;  %v17501_v5 = vld [vmem:[%s27190_s1 + $0x1194] sm:$0xf]  ;;  %v13090_v58 = vld [vmem:[%s27190_s1 + $0xd4c] sm:$0xf0] }
 0x163   :  { %4633 = vmatpush.bf16.msrb.mxu3 %v13557_v27  ;;  %v12937_v27 = vor.u32 %v17319_v19, %v12934_v54 }
 0x164   :  { %4671 = vmatpush.bf16.msrb.mxu0 %v11949_v13  ;;  %v13353_v13 = vor.u32 %v17423_v29, %v13350_v30  ;;  %v13610_v29 = vld [vmem:[%s27190_s1 + $0x115c] sm:$0xf0]  ;;  %v17371_v30 = vld [vmem:[%s27190_s1 + $0xd84] sm:$0xf] }
 0x165   :  { %4621 = vmatpush.bf16.msrb.mxu1 %v13089_v45  ;;  %v17293_v45 = vld [vmem:[%s27190_s1 + $0xb14] sm:$0xf]  ;;  %v4402_v1 = vpop.f32.mrf.mxu1 }
 0x166   :  { %4659 = vmatpush.bf16.msra.mxu2 %v11481_v28  ;;  %v17410_v28 = vld [vmem:[%s27190_s1 + $0xebc] sm:$0xf] }
 0x167   :  { %4634 = vmatpush.bf16.msrb.mxu3 %v13505_v46  ;;  %v12830_v46 = vld [vmem:[%s27190_s1 + $0xb44] sm:$0xf0]  ;;  %v13301_v49 = vor.u32 %v17410_v28, %v13298_v41 }
 0x168   :  { %4672 = vmatpush.bf16.msrb.mxu0 %v11897_v60  ;;  %4622 = vmatmul.bf16.vlgmr.msrb.gmra.mxu1 %v18855_v34  ;;  %v12833_v56 = vor.u32 %v17293_v45, %v12830_v46  ;;  %v17176_v60 = vld [vmem:[%s27190_s1 + $0x76c] sm:$0xf]  ;;  %v4428_v2 = vpop.f32.mrf.mxu0  ;;  %v13922_v45 = vld [vmem:[%s27190_s1 + $0x13cc] sm:$0xf0] }
 0x169   :  { %4679 = vmatpush.bf16.msra.mxu1 %v12625_v50  ;;  %v17514_v50 = vld [vmem:[%s27190_s1 + $0x11fc] sm:$0xf]  ;;  %v12365_v12 = vor.u32 %v17176_v60, %v12362_v62  ;;  %v12212_v60 = vld [vmem:[%s27190_s1 + $0x638] sm:$0xf]  ;;  %v13925_v62 = vor.u32 %v17566_v43, %v13922_v45  ;;  %v12940_v43 = vld [vmem:[%s27190_s1 + $0xbe8] sm:$0xf] }
 0x16a   :  { %4635 = vmatmul.bf16.vlgmr.msrb.gmra.mxu3 %v18866_v39  ;;  %4660 = vmatpush.bf16.msra.mxu2 %v11429_v0  ;;  %v12778_v0 = vld [vmem:[%s27190_s1 + $0xadc] sm:$0xf0]  ;;  %v17326_v45 = vld [vmem:[%s27190_s1 + $0xc18] sm:$0xf0] }
 0x16b   :  { %4692 = vmatpush.bf16.msra.mxu3 %v13041_v51  ;;  %v13714_v51 = vld [vmem:[%s27190_s1 + $0x122c] sm:$0xf0]  ;;  %v12781_v14 = vor.u32 %v17280_v63, %v12778_v0  ;;  %v17144_v0 = vld [vmem:[%s27190_s1 + $0x668] sm:$0xf0] }
 0x16c   :  { %4673 = vmatpush.bf16.msrb.mxu0 %v11845_v16  ;;  %v13194_v16 = vld [vmem:[%s27190_s1 + $0xe1c] sm:$0xf0]  ;;  %v4415_v54 = vpop.f32.mrf.mxu2 }
 0x16d   :  { %4680 = vmatpush.bf16.msra.mxu1 %v12573_v6  ;;  %4661 = vmatmul.bf16.vlgmr.msra.gmra.mxu2 %v18684_v8  ;;  %v13662_v6 = vld [vmem:[%s27190_s1 + $0x11c4] sm:$0xf0] }
 0x16e   :  { %4705 = vmatpush.bf16.msrb.mxu2 %v13457_v3  ;;  %v13717_v3 = vor.u32 %v17514_v50, %v13714_v51  ;;  %v13665_v23 = vor.u32 %v17501_v5, %v13662_v6  ;;  %v13558_v50 = vld [vmem:[%s27190_s1 + $0x10f4] sm:$0xf0]  ;;  %v17027_v6 = vld [vmem:[%s27190_s1 + $0x2c0] sm:$0xf0] }
 0x16f   :  { %4693 = vmatpush.bf16.msra.mxu3 %v12989_v11  ;;  %4674 = vmatmul.bf16.vlgmr.msrb.gmra.mxu0 %v18686_v9  ;;  %v4389_v11 = vpop.f32.mrf.mxu3 }
 0x170   :  { %4718 = vmatpush.bf16.msra.mxu0 %v13873_v20  ;;  %v4390_v19 = vadd.f32 %v4389_v11, %v732_v61  ;;  %v12310_v20 = vld [vmem:[%s27190_s1 + $0x734] sm:$0xf0]  ;;  %v4430_v28 = vpop.f32.mrf.mxu0  ;;  %v17462_v11 = vld [vmem:[%s27190_s1 + $0x105c] sm:$0xf] }
 0x171   :  { %4681 = vmatpush.bf16.msra.mxu1 %v12521_v25  ;;  %v13197_v25 = vor.u32 %v17384_v15, %v13194_v16  ;;  %v12313_v10 = vor.u32 %v17163_v18, %v12310_v20  ;;  %v13044_v16 = vld [vmem:[%s27190_s1 + $0xcb8] sm:$0xf]  ;;  %v17352_v18 = vld [vmem:[%s27190_s1 + $0xce8] sm:$0xf0]  ;;  %v12576_v20 = vld [vmem:[%s27190_s1 + $0x910] sm:$0xf] }
 0x172   :  { %4706 = vmatpush.bf16.msrb.mxu2 %v13405_v22  ;;  %v12726_v22 = vld [vmem:[%s27190_s1 + $0xa74] sm:$0xf0]  ;;  %v4403_v24 = vadd.f32 %v4402_v1, %v4390_v19  ;;  %v12160_v19 = vld [vmem:[%s27190_s1 + $0x5d0] sm:$0xf]  ;;  %v17001_v28 = vld [vmem:[%s27190_s1 + $0x1f0] sm:$0xf0] }
 0x173   :  { %4694 = vmatpush.bf16.msra.mxu3 %v12937_v27  ;;  %v17488_v27 = vld [vmem:[%s27190_s1 + $0x112c] sm:$0xf]  ;;  %v12729_v31 = vor.u32 %v17267_v21, %v12726_v22  ;;  %v12628_v1 = vld [vmem:[%s27190_s1 + $0x978] sm:$0xf]  ;;  %v17235_v21 = vld [vmem:[%s27190_s1 + $0x940] sm:$0xf0] }
 0x174   :  { %4719 = vmatpush.bf16.msra.mxu0 %v13821_v35  ;;  %v12258_v35 = vld [vmem:[%s27190_s1 + $0x6cc] sm:$0xf0]  ;;  %v13613_v41 = vor.u32 %v17488_v27, %v13610_v29  ;;  %v4417_v63 = vpop.f32.mrf.mxu2  ;;  %v17014_v27 = vld [vmem:[%s27190_s1 + $0x258] sm:$0xf0] }
 0x175   :  { %4682 = vmatpush.bf16.msra.mxu1 %v12469_v37  ;;  %v11796_v37 = vld [vmem:[%s27190_s1 + $0x2f8] sm:$0xf]  ;;  %v12261_v52 = vor.u32 %v17150_v33, %v12258_v35  ;;  %v17118_v33 = vld [vmem:[%s27190_s1 + $0x598] sm:$0xf0]  ;;  %v12524_v35 = vld [vmem:[%s27190_s1 + $0x8a8] sm:$0xf] }
 0x176   :  { %4707 = vmatpush.bf16.msrb.mxu2 %v13353_v13  ;;  %v4416_v13 = vadd.f32 %v4415_v54, %v4403_v24  ;;  %v11797_v61 = vor.u32 %v17040_v17, %v11796_v37  ;;  %v17131_v54 = vld [vmem:[%s27190_s1 + $0x600] sm:$0xf0]  ;;  %v13045_v24 = vor.u32 %v17352_v18, %v13044_v16  ;;  %v17313_v63 = vld [vmem:[%s27190_s1 + $0xbb0] sm:$0xf0]  ;;  %v11536_v16 = vld [vmem:[%s27190_s1 + $0xf0] sm:$0xf] }
 0x177   :  { %4695 = vmatpush.bf16.msra.mxu3 %v12885_v38  ;;  %v4404_v38 = vpop.f32.mrf.mxu1  ;;  %v4391_v51 = vpop.f32.mrf.mxu3  ;;  %v12161_v29 = vor.u32 %v17131_v54, %v12160_v19  ;;  %v16975_v18 = vld [vmem:[%s27190_s1 + $0x120] sm:$0xf0] }
 0x178   :  { %4720 = vmatpush.bf16.msra.mxu0 %v13769_v47  ;;  %v20872_v46 = vadd.f32 %v4428_v2, %v4416_v13  ;;  %v13145_v47 = vor.u32 %v17371_v30, %v13142_v32  ;;  %v17248_v2 = vld [vmem:[%s27190_s1 + $0x9a8] sm:$0xf0]  ;;  %v12577_v30 = vor.u32 %v17235_v21, %v12576_v20  ;;  %v12108_v32 = vld [vmem:[%s27190_s1 + $0x568] sm:$0xf]  ;;  %v17222_v13 = vld [vmem:[%s27190_s1 + $0x8d8] sm:$0xf0] }
 0x179   :  { %4683 = vmatpush.bf16.msra.mxu1 %v12417_v53  ;;  %v12677_v53 = vor.u32 %v17254_v36, %v12674_v26  ;;  %v12629_v15 = vor.u32 %v17248_v2, %v12628_v1  ;;  %v11640_v38 = vld [vmem:[%s27190_s1 + $0x1c0] sm:$0xf]  ;;  %v12525_v17 = vor.u32 %v17222_v13, %v12524_v35  ;;  %v17209_v51 = vld [vmem:[%s27190_s1 + $0x870] sm:$0xf0]  ;;  %v17092_v1 = vld [vmem:[%s27190_s1 + $0x4c8] sm:$0xf0] }
 0x17a   :  { %4708 = vmatpush.bf16.msrb.mxu2 %v13301_v49  ;;  %v17475_v49 = vld [vmem:[%s27190_s1 + $0x10c4] sm:$0xf]  ;;  %v12420_v2 = vld [vmem:[%s27190_s1 + $0x7d8] sm:$0xf]  ;;  %v17300_v21 = vld [vmem:[%s27190_s1 + $0xb48] sm:$0xf0] }
 0x17b   :  { %4696 = vmatpush.bf16.msra.mxu3 %v12833_v56  ;;  %v17358_v56 = vld [vmem:[%s27190_s1 + $0xd1c] sm:$0xf]  ;;  %v12784_v13 = vld [vmem:[%s27190_s1 + $0xab0] sm:$0xf] }
 0x17c   :  { %4721 = vmatpush.bf16.msra.mxu0 %v13717_v3  ;;  %v13561_v3 = vor.u32 %v17475_v49, %v13558_v50  ;;  %v13093_v5 = vor.u32 %v17358_v56, %v13090_v58  ;;  %v20954_v36 = vpop.f32.mrf.mxu2  ;;  %v17105_v49 = vld [vmem:[%s27190_s1 + $0x530] sm:$0xf0]  ;;  %v12472_v50 = vld [vmem:[%s27190_s1 + $0x840] sm:$0xf]  ;;  %v11588_v56 = vld [vmem:[%s27190_s1 + $0x158] sm:$0xf] }
 0x17d   :  { %4684 = vmatpush.bf16.msra.mxu1 %v12365_v12  ;;  %v13506_v12 = vld [vmem:[%s27190_s1 + $0x108c] sm:$0xf0]  ;;  %v16988_v58 = vld [vmem:[%s27190_s1 + $0x188] sm:$0xf0] }
 0x17e   :  { %4709 = vmatpush.bf16.msrb.mxu2 %v13249_v4  ;;  %v11744_v4 = vld [vmem:[%s27190_s1 + $0x290] sm:$0xf] }
 0x17f   :  { %4697 = vmatpush.bf16.msra.mxu3 %v12781_v14  ;;  %v12213_v14 = vor.u32 %v17144_v0, %v12212_v60  ;;  %v11745_v22 = vor.u32 %v17027_v6, %v11744_v4  ;;  %v12004_v0 = vld [vmem:[%s27190_s1 + $0x498] sm:$0xf]  ;;  %v11589_v6 = vor.u32 %v16988_v58, %v11588_v56  ;;  %v17456_v56 = vld [vmem:[%s27190_s1 + $0x1028] sm:$0xf0]  ;;  %v12732_v58 = vld [vmem:[%s27190_s1 + $0xa48] sm:$0xf] }
 0x180   :  { %4722 = vmatpush.bf16.msra.mxu0 %v13665_v23  ;;  %v13509_v23 = vor.u32 %v17462_v11, %v13506_v12  ;;  %v733_v11 = vperm.slane %v20404_v59, 5  ;;  %v12005_v54 = vor.u32 %v17092_v1, %v12004_v0  ;;  %v12836_v59 = vld [vmem:[%s27190_s1 + $0xb18] sm:$0xf]  ;;  %v17053_v0 = vld [vmem:[%s27190_s1 + $0x390] sm:$0xf0] }
 0x181   :  { %4685 = vmatpush.bf16.msra.mxu1 %v12313_v10  ;;  %v12992_v10 = vld [vmem:[%s27190_s1 + $0xc50] sm:$0xf]  ;;  %v12264_v1 = vld [vmem:[%s27190_s1 + $0x6a0] sm:$0xf] }
 0x182   :  { %4710 = vmatpush.bf16.msrb.mxu2 %v13197_v25  ;;  %v11692_v25 = vld [vmem:[%s27190_s1 + $0x228] sm:$0xf] }
 0x183   :  { %4698 = vmatpush.bf16.msra.mxu3 %v12729_v31  ;;  %v17339_v31 = vld [vmem:[%s27190_s1 + $0xc80] sm:$0xf0]  ;;  %v11693_v26 = vor.u32 %v17014_v27, %v11692_v25  ;;  %v11537_v27 = vor.u32 %v16975_v18, %v11536_v16 }
 0x184   :  { %4723 = vmatpush.bf16.msra.mxu0 %v13613_v41  ;;  %v12993_v37 = vor.u32 %v17339_v31, %v12992_v10  ;;  %v12109_v41 = vor.u32 %v17118_v33, %v12108_v32  ;;  %v4469_v4 = vpop.f32.mrf.mxu2  ;;  %v11484_v10 = vld [vmem:[%s27190_s1 + $0x88] sm:$0xf]  ;;  %v16962_v31 = vld [vmem:[%s27190_s1 + $0xb8] sm:$0xf0] }
 0x185   :  { %4686 = vmatpush.bf16.msra.mxu1 %v12261_v52  ;;  %v11641_v52 = vor.u32 %v17001_v28, %v11640_v38  ;;  %v12316_v38 = vld [vmem:[%s27190_s1 + $0x708] sm:$0xf]  ;;  %v17170_v28 = vld [vmem:[%s27190_s1 + $0x738] sm:$0xf0] }
 0x186   :  { %4711 = vmatpush.bf16.msrb.mxu2 %v13145_v47  ;;  %v12056_v47 = vld [vmem:[%s27190_s1 + $0x500] sm:$0xf] }
 0x187   :  { %4699 = vmatpush.bf16.msra.mxu3 %v12677_v53  ;;  %v12941_v53 = vor.u32 %v17326_v45, %v12940_v43  ;;  %v12057_v60 = vor.u32 %v17105_v49, %v12056_v47  ;;  %v11432_v43 = vld [vmem:[%s27190_s1 + $0x20] sm:$0xf]  ;;  %v16949_v45 = vld [vmem:[%s27190_s1 + $0x50] sm:$0xf0] }
 0x188   :  { %4724 = vmatpush.bf16.msra.mxu0 %v13561_v3  ;;  %4687 = vmatmul.bf16.vlgmr.msra.gmra.mxu1 %v18653_v55  ;;  %v17196_v3 = vld [vmem:[%s27190_s1 + $0x808] sm:$0xf0]  ;;  %v4480_v12 = vpop.f32.mrf.mxu0  ;;  %v11433_v4 = vor.u32 %v16949_v45, %v11432_v43 }
 0x189   :  { %4738 = vmatpush.bf16.msrb.mxu1 %v13925_v62  ;;  %v12888_v62 = vld [vmem:[%s27190_s1 + $0xb80] sm:$0xf]  ;;  %v12421_v20 = vor.u32 %v17196_v3, %v12420_v2  ;;  %v17157_v2 = vld [vmem:[%s27190_s1 + $0x6d0] sm:$0xf0]  ;;  %v13876_v3 = vld [vmem:[%s27190_s1 + $0x1338] sm:$0xf] }
 0x18a   :  { %4712 = vmatpush.bf16.msrb.mxu2 %v13093_v5  ;;  %4700 = vmatmul.bf16.vlgmr.msra.gmra.mxu3 %v18658_v57  ;;  %v4454_v5 = vpop.f32.mrf.mxu1  ;;  %v12265_v18 = vor.u32 %v17157_v2, %v12264_v1  ;;  %v13252_v1 = vld [vmem:[%s27190_s1 + $0xe58] sm:$0xf]  ;;  %v17404_v2 = vld [vmem:[%s27190_s1 + $0xe88] sm:$0xf0] }
 0x18b   :  { %4744 = vmatpush.bf16.msrb.mxu3 %v11797_v61  ;;  %v12473_v61 = vor.u32 %v17209_v51, %v12472_v50 }
 0x18c   :  { %4725 = vmatpush.bf16.msra.mxu0 %v13509_v23  ;;  %v12368_v23 = vld [vmem:[%s27190_s1 + $0x770] sm:$0xf] }
 0x18d   :  { %4757 = vmatpush.bf16.msra.mxu1 %v12213_v14  ;;  %4713 = vmatmul.bf16.vlgmr.msrb.gmra.mxu2 %v18855_v34  ;;  %v4441_v14 = vpop.f32.mrf.mxu3 }
 0x18e   :  { %4770 = vmatpush.bf16.msra.mxu2 %v12629_v15  ;;  %v12889_v15 = vor.u32 %v17313_v63, %v12888_v62  ;;  %v4442_v19 = vadd.f32 %v4441_v14, %v20872_v46  ;;  %v17079_v46 = vld [vmem:[%s27190_s1 + $0x460] sm:$0xf0]  ;;  %v17274_v62 = vld [vmem:[%s27190_s1 + $0xa78] sm:$0xf0]  ;;  %v11848_v63 = vld [vmem:[%s27190_s1 + $0x360] sm:$0xf] }
 0x18f   :  { %4745 = vmatpush.bf16.msrb.mxu3 %v11745_v22  ;;  %4726 = vmatmul.bf16.vlgmr.msra.gmra.mxu0 %v18866_v39  ;;  %v11952_v22 = vld [vmem:[%s27190_s1 + $0x430] sm:$0xf]  ;;  %v12733_v14 = vor.u32 %v17274_v62, %v12732_v58  ;;  %v11849_v16 = vor.u32 %v17053_v0, %v11848_v63  ;;  %v17112_v58 = vld [vmem:[%s27190_s1 + $0x56c] sm:$0xf]  ;;  %v17521_v62 = vld [vmem:[%s27190_s1 + $0x1230] sm:$0xf0] }
 0x190   :  { %4783 = vmatpush.bf16.msrb.mxu0 %v13045_v24  ;;  %v17183_v24 = vld [vmem:[%s27190_s1 + $0x7a0] sm:$0xf0]  ;;  %v4455_v25 = vadd.f32 %v4454_v5, %v4442_v19  ;;  %v11953_v33 = vor.u32 %v17079_v46, %v11952_v22  ;;  %v4482_v50 = vpop.f32.mrf.mxu0  ;;  %v17560_v5 = vld [vmem:[%s27190_s1 + $0x1368] sm:$0xf0]  ;;  %v17034_v22 = vld [vmem:[%s27190_s1 + $0x2fc] sm:$0xf] }
 0x191   :  { %4758 = vmatpush.bf16.msra.mxu1 %v12161_v29  ;;  %v4481_v29 = vadd.f32 %v4480_v12, %v733_v11  ;;  %v12369_v35 = vor.u32 %v17183_v24, %v12368_v23  ;;  %v17573_v11 = vld [vmem:[%s27190_s1 + $0x13d0] sm:$0xf0]  ;;  %v17443_v19 = vld [vmem:[%s27190_s1 + $0xfc0] sm:$0xf0]  ;;  %v11798_v46 = vld [vmem:[%s27190_s1 + $0x32c] sm:$0xf0] }
 0x192   :  { %4771 = vmatpush.bf16.msra.mxu2 %v12577_v30  ;;  %v12837_v30 = vor.u32 %v17300_v21, %v12836_v59  ;;  %v21041_v32 = vadd.f32 %v20954_v36, %v4455_v25  ;;  %v17066_v36 = vld [vmem:[%s27190_s1 + $0x3f8] sm:$0xf0]  ;;  %v4456_v49 = vpop.f32.mrf.mxu1  ;;  %v13877_v59 = vor.u32 %v17560_v5, %v13876_v3  ;;  %v12214_v25 = vld [vmem:[%s27190_s1 + $0x66c] sm:$0xf0]  ;;  %v17417_v50 = vld [vmem:[%s27190_s1 + $0xef0] sm:$0xf0] }
 0x193   :  { %4746 = vmatpush.bf16.msrb.mxu3 %v11693_v26  ;;  %v17287_v26 = vld [vmem:[%s27190_s1 + $0xae0] sm:$0xf0]  ;;  %v17138_v23 = vld [vmem:[%s27190_s1 + $0x63c] sm:$0xf]  ;;  %v13304_v49 = vld [vmem:[%s27190_s1 + $0xec0] sm:$0xf] }
 0x194   :  { %4784 = vmatpush.bf16.msrb.mxu0 %v12993_v37  ;;  %v11900_v37 = vld [vmem:[%s27190_s1 + $0x3c8] sm:$0xf]  ;;  %v12785_v51 = vor.u32 %v17287_v26, %v12784_v13  ;;  %v12217_v13 = vor.u32 %v17138_v23, %v12214_v25  ;;  %v13305_v63 = vor.u32 %v17417_v50, %v13304_v49  ;;  %v11590_v25 = vld [vmem:[%s27190_s1 + $0x18c] sm:$0xf0]  ;;  %v17482_v50 = vld [vmem:[%s27190_s1 + $0x10f8] sm:$0xf0] }
 0x195   :  { %4759 = vmatpush.bf16.msra.mxu1 %v12109_v41  ;;  %v4493_v41 = vpop.f32.mrf.mxu2  ;;  %v13564_v49 = vld [vmem:[%s27190_s1 + $0x10c8] sm:$0xf]  ;;  %vm5203_vm5 = vcmp.gt.f32.partialorder %v21041_v32, 0.0 }
 0x196   :  { %4772 = vmatpush.bf16.msra.mxu2 %v12525_v17  ;;  %v11485_v17 = vor.u32 %v16962_v31, %v11484_v10  ;;  %v21067_v47 = vadd.f32 %v4493_v41, %v4481_v29  ;;  %v17547_v29 = vld [vmem:[%s27190_s1 + $0x1300] sm:$0xf0]  ;;  %v11801_v31 = vor.u32 %v17034_v22, %v11798_v46  ;;  %v13772_v41 = vld [vmem:[%s27190_s1 + $0x1268] sm:$0xf] }
 0x197   :  { %4747 = vmatpush.bf16.msrb.mxu3 %v11641_v52  ;;  %v4443_v52 = vpop.f32.mrf.mxu3 }
 0x198   :  { %4785 = vmatpush.bf16.msrb.mxu0 %v12941_v53  ;;  %13953 = vmatmul.msk.bf16.vlgmr.msrb.gmra.mxu1 %vm4012_vm0, %v18767_v48  ;;  %v13460_v53 = vld [vmem:[%s27190_s1 + $0xff8] sm:$0xf] }
 0x199   :  { %4760 = vmatpush.bf16.msra.mxu1 %v12057_v60  ;;  %v11901_v60 = vor.u32 %v17066_v36, %v11900_v37  ;;  %v13461_v12 = vor.u32 %v17456_v56, %v13460_v53  ;;  %v17021_v37 = vld [vmem:[%s27190_s1 + $0x294] sm:$0xf]  ;;  %v11746_v36 = vld [vmem:[%s27190_s1 + $0x2c4] sm:$0xf0]  ;;  %v17008_v53 = vld [vmem:[%s27190_s1 + $0x22c] sm:$0xf] }
 0x19a   :  { %4773 = vmatpush.bf16.msra.mxu2 %v12473_v61  ;;  %v12317_v61 = vor.u32 %v17170_v28, %v12316_v38  ;;  %v17125_v38 = vld [vmem:[%s27190_s1 + $0x5d4] sm:$0xf]  ;;  %v12162_v28 = vld [vmem:[%s27190_s1 + $0x604] sm:$0xf0]  ;;  %v11749_v45 = vor.u32 %v17021_v37, %v11746_v36  ;;  %v11694_v56 = vld [vmem:[%s27190_s1 + $0x25c] sm:$0xf0] }
 0x19b   :  { %4748 = vmatpush.bf16.msrb.mxu3 %v11589_v6  ;;  %v13928_v6 = vld [vmem:[%s27190_s1 + $0x13a0] sm:$0xf]  ;;  %v11697_v0 = vor.u32 %v17008_v53, %v11694_v56 }
 0x19c   :  { %4786 = vmatpush.bf16.msrb.mxu0 %v12889_v15  ;;  %v13408_v15 = vld [vmem:[%s27190_s1 + $0xf90] sm:$0xf]  ;;  %v13929_v21 = vor.u32 %v17573_v11, %v13928_v6  ;;  %v16995_v6 = vld [vmem:[%s27190_s1 + $0x1c4] sm:$0xf]  ;;  %v11642_v11 = vld [vmem:[%s27190_s1 + $0x1f4] sm:$0xf0] }
 0x19d   :  { %4761 = vmatpush.bf16.msra.mxu1 %v12005_v54  ;;  %v12680_v54 = vld [vmem:[%s27190_s1 + $0x9e0] sm:$0xf]  ;;  %v4495_v24 = vpop.f32.mrf.mxu2 }
 0x19e   :  { %4774 = vmatpush.bf16.msra.mxu2 %v12421_v20  ;;  %v17261_v20 = vld [vmem:[%s27190_s1 + $0xa10] sm:$0xf0]  ;;  %v16982_v24 = vld [vmem:[%s27190_s1 + $0x15c] sm:$0xf]  ;;  %v13096_v53 = vld [vmem:[%s27190_s1 + $0xd20] sm:$0xf] }
 0x19f   :  { %4749 = vmatpush.bf16.msrb.mxu3 %v11537_v27  ;;  %v13824_v27 = vld [vmem:[%s27190_s1 + $0x12d0] sm:$0xf]  ;;  %v12681_v10 = vor.u32 %v17261_v20, %v12680_v54  ;;  %v11645_v20 = vor.u32 %v16995_v6, %v11642_v11  ;;  %v13512_v6 = vld [vmem:[%s27190_s1 + $0x1060] sm:$0xf]  ;;  %v17469_v11 = vld [vmem:[%s27190_s1 + $0x1090] sm:$0xf0] }
 0x1a0   :  { %4787 = vmatpush.bf16.msrb.mxu0 %v12837_v30  ;;  %v13409_v30 = vor.u32 %v17443_v19, %v13408_v15  ;;  %v13825_v26 = vor.u32 %v17547_v29, %v13824_v27  ;;  %v13668_v15 = vld [vmem:[%s27190_s1 + $0x1198] sm:$0xf]  ;;  %v17086_v27 = vld [vmem:[%s27190_s1 + $0x49c] sm:$0xf]  ;;  %v13616_v29 = vld [vmem:[%s27190_s1 + $0x1130] sm:$0xf] }
 0x1a1   :  { %4762 = vmatpush.bf16.msra.mxu1 %v11953_v33  ;;  %v13356_v33 = vld [vmem:[%s27190_s1 + $0xf28] sm:$0xf] }
 0x1a2   :  { %4775 = vmatpush.bf16.msra.mxu2 %v12369_v35  ;;  %v17430_v35 = vld [vmem:[%s27190_s1 + $0xf58] sm:$0xf0] }
 0x1a3   :  { %4750 = vmatpush.bf16.msrb.mxu3 %v11485_v17  ;;  %v17534_v17 = vld [vmem:[%s27190_s1 + $0x1298] sm:$0xf0]  ;;  %v13357_v43 = vor.u32 %v17430_v35, %v13356_v33  ;;  %v11593_v33 = vor.u32 %v16982_v24, %v11590_v25  ;;  %v13148_v35 = vld [vmem:[%s27190_s1 + $0xd88] sm:$0xf] }
 0x1a4   :  { %4788 = vmatpush.bf16.msrb.mxu0 %v12785_v51  ;;  %v12165_v51 = vor.u32 %v17125_v38, %v12162_v28  ;;  %v13773_v52 = vor.u32 %v17534_v17, %v13772_v41  ;;  %v16969_v28 = vld [vmem:[%s27190_s1 + $0xf4] sm:$0xf]  ;;  %v11538_v41 = vld [vmem:[%s27190_s1 + $0x124] sm:$0xf0]  ;;  %v17450_v25 = vld [vmem:[%s27190_s1 + $0xffc] sm:$0xf] }
 0x1a5   :  { %4763 = vmatpush.bf16.msra.mxu1 %v11901_v60  ;;  %v12110_v60 = vld [vmem:[%s27190_s1 + $0x59c] sm:$0xf0]  ;;  %v4519_v3 = vpop.f32.mrf.mxu1  ;;  %v17073_v17 = vld [vmem:[%s27190_s1 + $0x434] sm:$0xf] }
 0x1a6   :  { %4776 = vmatpush.bf16.msra.mxu2 %v12317_v61  ;;  %v13720_v61 = vld [vmem:[%s27190_s1 + $0x1200] sm:$0xf] }
 0x1a7   :  { %4751 = vmatpush.bf16.msrb.mxu3 %v11433_v4  ;;  %v12113_v4 = vor.u32 %v17112_v58, %v12110_v60  ;;  %v13721_v5 = vor.u32 %v17521_v62, %v13720_v61  ;;  %v11541_v60 = vor.u32 %v16969_v28, %v11538_v41  ;;  %v17365_v61 = vld [vmem:[%s27190_s1 + $0xd50] sm:$0xf0]  ;;  %v17242_v62 = vld [vmem:[%s27190_s1 + $0x97c] sm:$0xf]  ;;  %v12526_v28 = vld [vmem:[%s27190_s1 + $0x8dc] sm:$0xf0] }
 0x1a8   :  { %4789 = vmatpush.bf16.msrb.mxu0 %v12733_v14  ;;  %v12058_v14 = vld [vmem:[%s27190_s1 + $0x534] sm:$0xf0]  ;;  %v4532_v19 = vpop.f32.mrf.mxu0 }
 0x1a9   :  { %4764 = vmatpush.bf16.msra.mxu1 %v11849_v16  ;;  %v17508_v16 = vld [vmem:[%s27190_s1 + $0x11c8] sm:$0xf0]  ;;  %v4506_v54 = vpop.f32.mrf.mxu3 }
 0x1aa   :  { %4777 = vmatpush.bf16.msra.mxu2 %v12265_v18  ;;  %4752 = vmatmul.bf16.vlgmr.msrb.gmra.mxu3 %v18684_v8  ;;  %v13253_v18 = vor.u32 %v17404_v2, %v13252_v1  ;;  %v4507_v22 = vadd.f32 %v4506_v54, %v21067_v47  ;;  %v13669_v23 = vor.u32 %v17508_v16, %v13668_v15  ;;  %v12006_v47 = vld [vmem:[%s27190_s1 + $0x4cc] sm:$0xf0]  ;;  %v16956_v2 = vld [vmem:[%s27190_s1 + $0x8c] sm:$0xf]  ;;  %v12578_v54 = vld [vmem:[%s27190_s1 + $0x944] sm:$0xf0] }
 0x1ab   :  { %4796 = vmatpush.bf16.msra.mxu3 %v13461_v12  ;;  %v17099_v12 = vld [vmem:[%s27190_s1 + $0x504] sm:$0xf]  ;;  %v12009_v36 = vor.u32 %v17086_v27, %v12006_v47  ;;  %v13565_v1 = vor.u32 %v17482_v50, %v13564_v49  ;;  %v13046_v15 = vld [vmem:[%s27190_s1 + $0xcec] sm:$0xf0]  ;;  %v17554_v47 = vld [vmem:[%s27190_s1 + $0x133c] sm:$0xf] }
 0x1ac   :  { %4790 = vmatpush.bf16.msrb.mxu0 %v12681_v10  ;;  %4765 = vmatmul.bf16.vlgmr.msra.gmra.mxu1 %v18686_v9  ;;  %v12061_v46 = vor.u32 %v17099_v12, %v12058_v14  ;;  %v4520_v10 = vadd.f32 %v4519_v3, %v4507_v22  ;;  %v11486_v3 = vld [vmem:[%s27190_s1 + $0xbc] sm:$0xf0]  ;;  %v13097_v12 = vor.u32 %v17365_v61, %v13096_v53  ;;  %v17346_v14 = vld [vmem:[%s27190_s1 + $0xcbc] sm:$0xf]  ;;  %v11434_v22 = vld [vmem:[%s27190_s1 + $0x54] sm:$0xf0] }
 0x1ad   :  { %4809 = vmatpush.bf16.msrb.mxu1 %v13877_v59  ;;  %4778 = vmatmul.bf16.vlgmr.msra.gmra.mxu2 %v18653_v55  ;;  %v13200_v59 = vld [vmem:[%s27190_s1 + $0xdf0] sm:$0xf]  ;;  %v13049_v24 = vor.u32 %v17346_v14, %v13046_v15  ;;  %v17541_v49 = vld [vmem:[%s27190_s1 + $0x12d4] sm:$0xf]  ;;  %v13826_v50 = vld [vmem:[%s27190_s1 + $0x1304] sm:$0xf0] }
 0x1ae   :  { %4829 = vmatpush.bf16.msrb.mxu2 %v13929_v21  ;;  %v17391_v21 = vld [vmem:[%s27190_s1 + $0xe20] sm:$0xf0]  ;;  %v4533_v37 = vadd.f32 %v4532_v19, %v4520_v10  ;;  %v17229_v19 = vld [vmem:[%s27190_s1 + $0x914] sm:$0xf]  ;;  %v13462_v27 = vld [vmem:[%s27190_s1 + $0x102c] sm:$0xf0]  ;;  %v13829_v61 = vor.u32 %v17541_v49, %v13826_v50 }
 0x1af   :  { %4797 = vmatpush.bf16.msra.mxu3 %v13409_v30  ;;  %4791 = vmatmul.bf16.vlgmr.msrb.gmra.mxu0 %v18658_v57  ;;  %v17495_v30 = vld [vmem:[%s27190_s1 + $0x1160] sm:$0xf0]  ;;  %v17333_v10 = vld [vmem:[%s27190_s1 + $0xc54] sm:$0xf]  ;;  %v12422_v14 = vld [vmem:[%s27190_s1 + $0x80c] sm:$0xf0] }
 0x1b0   :  { %4835 = vmatpush.bf16.msra.mxu0 %v11801_v31  ;;  %v13201_v31 = vor.u32 %v17391_v21, %v13200_v59  ;;  %v13617_v38 = vor.u32 %v17495_v30, %v13616_v29  ;;  %v4534_v56 = vpop.f32.mrf.mxu0  ;;  %v13513_v21 = vor.u32 %v17469_v11, %v13512_v6  ;;  %v13878_v30 = vld [vmem:[%s27190_s1 + $0x136c] sm:$0xf0]  ;;  %v17411_v15 = vld [vmem:[%s27190_s1 + $0xec4] sm:$0xf] }
 0x1b1   :  { %4810 = vmatpush.bf16.msrb.mxu1 %v13825_v26  ;;  %v4521_v26 = vpop.f32.mrf.mxu1  ;;  %v4508_v58 = vpop.f32.mrf.mxu3  ;;  %v13881_v41 = vor.u32 %v17554_v47, %v13878_v30 }
 0x1b2   :  { %4848 = vmatpush.bf16.msra.mxu2 %v12217_v13  ;;  %v17378_v13 = vld [vmem:[%s27190_s1 + $0xdb8] sm:$0xf0]  ;;  %v17203_v58 = vld [vmem:[%s27190_s1 + $0x844] sm:$0xf] }
 0x1b3   :  { %4798 = vmatpush.bf16.msra.mxu3 %v13357_v43  ;;  %v4545_v43 = vpop.f32.mrf.mxu2 }
 0x1b4   :  { %4836 = vmatpush.bf16.msra.mxu0 %v11749_v45  ;;  %v11954_v45 = vld [vmem:[%s27190_s1 + $0x464] sm:$0xf0] }
 0x1b5   :  { %4811 = vmatpush.bf16.msrb.mxu1 %v13773_v52  ;;  %v13149_v52 = vor.u32 %v17378_v13, %v13148_v35  ;;  %v12581_v35 = vor.u32 %v17229_v19, %v12578_v54  ;;  %v13306_v19 = vld [vmem:[%s27190_s1 + $0xef4] sm:$0xf0]  ;;  %v17515_v54 = vld [vmem:[%s27190_s1 + $0x1204] sm:$0xf] }
 0x1b6   :  { %4849 = vmatpush.bf16.msra.mxu2 %v12165_v51  ;;  %v4546_v51 = vadd.f32 %v4545_v43, %v4533_v37  ;;  %v17437_v43 = vld [vmem:[%s27190_s1 + $0xf94] sm:$0xf] }
 0x1b7   :  { %4799 = vmatpush.bf16.msra.mxu3 %v13305_v63  ;;  %v12630_v63 = vld [vmem:[%s27190_s1 + $0x9ac] sm:$0xf0] }
 0x1b8   :  { %4837 = vmatpush.bf16.msra.mxu0 %v11697_v0  ;;  %v11957_v0 = vor.u32 %v17073_v17, %v11954_v45  ;;  %v12633_v16 = vor.u32 %v17242_v62, %v12630_v63  ;;  %v13410_v45 = vld [vmem:[%s27190_s1 + $0xfc4] sm:$0xf0]  ;;  %v17424_v63 = vld [vmem:[%s27190_s1 + $0xf2c] sm:$0xf] }
 0x1b9   :  { %4812 = vmatpush.bf16.msrb.mxu1 %v13721_v5  ;;  %v11902_v5 = vld [vmem:[%s27190_s1 + $0x3fc] sm:$0xf0]  ;;  %v13413_v56 = vor.u32 %v17437_v43, %v13410_v45 }
 0x1ba   :  { %4850 = vmatpush.bf16.msra.mxu2 %v12113_v4  ;;  %v17060_v4 = vld [vmem:[%s27190_s1 + $0x3cc] sm:$0xf]  ;;  %v12318_v43 = vld [vmem:[%s27190_s1 + $0x73c] sm:$0xf0] }
 0x1bb   :  { %4800 = vmatpush.bf16.msra.mxu3 %v13253_v18  ;;  %v11489_v18 = vor.u32 %v16956_v2, %v11486_v3  ;;  %v11905_v59 = vor.u32 %v17060_v4, %v11902_v5  ;;  %v4547_v29 = vpop.f32.mrf.mxu2  ;;  %v13774_v2 = vld [vmem:[%s27190_s1 + $0x129c] sm:$0xf0]  ;;  %v17307_v3 = vld [vmem:[%s27190_s1 + $0xb84] sm:$0xf]  ;;  %v12890_v4 = vld [vmem:[%s27190_s1 + $0xbb4] sm:$0xf0] }
 0x1bc   :  { %4838 = vmatpush.bf16.msra.mxu0 %v11645_v20  ;;  %v16943_v20 = vld [vmem:[%s27190_s1 + $0x24] sm:$0xf] }
 0x1bd   :  { %4813 = vmatpush.bf16.msrb.mxu1 %v13669_v23  ;;  %13954 = vmatmul.msk.bf16.vlgmr.msrb.gmra.mxu2 %vm4012_vm0, %v18767_v48  ;;  %v11850_v23 = vld [vmem:[%s27190_s1 + $0x394] sm:$0xf0]  ;;  %v11437_v13 = vor.u32 %v16943_v20, %v11434_v22  ;;  %v21406_v20 = vld [vmem:[%s27191_s2] sm:$0xff]  ;;  %v17294_v22 = vld [vmem:[%s27190_s1 + $0xb1c] sm:$0xf] }
 0x1be   :  { %4851 = vmatpush.bf16.msra.mxu2 %v12061_v46  ;;  %v17047_v46 = vld [vmem:[%s27190_s1 + $0x364] sm:$0xf] }
 0x1bf   :  { %4801 = vmatpush.bf16.msra.mxu3 %v13201_v31  ;;  %v12994_v31 = vld [vmem:[%s27190_s1 + $0xc84] sm:$0xf0]  ;;  %v11853_v37 = vor.u32 %v17047_v46, %v11850_v23  ;;  %v12838_v46 = vld [vmem:[%s27190_s1 + $0xb4c] sm:$0xf0] }
 0x1c0   :  { %4839 = vmatpush.bf16.msra.mxu0 %v11593_v33  ;;  %v4558_v33 = vpop.f32.mrf.mxu3  ;;  %v12997_v17 = vor.u32 %v17333_v10, %v12994_v31  ;;  %v12841_v10 = vor.u32 %v17294_v22, %v12838_v46  ;;  %v17398_v31 = vld [vmem:[%s27190_s1 + $0xe5c] sm:$0xf]  ;;  %v11804_v46 = vld [vmem:[%s27190_s1 + $0x300] sm:$0xf] }
 0x1c1   :  { %4814 = vmatpush.bf16.msrb.mxu1 %v13617_v38  ;;  %v21334_v26 = vadd.f32 %v4558_v33, %v4546_v51  ;;  %v17216_v38 = vld [vmem:[%s27190_s1 + $0x8ac] sm:$0xf]  ;;  %v13254_v33 = vld [vmem:[%s27190_s1 + $0xe8c] sm:$0xf0] }
 0x1c2   :  { %4852 = vmatpush.bf16.msra.mxu2 %v12009_v36  ;;  %v13465_v36 = vor.u32 %v17450_v25, %v13462_v27  ;;  %v17320_v51 = vld [vmem:[%s27190_s1 + $0xbec] sm:$0xf]  ;;  %v12529_v53 = vor.u32 %v17216_v38, %v12526_v28  ;;  %v17177_v25 = vld [vmem:[%s27190_s1 + $0x774] sm:$0xf]  ;;  %v12370_v27 = vld [vmem:[%s27190_s1 + $0x7a4] sm:$0xf0] }
 0x1c3   :  { %4802 = vmatpush.bf16.msra.mxu3 %v13149_v52  ;;  %v12942_v52 = vld [vmem:[%s27190_s1 + $0xc1c] sm:$0xf0]  ;;  %v12786_v38 = vld [vmem:[%s27190_s1 + $0xae4] sm:$0xf0]  ;;  %v12373_v28 = vor.u32 %v17177_v25, %v12370_v27  ;;  %vm5204_vm6 = vcmp.gt.f32.partialorder %v21334_v26, 0.0 }
 0x1c4   :  { %4840 = vmatpush.bf16.msra.mxu0 %v11541_v60  ;;  %v12474_v60 = vld [vmem:[%s27190_s1 + $0x874] sm:$0xf0]  ;;  %v12945_v62 = vor.u32 %v17320_v51, %v12942_v52  ;;  %v17385_v51 = vld [vmem:[%s27190_s1 + $0xdf4] sm:$0xf]  ;;  %v13202_v52 = vld [vmem:[%s27190_s1 + $0xe24] sm:$0xf0] }
 0x1c5   :  { %4815 = vmatpush.bf16.msrb.mxu1 %v13565_v1  ;;  %v17528_v1 = vld [vmem:[%s27190_s1 + $0x126c] sm:$0xf]  ;;  %v12477_v5 = vor.u32 %v17203_v58, %v12474_v60  ;;  %v4571_v47 = vpop.f32.mrf.mxu1  ;;  %v13618_v58 = vld [vmem:[%s27190_s1 + $0x1164] sm:$0xf0]  ;;  %v12220_v27 = vld [vmem:[%s27190_s1 + $0x640] sm:$0xf] }
 0x1c6   :  { %4853 = vmatpush.bf16.msra.mxu2 %v11957_v0  ;;  %v13358_v0 = vld [vmem:[%s27190_s1 + $0xf5c] sm:$0xf0]  ;;  %v17268_v60 = vld [vmem:[%s27190_s1 + $0xa4c] sm:$0xf] }
 0x1c7   :  { %4803 = vmatpush.bf16.msra.mxu3 %v13097_v12  ;;  %v13361_v11 = vor.u32 %v17424_v63, %v13358_v0  ;;  %v17190_v12 = vld [vmem:[%s27190_s1 + $0x7dc] sm:$0xf]  ;;  %v17151_v63 = vld [vmem:[%s27190_s1 + $0x6a4] sm:$0xf] }
 0x1c8   :  { %4841 = vmatpush.bf16.msra.mxu0 %v11489_v18  ;;  %v4560_v6 = vpop.f32.mrf.mxu3  ;;  %v12893_v18 = vor.u32 %v17307_v3, %v12890_v4  ;;  %v12425_v23 = vor.u32 %v17190_v12, %v12422_v14  ;;  %v4597_v29 = vpop.f32.mrf.mxu0  ;;  %v12266_v3 = vld [vmem:[%s27190_s1 + $0x6d4] sm:$0xf0]  ;;  %v17372_v4 = vld [vmem:[%s27190_s1 + $0xd8c] sm:$0xf] }
 0x1c9   :  { %4816 = vmatpush.bf16.msrb.mxu1 %v13513_v21  ;;  %v13722_v21 = vld [vmem:[%s27190_s1 + $0x1234] sm:$0xf0]  ;;  %v12269_v22 = vor.u32 %v17151_v63, %v12266_v3  ;;  %v17236_v63 = vld [vmem:[%s27190_s1 + $0x948] sm:$0xf0]  ;;  %v11700_v3 = vld [vmem:[%s27190_s1 + $0x230] sm:$0xf] }
 0x1ca   :  { %4854 = vmatpush.bf16.msra.mxu2 %v11905_v59  ;;  %4804 = vmatmul.bf16.vlgmr.msra.gmra.mxu3 %v18855_v34  ;;  %v734_v59 = vperm.slane %v21406_v20, 6  ;;  %v13725_v30 = vor.u32 %v17515_v54, %v13722_v21  ;;  %v13566_v54 = vld [vmem:[%s27190_s1 + $0x10fc] sm:$0xf0]  ;;  %v12682_v21 = vld [vmem:[%s27190_s1 + $0xa14] sm:$0xf0] }
 0x1cb   :  { %4861 = vmatpush.bf16.msrb.mxu3 %v12633_v16  ;;  %v13777_v16 = vor.u32 %v17528_v1, %v13774_v2  ;;  %v13205_v2 = vor.u32 %v17385_v51, %v13202_v52  ;;  %v12168_v51 = vld [vmem:[%s27190_s1 + $0x5d8] sm:$0xf]  ;;  %v17132_v52 = vld [vmem:[%s27190_s1 + $0x608] sm:$0xf0] }
 0x1cc   :  { %4842 = vmatpush.bf16.msra.mxu0 %v11437_v13  ;;  %4817 = vmatmul.bf16.vlgmr.msrb.gmra.mxu1 %v18866_v39  ;;  %v4572_v13 = vadd.f32 %v4571_v47, %v734_v59  ;;  %v17255_v59 = vld [vmem:[%s27190_s1 + $0x9e4] sm:$0xf]  ;;  %v17145_v47 = vld [vmem:[%s27190_s1 + $0x670] sm:$0xf0] }
 0x1cd   :  { %4874 = vmatpush.bf16.msra.mxu1 %v13049_v24  ;;  %v13309_v24 = vor.u32 %v17411_v15, %v13306_v19  ;;  %v4573_v6 = vpop.f32.mrf.mxu1  ;;  %v17476_v15 = vld [vmem:[%s27190_s1 + $0x10cc] sm:$0xf] }
 0x1ce   :  { %4855 = vmatpush.bf16.msra.mxu2 %v11853_v37  ;;  %v13670_v37 = vld [vmem:[%s27190_s1 + $0x11cc] sm:$0xf0]  ;;  %v17119_v6 = vld [vmem:[%s27190_s1 + $0x5a0] sm:$0xf0] }
 0x1cf   :  { %4862 = vmatpush.bf16.msrb.mxu3 %v12581_v35  ;;  %4843 = vmatmul.bf16.vlgmr.msra.gmra.mxu0 %v18684_v8  ;;  %v17502_v35 = vld [vmem:[%s27190_s1 + $0x119c] sm:$0xf] }
 0x1d0   :  { %4887 = vmatpush.bf16.msrb.mxu0 %v13465_v36  ;;  %v17281_v36 = vld [vmem:[%s27190_s1 + $0xab4] sm:$0xf]  ;;  %v4584_v45 = vpop.f32.mrf.mxu3  ;;  %v13673_v49 = vor.u32 %v17502_v35, %v13670_v37  ;;  %v4610_v1 = vpop.f32.mrf.mxu2  ;;  %v17463_v35 = vld [vmem:[%s27190_s1 + $0x1064] sm:$0xf] }
 0x1d1   :  { %4875 = vmatpush.bf16.msra.mxu1 %v12997_v17  ;;  %4856 = vmatmul.bf16.vlgmr.msra.gmra.mxu2 %v18686_v9  ;;  %v17164_v17 = vld [vmem:[%s27190_s1 + $0x70c] sm:$0xf]  ;;  %v12789_v50 = vor.u32 %v17281_v36, %v12786_v38  ;;  %v12636_v36 = vld [vmem:[%s27190_s1 + $0x980] sm:$0xf]  ;;  %v17249_v38 = vld [vmem:[%s27190_s1 + $0x9b0] sm:$0xf0] }
 0x1d2   :  { %4900 = vmatpush.bf16.msrb.mxu2 %v13881_v41  ;;  %v13257_v41 = vor.u32 %v17398_v31, %v13254_v33  ;;  %v12685_v31 = vor.u32 %v17255_v59, %v12682_v21  ;;  %v13098_v33 = vld [vmem:[%s27190_s1 + $0xd54] sm:$0xf0]  ;;  %v17327_v59 = vld [vmem:[%s27190_s1 + $0xc20] sm:$0xf0]  ;;  %v11648_v21 = vld [vmem:[%s27190_s1 + $0x1c8] sm:$0xf] }
 0x1d3   :  { %4863 = vmatpush.bf16.msrb.mxu3 %v12529_v53  ;;  %v17489_v53 = vld [vmem:[%s27190_s1 + $0x1134] sm:$0xf] }
 0x1d4   :  { %4888 = vmatpush.bf16.msrb.mxu0 %v13413_v56  ;;  %v4585_v56 = vadd.f32 %v4584_v45, %v4572_v13  ;;  %v13621_v12 = vor.u32 %v17489_v53, %v13618_v58  ;;  %v13514_v13 = vld [vmem:[%s27190_s1 + $0x1094] sm:$0xf0]  ;;  %v17028_v45 = vld [vmem:[%s27190_s1 + $0x2c8] sm:$0xf0]  ;;  %v12637_v58 = vor.u32 %v17249_v38, %v12636_v36  ;;  %v16989_v36 = vld [vmem:[%s27190_s1 + $0x190] sm:$0xf0] }
 0x1d5   :  { %4876 = vmatpush.bf16.msra.mxu1 %v12945_v62  ;;  %v12321_v62 = vor.u32 %v17164_v17, %v12318_v43  ;;  %v17353_v17 = vld [vmem:[%s27190_s1 + $0xcf0] sm:$0xf0]  ;;  %v11752_v43 = vld [vmem:[%s27190_s1 + $0x298] sm:$0xf]  ;;  %v12012_v38 = vld [vmem:[%s27190_s1 + $0x4a0] sm:$0xf] }
 0x1d6   :  { %4901 = vmatpush.bf16.msrb.mxu2 %v13829_v61  ;;  %v12734_v61 = vld [vmem:[%s27190_s1 + $0xa7c] sm:$0xf0]  ;;  %v4598_v0 = vadd.f32 %v4597_v29, %v4585_v56  ;;  %v17359_v29 = vld [vmem:[%s27190_s1 + $0xd24] sm:$0xf]  ;;  %v13517_v56 = vor.u32 %v17463_v35, %v13514_v13  ;;  %v17314_v35 = vld [vmem:[%s27190_s1 + $0xbb8] sm:$0xf0] }
 0x1d7   :  { %4864 = vmatpush.bf16.msrb.mxu3 %v12477_v5  ;;  %v13150_v5 = vld [vmem:[%s27190_s1 + $0xdbc] sm:$0xf0]  ;;  %v12737_v14 = vor.u32 %v17268_v60, %v12734_v61  ;;  %v11753_v61 = vor.u32 %v17028_v45, %v11752_v43  ;;  %v17197_v43 = vld [vmem:[%s27190_s1 + $0x810] sm:$0xf0] }
 0x1d8   :  { %4889 = vmatpush.bf16.msrb.mxu0 %v13361_v11  ;;  %v4599_v11 = vpop.f32.mrf.mxu0  ;;  %v21487_v19 = vadd.f32 %v4610_v1, %v4598_v0  ;;  %v13000_v0 = vld [vmem:[%s27190_s1 + $0xc58] sm:$0xf]  ;;  %v12169_v1 = vor.u32 %v17132_v52, %v12168_v51  ;;  %v11596_v13 = vld [vmem:[%s27190_s1 + $0x160] sm:$0xf]  ;;  %v17301_v51 = vld [vmem:[%s27190_s1 + $0xb50] sm:$0xf0] }
 0x1d9   :  { %4877 = vmatpush.bf16.msra.mxu1 %v12893_v18  ;;  %v13930_v18 = vld [vmem:[%s27190_s1 + $0x13d4] sm:$0xf0]  ;;  %v12844_v45 = vld [vmem:[%s27190_s1 + $0xb20] sm:$0xf] }
 0x1da   :  { %4902 = vmatpush.bf16.msrb.mxu2 %v13777_v16  ;;  %v17567_v16 = vld [vmem:[%s27190_s1 + $0x13a4] sm:$0xf]  ;;  %v11544_v52 = vld [vmem:[%s27190_s1 + $0xf8] sm:$0xf] }
 0x1db   :  { %4865 = vmatpush.bf16.msrb.mxu3 %v12425_v23  ;;  %v17041_v23 = vld [vmem:[%s27190_s1 + $0x330] sm:$0xf0]  ;;  %v13933_v25 = vor.u32 %v17567_v16, %v13930_v18  ;;  %v17223_v16 = vld [vmem:[%s27190_s1 + $0x8e0] sm:$0xf0]  ;;  %v12948_v18 = vld [vmem:[%s27190_s1 + $0xbf0] sm:$0xf] }
 0x1dc   :  { %4890 = vmatpush.bf16.msrb.mxu0 %v13309_v24  ;;  %v13153_v24 = vor.u32 %v17372_v4, %v13150_v5  ;;  %v11805_v37 = vor.u32 %v17041_v23, %v11804_v46  ;;  %v17015_v4 = vld [vmem:[%s27190_s1 + $0x260] sm:$0xf0]  ;;  %v12116_v5 = vld [vmem:[%s27190_s1 + $0x570] sm:$0xf]  ;;  %v12064_v46 = vld [vmem:[%s27190_s1 + $0x508] sm:$0xf] }
 0x1dd   :  { %4878 = vmatpush.bf16.msra.mxu1 %v12841_v10  ;;  %v13569_v10 = vor.u32 %v17476_v15, %v13566_v54  ;;  %v12532_v15 = vld [vmem:[%s27190_s1 + $0x8b0] sm:$0xf]  ;;  %v12117_v54 = vor.u32 %v17119_v6, %v12116_v5  ;;  %v17106_v23 = vld [vmem:[%s27190_s1 + $0x538] sm:$0xf0] }
 0x1de   :  { %4903 = vmatpush.bf16.msrb.mxu2 %v13725_v30  ;;  %v4586_v30 = vpop.f32.mrf.mxu3 }
 0x1df   :  { %4866 = vmatpush.bf16.msrb.mxu3 %v12373_v28  ;;  %v13052_v28 = vld [vmem:[%s27190_s1 + $0xcc0] sm:$0xf]  ;;  %v17210_v30 = vld [vmem:[%s27190_s1 + $0x878] sm:$0xf0] }
 0x1e0   :  { %4891 = vmatpush.bf16.msrb.mxu0 %v13257_v41  ;;  %v12221_v41 = vor.u32 %v17145_v47, %v12220_v27  ;;  %v21546_v53 = vpop.f32.mrf.mxu0  ;;  %v13053_v60 = vor.u32 %v17353_v17, %v13052_v28  ;;  %v12949_v27 = vor.u32 %v17327_v59, %v12948_v18  ;;  %v17093_v28 = vld [vmem:[%s27190_s1 + $0x4d0] sm:$0xf0]  ;;  %v11908_v18 = vld [vmem:[%s27190_s1 + $0x3d0] sm:$0xf] }
 0x1e1   :  { %4879 = vmatpush.bf16.msra.mxu1 %v12789_v50  ;;  %v13101_v50 = vor.u32 %v17359_v29, %v13098_v33  ;;  %v12480_v29 = vld [vmem:[%s27190_s1 + $0x848] sm:$0xf] }
 0x1e2   :  { %4904 = vmatpush.bf16.msrb.mxu2 %v13673_v49  ;;  %v4612_v49 = vpop.f32.mrf.mxu2  ;;  %v12896_v33 = vld [vmem:[%s27190_s1 + $0xb88] sm:$0xf] }
 0x1e3   :  { %4867 = vmatpush.bf16.msrb.mxu3 %v12321_v62  ;;  %v12584_v62 = vld [vmem:[%s27190_s1 + $0x918] sm:$0xf]  ;;  %v12897_v17 = vor.u32 %v17314_v35, %v12896_v33  ;;  %v11597_v49 = vor.u32 %v16989_v36, %v11596_v13  ;;  %v17054_v33 = vld [vmem:[%s27190_s1 + $0x398] sm:$0xf0]  ;;  %v13468_v35 = vld [vmem:[%s27190_s1 + $0x1000] sm:$0xf] }
 0x1e4   :  { %4892 = vmatpush.bf16.msrb.mxu0 %v13205_v2  ;;  %v17340_v2 = vld [vmem:[%s27190_s1 + $0xc88] sm:$0xf0]  ;;  %v12585_v11 = vor.u32 %v17236_v63, %v12584_v62  ;;  %v735_v62 = vperm.slane %v21406_v20, 7  ;;  %v17457_v36 = vld [vmem:[%s27190_s1 + $0x1030] sm:$0xf0] }
 0x1e5   :  { %4880 = vmatpush.bf16.msra.mxu1 %v12737_v14  ;;  %v11701_v14 = vor.u32 %v17015_v4, %v11700_v3  ;;  %v12376_v3 = vld [vmem:[%s27190_s1 + $0x778] sm:$0xf]  ;;  %v17184_v4 = vld [vmem:[%s27190_s1 + $0x7a8] sm:$0xf0] }
 0x1e6   :  { %4905 = vmatpush.bf16.msrb.mxu2 %v13621_v12  ;;  %v13001_v12 = vor.u32 %v17340_v2, %v13000_v0  ;;  %v12845_v2 = vor.u32 %v17301_v51, %v12844_v45  ;;  %v12688_v45 = vld [vmem:[%s27190_s1 + $0x9e8] sm:$0xf]  ;;  %v17262_v51 = vld [vmem:[%s27190_s1 + $0xa18] sm:$0xf0] }
 0x1e7   :  { %4868 = vmatpush.bf16.msrb.mxu3 %v12269_v22  ;;  %v17002_v22 = vld [vmem:[%s27190_s1 + $0x1f8] sm:$0xf0] }
 0x1e8   :  { %4893 = vmatpush.bf16.msrb.mxu0 %v13153_v24  ;;  %v4651_v24 = vpop.f32.mrf.mxu0  ;;  %v11649_v47 = vor.u32 %v17002_v22, %v11648_v21  ;;  %v12377_v21 = vor.u32 %v17184_v4, %v12376_v3  ;;  %v13832_v3 = vld [vmem:[%s27190_s1 + $0x12d8] sm:$0xf]  ;;  %v17548_v4 = vld [vmem:[%s27190_s1 + $0x1308] sm:$0xf0] }
 0x1e9   :  { %4881 = vmatpush.bf16.msra.mxu1 %v12685_v31  ;;  %v12065_v31 = vor.u32 %v17106_v23, %v12064_v46  ;;  %v12324_v46 = vld [vmem:[%s27190_s1 + $0x710] sm:$0xf]  ;;  %v17171_v23 = vld [vmem:[%s27190_s1 + $0x740] sm:$0xf0] }
 0x1ea   :  { %4906 = vmatpush.bf16.msrb.mxu2 %v13569_v10  ;;  %4869 = vmatmul.bf16.vlgmr.msrb.gmra.mxu3 %v18653_v55  ;;  %v4623_v10 = vpop.f32.mrf.mxu1  ;;  %v12740_v24 = vld [vmem:[%s27190_s1 + $0xa50] sm:$0xf] }
 0x1eb   :  { %4920 = vmatpush.bf16.msra.mxu3 %v13933_v25  ;;  %v12533_v25 = vor.u32 %v17223_v16, %v12532_v15 }
 0x1ec   :  { %4894 = vmatpush.bf16.msrb.mxu0 %v13101_v50  ;;  %4882 = vmatmul.bf16.vlgmr.msra.gmra.mxu1 %v18658_v57  ;;  %v12013_v50 = vor.u32 %v17093_v28, %v12012_v38  ;;  %v13884_v38 = vld [vmem:[%s27190_s1 + $0x1340] sm:$0xf]  ;;  %v17561_v28 = vld [vmem:[%s27190_s1 + $0x1370] sm:$0xf0] }
 0x1ed   :  { %4926 = vmatpush.bf16.msrb.mxu1 %v11805_v37  ;;  %v4624_v37 = vadd.f32 %v4623_v10, %v21487_v19  ;;  %v12428_v19 = vld [vmem:[%s27190_s1 + $0x7e0] sm:$0xf]  ;;  %v16950_v10 = vld [vmem:[%s27190_s1 + $0x58] sm:$0xf0] }
 0x1ee   :  { %4907 = vmatpush.bf16.msrb.mxu2 %v13517_v56  ;;  %v16976_v56 = vld [vmem:[%s27190_s1 + $0x128] sm:$0xf0]  ;;  %v12429_v0 = vor.u32 %v17197_v43, %v12428_v19  ;;  %v12272_v19 = vld [vmem:[%s27190_s1 + $0x6a8] sm:$0xf]  ;;  %v17158_v43 = vld [vmem:[%s27190_s1 + $0x6d8] sm:$0xf0] }
 0x1ef   :  { %4939 = vmatpush.bf16.msrb.mxu3 %v12221_v41  ;;  %4895 = vmatmul.bf16.vlgmr.msrb.gmra.mxu0 %v18855_v34  ;;  %v12481_v41 = vor.u32 %v17210_v30, %v12480_v29  ;;  %v11545_v20 = vor.u32 %v16976_v56, %v11544_v52  ;;  %v17275_v29 = vld [vmem:[%s27190_s1 + $0xa80] sm:$0xf0]  ;;  %v11440_v30 = vld [vmem:[%s27190_s1 + $0x28] sm:$0xf]  ;;  %v17574_v56 = vld [vmem:[%s27190_s1 + $0x13d8] sm:$0xf0] }
 0x1f0   :  { %4952 = vmatpush.bf16.msra.mxu0 %v12637_v58  ;;  %v4636_v58 = vpop.f32.mrf.mxu3  ;;  %v4662_v16 = vpop.f32.mrf.mxu2  ;;  %v13936_v52 = vld [vmem:[%s27190_s1 + $0x13a8] sm:$0xf] }
 0x1f1   :  { %4927 = vmatpush.bf16.msrb.mxu1 %v11753_v61  ;;  %4908 = vmatmul.bf16.vlgmr.msrb.gmra.mxu2 %v18866_v39  ;;  %v17080_v61 = vld [vmem:[%s27190_s1 + $0x468] sm:$0xf0]  ;;  %v4637_v63 = vadd.f32 %v4636_v58, %v4624_v37  ;;  %v4663_v59 = vadd.f32 %v4662_v16, %v735_v62  ;;  %v12325_v37 = vor.u32 %v17171_v23, %v12324_v46  ;;  %v17035_v62 = vld [vmem:[%s27190_s1 + $0x304] sm:$0xf] }
 0x1f2   :  { %4965 = vmatpush.bf16.msra.mxu2 %v13053_v60  ;;  %v11960_v60 = vld [vmem:[%s27190_s1 + $0x438] sm:$0xf]  ;;  %v4625_v15 = vpop.f32.mrf.mxu1  ;;  %v13833_v16 = vor.u32 %v17548_v4, %v13832_v3  ;;  %v17392_v4 = vld [vmem:[%s27190_s1 + $0xe28] sm:$0xf0] }
 0x1f3   :  { %4940 = vmatpush.bf16.msrb.mxu3 %v12169_v1  ;;  %v4675_v1 = vpop.f32.mrf.mxu0  ;;  %v21659_v5 = vadd.f32 %v21546_v53, %v4637_v63  ;;  %v11961_v6 = vor.u32 %v17080_v61, %v11960_v60  ;;  %v16963_v53 = vld [vmem:[%s27190_s1 + $0xc0] sm:$0xf0]  ;;  %v13469_v60 = vor.u32 %v17457_v36, %v13468_v35  ;;  %v13885_v61 = vor.u32 %v17561_v28, %v13884_v38  ;;  %v11806_v63 = vld [vmem:[%s27190_s1 + $0x334] sm:$0xf0]  ;;  %v13728_v35 = vld [vmem:[%s27190_s1 + $0x1208] sm:$0xf] }
 0x1f4   :  { %4953 = vmatpush.bf16.msra.mxu0 %v12585_v11  ;;  %v12792_v11 = vld [vmem:[%s27190_s1 + $0xab8] sm:$0xf]  ;;  %v17113_v28 = vld [vmem:[%s27190_s1 + $0x574] sm:$0xf] }
 0x1f5   :  { %4928 = vmatpush.bf16.msrb.mxu1 %v11701_v14  ;;  %v11492_v14 = vld [vmem:[%s27190_s1 + $0x90] sm:$0xf]  ;;  %vm5205_vm7 = vcmp.gt.f32.partialorder %v21659_v5, 0.0 }
 0x1f6   :  { %4966 = vmatpush.bf16.msra.mxu2 %v13001_v12  ;;  %v17288_v12 = vld [vmem:[%s27190_s1 + $0xae8] sm:$0xf0] }
 0x1f7   :  { %4941 = vmatpush.bf16.msrb.mxu3 %v12117_v54  ;;  %v17067_v54 = vld [vmem:[%s27190_s1 + $0x400] sm:$0xf0]  ;;  %v12793_v22 = vor.u32 %v17288_v12, %v12792_v11  ;;  %v11809_v11 = vor.u32 %v17035_v62, %v11806_v63 }
 0x1f8   :  { %4954 = vmatpush.bf16.msra.mxu0 %v12533_v25  ;;  %v21688_v25 = vadd.f32 %v4675_v1, %v4663_v59  ;;  %v4638_v13 = vpop.f32.mrf.mxu3  ;;  %v4664_v58 = vpop.f32.mrf.mxu2  ;;  %v12273_v1 = vor.u32 %v17158_v43, %v12272_v19  ;;  %v17139_v12 = vld [vmem:[%s27190_s1 + $0x644] sm:$0xf] }
 0x1f9   :  { %4929 = vmatpush.bf16.msrb.mxu1 %v11649_v47  ;;  %v11909_v47 = vor.u32 %v17067_v54, %v11908_v18  ;;  %v11754_v18 = vld [vmem:[%s27190_s1 + $0x2cc] sm:$0xf0]  ;;  %v17431_v59 = vld [vmem:[%s27190_s1 + $0xf60] sm:$0xf0]  ;;  %v17522_v13 = vld [vmem:[%s27190_s1 + $0x1238] sm:$0xf0] }
 0x1fa   :  { %4967 = vmatpush.bf16.msra.mxu2 %v12949_v27  ;;  %13955 = vmatmul.msk.bf16.vlgmr.msra.gmra.mxu3 %vm4012_vm0, %v18767_v48  ;;  %v11493_v27 = vor.u32 %v16963_v53, %v11492_v14  ;;  %v12222_v14 = vld [vmem:[%s27190_s1 + $0x674] sm:$0xf0]  ;;  %v17022_v53 = vld [vmem:[%s27190_s1 + $0x29c] sm:$0xf]  ;;  %v13364_v54 = vld [vmem:[%s27190_s1 + $0xf30] sm:$0xf]  ;;  %v13729_v43 = vor.u32 %v17522_v13, %v13728_v35 }
 0x1fb   :  { %4942 = vmatpush.bf16.msrb.mxu3 %v12065_v31  ;;  %v11856_v31 = vld [vmem:[%s27190_s1 + $0x368] sm:$0xf]  ;;  %v12225_v46 = vor.u32 %v17139_v12, %v12222_v14  ;;  %v11757_v23 = vor.u32 %v17022_v53, %v11754_v18  ;;  %v12014_v53 = vld [vmem:[%s27190_s1 + $0x4d4] sm:$0xf0]  ;;  %v16957_v35 = vld [vmem:[%s27190_s1 + $0x94] sm:$0xf] }
 0x1fc   :  { %4955 = vmatpush.bf16.msra.mxu0 %v12481_v41  ;;  %v4677_v41 = vpop.f32.mrf.mxu0 }
 0x1fd   :  { %4930 = vmatpush.bf16.msrb.mxu1 %v11597_v49  ;;  %v11441_v49 = vor.u32 %v16950_v10, %v11440_v30  ;;  %v17009_v30 = vld [vmem:[%s27190_s1 + $0x234] sm:$0xf]  ;;  %v11702_v10 = vld [vmem:[%s27190_s1 + $0x264] sm:$0xf0] }
 0x1fe   :  { %4968 = vmatpush.bf16.msra.mxu2 %v12897_v17  ;;  %v12741_v17 = vor.u32 %v17275_v29, %v12740_v24  ;;  %v17126_v24 = vld [vmem:[%s27190_s1 + $0x5dc] sm:$0xf]  ;;  %v11705_v38 = vor.u32 %v17009_v30, %v11702_v10  ;;  %v12118_v41 = vld [vmem:[%s27190_s1 + $0x5a4] sm:$0xf0] }
 0x1ff   :  { %4943 = vmatpush.bf16.msrb.mxu3 %v12013_v50  ;;  %v11857_v50 = vor.u32 %v17054_v33, %v11856_v31  ;;  %v13312_v31 = vld [vmem:[%s27190_s1 + $0xec8] sm:$0xf]  ;;  %v17418_v33 = vld [vmem:[%s27190_s1 + $0xef8] sm:$0xf0] }
 0x200   :  { %4956 = vmatpush.bf16.msra.mxu0 %v12429_v0  ;;  %v13416_v0 = vld [vmem:[%s27190_s1 + $0xf98] sm:$0xf]  ;;  %v13313_v19 = vor.u32 %v17418_v33, %v13312_v31  ;;  %v17074_v31 = vld [vmem:[%s27190_s1 + $0x43c] sm:$0xf]  ;;  %v11962_v33 = vld [vmem:[%s27190_s1 + $0x46c] sm:$0xf0] }
 0x201   :  { %4931 = vmatpush.bf16.msrb.mxu1 %v11545_v20  ;;  %v12689_v20 = vor.u32 %v17262_v51, %v12688_v45  ;;  %v16996_v45 = vld [vmem:[%s27190_s1 + $0x1cc] sm:$0xf]  ;;  %v13676_v51 = vld [vmem:[%s27190_s1 + $0x11a0] sm:$0xf] }
 0x202   :  { %4969 = vmatpush.bf16.msra.mxu2 %v12845_v2  ;;  %v17444_v2 = vld [vmem:[%s27190_s1 + $0xfc8] sm:$0xf0] }
 0x203   :  { %4944 = vmatpush.bf16.msrb.mxu3 %v11961_v6  ;;  %v13937_v6 = vor.u32 %v17574_v56, %v13936_v52  ;;  %v13417_v15 = vor.u32 %v17444_v2, %v13416_v0  ;;  %v17509_v52 = vld [vmem:[%s27190_s1 + $0x11d0] sm:$0xf0]  ;;  %v12121_v56 = vor.u32 %v17113_v28, %v12118_v41  ;;  %v16983_v0 = vld [vmem:[%s27190_s1 + $0x164] sm:$0xf]  ;;  %v13208_v2 = vld [vmem:[%s27190_s1 + $0xdf8] sm:$0xf] }
 0x204   :  { %4957 = vmatpush.bf16.msra.mxu0 %v12377_v21  ;;  %v13780_v21 = vld [vmem:[%s27190_s1 + $0x1270] sm:$0xf]  ;;  %v13677_v63 = vor.u32 %v17509_v52, %v13676_v51  ;;  %v13104_v28 = vld [vmem:[%s27190_s1 + $0xd28] sm:$0xf]  ;;  %v17366_v41 = vld [vmem:[%s27190_s1 + $0xd58] sm:$0xf0] }
 0x205   :  { %4932 = vmatpush.bf16.msrb.mxu1 %v11493_v27  ;;  %v12170_v27 = vld [vmem:[%s27190_s1 + $0x60c] sm:$0xf0]  ;;  %v4688_v36 = vpop.f32.mrf.mxu1  ;;  %v13054_v51 = vld [vmem:[%s27190_s1 + $0xcf4] sm:$0xf0] }
 0x206   :  { %4970 = vmatpush.bf16.msra.mxu2 %v12793_v22  ;;  %v17535_v22 = vld [vmem:[%s27190_s1 + $0x12a0] sm:$0xf0] }
 0x207   :  { %4945 = vmatpush.bf16.msrb.mxu3 %v11909_v47  ;;  %v13365_v47 = vor.u32 %v17431_v59, %v13364_v54  ;;  %v13781_v29 = vor.u32 %v17535_v22, %v13780_v21  ;;  %v13209_v54 = vor.u32 %v17392_v4, %v13208_v2  ;;  %v16970_v21 = vld [vmem:[%s27190_s1 + $0xfc] sm:$0xf]  ;;  %v11546_v22 = vld [vmem:[%s27190_s1 + $0x12c] sm:$0xf0]  ;;  %v11442_v2 = vld [vmem:[%s27190_s1 + $0x5c] sm:$0xf0] }
 0x208   :  { %4958 = vmatpush.bf16.msra.mxu0 %v12325_v37  ;;  %v12173_v37 = vor.u32 %v17126_v24, %v12170_v27  ;;  %v17379_v24 = vld [vmem:[%s27190_s1 + $0xdc0] sm:$0xf0]  ;;  %v13572_v27 = vld [vmem:[%s27190_s1 + $0x10d0] sm:$0xf]  ;;  %v11549_v10 = vor.u32 %v16970_v21, %v11546_v22 }
 0x209   :  { %4933 = vmatpush.bf16.msrb.mxu1 %v11441_v49  ;;  %v11650_v49 = vld [vmem:[%s27190_s1 + $0x1fc] sm:$0xf0]  ;;  %v17555_v22 = vld [vmem:[%s27190_s1 + $0x1344] sm:$0xf] }
 0x20a   :  { %4971 = vmatpush.bf16.msra.mxu2 %v12741_v17  ;;  %v4689_v17 = vadd.f32 %v4688_v36, %v21688_v25  ;;  %v17405_v25 = vld [vmem:[%s27190_s1 + $0xe90] sm:$0xf0]  ;;  %v11653_v58 = vor.u32 %v16996_v45, %v11650_v49  ;;  %v11965_v49 = vor.u32 %v17074_v31, %v11962_v33  ;;  %v12950_v33 = vld [vmem:[%s27190_s1 + $0xc24] sm:$0xf0] }
 0x20b   :  { %4946 = vmatpush.bf16.msrb.mxu3 %v11857_v50  ;;  %v13260_v50 = vld [vmem:[%s27190_s1 + $0xe60] sm:$0xf]  ;;  %v17321_v31 = vld [vmem:[%s27190_s1 + $0xbf4] sm:$0xf] }
 0x20c   :  { %4959 = vmatpush.bf16.msra.mxu0 %v12273_v1  ;;  %4934 = vmatmul.bf16.vlgmr.msrb.gmra.mxu1 %v18684_v8  ;;  %v13261_v62 = vor.u32 %v17405_v25, %v13260_v50  ;;  %v11598_v1 = vld [vmem:[%s27190_s1 + $0x194] sm:$0xf0]  ;;  %v4727_v3 = vpop.f32.mrf.mxu0  ;;  %v17347_v25 = vld [vmem:[%s27190_s1 + $0xcc4] sm:$0xf] }
 0x20d   :  { %4978 = vmatpush.bf16.msra.mxu1 %v13469_v60  ;;  %v17100_v60 = vld [vmem:[%s27190_s1 + $0x50c] sm:$0xf]  ;;  %v4690_v12 = vpop.f32.mrf.mxu1  ;;  %v4701_v14 = vpop.f32.mrf.mxu3  ;;  %v12638_v50 = vld [vmem:[%s27190_s1 + $0x9b4] sm:$0xf0]  ;;  %v13057_v4 = vor.u32 %v17347_v25, %v13054_v51 }
 0x20e   :  { %4972 = vmatpush.bf16.msra.mxu2 %v12689_v20  ;;  %4947 = vmatmul.bf16.vlgmr.msrb.gmra.mxu3 %v18686_v9  ;;  %v13624_v20 = vld [vmem:[%s27190_s1 + $0x1138] sm:$0xf]  ;;  %v4702_v18 = vadd.f32 %v4701_v14, %v4689_v17  ;;  %v13520_v17 = vld [vmem:[%s27190_s1 + $0x1068] sm:$0xf] }
 0x20f   :  { %4991 = vmatpush.bf16.msra.mxu3 %v13885_v61  ;;  %4960 = vmatmul.bf16.vlgmr.msra.gmra.mxu0 %v18653_v55  ;;  %v12066_v61 = vld [vmem:[%s27190_s1 + $0x53c] sm:$0xf0] }
 0x210   :  { %5011 = vmatpush.bf16.msrb.mxu0 %v13937_v6  ;;  %v17496_v6 = vld [vmem:[%s27190_s1 + $0x1168] sm:$0xf0] }
 0x211   :  { %4979 = vmatpush.bf16.msra.mxu1 %v13417_v15  ;;  %4973 = vmatmul.bf16.vlgmr.msra.gmra.mxu2 %v18658_v57  ;;  %v11601_v15 = vor.u32 %v16983_v0, %v11598_v1  ;;  %v13625_v59 = vor.u32 %v17496_v6, %v13624_v20  ;;  %v16944_v1 = vld [vmem:[%s27190_s1 + $0x2c] sm:$0xf]  ;;  %v17451_v20 = vld [vmem:[%s27190_s1 + $0x1004] sm:$0xf]  ;;  %v13470_v6 = vld [vmem:[%s27190_s1 + $0x1034] sm:$0xf0] }
 0x212   :  { %5017 = vmatpush.bf16.msrb.mxu2 %v11809_v11  ;;  %v12069_v11 = vor.u32 %v17100_v60, %v12066_v61  ;;  %v11910_v60 = vld [vmem:[%s27190_s1 + $0x404] sm:$0xf0]  ;;  %v13473_v21 = vor.u32 %v17451_v20, %v13470_v6 }
 0x213   :  { %4992 = vmatpush.bf16.msra.mxu3 %v13833_v16  ;;  %v17087_v16 = vld [vmem:[%s27190_s1 + $0x4a4] sm:$0xf] }
 0x214   :  { %5030 = vmatpush.bf16.msra.mxu0 %v12225_v46  ;;  %v13156_v46 = vld [vmem:[%s27190_s1 + $0xd90] sm:$0xf]  ;;  %v12017_v30 = vor.u32 %v17087_v16, %v12014_v53  ;;  %v4729_v45 = vpop.f32.mrf.mxu0  ;;  %v17334_v16 = vld [vmem:[%s27190_s1 + $0xc5c] sm:$0xf] }
 0x215   :  { %4980 = vmatpush.bf16.msra.mxu1 %v13365_v47  ;;  %v17483_v47 = vld [vmem:[%s27190_s1 + $0x1100] sm:$0xf0]  ;;  %v4740_v52 = vpop.f32.mrf.mxu1  ;;  %v4703_v61 = vpop.f32.mrf.mxu3  ;;  %v13002_v53 = vld [vmem:[%s27190_s1 + $0xc8c] sm:$0xf0]  ;;  %v12482_v45 = vld [vmem:[%s27190_s1 + $0x87c] sm:$0xf0] }
 0x216   :  { %5018 = vmatpush.bf16.msrb.mxu2 %v11757_v23  ;;  %v4714_v23 = vpop.f32.mrf.mxu2  ;;  %v13573_v36 = vor.u32 %v17483_v47, %v13572_v27  ;;  %v17438_v27 = vld [vmem:[%s27190_s1 + $0xf9c] sm:$0xf]  ;;  %v13418_v47 = vld [vmem:[%s27190_s1 + $0xfcc] sm:$0xf0] }
 0x217   :  { %4993 = vmatpush.bf16.msra.mxu3 %v13781_v29  ;;  %v4715_v29 = vadd.f32 %v4714_v23, %v4702_v18  ;;  %v11445_v18 = vor.u32 %v16944_v1, %v11442_v2  ;;  %v12430_v1 = vld [vmem:[%s27190_s1 + $0x814] sm:$0xf0]  ;;  %v17295_v2 = vld [vmem:[%s27190_s1 + $0xb24] sm:$0xf] }
 0x218   :  { %5031 = vmatpush.bf16.msra.mxu0 %v12173_v37  ;;  %v13157_v37 = vor.u32 %v17379_v24, %v13156_v46  ;;  %v13886_v46 = vld [vmem:[%s27190_s1 + $0x1374] sm:$0xf0]  ;;  %v13005_v24 = vor.u32 %v17334_v16, %v13002_v53 }
 0x219   :  { %4981 = vmatpush.bf16.msra.mxu1 %v13313_v19  ;;  %v4728_v13 = vadd.f32 %v4727_v3, %v4715_v29  ;;  %v17470_v19 = vld [vmem:[%s27190_s1 + $0x1098] sm:$0xf0]  ;;  %v17217_v29 = vld [vmem:[%s27190_s1 + $0x8b4] sm:$0xf]  ;;  %v13262_v53 = vld [vmem:[%s27190_s1 + $0xe94] sm:$0xf0] }
 0x21a   :  { %5019 = vmatpush.bf16.msrb.mxu2 %v11705_v38  ;;  %v11494_v38 = vld [vmem:[%s27190_s1 + $0xc4] sm:$0xf0]  ;;  %v13521_v0 = vor.u32 %v17470_v19, %v13520_v17  ;;  %v17425_v17 = vld [vmem:[%s27190_s1 + $0xf34] sm:$0xf] }
 0x21b   :  { %4994 = vmatpush.bf16.msra.mxu3 %v13729_v43  ;;  %v17243_v43 = vld [vmem:[%s27190_s1 + $0x984] sm:$0xf]  ;;  %v13366_v19 = vld [vmem:[%s27190_s1 + $0xf64] sm:$0xf0] }
 0x21c   :  { %5032 = vmatpush.bf16.msra.mxu0 %v12121_v56  ;;  %v11497_v56 = vor.u32 %v16957_v35, %v11494_v38  ;;  %v12641_v3 = vor.u32 %v17243_v43, %v12638_v50  ;;  %v13889_v35 = vor.u32 %v17555_v22, %v13886_v46  ;;  %v13834_v38 = vld [vmem:[%s27190_s1 + $0x130c] sm:$0xf0]  ;;  %v17204_v43 = vld [vmem:[%s27190_s1 + $0x84c] sm:$0xf]  ;;  %v12898_v50 = vld [vmem:[%s27190_s1 + $0xbbc] sm:$0xf0]  ;;  %v13369_v51 = vor.u32 %v17425_v17, %v13366_v19 }
 0x21d   :  { %4982 = vmatpush.bf16.msra.mxu1 %v13261_v62  ;;  %v21922_v62 = vadd.f32 %v4740_v52, %v4728_v13  ;;  %v4742_v13 = vpop.f32.mrf.mxu1  ;;  %v17529_v52 = vld [vmem:[%s27190_s1 + $0x1274] sm:$0xf]  ;;  %v12794_v22 = vld [vmem:[%s27190_s1 + $0xaec] sm:$0xf0] }
 0x21e   :  { %5020 = vmatpush.bf16.msrb.mxu2 %v11653_v58  ;;  %v17061_v58 = vld [vmem:[%s27190_s1 + $0x3d4] sm:$0xf]  ;;  %v4716_v12 = vpop.f32.mrf.mxu2 }
 0x21f   :  { %4995 = vmatpush.bf16.msra.mxu3 %v13677_v63  ;;  %13956 = vmatmul.msk.bf16.vlgmr.msrb.gmra.mxu0 %vm4012_vm0, %v18767_v48  ;;  %v13105_v63 = vor.u32 %v17366_v41, %v13104_v28  ;;  %v11913_v14 = vor.u32 %v17061_v58, %v11910_v60  ;;  %v12953_v41 = vor.u32 %v17321_v31, %v12950_v33  ;;  %v17412_v58 = vld [vmem:[%s27190_s1 + $0xecc] sm:$0xf]  ;;  %v13730_v12 = vld [vmem:[%s27190_s1 + $0x123c] sm:$0xf0]  ;;  %v17386_v33 = vld [vmem:[%s27190_s1 + $0xdfc] sm:$0xf] }
 0x220   :  { %5033 = vmatpush.bf16.msra.mxu0 %v12069_v11  ;;  %v17230_v11 = vld [vmem:[%s27190_s1 + $0x91c] sm:$0xf]  ;;  %v12485_v60 = vor.u32 %v17204_v43, %v12482_v45  ;;  %v17165_v13 = vld [vmem:[%s27190_s1 + $0x714] sm:$0xf]  ;;  %vm5206_vm8 = vcmp.gt.f32.partialorder %v21922_v62, 0.0 }
 0x221   :  { %4983 = vmatpush.bf16.msra.mxu1 %v13209_v54  ;;  %v17048_v54 = vld [vmem:[%s27190_s1 + $0x36c] sm:$0xf]  ;;  %v17490_v45 = vld [vmem:[%s27190_s1 + $0x113c] sm:$0xf] }
 0x222   :  { %5021 = vmatpush.bf16.msrb.mxu2 %v11601_v15  ;;  %v12586_v15 = vld [vmem:[%s27190_s1 + $0x94c] sm:$0xf0] }
 0x223   :  { %4996 = vmatpush.bf16.msra.mxu3 %v13625_v59  ;;  %v11858_v59 = vld [vmem:[%s27190_s1 + $0x39c] sm:$0xf0]  ;;  %v12589_v23 = vor.u32 %v17230_v11, %v12586_v15  ;;  %v17516_v11 = vld [vmem:[%s27190_s1 + $0x120c] sm:$0xf] }
 0x224   :  { %5034 = vmatpush.bf16.msra.mxu0 %v12017_v30  ;;  %v11861_v30 = vor.u32 %v17048_v54, %v11858_v59  ;;  %v12378_v59 = vld [vmem:[%s27190_s1 + $0x7ac] sm:$0xf0] }
 0x225   :  { %4984 = vmatpush.bf16.msra.mxu1 %v13157_v37  ;;  %v13421_v37 = vor.u32 %v17438_v27, %v13418_v47  ;;  %v17503_v47 = vld [vmem:[%s27190_s1 + $0x11a4] sm:$0xf] }
 0x226   :  { %5022 = vmatpush.bf16.msrb.mxu2 %v11549_v10  ;;  %v12534_v10 = vld [vmem:[%s27190_s1 + $0x8e4] sm:$0xf0] }
 0x227   :  { %4997 = vmatpush.bf16.msra.mxu3 %v13573_v36  ;;  %v17542_v36 = vld [vmem:[%s27190_s1 + $0x12dc] sm:$0xf]  ;;  %v12537_v28 = vor.u32 %v17217_v29, %v12534_v10  ;;  %v13678_v29 = vld [vmem:[%s27190_s1 + $0x11d4] sm:$0xf0] }
 0x228   :  { %5035 = vmatpush.bf16.msra.mxu0 %v11965_v49  ;;  %v17308_v49 = vld [vmem:[%s27190_s1 + $0xb8c] sm:$0xf]  ;;  %v13837_v25 = vor.u32 %v17542_v36, %v13834_v38  ;;  %v12326_v38 = vld [vmem:[%s27190_s1 + $0x744] sm:$0xf0]  ;;  %v13681_v17 = vor.u32 %v17503_v47, %v13678_v29  ;;  %v17250_v29 = vld [vmem:[%s27190_s1 + $0x9b8] sm:$0xf0] }
 0x229   :  { %4985 = vmatpush.bf16.msra.mxu1 %v13105_v63  ;;  %v12901_v61 = vor.u32 %v17308_v49, %v12898_v50  ;;  %v13314_v63 = vld [vmem:[%s27190_s1 + $0xefc] sm:$0xf0]  ;;  %v4766_v46 = vpop.f32.mrf.mxu1  ;;  %v13626_v49 = vld [vmem:[%s27190_s1 + $0x116c] sm:$0xf0]  ;;  %v17373_v50 = vld [vmem:[%s27190_s1 + $0xd94] sm:$0xf] }
 0x22a   :  { %5023 = vmatpush.bf16.msrb.mxu2 %v11497_v56  ;;  %v13782_v56 = vld [vmem:[%s27190_s1 + $0x12a4] sm:$0xf0]  ;;  %v13317_v6 = vor.u32 %v17412_v58, %v13314_v63  ;;  %v12274_v58 = vld [vmem:[%s27190_s1 + $0x6dc] sm:$0xf0] }
 0x22b   :  { %4998 = vmatpush.bf16.msra.mxu3 %v13521_v0  ;;  %v17191_v0 = vld [vmem:[%s27190_s1 + $0x7e4] sm:$0xf]  ;;  %v13785_v20 = vor.u32 %v17529_v52, %v13782_v56  ;;  %v13158_v52 = vld [vmem:[%s27190_s1 + $0xdc4] sm:$0xf0]  ;;  %v17152_v56 = vld [vmem:[%s27190_s1 + $0x6ac] sm:$0xf] }
 0x22c   :  { %5036 = vmatpush.bf16.msra.mxu0 %v11913_v14  ;;  %4986 = vmatmul.bf16.vlgmr.msra.gmra.mxu1 %v18855_v34  ;;  %v17399_v14 = vld [vmem:[%s27190_s1 + $0xe64] sm:$0xf]  ;;  %v12433_v15 = vor.u32 %v17191_v0, %v12430_v1  ;;  %v12690_v63 = vld [vmem:[%s27190_s1 + $0xa1c] sm:$0xf0]  ;;  %v11812_v0 = vld [vmem:[%s27190_s1 + $0x308] sm:$0xf] }
 0x22d   :  { %5043 = vmatpush.bf16.msrb.mxu1 %v12641_v3  ;;  %v12846_v3 = vld [vmem:[%s27190_s1 + $0xb54] sm:$0xf0]  ;;  %v13265_v27 = vor.u32 %v17399_v14, %v13262_v53  ;;  %v13161_v14 = vor.u32 %v17373_v50, %v13158_v52  ;;  %v12644_v47 = vld [vmem:[%s27190_s1 + $0x988] sm:$0xf] }
 0x22e   :  { %4999 = vmatmul.bf16.vlgmr.msra.gmra.mxu3 %v18866_v39  ;;  %5024 = vmatpush.bf16.msrb.mxu2 %v11445_v18  ;;  %v12849_v16 = vor.u32 %v17295_v2, %v12846_v3  ;;  %v17178_v18 = vld [vmem:[%s27190_s1 + $0x77c] sm:$0xf]  ;;  %v13629_v3 = vor.u32 %v17490_v45, %v13626_v49 }
 0x22f   :  { %5056 = vmatpush.bf16.msrb.mxu3 %v13057_v4  ;;  %v22032_v4 = vld [vmem:[%s27191_s2 + $0x8] sm:$0x1f]  ;;  %v12381_v10 = vor.u32 %v17178_v18, %v12378_v59  ;;  %v12277_v18 = vor.u32 %v17152_v56, %v12274_v58  ;;  %v13008_v58 = vld [vmem:[%s27190_s1 + $0xc60] sm:$0xf] }
 0x230   :  { %5037 = vmatpush.bf16.msra.mxu0 %v11861_v30  ;;  %v736_v54 = vperm.slane %v22032_v4, 0  ;;  %v4753_v30 = vpop.f32.mrf.mxu3  ;;  %v4779_v36 = vpop.f32.mrf.mxu2  ;;  %v17360_v59 = vld [vmem:[%s27190_s1 + $0xd2c] sm:$0xf] }
 0x231   :  { %5044 = vmatpush.bf16.msrb.mxu1 %v12589_v23  ;;  %5025 = vmatmul.bf16.vlgmr.msrb.gmra.mxu2 %v18684_v8  ;;  %v4792_v23 = vpop.f32.mrf.mxu0  ;;  %v4768_v1 = vpop.f32.mrf.mxu1 }
 0x232   :  { %5069 = vmatpush.bf16.msra.mxu2 %v13473_v21  ;;  %v17282_v21 = vld [vmem:[%s27190_s1 + $0xabc] sm:$0xf]  ;;  %v17224_v1 = vld [vmem:[%s27190_s1 + $0x8e8] sm:$0xf0] }
 0x233   :  { %5057 = vmatpush.bf16.msrb.mxu3 %v13005_v24  ;;  %5038 = vmatmul.bf16.vlgmr.msra.gmra.mxu0 %v18686_v9  ;;  %v13733_v24 = vor.u32 %v17516_v11, %v13730_v12  ;;  %v12797_v31 = vor.u32 %v17282_v21, %v12794_v22  ;;  %v13938_v11 = vld [vmem:[%s27190_s1 + $0x13dc] sm:$0xf0]  ;;  %v12228_v22 = vld [vmem:[%s27190_s1 + $0x648] sm:$0xf] }
 0x234   :  { %5082 = vmatpush.bf16.msrb.mxu0 %v13889_v35  ;;  %v13210_v35 = vld [vmem:[%s27190_s1 + $0xe2c] sm:$0xf0]  ;;  %v13106_v21 = vld [vmem:[%s27190_s1 + $0xd5c] sm:$0xf0] }
 0x235   :  { %5045 = vmatpush.bf16.msrb.mxu1 %v12537_v28  ;;  %v17269_v28 = vld [vmem:[%s27190_s1 + $0xa54] sm:$0xf]  ;;  %v13213_v43 = vor.u32 %v17386_v33, %v13210_v35  ;;  %v17464_v35 = vld [vmem:[%s27190_s1 + $0x106c] sm:$0xf] }
 0x236   :  { %5070 = vmatpush.bf16.msra.mxu2 %v13421_v37  ;;  %v4754_v37 = vadd.f32 %v4753_v30, %v736_v54  ;;  %v17029_v33 = vld [vmem:[%s27190_s1 + $0x2d0] sm:$0xf0] }
 0x237   :  { %5058 = vmatpush.bf16.msrb.mxu3 %v12953_v41  ;;  %v12742_v41 = vld [vmem:[%s27190_s1 + $0xa84] sm:$0xf0] }
 0x238   :  { %5083 = vmatpush.bf16.msrb.mxu0 %v13837_v25  ;;  %v4767_v19 = vadd.f32 %v4766_v46, %v4754_v37  ;;  %v12329_v25 = vor.u32 %v17165_v13, %v12326_v38  ;;  %v4755_v53 = vpop.f32.mrf.mxu3  ;;  %v13522_v13 = vld [vmem:[%s27190_s1 + $0x109c] sm:$0xf0]  ;;  %v13060_v38 = vld [vmem:[%s27190_s1 + $0xcc8] sm:$0xf] }
 0x239   :  { %5046 = vmatpush.bf16.msrb.mxu1 %v12485_v60  ;;  %v4794_v2 = vpop.f32.mrf.mxu0  ;;  %v13525_v49 = vor.u32 %v17464_v35, %v13522_v13  ;;  %v17328_v53 = vld [vmem:[%s27190_s1 + $0xc28] sm:$0xf0]  ;;  %v17198_v35 = vld [vmem:[%s27190_s1 + $0x818] sm:$0xf0] }
 0x23a   :  { %5071 = vmatpush.bf16.msra.mxu2 %v13369_v51  ;;  %v12745_v51 = vor.u32 %v17269_v28, %v12742_v41  ;;  %v4780_v60 = vadd.f32 %v4779_v36, %v4767_v19  ;;  %v12645_v36 = vor.u32 %v17250_v29, %v12644_v47  ;;  %v17354_v28 = vld [vmem:[%s27190_s1 + $0xcf8] sm:$0xf0]  ;;  %v12176_v41 = vld [vmem:[%s27190_s1 + $0x5e0] sm:$0xf]  ;;  %v12904_v29 = vld [vmem:[%s27190_s1 + $0xb90] sm:$0xf] }
 0x23b   :  { %5059 = vmatpush.bf16.msrb.mxu3 %v12901_v61  ;;  %v17256_v61 = vld [vmem:[%s27190_s1 + $0x9ec] sm:$0xf]  ;;  %v12592_v19 = vld [vmem:[%s27190_s1 + $0x920] sm:$0xf]  ;;  %v13061_v50 = vor.u32 %v17354_v28, %v13060_v38  ;;  %v737_v38 = vperm.slane %v22032_v4, 1 }
 0x23c   :  { %5084 = vmatpush.bf16.msrb.mxu0 %v13785_v20  ;;  %v17042_v20 = vld [vmem:[%s27190_s1 + $0x338] sm:$0xf0]  ;;  %v22120_v12 = vadd.f32 %v4792_v23, %v4780_v60  ;;  %v12693_v54 = vor.u32 %v17256_v61, %v12690_v63  ;;  %v17341_v60 = vld [vmem:[%s27190_s1 + $0xc90] sm:$0xf0]  ;;  %v12124_v61 = vld [vmem:[%s27190_s1 + $0x578] sm:$0xf] }
 0x23d   :  { %5047 = vmatpush.bf16.msrb.mxu1 %v12433_v15  ;;  %v17477_v15 = vld [vmem:[%s27190_s1 + $0x10d4] sm:$0xf]  ;;  %v11813_v46 = vor.u32 %v17042_v20, %v11812_v0  ;;  %v17120_v63 = vld [vmem:[%s27190_s1 + $0x5a8] sm:$0xf0]  ;;  %v12540_v0 = vld [vmem:[%s27190_s1 + $0x8b8] sm:$0xf]  ;;  %v13009_v20 = vor.u32 %v17341_v60, %v13008_v58 }
 0x23e   :  { %5072 = vmatpush.bf16.msra.mxu2 %v13317_v6  ;;  %v17568_v6 = vld [vmem:[%s27190_s1 + $0x13ac] sm:$0xf]  ;;  %v12852_v4 = vld [vmem:[%s27190_s1 + $0xb28] sm:$0xf] }
 0x23f   :  { %5060 = vmatpush.bf16.msrb.mxu3 %v12849_v16  ;;  %v13574_v16 = vld [vmem:[%s27190_s1 + $0x1104] sm:$0xf0]  ;;  %v13941_v23 = vor.u32 %v17568_v6, %v13938_v11  ;;  %v11656_v6 = vld [vmem:[%s27190_s1 + $0x1d0] sm:$0xf]  ;;  %v17003_v11 = vld [vmem:[%s27190_s1 + $0x200] sm:$0xf0] }
 0x240   :  { %5085 = vmatpush.bf16.msrb.mxu0 %v13733_v24  ;;  %v4781_v24 = vpop.f32.mrf.mxu2  ;;  %v13577_v30 = vor.u32 %v17477_v15, %v13574_v16  ;;  %v12541_v15 = vor.u32 %v17224_v1, %v12540_v0  ;;  %v12956_v16 = vld [vmem:[%s27190_s1 + $0xbf8] sm:$0xf]  ;;  %v16964_v1 = vld [vmem:[%s27190_s1 + $0xc8] sm:$0xf0] }
 0x241   :  { %5048 = vmatpush.bf16.msrb.mxu1 %v12381_v10  ;;  %v11760_v10 = vld [vmem:[%s27190_s1 + $0x2a0] sm:$0xf]  ;;  %v16990_v24 = vld [vmem:[%s27190_s1 + $0x198] sm:$0xf0]  ;;  %v11500_v0 = vld [vmem:[%s27190_s1 + $0x98] sm:$0xf] }
 0x242   :  { %5073 = vmatpush.bf16.msra.mxu2 %v13265_v27  ;;  %v17146_v27 = vld [vmem:[%s27190_s1 + $0x678] sm:$0xf0]  ;;  %v11761_v45 = vor.u32 %v17029_v33, %v11760_v10  ;;  %v12020_v10 = vld [vmem:[%s27190_s1 + $0x4a8] sm:$0xf] }
 0x243   :  { %5061 = vmatpush.bf16.msrb.mxu3 %v12797_v31  ;;  %v13109_v31 = vor.u32 %v17360_v59, %v13106_v21  ;;  %v12229_v37 = vor.u32 %v17146_v27, %v12228_v22  ;;  %v12488_v59 = vld [vmem:[%s27190_s1 + $0x850] sm:$0xf]  ;;  %v17211_v21 = vld [vmem:[%s27190_s1 + $0x880] sm:$0xf0]  ;;  %v11657_v22 = vor.u32 %v17003_v11, %v11656_v6  ;;  %v12436_v33 = vld [vmem:[%s27190_s1 + $0x7e8] sm:$0xf] }
 0x244   :  { %5086 = vmatpush.bf16.msrb.mxu0 %v13681_v17  ;;  %v17133_v17 = vld [vmem:[%s27190_s1 + $0x610] sm:$0xf0]  ;;  %v12489_v47 = vor.u32 %v17211_v21, %v12488_v59  ;;  %v12800_v11 = vld [vmem:[%s27190_s1 + $0xac0] sm:$0xf]  ;;  %v11448_v59 = vld [vmem:[%s27190_s1 + $0x30] sm:$0xf] }
 0x245   :  { %5049 = vmatpush.bf16.msrb.mxu1 %v12329_v25  ;;  %v11708_v25 = vld [vmem:[%s27190_s1 + $0x238] sm:$0xf]  ;;  %v12177_v52 = vor.u32 %v17133_v17, %v12176_v41  ;;  %v16951_v21 = vld [vmem:[%s27190_s1 + $0x60] sm:$0xf0] }
 0x246   :  { %5074 = vmatpush.bf16.msra.mxu2 %v13213_v43  ;;  %v17237_v43 = vld [vmem:[%s27190_s1 + $0x950] sm:$0xf0] }
 0x247   :  { %5062 = vmatpush.bf16.msrb.mxu3 %v12745_v51  ;;  %v17016_v51 = vld [vmem:[%s27190_s1 + $0x268] sm:$0xf0]  ;;  %v12593_v56 = vor.u32 %v17237_v43, %v12592_v19  ;;  %v11552_v19 = vld [vmem:[%s27190_s1 + $0x100] sm:$0xf]  ;;  %v16977_v43 = vld [vmem:[%s27190_s1 + $0x130] sm:$0xf0] }
 0x248   :  { %5087 = vmatpush.bf16.msrb.mxu0 %v13629_v3  ;;  %v22202_v2 = vpop.f32.mrf.mxu2  ;;  %v11709_v3 = vor.u32 %v17016_v51, %v11708_v25  ;;  %v17302_v25 = vld [vmem:[%s27190_s1 + $0xb58] sm:$0xf0]  ;;  %v11968_v51 = vld [vmem:[%s27190_s1 + $0x440] sm:$0xf]  ;;  %v11553_v60 = vor.u32 %v16977_v43, %v11552_v19  ;;  %v17575_v19 = vld [vmem:[%s27190_s1 + $0x13e0] sm:$0xf0] }
 0x249   :  { %5050 = vmatpush.bf16.msrb.mxu1 %v12277_v18  ;;  %v12072_v18 = vld [vmem:[%s27190_s1 + $0x510] sm:$0xf] }
 0x24a   :  { %5075 = vmatpush.bf16.msra.mxu2 %v13161_v14  ;;  %v12125_v14 = vor.u32 %v17120_v63, %v12124_v61  ;;  %v12853_v63 = vor.u32 %v17302_v25, %v12852_v4  ;;  %v17445_v25 = vld [vmem:[%s27190_s1 + $0xfd0] sm:$0xf0] }
 0x24b   :  { %5063 = vmatpush.bf16.msrb.mxu3 %v12693_v54  ;;  %v17107_v54 = vld [vmem:[%s27190_s1 + $0x540] sm:$0xf0] }
 0x24c   :  { %5088 = vmatpush.bf16.msrb.mxu0 %v13577_v30  ;;  %5051 = vmatmul.bf16.vlgmr.msrb.gmra.mxu1 %v18653_v55  ;;  %v12073_v27 = vor.u32 %v17107_v54, %v12072_v18  ;;  %v17315_v30 = vld [vmem:[%s27190_s1 + $0xbc0] sm:$0xf0]  ;;  %v4844_v28 = vpop.f32.mrf.mxu0  ;;  %v11501_v54 = vor.u32 %v16964_v1, %v11500_v0  ;;  %v13840_v1 = vld [vmem:[%s27190_s1 + $0x12e0] sm:$0xf] }
 0x24d   :  { %5102 = vmatpush.bf16.msra.mxu1 %v13941_v23  ;;  %v11604_v23 = vld [vmem:[%s27190_s1 + $0x168] sm:$0xf]  ;;  %v4805_v41 = vpop.f32.mrf.mxu3  ;;  %v12905_v17 = vor.u32 %v17315_v30, %v12904_v29  ;;  %v4845_v61 = vadd.f32 %v4844_v28, %v737_v38  ;;  %v17458_v29 = vld [vmem:[%s27190_s1 + $0x1038] sm:$0xf0]  ;;  %v12748_v30 = vld [vmem:[%s27190_s1 + $0xa58] sm:$0xf]  ;;  %v11449_v28 = vor.u32 %v16951_v21, %v11448_v59 }
 0x24e   :  { %5076 = vmatpush.bf16.msra.mxu2 %v13109_v31  ;;  %5064 = vmatmul.bf16.vlgmr.msrb.gmra.mxu3 %v18658_v57  ;;  %v17094_v31 = vld [vmem:[%s27190_s1 + $0x4d8] sm:$0xf0]  ;;  %v13892_v38 = vld [vmem:[%s27190_s1 + $0x1348] sm:$0xf]  ;;  %v17628_v0 = vld [vmem:[%s27192_s3 + $0x1a0] sm:$0xf0] }
 0x24f   :  { %5108 = vmatpush.bf16.msra.mxu3 %v11813_v46  ;;  %v12957_v46 = vor.u32 %v17328_v53, %v12956_v16  ;;  %v12332_v16 = vld [vmem:[%s27190_s1 + $0x718] sm:$0xf]  ;;  %v17172_v53 = vld [vmem:[%s27190_s1 + $0x748] sm:$0xf0] }
 0x250   :  { %5089 = vmatpush.bf16.msrb.mxu0 %v13525_v49  ;;  %v4833_v13 = vpop.f32.mrf.mxu2  ;;  %v12021_v49 = vor.u32 %v17094_v31, %v12020_v10  ;;  %v12333_v31 = vor.u32 %v17172_v53, %v12332_v16  ;;  %v17677_v59 = vld [vmem:[%s27192_s3 + $0x328] sm:$0xf0] }
 0x251   :  { %5121 = vmatpush.bf16.msrb.mxu1 %v12229_v37  ;;  %5077 = vmatmul.bf16.vlgmr.msra.gmra.mxu2 %v18855_v34  ;;  %v4818_v37 = vpop.f32.mrf.mxu1  ;;  %v17055_v13 = vld [vmem:[%s27190_s1 + $0x3a0] sm:$0xf0]  ;;  %v17621_v21 = vld [vmem:[%s27192_s3 + $0x168] sm:$0xf0] }
 0x252   :  { %5134 = vmatpush.bf16.msrb.mxu2 %v12645_v36  ;;  %v11605_v36 = vor.u32 %v16990_v24, %v11604_v23 }
 0x253   :  { %5109 = vmatpush.bf16.msra.mxu3 %v11761_v45  ;;  %5090 = vmatmul.bf16.vlgmr.msrb.gmra.mxu0 %v18866_v39  ;;  %v4806_v45 = vadd.f32 %v4805_v41, %v22120_v12  ;;  %v17081_v12 = vld [vmem:[%s27190_s1 + $0x470] sm:$0xf0]  ;;  %v17562_v41 = vld [vmem:[%s27190_s1 + $0x1378] sm:$0xf0] }
 0x254   :  { %5147 = vmatpush.bf16.msra.mxu0 %v13061_v50  ;;  %v12437_v50 = vor.u32 %v17198_v35, %v12436_v33  ;;  %v4846_v23 = vpop.f32.mrf.mxu0  ;;  %v17276_v33 = vld [vmem:[%s27190_s1 + $0xa88] sm:$0xf0]  ;;  %v11864_v35 = vld [vmem:[%s27190_s1 + $0x370] sm:$0xf] }
 0x255   :  { %5122 = vmatpush.bf16.msrb.mxu1 %v12177_v52  ;;  %v12384_v52 = vld [vmem:[%s27190_s1 + $0x780] sm:$0xf]  ;;  %v4819_v58 = vadd.f32 %v4818_v37, %v4806_v45  ;;  %v12280_v37 = vld [vmem:[%s27190_s1 + $0x6b0] sm:$0xf]  ;;  %v12749_v45 = vor.u32 %v17276_v33, %v12748_v30  ;;  %v17536_v23 = vld [vmem:[%s27190_s1 + $0x12a8] sm:$0xf0] }
 0x256   :  { %5135 = vmatpush.bf16.msrb.mxu2 %v12593_v56  ;;  %v17185_v56 = vld [vmem:[%s27190_s1 + $0x7b0] sm:$0xf0] }
 0x257   :  { %5110 = vmatpush.bf16.msra.mxu3 %v11709_v3  ;;  %v22289_v3 = vadd.f32 %v22202_v2, %v4819_v58  ;;  %v12385_v6 = vor.u32 %v17185_v56, %v12384_v52  ;;  %v17068_v2 = vld [vmem:[%s27190_s1 + $0x408] sm:$0xf0]  ;;  %v13893_v52 = vor.u32 %v17562_v41, %v13892_v38  ;;  %v14157_v58 = vld [vmem:[%s27192_s3 + $0x188] sm:$0xf]  ;;  %v17614_v33 = vld [vmem:[%s27192_s3 + $0x130] sm:$0xf0] }
 0x258   :  { %5148 = vmatpush.bf16.msra.mxu0 %v13009_v20  ;;  %v11969_v20 = vor.u32 %v17081_v12, %v11968_v51  ;;  %v4857_v18 = vpop.f32.mrf.mxu2  ;;  %v12696_v51 = vld [vmem:[%s27190_s1 + $0x9f0] sm:$0xf]  ;;  %v17263_v12 = vld [vmem:[%s27190_s1 + $0xa20] sm:$0xf0]  ;;  %v14158_v16 = vor.u32 %v17628_v0, %v14157_v58  ;;  %v13268_v38 = vld [vmem:[%s27190_s1 + $0xe68] sm:$0xf] }
 0x259   :  { %5123 = vmatpush.bf16.msrb.mxu1 %v12125_v14  ;;  %v17289_v14 = vld [vmem:[%s27190_s1 + $0xaf0] sm:$0xf0]  ;;  %v14269_v0 = vld [vmem:[%s27192_s3 + $0x268] sm:$0xf]  ;;  %vm5207_vm9 = vcmp.gt.f32.partialorder %v22289_v3, 0.0 }
 0x25a   :  { %5136 = vmatpush.bf16.msrb.mxu2 %v12541_v15  ;;  %v11916_v15 = vld [vmem:[%s27190_s1 + $0x3d8] sm:$0xf]  ;;  %v12801_v24 = vor.u32 %v17289_v14, %v12800_v11  ;;  %v12697_v11 = vor.u32 %v17263_v12, %v12696_v51 }
 0x25b   :  { %5111 = vmatpush.bf16.msra.mxu3 %v11657_v22  ;;  %v22315_v22 = vadd.f32 %v4857_v18, %v4845_v61  ;;  %v11917_v10 = vor.u32 %v17068_v2, %v11916_v15  ;;  %v17684_v61 = vld [vmem:[%s27192_s3 + $0x360] sm:$0xf0]  ;;  %v13372_v15 = vld [vmem:[%s27190_s1 + $0xf38] sm:$0xf]  ;;  %v17432_v2 = vld [vmem:[%s27190_s1 + $0xf68] sm:$0xf0] }
 0x25c   :  { %5149 = vmatpush.bf16.msra.mxu0 %v12957_v46  ;;  %13957 = vmatmul.msk.bf16.vlgmr.msra.gmra.mxu1 %vm4012_vm0, %v18767_v48  ;;  %v4820_v46 = vpop.f32.mrf.mxu1  ;;  %v14129_v18 = vld [vmem:[%s27192_s3 + $0x150] sm:$0xf] }
 0x25d   :  { %5124 = vmatpush.bf16.msrb.mxu1 %v12073_v27  ;;  %v4807_v27 = vpop.f32.mrf.mxu3  ;;  %v13788_v46 = vld [vmem:[%s27190_s1 + $0x1278] sm:$0xf] }
 0x25e   :  { %5137 = vmatpush.bf16.msrb.mxu2 %v12489_v47  ;;  %v13476_v47 = vld [vmem:[%s27190_s1 + $0x1008] sm:$0xf]  ;;  %v13789_v30 = vor.u32 %v17536_v23, %v13788_v46  ;;  %v14241_v46 = vld [vmem:[%s27192_s3 + $0x230] sm:$0xf]  ;;  %v17649_v23 = vld [vmem:[%s27192_s3 + $0x248] sm:$0xf0] }
 0x25f   :  { %5112 = vmatpush.bf16.msra.mxu3 %v11605_v36  ;;  %v17159_v36 = vld [vmem:[%s27190_s1 + $0x6e0] sm:$0xf0]  ;;  %v13477_v43 = vor.u32 %v17458_v29, %v13476_v47  ;;  %v14130_v29 = vor.u32 %v17621_v21, %v14129_v18  ;;  %v14017_v21 = vld [vmem:[%s27192_s3 + $0x70] sm:$0xf] }
 0x260   :  { %5150 = vmatpush.bf16.msra.mxu0 %v12905_v17  ;;  %v13944_v17 = vld [vmem:[%s27190_s1 + $0x13b0] sm:$0xf]  ;;  %v12281_v4 = vor.u32 %v17159_v36, %v12280_v37  ;;  %v17419_v47 = vld [vmem:[%s27190_s1 + $0xf00] sm:$0xf0] }
 0x261   :  { %5125 = vmatpush.bf16.msrb.mxu1 %v12021_v49  ;;  %v13424_v49 = vld [vmem:[%s27190_s1 + $0xfa0] sm:$0xf]  ;;  %v13945_v56 = vor.u32 %v17575_v19, %v13944_v17 }
 0x262   :  { %5138 = vmatpush.bf16.msrb.mxu2 %v12437_v50  ;;  %v11865_v50 = vor.u32 %v17055_v13, %v11864_v35  ;;  %v13736_v35 = vld [vmem:[%s27190_s1 + $0x1210] sm:$0xf]  ;;  %v17523_v13 = vld [vmem:[%s27190_s1 + $0x1240] sm:$0xf0]  ;;  %v14073_v19 = vld [vmem:[%s27192_s3 + $0xe0] sm:$0xf] }
 0x263   :  { %5113 = vmatpush.bf16.msra.mxu3 %v11553_v60  ;;  %v14381_v60 = vld [vmem:[%s27192_s3 + $0x348] sm:$0xf]  ;;  %v13737_v17 = vor.u32 %v17523_v13, %v13736_v35  ;;  %v17367_v35 = vld [vmem:[%s27190_s1 + $0xd60] sm:$0xf0] }
 0x264   :  { %5151 = vmatpush.bf16.msra.mxu0 %v12853_v63  ;;  %v4859_v63 = vpop.f32.mrf.mxu2  ;;  %v14382_v14 = vor.u32 %v17684_v61, %v14381_v60  ;;  %v14605_v13 = vld [vmem:[%s27192_s3 + $0x508] sm:$0xf] }
 0x265   :  { %5126 = vmatpush.bf16.msrb.mxu1 %v11969_v20  ;;  %v17549_v20 = vld [vmem:[%s27190_s1 + $0x1310] sm:$0xf0]  ;;  %v14045_v63 = vld [vmem:[%s27192_s3 + $0xa8] sm:$0xf] }
 0x266   :  { %5139 = vmatpush.bf16.msrb.mxu2 %v12385_v6  ;;  %v13425_v6 = vor.u32 %v17445_v25, %v13424_v49  ;;  %v13841_v53 = vor.u32 %v17549_v20, %v13840_v1  ;;  %v13684_v49 = vld [vmem:[%s27190_s1 + $0x11a8] sm:$0xf]  ;;  %v17656_v1 = vld [vmem:[%s27192_s3 + $0x280] sm:$0xf0]  ;;  %v13632_v20 = vld [vmem:[%s27190_s1 + $0x1140] sm:$0xf] }
 0x267   :  { %5114 = vmatpush.bf16.msra.mxu3 %v11501_v54  ;;  %v14353_v54 = vld [vmem:[%s27192_s3 + $0x310] sm:$0xf] }
 0x268   :  { %5152 = vmatpush.bf16.msra.mxu0 %v12801_v24  ;;  %v13373_v24 = vor.u32 %v17432_v2, %v13372_v15  ;;  %v14354_v27 = vor.u32 %v17677_v59, %v14353_v54  ;;  %v14270_v15 = vor.u32 %v17656_v1, %v14269_v0  ;;  %v13164_v2 = vld [vmem:[%s27190_s1 + $0xd98] sm:$0xf]  ;;  %v17635_v0 = vld [vmem:[%s27192_s3 + $0x1d8] sm:$0xf0]  ;;  %v15053_v1 = vld [vmem:[%s27192_s3 + $0x888] sm:$0xf] }
 0x269   :  { %5127 = vmatpush.bf16.msrb.mxu1 %v11917_v10  ;;  %v14325_v10 = vld [vmem:[%s27192_s3 + $0x2d8] sm:$0xf] }
 0x26a   :  { %5140 = vmatpush.bf16.msrb.mxu2 %v12333_v31  ;;  %v17670_v31 = vld [vmem:[%s27192_s3 + $0x2f0] sm:$0xf0] }
 0x26b   :  { %5115 = vmatpush.bf16.msra.mxu3 %v11449_v28  ;;  %v14326_v36 = vor.u32 %v17670_v31, %v14325_v10  ;;  %v4883_v28 = vpop.f32.mrf.mxu1 }
 0x26c   :  { %5153 = vmatpush.bf16.msra.mxu0 %v12749_v45  ;;  %v17607_v45 = vld [vmem:[%s27192_s3 + $0xf8] sm:$0xf0]  ;;  %v4896_v25 = vpop.f32.mrf.mxu0 }
 0x26d   :  { %5128 = vmatpush.bf16.msrb.mxu1 %v11865_v50  ;;  %v17510_v50 = vld [vmem:[%s27190_s1 + $0x11d8] sm:$0xf0]  ;;  %v4870_v51 = vpop.f32.mrf.mxu3  ;;  %v14074_v60 = vor.u32 %v17607_v45, %v14073_v19  ;;  %v17471_v19 = vld [vmem:[%s27190_s1 + $0x10a0] sm:$0xf0] }
 0x26e   :  { %5141 = vmatpush.bf16.msrb.mxu2 %v12281_v4  ;;  %5116 = vmatmul.bf16.vlgmr.msra.gmra.mxu3 %v18684_v8  ;;  %v13320_v8 = vld [vmem:[%s27190_s1 + $0xed0] sm:$0xf]  ;;  %v4871_v58 = vadd.f32 %v4870_v51, %v22315_v22  ;;  %v13685_v61 = vor.u32 %v17510_v50, %v13684_v49  ;;  %v17600_v22 = vld [vmem:[%s27192_s3 + $0xc0] sm:$0xf0]  ;;  %v5212_v49 = vmul.f32 0.01, %v19774_v42 }
 0x26f   :  { %5160 = vmatpush.bf16.msrb.mxu3 %v13477_v43  ;;  %v13321_v37 = vor.u32 %v17419_v47, %v13320_v8  ;;  %v17663_v43 = vld [vmem:[%s27192_s3 + $0x2b8] sm:$0xf0]  ;;  %v14046_v54 = vor.u32 %v17600_v22, %v14045_v63  ;;  %v13580_v8 = vld [vmem:[%s27190_s1 + $0x10d8] sm:$0xf]  ;;  %v17484_v47 = vld [vmem:[%s27190_s1 + $0x1108] sm:$0xf0] }
 0x270   :  { %5154 = vmatpush.bf16.msra.mxu0 %v12697_v11  ;;  %5129 = vmatmul.bf16.vlgmr.msrb.gmra.mxu1 %v18686_v9  ;;  %v17406_v9 = vld [vmem:[%s27190_s1 + $0xe98] sm:$0xf0]  ;;  %v4884_v11 = vadd.f32 %v4883_v28, %v4871_v58  ;;  %v17642_v28 = vld [vmem:[%s27192_s3 + $0x210] sm:$0xf0]  ;;  %v17796_v45 = vld [vmem:[%s27192_s3 + $0x6e0] sm:$0xf0] }
 0x271   :  { %5173 = vmatpush.bf16.msra.mxu1 %v13893_v52  ;;  %5142 = vmatmul.bf16.vlgmr.msrb.gmra.mxu2 %v18653_v55  ;;  %v14101_v55 = vld [vmem:[%s27192_s3 + $0x118] sm:$0xf]  ;;  %v13269_v4 = vor.u32 %v17406_v9, %v13268_v38  ;;  %v13216_v52 = vld [vmem:[%s27190_s1 + $0xe00] sm:$0xf]  ;;  %v5213_v50 = vmul.f32 0.01, %v20073_v40 }
 0x272   :  { %5193 = vmatpush.bf16.msra.mxu2 %v13945_v56  ;;  %v14102_v41 = vor.u32 %v17614_v33, %v14101_v55  ;;  %v17393_v56 = vld [vmem:[%s27190_s1 + $0xe30] sm:$0xf0]  ;;  %v4897_v18 = vadd.f32 %v4896_v25, %v4884_v11  ;;  %v13112_v55 = vld [vmem:[%s27190_s1 + $0xd30] sm:$0xf]  ;;  %v14242_v33 = vor.u32 %v17649_v23, %v14241_v46  ;;  %v13989_v38 = vld [vmem:[%s27192_s3 + $0x38] sm:$0xf] }
 0x273   :  { %5161 = vmatpush.bf16.msrb.mxu3 %v13425_v6  ;;  %5155 = vmatmul.bf16.vlgmr.msra.gmra.mxu0 %v18658_v57  ;;  %v14297_v57 = vld [vmem:[%s27192_s3 + $0x2a0] sm:$0xf]  ;;  %v17497_v6 = vld [vmem:[%s27190_s1 + $0x1170] sm:$0xf0]  ;;  %v14213_v9 = vld [vmem:[%s27192_s3 + $0x1f8] sm:$0xf] }
 0x274   :  { %9583 = vmatpush.bf16.msrb.mxu0 %v14158_v16  ;;  %v14298_v12 = vor.u32 %v17663_v43, %v14297_v57  ;;  %v17380_v16 = vld [vmem:[%s27190_s1 + $0xdc8] sm:$0xf0]  ;;  %v13633_v59 = vor.u32 %v17497_v6, %v13632_v20  ;;  %v4898_v10 = vpop.f32.mrf.mxu0  ;;  %v13113_v57 = vor.u32 %v17367_v35, %v13112_v55  ;;  %v14829_v43 = vld [vmem:[%s27192_s3 + $0x6c8] sm:$0xf]  ;;  %v14214_v25 = vor.u32 %v17642_v28, %v14213_v9  ;;  %v14577_v51 = vld [vmem:[%s27192_s3 + $0x4d0] sm:$0xf] }
 0x275   :  { %5174 = vmatpush.bf16.msra.mxu1 %v13841_v53  ;;  %v4885_v53 = vpop.f32.mrf.mxu1  ;;  %v4872_v31 = vpop.f32.mrf.mxu3  ;;  %v13961_v58 = vld [vmem:[%s27192_s3] sm:$0xf]  ;;  %v17852_v20 = vld [vmem:[%s27192_s3 + $0x8a0] sm:$0xf0]  ;;  %v15277_v6 = vld [vmem:[%s27192_s3 + $0xa48] sm:$0xf] }
 0x276   :  { %9596 = vmatpush.bf16.msrb.mxu2 %v14382_v14  ;;  %v13217_v14 = vor.u32 %v17393_v56, %v13216_v52  ;;  %v17733_v56 = vld [vmem:[%s27192_s3 + $0x4e8] sm:$0xf0]  ;;  %v14185_v63 = vld [vmem:[%s27192_s3 + $0x1c0] sm:$0xf]  ;;  %v17908_v11 = vld [vmem:[%s27192_s3 + $0xa60] sm:$0xf0] }
 0x277   :  { %5162 = vmatpush.bf16.msrb.mxu3 %v13373_v24  ;;  %v4909_v24 = vpop.f32.mrf.mxu2  ;;  %v14549_v46 = vld [vmem:[%s27192_s3 + $0x498] sm:$0xf]  ;;  %v17726_v23 = vld [vmem:[%s27192_s3 + $0x4b0] sm:$0xf0] }
 0x278   :  { %9584 = vmatpush.bf16.msrb.mxu0 %v14130_v29  ;;  %v22508_v29 = vadd.f32 %v4909_v24, %v4897_v18  ;;  %v14186_v18 = vor.u32 %v17635_v0, %v14185_v63  ;;  %v15025_v24 = vld [vmem:[%s27192_s3 + $0x850] sm:$0xf]  ;;  %v14550_v10 = vor.u32 %v17726_v23, %v14549_v46  ;;  %v17894_v9 = vld [vmem:[%s27192_s3 + $0x9f0] sm:$0xf0]  ;;  %v14437_v46 = vld [vmem:[%s27192_s3 + $0x3b8] sm:$0xf] }
 0x279   :  { %5175 = vmatpush.bf16.msra.mxu1 %v13789_v30  ;;  %v13165_v30 = vor.u32 %v17380_v16, %v13164_v2  ;;  %v14801_v2 = vld [vmem:[%s27192_s3 + $0x690] sm:$0xf]  ;;  %v17789_v16 = vld [vmem:[%s27192_s3 + $0x6a8] sm:$0xf0]  ;;  %v17698_v23 = vld [vmem:[%s27192_s3 + $0x3d0] sm:$0xf0] }
 0x27a   :  { %9597 = vmatpush.bf16.msrb.mxu2 %v14354_v27  ;;  %v17593_v27 = vld [vmem:[%s27192_s3 + $0x88] sm:$0xf0] }
 0x27b   :  { %5163 = vmatpush.bf16.msrb.mxu3 %v13321_v37  ;;  %v14018_v37 = vor.u32 %v17593_v27, %v14017_v21  ;;  %v15278_v21 = vor.u32 %v17908_v11, %v15277_v6  ;;  %v17845_v27 = vld [vmem:[%s27192_s3 + $0x868] sm:$0xf0]  ;;  %v17824_v11 = vld [vmem:[%s27192_s3 + $0x7c0] sm:$0xf0] }
 0x27c   :  { %9585 = vmatpush.bf16.msrb.mxu0 %v14102_v41  ;;  %v17586_v41 = vld [vmem:[%s27192_s3 + $0x50] sm:$0xf0] }
 0x27d   :  { %5176 = vmatpush.bf16.msra.mxu1 %v13737_v17  ;;  %v13528_v17 = vld [vmem:[%s27190_s1 + $0x1070] sm:$0xf] }
 0x27e   :  { %9598 = vmatpush.bf16.msrb.mxu2 %v14326_v36  ;;  %v13581_v36 = vor.u32 %v17484_v47, %v13580_v8  ;;  %v13529_v52 = vor.u32 %v17471_v19, %v13528_v17  ;;  %v15249_v8 = vld [vmem:[%s27192_s3 + $0xa10] sm:$0xf]  ;;  %v17901_v47 = vld [vmem:[%s27192_s3 + $0xa28] sm:$0xf0]  ;;  %v17775_v17 = vld [vmem:[%s27192_s3 + $0x638] sm:$0xf0] }
 0x27f   :  { %5164 = vmatpush.bf16.msrb.mxu3 %v13269_v4  ;;  %v4911_v22 = vpop.f32.mrf.mxu2  ;;  %v15250_v35 = vor.u32 %v17901_v47, %v15249_v8  ;;  %v17873_v8 = vld [vmem:[%s27192_s3 + $0x948] sm:$0xf0]  ;;  %v14661_v47 = vld [vmem:[%s27192_s3 + $0x578] sm:$0xf] }
 0x280   :  { %9586 = vmatpush.bf16.msrb.mxu0 %v14074_v60  ;;  %v17579_v60 = vld [vmem:[%s27192_s3 + $0x18] sm:$0xf0]  ;;  %v17705_v22 = vld [vmem:[%s27192_s3 + $0x408] sm:$0xf0] }
 0x281   :  { %5177 = vmatpush.bf16.msra.mxu1 %v13685_v61  ;;  %13958 = vmatmul.msk.bf16.vlgmr.msra.gmra.mxu2 %vm4012_vm0, %v18767_v48  ;;  %v17740_v48 = vld [vmem:[%s27192_s3 + $0x520] sm:$0xf0]  ;;  %v14830_v61 = vor.u32 %v17796_v45, %v14829_v43  ;;  %v13962_v53 = vor.u32 %v17579_v60, %v13961_v58  ;;  %v14493_v45 = vld [vmem:[%s27192_s3 + $0x428] sm:$0xf] }
 0x282   :  { %9599 = vmatpush.bf16.msrb.mxu2 %v14298_v12  ;;  %v14606_v4 = vor.u32 %v17740_v48, %v14605_v13  ;;  %v13990_v12 = vor.u32 %v17586_v41, %v13989_v38  ;;  %v17719_v13 = vld [vmem:[%s27192_s3 + $0x478] sm:$0xf0]  ;;  %v14997_v48 = vld [vmem:[%s27192_s3 + $0x818] sm:$0xf]  ;;  %v14745_v41 = vld [vmem:[%s27192_s3 + $0x620] sm:$0xf] }
 0x283   :  { %5165 = vmatpush.bf16.msrb.mxu3 %v13217_v14  ;;  %v22582_v14 = vpop.f32.mrf.mxu3  ;;  %v15221_v38 = vld [vmem:[%s27192_s3 + $0x9d8] sm:$0xf] }
 0x284   :  { %9587 = vmatpush.bf16.msrb.mxu0 %v14046_v54  ;;  %v5225_v54 = vsel %vm5199_vm1, %v19774_v42, %v5212_v49  ;;  %v5226_v42 = vsel %vm5200_vm2, %v20073_v40, %v5213_v50  ;;  %v14773_v40 = vld [vmem:[%s27192_s3 + $0x658] sm:$0xf]  ;;  %v15222_v43 = vor.u32 %v17894_v9, %v15221_v38  ;;  %v17712_v49 = vld [vmem:[%s27192_s3 + $0x440] sm:$0xf0]  ;;  %v14969_v50 = vld [vmem:[%s27192_s3 + $0x7e0] sm:$0xf] }
 0x285   :  { %5178 = vmatpush.bf16.msra.mxu1 %v13633_v59  ;;  %v15054_v59 = vor.u32 %v17852_v20, %v15053_v1  ;;  %v22622_v55 = vpack.c.bf16 %v5225_v54, %v5225_v54  ;;  %v22624_v31 = vpack.c.bf16 %v5226_v42, %v5226_v42  ;;  %v14494_v58 = vor.u32 %v17712_v49, %v14493_v45  ;;  %v14465_v1 = vld [vmem:[%s27192_s3 + $0x3f0] sm:$0xf]  ;;  %v14941_v20 = vld [vmem:[%s27192_s3 + $0x7a8] sm:$0xf]  ;;  %v17691_v38 = vld [vmem:[%s27192_s3 + $0x398] sm:$0xf0] }
 0x286   :  { %9600 = vmatpush.bf16.msrb.mxu2 %v14270_v15  ;;  %v14578_v15 = vor.u32 %v17733_v56, %v14577_v51  ;;  %v15193_v51 = vld [vmem:[%s27192_s3 + $0x9a0] sm:$0xf]  ;;  %v17768_v56 = vld [vmem:[%s27192_s3 + $0x600] sm:$0xf0]  ;;  %v15501_v9 = vld [vmem:[%s27192_s3 + $0xc08] sm:$0xf] }
 0x287   :  { %5166 = vmatpush.bf16.msrb.mxu3 %v13165_v30  ;;  %v17782_v30 = vld [vmem:[%s27192_s3 + $0x670] sm:$0xf0]  ;;  %v14633_v45 = vld [vmem:[%s27192_s3 + $0x540] sm:$0xf]  ;;  %v17747_v49 = vld [vmem:[%s27192_s3 + $0x558] sm:$0xf0] }
 0x288   :  { %9588 = vmatpush.bf16.msrb.mxu0 %v14018_v37  ;;  %v14774_v37 = vor.u32 %v17782_v30, %v14773_v40  ;;  %v17754_v40 = vld [vmem:[%s27192_s3 + $0x590] sm:$0xf0] }
 0x289   :  { %5179 = vmatpush.bf16.msra.mxu1 %v13581_v36  ;;  %v17838_v36 = vld [vmem:[%s27192_s3 + $0x830] sm:$0xf0]  ;;  %v22676_v60 = vpop.f32.mrf.mxu1 }
 0x28a   :  { %9601 = vmatpush.bf16.msrb.mxu2 %v14242_v33  ;;  %v15026_v33 = vor.u32 %v17845_v27, %v15025_v24  ;;  %v14913_v24 = vld [vmem:[%s27192_s3 + $0x770] sm:$0xf] }
 0x28b   :  { %5167 = vmatpush.bf16.msrb.mxu3 %v13113_v57  ;;  %v4924_v28 = vpop.f32.mrf.mxu3  ;;  %v14998_v57 = vor.u32 %v17838_v36, %v14997_v48  ;;  %v15137_v27 = vld [vmem:[%s27192_s3 + $0x930] sm:$0xf] }
 0x28c   :  { %9589 = vmatpush.bf16.msrb.mxu0 %v13990_v12  ;;  %v17887_v12 = vld [vmem:[%s27192_s3 + $0x9b8] sm:$0xf0]  ;;  %v15138_v36 = vor.u32 %v17873_v8, %v15137_v27  ;;  %v17964_v28 = vld [vmem:[%s27192_s3 + $0xc20] sm:$0xf0] }
 0x28d   :  { %5180 = vmatpush.bf16.msra.mxu1 %v13529_v52  ;;  %v14717_v52 = vld [vmem:[%s27192_s3 + $0x5e8] sm:$0xf]  ;;  %v15194_v0 = vor.u32 %v17887_v12, %v15193_v51  ;;  %v5216_v12 = vmul.f32 0.01, %v21041_v32 }
 0x28e   :  { %9602 = vmatpush.bf16.msrb.mxu2 %v14214_v25  ;;  %5168 = vmatmul.bf16.vlgmr.msrb.gmra.mxu3 %v18855_v34  ;;  %v14802_v34 = vor.u32 %v17789_v16, %v14801_v2  ;;  %v17831_v25 = vld [vmem:[%s27192_s3 + $0x7f8] sm:$0xf0]  ;;  %v14718_v6 = vor.u32 %v17768_v56, %v14717_v52  ;;  %v17880_v2 = vld [vmem:[%s27192_s3 + $0x980] sm:$0xf0]  ;;  %v14689_v16 = vld [vmem:[%s27192_s3 + $0x5b0] sm:$0xf]  ;;  %v15502_v56 = vor.u32 %v17964_v28, %v15501_v9 }
 0x28f   :  { %9609 = vmatpush.bf16.msra.mxu3 %v14606_v4  ;;  %v14746_v4 = vor.u32 %v17775_v17, %v14745_v41  ;;  %v14970_v63 = vor.u32 %v17831_v25, %v14969_v50  ;;  %v14662_v41 = vor.u32 %v17754_v40, %v14661_v47  ;;  %v14885_v17 = vld [vmem:[%s27192_s3 + $0x738] sm:$0xf]  ;;  %v18020_v25 = vld [vmem:[%s27192_s3 + $0xde0] sm:$0xf0]  ;;  %v5217_v52 = vmul.f32 0.01, %v21334_v26 }
 0x290   :  { %5181 = vmatmul.bf16.vlgmr.msra.gmra.mxu1 %v18866_v39  ;;  %9590 = vmatpush.bf16.msrb.mxu0 %v13962_v53  ;;  %v14521_v39 = vld [vmem:[%s27192_s3 + $0x460] sm:$0xf]  ;;  %v17761_v53 = vld [vmem:[%s27192_s3 + $0x5c8] sm:$0xf0]  ;;  %v5229_v40 = vsel %vm5203_vm5, %v21041_v32, %v5216_v12  ;;  %v18006_v9 = vld [vmem:[%s27192_s3 + $0xd70] sm:$0xf0] }
 0x291   :  { %9622 = vmatpush.bf16.msrb.mxu1 %v14830_v61  ;;  %v14522_v19 = vor.u32 %v17719_v13, %v14521_v39  ;;  %v22678_v61 = vpop.f32.mrf.mxu0  ;;  %v14690_v42 = vor.u32 %v17761_v53, %v14689_v16  ;;  %v14409_v39 = vld [vmem:[%s27192_s3 + $0x380] sm:$0xf]  ;;  %v4937_v13 = vpop.f32.mrf.mxu1  ;;  %v17859_v16 = vld [vmem:[%s27192_s3 + $0x8d8] sm:$0xf0]  ;;  %v15949_v53 = vld [vmem:[%s27192_s3 + $0xf88] sm:$0xf]  ;;  %v5230_v32 = vsel %vm5204_vm6, %v21334_v26, %v5217_v52  ;;  %v22856_v28 = vpack.c.bf16 %v5229_v40, %v5229_v40 }
 0x292   :  { %9603 = vmatpush.bf16.msrb.mxu2 %v14186_v18  ;;  %v14466_v18 = vor.u32 %v17705_v22, %v14465_v1  ;;  %v14410_v50 = vor.u32 %v17691_v38, %v14409_v39  ;;  %v14634_v22 = vor.u32 %v17747_v49, %v14633_v45  ;;  %v17950_v39 = vld [vmem:[%s27192_s3 + $0xbb0] sm:$0xf0]  ;;  %v15921_v13 = vld [vmem:[%s27192_s3 + $0xf50] sm:$0xf]  ;;  %v18125_v38 = vld [vmem:[%s27192_s3 + $0x1128] sm:$0xf0] }
 0x293   :  { %9610 = vmatpush.bf16.msra.mxu3 %v14578_v15  ;;  %9591 = vmatmul.bf16.vlgmr.msrb.gmra.mxu0 %v22622_v55  ;;  %v15165_v15 = vld [vmem:[%s27192_s3 + $0x968] sm:$0xf]  ;;  %v22704_v54 = vpop.f32.mrf.mxu3  ;;  %v15669_v26 = vld [vmem:[%s27192_s3 + $0xd58] sm:$0xf]  ;;  %v17943_v45 = vld [vmem:[%s27192_s3 + $0xb78] sm:$0xf0] }
 0x294   :  { %9635 = vmatpush.bf16.msra.mxu0 %v15054_v59  ;;  %v14942_v59 = vor.u32 %v17824_v11, %v14941_v20  ;;  %v22731_v30 = vpop.f32.mrf.mxu2  ;;  %v17957_v20 = vld [vmem:[%s27192_s3 + $0xbe8] sm:$0xf0]  ;;  %v17803_v11 = vld [vmem:[%s27192_s3 + $0x718] sm:$0xf0]  ;;  %v15893_v49 = vld [vmem:[%s27192_s3 + $0xf18] sm:$0xf] }
 0x295   :  { %9623 = vmatpush.bf16.msrb.mxu1 %v14802_v34  ;;  %9604 = vmatmul.bf16.vlgmr.msrb.gmra.mxu2 %v22624_v31  ;;  %v17817_v34 = vld [vmem:[%s27192_s3 + $0x788] sm:$0xf0]  ;;  %v15641_v52 = vld [vmem:[%s27192_s3 + $0xd20] sm:$0xf]  ;;  %v16061_v40 = vld [vmem:[%s27192_s3 + $0x1068] sm:$0xf] }
 0x296   :  { %9648 = vmatpush.bf16.msra.mxu2 %v15278_v21  ;;  %v15166_v21 = vor.u32 %v17880_v2, %v15165_v15  ;;  %v15081_v2 = vld [vmem:[%s27192_s3 + $0x8c0] sm:$0xf] }
 0x297   :  { %9611 = vmatpush.bf16.msra.mxu3 %v14550_v10  ;;  %v5214_v10 = vmul.f32 0.01, %v20425_v7  ;;  %v15082_v47 = vor.u32 %v17859_v16, %v15081_v2  ;;  %v18111_v2 = vld [vmem:[%s27192_s3 + $0x10b8] sm:$0xf0]  ;;  %v15613_v16 = vld [vmem:[%s27192_s3 + $0xce8] sm:$0xf] }
 0x298   :  { %9636 = vmatpush.bf16.msra.mxu0 %v15026_v33  ;;  %v5215_v33 = vmul.f32 0.01, %v20679_v44 }
 0x299   :  { %9624 = vmatpush.bf16.msrb.mxu1 %v14774_v37  ;;  %v4963_v48 = vpop.f32.mrf.mxu0  ;;  %v14914_v37 = vor.u32 %v17817_v34, %v14913_v24  ;;  %v18013_v34 = vld [vmem:[%s27192_s3 + $0xda8] sm:$0xf0] }
 0x29a   :  { %9649 = vmatpush.bf16.msra.mxu2 %v15250_v35  ;;  %v14438_v35 = vor.u32 %v17698_v23, %v14437_v46  ;;  %v5228_v15 = vsel %vm5202_vm4, %v20679_v44, %v5215_v33  ;;  %v16173_v44 = vld [vmem:[%s27192_s3 + $0x1148] sm:$0xf] }
 0x29b   :  { %9612 = vmatpush.bf16.msra.mxu3 %v14522_v19  ;;  %v17810_v19 = vld [vmem:[%s27192_s3 + $0x750] sm:$0xf0]  ;;  %v4950_v51 = vpop.f32.mrf.mxu3  ;;  %v22822_v27 = vpack.c.bf16 %v5228_v15, %v5228_v15  ;;  %v18055_v15 = vld [vmem:[%s27192_s3 + $0xef8] sm:$0xf0] }
 0x29c   :  { %9637 = vmatpush.bf16.msra.mxu0 %v14998_v57  ;;  %v15109_v57 = vld [vmem:[%s27192_s3 + $0x8f8] sm:$0xf]  ;;  %v18118_v51 = vld [vmem:[%s27192_s3 + $0x10f0] sm:$0xf0] }
 0x29d   :  { %9625 = vmatpush.bf16.msrb.mxu1 %v14746_v4  ;;  %v15725_v4 = vld [vmem:[%s27192_s3 + $0xdc8] sm:$0xf] }
 0x29e   :  { %9650 = vmatpush.bf16.msra.mxu2 %v15222_v43  ;;  %v17866_v43 = vld [vmem:[%s27192_s3 + $0x910] sm:$0xf0] }
 0x29f   :  { %9613 = vmatpush.bf16.msra.mxu3 %v14494_v58  ;;  %v14886_v58 = vor.u32 %v17810_v19, %v14885_v17  ;;  %v15110_v1 = vor.u32 %v17866_v43, %v15109_v57  ;;  %v22858_v17 = vpack.c.bf16 %v5230_v32, %v5230_v32  ;;  %v15417_v43 = vld [vmem:[%s27192_s3 + $0xb60] sm:$0xf]  ;;  %v22944_v32 = vld [vmem:[%s27191_s2 + $0x8] sm:$0x1f] }
 0x2a0   :  { %9638 = vmatpush.bf16.msra.mxu0 %v14970_v63  ;;  %v15473_v63 = vld [vmem:[%s27192_s3 + $0xbd0] sm:$0xf] }
 0x2a1   :  { %9626 = vmatpush.bf16.msrb.mxu1 %v14718_v6  ;;  %v14857_v6 = vld [vmem:[%s27192_s3 + $0x700] sm:$0xf]  ;;  %v22811_v46 = vpop.f32.mrf.mxu0  ;;  %v15474_v24 = vor.u32 %v17957_v20, %v15473_v63  ;;  %v17936_v20 = vld [vmem:[%s27192_s3 + $0xb40] sm:$0xf0] }
 0x2a2   :  { %9651 = vmatpush.bf16.msra.mxu2 %v15194_v0  ;;  %v5227_v0 = vsel %vm5201_vm3, %v20425_v7, %v5214_v10  ;;  %v15726_v7 = vor.u32 %v18020_v25, %v15725_v4  ;;  %v14858_v8 = vor.u32 %v17803_v11, %v14857_v6  ;;  %v18062_v4 = vld [vmem:[%s27192_s3 + $0xf30] sm:$0xf0]  ;;  %v16117_v25 = vld [vmem:[%s27192_s3 + $0x10d8] sm:$0xf]  ;;  %v15865_v6 = vld [vmem:[%s27192_s3 + $0xee0] sm:$0xf] }
 0x2a3   :  { %9614 = vmatpush.bf16.msra.mxu3 %v14466_v18  ;;  %v4976_v18 = vpop.f32.mrf.mxu2  ;;  %v22813_v23 = vpack.c.bf16 %v5227_v0, %v5227_v0  ;;  %v15894_v63 = vor.u32 %v18062_v4, %v15893_v49  ;;  %v16118_v0 = vor.u32 %v18118_v51, %v16117_v25  ;;  %v16033_v49 = vld [vmem:[%s27192_s3 + $0x1030] sm:$0xf]  ;;  %v15557_v4 = vld [vmem:[%s27192_s3 + $0xc78] sm:$0xf]  ;;  %v17978_v25 = vld [vmem:[%s27192_s3 + $0xc90] sm:$0xf0] }
 0x2a4   :  { %9639 = vmatpush.bf16.msra.mxu0 %v14942_v59  ;;  %v18076_v59 = vld [vmem:[%s27192_s3 + $0xfa0] sm:$0xf0]  ;;  %v5219_v51 = vmul.f32 0.01, %v21922_v62 }
 0x2a5   :  { %9627 = vmatpush.bf16.msrb.mxu1 %v14690_v42  ;;  %v15697_v42 = vld [vmem:[%s27192_s3 + $0xd90] sm:$0xf]  ;;  %v15950_v10 = vor.u32 %v18076_v59, %v15949_v53  ;;  %v17992_v53 = vld [vmem:[%s27192_s3 + $0xd00] sm:$0xf0]  ;;  %v15866_v59 = vor.u32 %v18055_v15, %v15865_v6  ;;  %v18034_v6 = vld [vmem:[%s27192_s3 + $0xe50] sm:$0xf0] }
 0x2a6   :  { %9652 = vmatpush.bf16.msra.mxu2 %v15166_v21  ;;  %v18132_v21 = vld [vmem:[%s27192_s3 + $0x1160] sm:$0xf0]  ;;  %v15698_v48 = vor.u32 %v18013_v34, %v15697_v42  ;;  %v15837_v42 = vld [vmem:[%s27192_s3 + $0xea8] sm:$0xf] }
 0x2a7   :  { %9615 = vmatpush.bf16.msra.mxu3 %v14438_v35  ;;  %v16174_v33 = vor.u32 %v18132_v21, %v16173_v44  ;;  %v15445_v35 = vld [vmem:[%s27192_s3 + $0xb98] sm:$0xf]  ;;  %v15361_v21 = vld [vmem:[%s27192_s3 + $0xaf0] sm:$0xf] }
 0x2a8   :  { %9640 = vmatpush.bf16.msra.mxu0 %v14914_v37  ;;  %v18069_v37 = vld [vmem:[%s27192_s3 + $0xf68] sm:$0xf0] }
 0x2a9   :  { %9628 = vmatpush.bf16.msrb.mxu1 %v14662_v41  ;;  %v15446_v41 = vor.u32 %v17950_v39, %v15445_v35  ;;  %v15922_v19 = vor.u32 %v18069_v37, %v15921_v13  ;;  %v5015_v12 = vpop.f32.mrf.mxu0  ;;  %v17985_v35 = vld [vmem:[%s27192_s3 + $0xcc8] sm:$0xf0]  ;;  %v5218_v13 = vmul.f32 0.01, %v21659_v5 }
 0x2aa   :  { %9653 = vmatpush.bf16.msra.mxu2 %v15138_v36  ;;  %v16145_v36 = vld [vmem:[%s27192_s3 + $0x1110] sm:$0xf]  ;;  %v22979_v12 = vadd.f32 %v22582_v14, %v22508_v29  ;;  %v16397_v29 = vld [vmem:[%s27192_s3 + $0x1308] sm:$0xf]  ;;  %v18188_v14 = vld [vmem:[%s27192_s3 + $0x1320] sm:$0xf0] }
 0x2ab   :  { %9616 = vmatpush.bf16.msra.mxu3 %v14410_v50  ;;  %v16146_v57 = vor.u32 %v18125_v38, %v16145_v36  ;;  %v15670_v50 = vor.u32 %v18006_v9, %v15669_v26  ;;  %v15333_v26 = vld [vmem:[%s27192_s3 + $0xab8] sm:$0xf]  ;;  %v17922_v9 = vld [vmem:[%s27192_s3 + $0xad0] sm:$0xf0] }
 0x2ac   :  { %9641 = vmatpush.bf16.msra.mxu0 %v14886_v58  ;;  %v15418_v58 = vor.u32 %v17943_v45, %v15417_v43  ;;  %v18041_v45 = vld [vmem:[%s27192_s3 + $0xe88] sm:$0xf0]  ;;  %vm5208_vm10 = vcmp.gt.f32.partialorder %v22979_v12, 0.0 }
 0x2ad   :  { %9629 = vmatpush.bf16.msrb.mxu1 %v14634_v22  ;;  %v15389_v22 = vld [vmem:[%s27192_s3 + $0xb28] sm:$0xf] }
 0x2ae   :  { %9654 = vmatpush.bf16.msra.mxu2 %v15110_v1  ;;  %9617 = vmatmul.bf16.vlgmr.msra.gmra.mxu3 %v22813_v23  ;;  %v22886_v1 = vpop.f32.mrf.mxu1  ;;  %v15390_v18 = vor.u32 %v17936_v20, %v15389_v22  ;;  %v17915_v22 = vld [vmem:[%s27192_s3 + $0xa98] sm:$0xf0]  ;;  %v15558_v20 = vor.u32 %v17978_v25, %v15557_v4  ;;  %v739_v4 = vperm.slane %v22944_v32, 3 }
 0x2af   :  { %9661 = vmatpush.bf16.msrb.mxu3 %v15502_v56  ;;  %v17999_v56 = vld [vmem:[%s27192_s3 + $0xd38] sm:$0xf0] }
 0x2b0   :  { %9630 = vmatmul.bf16.vlgmr.msrb.gmra.mxu1 %v22822_v27  ;;  %9642 = vmatpush.bf16.msra.mxu0 %v14858_v8  ;;  %v15642_v11 = vor.u32 %v17999_v56, %v15641_v52  ;;  %v15614_v8 = vor.u32 %v17992_v53, %v15613_v16  ;;  %v15334_v52 = vor.u32 %v17922_v9, %v15333_v26  ;;  %v15305_v56 = vld [vmem:[%s27192_s3 + $0xa80] sm:$0xf]  ;;  %v17971_v16 = vld [vmem:[%s27192_s3 + $0xc58] sm:$0xf0]  ;;  %v17625_v9 = vld [vmem:[%s27192_s3 + $0x18c] sm:$0xf] }
 0x2b1   :  { %9674 = vmatpush.bf16.msra.mxu1 %v15726_v7  ;;  %v16089_v7 = vld [vmem:[%s27192_s3 + $0x10a0] sm:$0xf]  ;;  %v22921_v34 = vpop.f32.mrf.mxu3  ;;  %v22938_v39 = vpop.f32.mrf.mxu0  ;;  %v18083_v26 = vld [vmem:[%s27192_s3 + $0xfd8] sm:$0xf0] }
 0x2b2   :  { %9655 = vmatpush.bf16.msra.mxu2 %v15082_v47  ;;  %v16090_v44 = vor.u32 %v18111_v2, %v16089_v7  ;;  %v18048_v47 = vld [vmem:[%s27192_s3 + $0xec0] sm:$0xf0]  ;;  %v18090_v7 = vld [vmem:[%s27192_s3 + $0x1010] sm:$0xf0]  ;;  %v15529_v2 = vld [vmem:[%s27192_s3 + $0xc40] sm:$0xf] }
 0x2b3   :  { %9662 = vmatpush.bf16.msrb.mxu3 %v15474_v24  ;;  %9643 = vmatmul.bf16.vlgmr.msra.gmra.mxu0 %v22856_v28  ;;  %v17929_v24 = vld [vmem:[%s27192_s3 + $0xb08] sm:$0xf0]  ;;  %v15838_v36 = vor.u32 %v18048_v47, %v15837_v42 }
 0x2b4   :  { %9687 = vmatpush.bf16.msrb.mxu0 %v15950_v10  ;;  %v18104_v10 = vld [vmem:[%s27192_s3 + $0x1080] sm:$0xf0]  ;;  %v15362_v37 = vor.u32 %v17929_v24, %v15361_v21  ;;  %v5221_v24 = vmul.f32 0.01, %v22979_v12 }
 0x2b5   :  { %9675 = vmatpush.bf16.msra.mxu1 %v15698_v48  ;;  %9656 = vmatmul.bf16.vlgmr.msra.gmra.mxu2 %v22858_v17  ;;  %v738_v48 = vperm.slane %v22944_v32, 2  ;;  %v16062_v38 = vor.u32 %v18104_v10, %v16061_v40  ;;  %v18244_v21 = vld [vmem:[%s27192_s3 + $0x14e0] sm:$0xf0]  ;;  %v16369_v40 = vld [vmem:[%s27192_s3 + $0x12d0] sm:$0xf] }
 0x2b6   :  { %9700 = vmatpush.bf16.msrb.mxu2 %v16174_v33  ;;  %v15585_v33 = vld [vmem:[%s27192_s3 + $0xcb0] sm:$0xf] }
 0x2b7   :  { %9663 = vmatpush.bf16.msrb.mxu3 %v15446_v41  ;;  %v15809_v41 = vld [vmem:[%s27192_s3 + $0xe70] sm:$0xf]  ;;  %v15586_v43 = vor.u32 %v17985_v35, %v15585_v33  ;;  %v5231_v33 = vsel %vm5205_vm7, %v21659_v5, %v5218_v13  ;;  %v15977_v13 = vld [vmem:[%s27192_s3 + $0xfc0] sm:$0xf]  ;;  %vm11369_vm7 = vcmask 39936  }
 0x2b8   :  { %9688 = vmatpush.bf16.msrb.mxu0 %v15922_v19  ;;  %v4989_v19 = vpop.f32.mrf.mxu1 }
 0x2b9   :  { %9676 = vmatpush.bf16.msra.mxu1 %v15670_v50  ;;  %v18097_v50 = vld [vmem:[%s27192_s3 + $0x1048] sm:$0xf0]  ;;  %v5002_v15 = vpop.f32.mrf.mxu3  ;;  %v5041_v53 = vpop.f32.mrf.mxu0 }
 0x2ba   :  { %9701 = vmatpush.bf16.msrb.mxu2 %v16146_v57  ;;  %v22956_v57 = vpop.f32.mrf.mxu2  ;;  %v18237_v19 = vld [vmem:[%s27192_s3 + $0x14a8] sm:$0xf0]  ;;  %v16537_v53 = vld [vmem:[%s27192_s3 + $0x1420] sm:$0xf] }
 0x2bb   :  { %9664 = vmatpush.bf16.msrb.mxu3 %v15418_v58  ;;  %v4936_v58 = vadd.f32 %v22676_v60, %v738_v48  ;;  %v15781_v60 = vld [vmem:[%s27192_s3 + $0xe38] sm:$0xf]  ;;  %v15530_v48 = vor.u32 %v17971_v16, %v15529_v2  ;;  %v18167_v2 = vld [vmem:[%s27192_s3 + $0x1278] sm:$0xf0] }
 0x2bc   :  { %9689 = vmatpush.bf16.msrb.mxu0 %v15894_v63  ;;  %v15810_v63 = vor.u32 %v18041_v45, %v15809_v41  ;;  %v15782_v47 = vor.u32 %v18034_v6, %v15781_v60  ;;  %v14159_v41 = vld [vmem:[%s27192_s3 + $0x1a4] sm:$0xf0]  ;;  %v14103_v16 = vld [vmem:[%s27192_s3 + $0x134] sm:$0xf0] }
 0x2bd   :  { %9677 = vmatpush.bf16.msra.mxu1 %v15642_v11  ;;  %v16005_v11 = vld [vmem:[%s27192_s3 + $0xff8] sm:$0xf]  ;;  %v4949_v42 = vadd.f32 %v22704_v54, %v4936_v58  ;;  %v18181_v54 = vld [vmem:[%s27192_s3 + $0x12e8] sm:$0xf0] }
 0x2be   :  { %9702 = vmatpush.bf16.msrb.mxu2 %v16118_v0  ;;  %v16034_v0 = vor.u32 %v18097_v50, %v16033_v49  ;;  %v16006_v35 = vor.u32 %v18090_v7, %v16005_v11  ;;  %v16370_v49 = vor.u32 %v18181_v54, %v16369_v40  ;;  %v16341_v58 = vld [vmem:[%s27192_s3 + $0x1298] sm:$0xf]  ;;  %v17604_v40 = vld [vmem:[%s27192_s3 + $0xe4] sm:$0xf] }
 0x2bf   :  { %9665 = vmatpush.bf16.msrb.mxu3 %v15390_v18  ;;  %v5220_v18 = vmul.f32 0.01, %v22289_v3  ;;  %v4962_v45 = vadd.f32 %v22678_v61, %v4949_v42 }
 0x2c0   :  { %9690 = vmatpush.bf16.msrb.mxu0 %v15866_v59  ;;  %v15306_v59 = vor.u32 %v17915_v22, %v15305_v56  ;;  %v14162_v56 = vor.u32 %v17625_v9, %v14159_v41  ;;  %v14131_v22 = vld [vmem:[%s27192_s3 + $0x16c] sm:$0xf0]  ;;  %v18209_v41 = vld [vmem:[%s27192_s3 + $0x13c8] sm:$0xf0] }
 0x2c1   :  { %9678 = vmatpush.bf16.msra.mxu1 %v15614_v8  ;;  %v16398_v8 = vor.u32 %v18188_v14, %v16397_v29  ;;  %v16565_v29 = vld [vmem:[%s27192_s3 + $0x1458] sm:$0xf]  ;;  %v18230_v14 = vld [vmem:[%s27192_s3 + $0x1470] sm:$0xf0]  ;;  %v16481_v9 = vld [vmem:[%s27192_s3 + $0x13b0] sm:$0xf] }
 0x2c2   :  { %9703 = vmatpush.bf16.msrb.mxu2 %v16090_v44  ;;  %v16621_v44 = vld [vmem:[%s27192_s3 + $0x14c8] sm:$0xf]  ;;  %v5028_v10 = vpop.f32.mrf.mxu2  ;;  %v16566_v7 = vor.u32 %v18230_v14, %v16565_v29  ;;  %v18258_v29 = vld [vmem:[%s27192_s3 + $0x1550] sm:$0xf0] }
 0x2c3   :  { %9666 = vmatpush.bf16.msrb.mxu3 %v15362_v37  ;;  %v15753_v37 = vld [vmem:[%s27192_s3 + $0xe00] sm:$0xf]  ;;  %v16622_v5 = vor.u32 %v18244_v21, %v16621_v44  ;;  %v16509_v10 = vld [vmem:[%s27192_s3 + $0x13e8] sm:$0xf] }
 0x2c4   :  { %9691 = vmatpush.bf16.msrb.mxu0 %v15838_v36  ;;  %v18027_v36 = vld [vmem:[%s27192_s3 + $0xe18] sm:$0xf0] }
 0x2c5   :  { %9679 = vmatpush.bf16.msra.mxu1 %v15586_v43  ;;  %v23057_v43 = vpack.c.bf16 %v5231_v33, %v5231_v33  ;;  %v15754_v25 = vor.u32 %v18027_v36, %v15753_v37  ;;  %v18216_v33 = vld [vmem:[%s27192_s3 + $0x1400] sm:$0xf0] }
 0x2c6   :  { %9704 = vmatpush.bf16.msrb.mxu2 %v16062_v38  ;;  %v5232_v38 = vsel %vm5206_vm8, %v21922_v62, %v5219_v51  ;;  %v16593_v62 = vld [vmem:[%s27192_s3 + $0x1490] sm:$0xf]  ;;  %v15978_v51 = vor.u32 %v18083_v26, %v15977_v13  ;;  %v16510_v36 = vor.u32 %v18216_v33, %v16509_v10  ;;  %v17597_v13 = vld [vmem:[%s27192_s3 + $0xac] sm:$0xf]  ;;  %v14047_v26 = vld [vmem:[%s27192_s3 + $0xc4] sm:$0xf0] }
 0x2c7   :  { %9667 = vmatpush.bf16.msrb.mxu3 %v15334_v52  ;;  %v23061_v50 = vpack.c.bf16 %v5232_v38, %v5232_v38  ;;  %v5233_v52 = vsel %vm5207_vm9, %v22289_v3, %v5220_v18  ;;  %v16594_v61 = vor.u32 %v18237_v19, %v16593_v62  ;;  %v5234_v3 = vsel %vm5208_vm10, %v22979_v12, %v5221_v24  ;;  %v18223_v18 = vld [vmem:[%s27192_s3 + $0x1438] sm:$0xf0]  ;;  %v16257_v38 = vld [vmem:[%s27192_s3 + $0x11f0] sm:$0xf] }
 0x2c8   :  { %9692 = vmatpush.bf16.msrb.mxu0 %v15810_v63  ;;  %v18174_v63 = vld [vmem:[%s27192_s3 + $0x12b0] sm:$0xf0]  ;;  %v23091_v60 = vpack.c.bf16 %v5233_v52, %v5233_v52  ;;  %v5027_v12 = vadd.f32 %v22956_v57, %v739_v4  ;;  %v23094_v11 = vpack.c.bf16 %v5234_v3, %v5234_v3  ;;  %v17611_v57 = vld [vmem:[%s27192_s3 + $0x11c] sm:$0xf] }
 0x2c9   :  { %9680 = vmatpush.bf16.msra.mxu1 %v15558_v20  ;;  %v4975_v20 = vadd.f32 %v22731_v30, %v4962_v45  ;;  %v16342_v6 = vor.u32 %v18174_v63, %v16341_v58  ;;  %v16313_v30 = vld [vmem:[%s27192_s3 + $0x1260] sm:$0xf]  ;;  %v5052_v44 = vpop.f32.mrf.mxu1  ;;  %v14106_v42 = vor.u32 %v17611_v57, %v14103_v16  ;;  %v14019_v58 = vld [vmem:[%s27192_s3 + $0x8c] sm:$0xf0]  ;;  %v16453_v63 = vld [vmem:[%s27192_s3 + $0x1378] sm:$0xf] }
 0x2ca   :  { %9705 = vmatpush.bf16.msrb.mxu2 %v16034_v0  ;;  %v17618_v0 = vld [vmem:[%s27192_s3 + $0x154] sm:$0xf]  ;;  %v5040_v21 = vadd.f32 %v22938_v39, %v5027_v12  ;;  %v16314_v24 = vor.u32 %v18167_v2, %v16313_v30  ;;  %v14075_v39 = vld [vmem:[%s27192_s3 + $0xfc] sm:$0xf0]  ;;  %v14383_v57 = vld [vmem:[%s27192_s3 + $0x364] sm:$0xf0] }
 0x2cb   :  { %9668 = vmatpush.bf16.msrb.mxu3 %v15306_v59  ;;  %v14134_v15 = vor.u32 %v17618_v0, %v14131_v22  ;;  %v4988_v59 = vadd.f32 %v22886_v1, %v4975_v20  ;;  %v18160_v1 = vld [vmem:[%s27192_s3 + $0x1240] sm:$0xf0]  ;;  %v14078_v37 = vor.u32 %v17604_v40, %v14075_v39  ;;  %v18202_v3 = vld [vmem:[%s27192_s3 + $0x1390] sm:$0xf0]  ;;  %v16677_v22 = vld [vmem:[%s27192_s3 + $0x1538] sm:$0xf] }
 0x2cc   :  { %9693 = vmatpush.bf16.msrb.mxu0 %v15782_v47  ;;  %v16285_v47 = vld [vmem:[%s27192_s3 + $0x1228] sm:$0xf]  ;;  %v16678_v20 = vor.u32 %v18258_v29, %v16677_v22  ;;  %v16454_v2 = vor.u32 %v18202_v3, %v16453_v63  ;;  %v17583_v16 = vld [vmem:[%s27192_s3 + $0x3c] sm:$0xf]  ;;  %v17737_v40 = vld [vmem:[%s27192_s3 + $0x50c] sm:$0xf] }
 0x2cd   :  { %9681 = vmatpush.bf16.msra.mxu1 %v15530_v48  ;;  %v5053_v48 = vadd.f32 %v5052_v44, %v5040_v21  ;;  %v16286_v54 = vor.u32 %v18160_v1, %v16285_v47  ;;  %v16425_v44 = vld [vmem:[%s27192_s3 + $0x1340] sm:$0xf]  ;;  %v14607_v39 = vld [vmem:[%s27192_s3 + $0x524] sm:$0xf0]  ;;  %v17667_v22 = vld [vmem:[%s27192_s3 + $0x2dc] sm:$0xf] }
 0x2ce   :  { %9706 = vmatpush.bf16.msrb.mxu2 %v16006_v35  ;;  %9669 = vmatmul.bf16.vlgmr.msrb.gmra.mxu3 %v23057_v43  ;;  %v5001_v35 = vadd.f32 %v22921_v34, %v4988_v59  ;;  %v16649_v21 = vld [vmem:[%s27192_s3 + $0x1500] sm:$0xf]  ;;  %v14327_v29 = vld [vmem:[%s27192_s3 + $0x2f4] sm:$0xf0] }
 0x2cf   :  { %9713 = vmatpush.bf16.msra.mxu3 %v16398_v8  ;;  %v16538_v8 = vor.u32 %v18223_v18, %v16537_v53  ;;  %v13991_v53 = vld [vmem:[%s27192_s3 + $0x54] sm:$0xf0] }
 0x2d0   :  { %9682 = vmatmul.bf16.vlgmr.msra.gmra.mxu1 %v23061_v50  ;;  %9694 = vmatpush.bf16.msrb.mxu0 %v15754_v25  ;;  %v5091_v34 = vpop.f32.mrf.mxu0  ;;  %v23156_v62 = vadd.f32 %v22811_v46, %v5001_v35  ;;  %v16229_v25 = vld [vmem:[%s27192_s3 + $0x11b8] sm:$0xf]  ;;  %v17590_v46 = vld [vmem:[%s27192_s3 + $0x74] sm:$0xf]  ;;  %v17793_v35 = vld [vmem:[%s27192_s3 + $0x6cc] sm:$0xf] }
 0x2d1   :  { %9726 = vmatpush.bf16.msrb.mxu1 %v16622_v5  ;;  %v18153_v5 = vld [vmem:[%s27192_s3 + $0x1208] sm:$0xf0]  ;;  %v5054_v19 = vpop.f32.mrf.mxu1  ;;  %v5065_v45 = vpop.f32.mrf.mxu3  ;;  %v14022_v30 = vor.u32 %v17590_v46, %v14019_v58 }
 0x2d2   :  { %9707 = vmatpush.bf16.msrb.mxu2 %v15978_v51  ;;  %v16258_v4 = vor.u32 %v18153_v5, %v16257_v38  ;;  %v18146_v51 = vld [vmem:[%s27192_s3 + $0x11d0] sm:$0xf0]  ;;  %vm5209_vm11 = vcmp.gt.f32.partialorder %v23156_v62, 0.0  ;;  %v5222_v14 = vmul.f32 0.01, %v23156_v62  ;;  %v13994_v38 = vor.u32 %v17583_v16, %v13991_v53 }
 0x2d3   :  { %9714 = vmatpush.bf16.msra.mxu3 %v16370_v49  ;;  %9695 = vmatmul.bf16.vlgmr.msrb.gmra.mxu0 %v23091_v60  ;;  %v5066_v49 = vadd.f32 %v5065_v45, %v5053_v48  ;;  %v16230_v12 = vor.u32 %v18146_v51, %v16229_v25  ;;  %v14831_v48 = vld [vmem:[%s27192_s3 + $0x6e4] sm:$0xf0]  ;;  %v14355_v5 = vld [vmem:[%s27192_s3 + $0x32c] sm:$0xf0]  ;;  %v17849_v45 = vld [vmem:[%s27192_s3 + $0x88c] sm:$0xf]  ;;  %v14330_v16 = vor.u32 %v17667_v22, %v14327_v29 }
 0x2d4   :  { %v5078_v52 = vpop.f32.mrf.mxu2  ;;  %9745 = vmatpush.bf16.msra.mxu0 %v16678_v20  ;;  %v17730_v25 = vld [vmem:[%s27192_s3 + $0x4d4] sm:$0xf] }
 0x2d5   :  { %9727 = vmatpush.bf16.msrb.mxu1 %v16594_v61  ;;  %9708 = vmatmul.bf16.vlgmr.msrb.gmra.mxu2 %v23094_v11  ;;  %v16482_v61 = vor.u32 %v18209_v41, %v16481_v9  ;;  %v5079_v0 = vadd.f32 %v5078_v52, %v5066_v49  ;;  %v5235_v9 = vsel %vm5209_vm11, %v23156_v62, %v5222_v14  ;;  %v14579_v62 = vld [vmem:[%s27192_s3 + $0x4ec] sm:$0xf0]  ;;  %v17786_v52 = vld [vmem:[%s27192_s3 + $0x694] sm:$0xf] }
 0x2d6   :  { %9752 = vmatpush.bf16.msra.mxu2 %v14162_v56  ;;  %v14050_v56 = vor.u32 %v17597_v13, %v14047_v26  ;;  %v17576_v13 = vld [vmem:[%s27192_s3 + $0x4] sm:$0xf]  ;;  %v14834_v49 = vor.u32 %v17793_v35, %v14831_v48  ;;  %v23259_v46 = vpack.c.bf16 %v5235_v9, %v5235_v9  ;;  %v17842_v14 = vld [vmem:[%s27192_s3 + $0x854] sm:$0xf]  ;;  %v14271_v35 = vld [vmem:[%s27192_s3 + $0x284] sm:$0xf0] }
 0x2d7   :  { %9715 = vmatpush.bf16.msra.mxu3 %v16342_v6  ;;  %v16201_v6 = vld [vmem:[%s27192_s3 + $0x1180] sm:$0xf]  ;;  %v5092_v59 = vadd.f32 %v5091_v34, %v5079_v0  ;;  %v17828_v48 = vld [vmem:[%s27192_s3 + $0x7e4] sm:$0xf] }
 0x2d8   :  { %v5093_v18 = vpop.f32.mrf.mxu0  ;;  %v13963_v34 = vld [vmem:[%s27192_s3 + $0x1c] sm:$0xf0] }
 0x2d9   :  { %9728 = vmatpush.bf16.msrb.mxu1 %v16566_v7  ;;  %v17681_v7 = vld [vmem:[%s27192_s3 + $0x34c] sm:$0xf]  ;;  %v5067_v47 = vpop.f32.mrf.mxu3  ;;  %v13966_v63 = vor.u32 %v17576_v13, %v13963_v34  ;;  %v17660_v18 = vld [vmem:[%s27192_s3 + $0x2a4] sm:$0xf]  ;;  %v14719_v13 = vld [vmem:[%s27192_s3 + $0x604] sm:$0xf0] }
 0x2da   :  { %9753 = vmatpush.bf16.msra.mxu2 %v14134_v15  ;;  %v18139_v15 = vld [vmem:[%s27192_s3 + $0x1198] sm:$0xf0]  ;;  %v17772_v47 = vld [vmem:[%s27192_s3 + $0x624] sm:$0xf] }
 0x2db   :  { %9716 = vmatpush.bf16.msra.mxu3 %v16314_v24  ;;  %v18251_v24 = vld [vmem:[%s27192_s3 + $0x1518] sm:$0xf0]  ;;  %v16202_v33 = vor.u32 %v18139_v15, %v16201_v6 }
 0x2dc   :  { %v16650_v1 = vor.u32 %v18251_v24, %v16649_v21  ;;  %v5080_v26 = vpop.f32.mrf.mxu2  ;;  %v17723_v15 = vld [vmem:[%s27192_s3 + $0x49c] sm:$0xf]  ;;  %v14999_v24 = vld [vmem:[%s27192_s3 + $0x834] sm:$0xf0] }
 0x2dd   :  { %9729 = vmatpush.bf16.msrb.mxu1 %v16538_v8  ;;  %v18195_v8 = vld [vmem:[%s27192_s3 + $0x1358] sm:$0xf0] }
 0x2de   :  { %9754 = vmatpush.bf16.msra.mxu2 %v14106_v42  ;;  %v5104_v42 = vpop.f32.mrf.mxu1  ;;  %v16426_v19 = vor.u32 %v18195_v8, %v16425_v44  ;;  %9746 = vmatpush.bf16.msra.mxu0 %v16650_v1  ;;  %v17835_v44 = vld [vmem:[%s27192_s3 + $0x81c] sm:$0xf]  ;;  %v14523_v8 = vld [vmem:[%s27192_s3 + $0x47c] sm:$0xf0] }
 0x2df   :  { %9717 = vmatpush.bf16.msra.mxu3 %v16286_v54  ;;  %v5105_v10 = vadd.f32 %v5104_v42, %v5092_v59  ;;  %v17674_v54 = vld [vmem:[%s27192_s3 + $0x314] sm:$0xf]  ;;  %v14299_v59 = vld [vmem:[%s27192_s3 + $0x2bc] sm:$0xf0]  ;;  %v17716_v42 = vld [vmem:[%s27192_s3 + $0x464] sm:$0xf] }
 0x2e0   :  { %v14358_v58 = vor.u32 %v17674_v54, %v14355_v5  ;;  %v14747_v1 = vld [vmem:[%s27192_s3 + $0x63c] sm:$0xf0]  ;;  %v17765_v5 = vld [vmem:[%s27192_s3 + $0x5ec] sm:$0xf] }
 0x2e1   :  { %9730 = vmatpush.bf16.msrb.mxu1 %v16510_v36  ;;  %v14386_v36 = vor.u32 %v17681_v7, %v14383_v57  ;;  %vm5210_vm12 = vcmp.gt.f32.partialorder %v5105_v10, 0.0  ;;  %v5223_v41 = vmul.f32 0.01, %v5105_v10  ;;  %v14551_v7 = vld [vmem:[%s27192_s3 + $0x4b4] sm:$0xf0]  ;;  %v14750_v54 = vor.u32 %v17772_v47, %v14747_v1 }
 0x2e2   :  { %9755 = vmatpush.bf16.msra.mxu2 %v14078_v37  ;;  %v14610_v37 = vor.u32 %v17737_v40, %v14607_v39  ;;  %v14554_v57 = vor.u32 %v17723_v15, %v14551_v7  ;;  %v14526_v40 = vor.u32 %v17716_v42, %v14523_v8  ;;  %v14302_v39 = vor.u32 %v17660_v18, %v14299_v59  ;;  %v14915_v15 = vld [vmem:[%s27192_s3 + $0x78c] sm:$0xf0]  ;;  %v17695_v7 = vld [vmem:[%s27192_s3 + $0x3bc] sm:$0xf]  ;;  %v17632_v18 = vld [vmem:[%s27192_s3 + $0x1c4] sm:$0xf] }
 0x2e3   :  { %9718 = vmatpush.bf16.msra.mxu3 %v16258_v4  ;;  %v15055_v4 = vld [vmem:[%s27192_s3 + $0x8a4] sm:$0xf0]  ;;  %v5236_v51 = vsel %vm5210_vm12, %v5105_v10, %v5223_v41  ;;  %v15002_v10 = vor.u32 %v17835_v44, %v14999_v24  ;;  %v17646_v41 = vld [vmem:[%s27192_s3 + $0x234] sm:$0xf]  ;;  %v14187_v59 = vld [vmem:[%s27192_s3 + $0x1dc] sm:$0xf0] }
 0x2e4   :  { %9778 = vmatpush.bf16.msrb.mxu0 %v14610_v37  ;;  %v23261_v0 = vpack.c.bf16 %v5236_v51, %v5236_v51  ;;  %v15058_v3 = vor.u32 %v17849_v45, %v15055_v4  ;;  %v14971_v37 = vld [vmem:[%s27192_s3 + $0x7fc] sm:$0xf0]  ;;  %v17821_v45 = vld [vmem:[%s27192_s3 + $0x7ac] sm:$0xf]  ;;  %v14722_v4 = vor.u32 %v17765_v5, %v14719_v13  ;;  %v17702_v51 = vld [vmem:[%s27192_s3 + $0x3f4] sm:$0xf] }
 0x2e5   :  { %9731 = vmatpush.bf16.msrb.mxu1 %v16482_v61  ;;  %v14582_v61 = vor.u32 %v17730_v25, %v14579_v62  ;;  %v14974_v9 = vor.u32 %v17828_v48, %v14971_v37  ;;  %v14943_v25 = vld [vmem:[%s27192_s3 + $0x7c4] sm:$0xf0]  ;;  %v17807_v42 = vld [vmem:[%s27192_s3 + $0x73c] sm:$0xf]  ;;  %v14887_v1 = vld [vmem:[%s27192_s3 + $0x754] sm:$0xf0] }
 0x2e6   :  { %9756 = vmatpush.bf16.msra.mxu2 %v14050_v56  ;;  %v14803_v56 = vld [vmem:[%s27192_s3 + $0x6ac] sm:$0xf0]  ;;  %v5106_v6 = vpop.f32.mrf.mxu1  ;;  %v14946_v29 = vor.u32 %v17821_v45, %v14943_v25  ;;  %v15279_v24 = vld [vmem:[%s27192_s3 + $0xa64] sm:$0xf0]  ;;  %v14635_v48 = vld [vmem:[%s27192_s3 + $0x55c] sm:$0xf0] }
 0x2e7   :  { %9719 = vmatpush.bf16.msra.mxu3 %v16230_v12  ;;  %v14806_v20 = vor.u32 %v17786_v52, %v14803_v56  ;;  %v15027_v12 = vld [vmem:[%s27192_s3 + $0x86c] sm:$0xf0]  ;;  %v15727_v5 = vld [vmem:[%s27192_s3 + $0xde4] sm:$0xf0]  ;;  %v14859_v25 = vld [vmem:[%s27192_s3 + $0x71c] sm:$0xf0] }
 0x2e8   :  { %9779 = vmatpush.bf16.msrb.mxu0 %v14582_v61  ;;  %v15030_v53 = vor.u32 %v17842_v14, %v15027_v12  ;;  %v14467_v52 = vld [vmem:[%s27192_s3 + $0x40c] sm:$0xf0]  ;;  %v17758_v61 = vld [vmem:[%s27192_s3 + $0x5b4] sm:$0xf]  ;;  %v17639_v14 = vld [vmem:[%s27192_s3 + $0x1fc] sm:$0xf] }
 0x2e9   :  { %9732 = vmatpush.bf16.msrb.mxu1 %v16454_v2  ;;  %v14775_v2 = vld [vmem:[%s27192_s3 + $0x674] sm:$0xf0]  ;;  %v17814_v12 = vld [vmem:[%s27192_s3 + $0x774] sm:$0xf] }
 0x2ea   :  { %9757 = vmatpush.bf16.msra.mxu2 %v14022_v30  ;;  %v17779_v30 = vld [vmem:[%s27192_s3 + $0x65c] sm:$0xf]  ;;  %v14918_v44 = vor.u32 %v17814_v12, %v14915_v15  ;;  %v15923_v15 = vld [vmem:[%s27192_s3 + $0xf6c] sm:$0xf0] }
 0x2eb   :  { %9720 = vmatpush.bf16.msra.mxu3 %v16202_v33  ;;  %v14778_v21 = vor.u32 %v17779_v30, %v14775_v2  ;;  %v17653_v33 = vld [vmem:[%s27192_s3 + $0x26c] sm:$0xf]  ;;  %v14439_v30 = vld [vmem:[%s27192_s3 + $0x3d4] sm:$0xf0]  ;;  %v17751_v2 = vld [vmem:[%s27192_s3 + $0x57c] sm:$0xf] }
 0x2ec   :  { %9780 = vmatpush.bf16.msrb.mxu0 %v14554_v57  ;;  %v14274_v26 = vor.u32 %v17653_v33, %v14271_v35  ;;  %v14663_v57 = vld [vmem:[%s27192_s3 + $0x594] sm:$0xf0]  ;;  %v17744_v35 = vld [vmem:[%s27192_s3 + $0x544] sm:$0xf] }
 0x2ed   :  { %9733 = vmatpush.bf16.msrb.mxu1 %v16426_v19  ;;  %v14243_v19 = vld [vmem:[%s27192_s3 + $0x24c] sm:$0xf0]  ;;  %v14666_v47 = vor.u32 %v17751_v2, %v14663_v57 }
 0x2ee   :  { %9758 = vmatpush.bf16.msra.mxu2 %v13994_v38  ;;  %9721 = vmatmul.bf16.vlgmr.msra.gmra.mxu3 %v23259_v46  ;;  %v14495_v38 = vld [vmem:[%s27192_s3 + $0x444] sm:$0xf0]  ;;  %v14246_v22 = vor.u32 %v17646_v41, %v14243_v19  ;;  %v17898_v41 = vld [vmem:[%s27192_s3 + $0xa14] sm:$0xf]  ;;  %v15251_v19 = vld [vmem:[%s27192_s3 + $0xa2c] sm:$0xf0] }
 0x2ef   :  { %9765 = vmatpush.bf16.msrb.mxu3 %v14386_v36  ;;  %v17709_v36 = vld [vmem:[%s27192_s3 + $0x42c] sm:$0xf] }
 0x2f0   :  { %9734 = vmatmul.bf16.vlgmr.msrb.gmra.mxu1 %v23261_v0  ;;  %9781 = vmatpush.bf16.msrb.mxu0 %v14526_v40  ;;  %v14498_v34 = vor.u32 %v17709_v36, %v14495_v38  ;;  %v23352_v62 = vpop.f32.mrf.mxu0  ;;  %v14190_v36 = vor.u32 %v17632_v18, %v14187_v59  ;;  %v18017_v38 = vld [vmem:[%s27192_s3 + $0xdcc] sm:$0xf] }
 0x2f1   :  { %9791 = vmatpush.bf16.msra.mxu1 %v14834_v49  ;;  %v23347_v49 = vpop.f32.mrf.mxu1  ;;  %v23360_v56 = vpop.f32.mrf.mxu3  ;;  %v15730_v45 = vor.u32 %v18017_v38, %v15727_v5  ;;  %v17870_v5 = vld [vmem:[%s27192_s3 + $0x934] sm:$0xf] }
 0x2f2   :  { %9759 = vmatpush.bf16.msra.mxu2 %v13966_v63  ;;  %v14470_v63 = vor.u32 %v17702_v51, %v14467_v52  ;;  %v15951_v51 = vld [vmem:[%s27192_s3 + $0xfa4] sm:$0xf0]  ;;  %v18010_v52 = vld [vmem:[%s27192_s3 + $0xd94] sm:$0xf] }
 0x2f3   :  { %9766 = vmatpush.bf16.msrb.mxu3 %v14358_v58  ;;  %v14691_v58 = vld [vmem:[%s27192_s3 + $0x5cc] sm:$0xf0] }
 0x2f4   :  { %9782 = vmatpush.bf16.msrb.mxu0 %v14498_v34  ;;  %v14694_v6 = vor.u32 %v17758_v61, %v14691_v58  ;;  %v14890_v34 = vor.u32 %v17807_v42, %v14887_v1  ;;  %v15699_v61 = vld [vmem:[%s27192_s3 + $0xdac] sm:$0xf0]  ;;  %v15254_v58 = vor.u32 %v17898_v41, %v15251_v19  ;;  %v15167_v1 = vld [vmem:[%s27192_s3 + $0x984] sm:$0xf0] }
 0x2f5   :  { %9792 = vmatpush.bf16.msra.mxu1 %v14806_v20  ;;  %9760 = vmatmul.bf16.vlgmr.msra.gmra.mxu2 %v22622_v55  ;;  %v14215_v20 = vld [vmem:[%s27192_s3 + $0x214] sm:$0xf0]  ;;  %v15702_v12 = vor.u32 %v18010_v52, %v15699_v61  ;;  %v17863_v61 = vld [vmem:[%s27192_s3 + $0x8fc] sm:$0xf] }
 0x2f6   :  { %9804 = vmatpush.bf16.msrb.mxu2 %v15058_v3  ;;  %v23368_v3 = vpop.f32.mrf.mxu2 }
 0x2f7   :  { %9767 = vmatpush.bf16.msrb.mxu3 %v14330_v16  ;;  %v14442_v16 = vor.u32 %v17695_v7, %v14439_v30  ;;  %v18003_v7 = vld [vmem:[%s27192_s3 + $0xd5c] sm:$0xf]  ;;  %v15671_v30 = vld [vmem:[%s27192_s3 + $0xd74] sm:$0xf0] }
 0x2f8   :  { %9783 = vmatpush.bf16.msrb.mxu0 %v14470_v63  ;;  %v5158_v40 = vpop.f32.mrf.mxu0  ;;  %v15674_v59 = vor.u32 %v18003_v7, %v15671_v30  ;;  %v15559_v7 = vld [vmem:[%s27192_s3 + $0xc94] sm:$0xf0] }
 0x2f9   :  { %9793 = vmatpush.bf16.msra.mxu1 %v14778_v21  ;;  %v17905_v21 = vld [vmem:[%s27192_s3 + $0xa4c] sm:$0xf]  ;;  %v5132_v8 = vpop.f32.mrf.mxu1  ;;  %v5119_v33 = vpop.f32.mrf.mxu3 }
 0x2fa   :  { %9805 = vmatpush.bf16.msrb.mxu2 %v15030_v53  ;;  %v14218_v53 = vor.u32 %v17639_v14, %v14215_v20  ;;  %v15282_v13 = vor.u32 %v17905_v21, %v15279_v24  ;;  %v15223_v14 = vld [vmem:[%s27192_s3 + $0x9f4] sm:$0xf0]  ;;  %v17996_v21 = vld [vmem:[%s27192_s3 + $0xd24] sm:$0xf]  ;;  %v15643_v24 = vld [vmem:[%s27192_s3 + $0xd3c] sm:$0xf0] }
 0x2fb   :  { %9768 = vmatpush.bf16.msrb.mxu3 %v14302_v39  ;;  %v17688_v39 = vld [vmem:[%s27192_s3 + $0x384] sm:$0xf] }
 0x2fc   :  { %9784 = vmatpush.bf16.msrb.mxu0 %v14442_v16  ;;  %v17884_v16 = vld [vmem:[%s27192_s3 + $0x9a4] sm:$0xf] }
 0x2fd   :  { %9794 = vmatpush.bf16.msra.mxu1 %v14750_v54  ;;  %v6035_v33 = vld [vmem:[%s27193_s4] sm:$0x7f] }
 0x2fe   :  { %9806 = vmatpush.bf16.msrb.mxu2 %v15002_v10  ;;  %v14411_v10 = vld [vmem:[%s27192_s3 + $0x39c] sm:$0xf0]  ;;  %v5145_v37 = vpop.f32.mrf.mxu2 }
 0x2ff   :  { %9769 = vmatpush.bf16.msrb.mxu3 %v14274_v26  ;;  %v14414_v54 = vor.u32 %v17688_v39, %v14411_v10  ;;  %v740_v26 = vperm.slane %v22944_v32, 4  ;;  %v18073_v32 = vld [vmem:[%s27192_s3 + $0xf8c] sm:$0xf]  ;;  %v15646_v10 = vor.u32 %v17996_v21, %v15643_v24  ;;  %v15615_v37 = vld [vmem:[%s27192_s3 + $0xd04] sm:$0xf0] }
 0x300   :  { %v15954_v20 = vor.u32 %v18073_v32, %v15951_v51  ;;  %v15587_v32 = vld [vmem:[%s27192_s3 + $0xccc] sm:$0xf0] }
 0x301   :  { %9795 = vmatpush.bf16.msra.mxu1 %v14722_v4  ;;  %v17800_v4 = vld [vmem:[%s27192_s3 + $0x704] sm:$0xf]  ;;  %9785 = vmatpush.bf16.msrb.mxu0 %v14414_v54  ;;  %v5118_v63 = vadd.f32 %v23360_v56, %v740_v26  ;;  %v17989_v54 = vld [vmem:[%s27192_s3 + $0xcec] sm:$0xf]  ;;  %v6037_v26 = vperm.slane %v6035_v33, 0 }
 0x302   :  { %9807 = vmatpush.bf16.msrb.mxu2 %v14974_v9  ;;  %v14638_v9 = vor.u32 %v17744_v35, %v14635_v48  ;;  %v15867_v48 = vld [vmem:[%s27192_s3 + $0xefc] sm:$0xf0]  ;;  %v15618_v19 = vor.u32 %v17989_v54, %v15615_v37  ;;  %v16623_v54 = vld [vmem:[%s27192_s3 + $0x14e4] sm:$0xf0] }
 0x303   :  { %9770 = vmatpush.bf16.msrb.mxu3 %v14246_v22  ;;  %v14862_v22 = vor.u32 %v17800_v4, %v14859_v25  ;;  %v5131_v57 = vadd.f32 %v23347_v49, %v5118_v63  ;;  %v15895_v49 = vld [vmem:[%s27192_s3 + $0xf34] sm:$0xf0]  ;;  %v15839_v4 = vld [vmem:[%s27192_s3 + $0xec4] sm:$0xf0]  ;;  %v17982_v25 = vld [vmem:[%s27192_s3 + $0xcb4] sm:$0xf] }
 0x305   :  { %9796 = vmatpush.bf16.msra.mxu1 %v14694_v6  ;;  %v18066_v6 = vld [vmem:[%s27192_s3 + $0xf54] sm:$0xf]  ;;  %v5144_v8 = vadd.f32 %v23368_v3, %v5131_v57  ;;  %v18052_v3 = vld [vmem:[%s27192_s3 + $0xee4] sm:$0xf]  ;;  %v15083_v57 = vld [vmem:[%s27192_s3 + $0x8dc] sm:$0xf0] }
 0x306   :  { %9808 = vmatpush.bf16.msrb.mxu2 %v14946_v29  ;;  %v17891_v29 = vld [vmem:[%s27192_s3 + $0x9dc] sm:$0xf]  ;;  %v23466_v56 = vpop.f32.mrf.mxu2  ;;  %v15926_v18 = vor.u32 %v18066_v6, %v15923_v15  ;;  %v15870_v41 = vor.u32 %v18052_v3, %v15867_v48  ;;  %v15811_v6 = vld [vmem:[%s27192_s3 + $0xe8c] sm:$0xf0]  ;;  %v18241_v48 = vld [vmem:[%s27192_s3 + $0x14cc] sm:$0xf] }
 0x307   :  { %9771 = vmatpush.bf16.msrb.mxu3 %v14218_v53  ;;  %v15226_v2 = vor.u32 %v17891_v29, %v15223_v14  ;;  %v15195_v53 = vld [vmem:[%s27192_s3 + $0x9bc] sm:$0xf0]  ;;  %v5157_v38 = vadd.f32 %v23352_v62, %v5144_v8  ;;  %v15590_v29 = vor.u32 %v17982_v25, %v15587_v32  ;;  %v18038_v14 = vld [vmem:[%s27192_s3 + $0xe74] sm:$0xf]  ;;  %v17975_v15 = vld [vmem:[%s27192_s3 + $0xc7c] sm:$0xf] }
 0x308   :  { %v15198_v42 = vor.u32 %v17884_v16, %v15195_v53  ;;  %v17961_v16 = vld [vmem:[%s27192_s3 + $0xc0c] sm:$0xf]  ;;  %v15814_v21 = vor.u32 %v18038_v14, %v15811_v6  ;;  %v15562_v24 = vor.u32 %v17975_v15, %v15559_v7  ;;  %v16175_v8 = vld [vmem:[%s27192_s3 + $0x1164] sm:$0xf0]  ;;  %v16679_v25 = vld [vmem:[%s27192_s3 + $0x1554] sm:$0xf0] }
 0x309   :  { %9797 = vmatpush.bf16.msra.mxu1 %v14666_v47  ;;  %v17877_v47 = vld [vmem:[%s27192_s3 + $0x96c] sm:$0xf]  ;;  %v18234_v32 = vld [vmem:[%s27192_s3 + $0x1494] sm:$0xf]  ;;  %v16651_v6 = vld [vmem:[%s27192_s3 + $0x151c] sm:$0xf0] }
 0x30a   :  { %9809 = vmatpush.bf16.msrb.mxu2 %v14918_v44  ;;  %v18059_v44 = vld [vmem:[%s27192_s3 + $0xf1c] sm:$0xf] }
 0x30b   :  { %9772 = vmatpush.bf16.msrb.mxu3 %v14190_v36  ;;  %v15898_v39 = vor.u32 %v18059_v44, %v15895_v49  ;;  %v15170_v36 = vor.u32 %v17877_v47, %v15167_v1  ;;  %v18031_v47 = vld [vmem:[%s27192_s3 + $0xe3c] sm:$0xf] }
 0x30c   :  { %v18227_v7 = vld [vmem:[%s27192_s3 + $0x145c] sm:$0xf] }
 0x30d   :  { %9798 = vmatpush.bf16.msra.mxu1 %v14638_v9  ;;  %v5182_v40 = vpop.f32.mrf.mxu1 }
 0x30e   :  { %9810 = vmatpush.bf16.msrb.mxu2 %v14890_v34  ;;  %9773 = vmatmul.bf16.vlgmr.msrb.gmra.mxu3 %v22624_v31  ;;  %v5197_v35 = vpop.f32.mrf.mxu2 }
 0x30f   :  { %9817 = vmatpush.bf16.msra.mxu3 %v15282_v13  ;;  %v15139_v13 = vld [vmem:[%s27192_s3 + $0x94c] sm:$0xf0] }
 0x310   :  { %9799 = vmatmul.bf16.vlgmr.msra.gmra.mxu1 %v22822_v27  ;;  %v9592_v9 = vpop.f32.mrf.mxu0  ;;  %v15142_v51 = vor.u32 %v17870_v5, %v15139_v13 }
 0x311   :  { %9843 = vmatpush.bf16.msrb.mxu1 %v15730_v45  ;;  %v5169_v34 = vpop.f32.mrf.mxu3  ;;  %v18045_v45 = vld [vmem:[%s27192_s3 + $0xeac] sm:$0xf] }
 0x312   :  { %9811 = vmatpush.bf16.msrb.mxu2 %v14862_v22  ;;  %v5170_v62 = vadd.f32 %v5169_v34, %v5157_v38  ;;  %v15842_v22 = vor.u32 %v18045_v45, %v15839_v4  ;;  %v15475_v38 = vld [vmem:[%s27192_s3 + $0xbec] sm:$0xf0]  ;;  %v18122_v34 = vld [vmem:[%s27192_s3 + $0x1114] sm:$0xf]  ;;  %v18255_v45 = vld [vmem:[%s27192_s3 + $0x153c] sm:$0xf] }
 0x313   :  { %9818 = vmatpush.bf16.msra.mxu3 %v15254_v58  ;;  %v15111_v58 = vld [vmem:[%s27192_s3 + $0x914] sm:$0xf0]  ;;  %v16682_v14 = vor.u32 %v18255_v45, %v16679_v25  ;;  %v18094_v45 = vld [vmem:[%s27192_s3 + $0x1034] sm:$0xf] }
 0x314   :  { %v5183_v52 = vadd.f32 %v5182_v40, %v5170_v62  ;;  %v15783_v40 = vld [vmem:[%s27192_s3 + $0xe54] sm:$0xf0] }
 0x315   :  { %9844 = vmatpush.bf16.msrb.mxu1 %v15702_v12  ;;  %9812 = vmatmul.bf16.vlgmr.msrb.gmra.mxu2 %v22856_v28  ;;  %v5184_v63 = vpop.f32.mrf.mxu1  ;;  %v9593_v12 = vadd.f32 %v9592_v9, %v6037_v26  ;;  %v15786_v5 = vor.u32 %v18031_v47, %v15783_v40  ;;  %v16147_v26 = vld [vmem:[%s27192_s3 + $0x112c] sm:$0xf0]  ;;  %v16626_v9 = vor.u32 %v18241_v48, %v16623_v54  ;;  %v16539_v47 = vld [vmem:[%s27192_s3 + $0x143c] sm:$0xf0]  ;;  %v16063_v48 = vld [vmem:[%s27192_s3 + $0x1084] sm:$0xf0] }
 0x316   :  { %9856 = vmatpush.bf16.msra.mxu2 %v15954_v20  ;;  %v5196_v20 = vadd.f32 %v23466_v56, %v5183_v52  ;;  %v17856_v56 = vld [vmem:[%s27192_s3 + $0x8c4] sm:$0xf]  ;;  %v16150_v52 = vor.u32 %v18122_v34, %v16147_v26  ;;  %v14781_v34 = vld [vmem:[%s27192_s3 + $0x660] sm:$0xf] }
 0x317   :  { %9819 = vmatpush.bf16.msra.mxu3 %v15226_v2  ;;  %v15114_v2 = vor.u32 %v17863_v61, %v15111_v58  ;;  %v15086_v3 = vor.u32 %v17856_v56, %v15083_v57  ;;  %v17947_v61 = vld [vmem:[%s27192_s3 + $0xb9c] sm:$0xf]  ;;  %v15447_v58 = vld [vmem:[%s27192_s3 + $0xbb4] sm:$0xf0]  ;;  %v17797_v57 = vld [vmem:[%s27192_s3 + $0x6e8] sm:$0xf0] }
 0x318   :  { %v9605_v30 = vpop.f32.mrf.mxu2  ;;  %vm5211_vm13 = vcmp.gt.f32.partialorder %v5196_v20, 0.0  ;;  %v5224_v53 = vmul.f32 0.01, %v5196_v20  ;;  %v9594_v49 = vpop.f32.mrf.mxu0  ;;  %v15450_v15 = vor.u32 %v17947_v61, %v15447_v58  ;;  %v18206_v61 = vld [vmem:[%s27192_s3 + $0x13b4] sm:$0xf] }
 0x319   :  { %9845 = vmatpush.bf16.msrb.mxu1 %v15674_v59  ;;  %v15503_v59 = vld [vmem:[%s27192_s3 + $0xc24] sm:$0xf0]  ;;  %v5171_v44 = vpop.f32.mrf.mxu3  ;;  %v16483_v58 = vld [vmem:[%s27192_s3 + $0x13cc] sm:$0xf0] }
 0x31a   :  { %9857 = vmatpush.bf16.msra.mxu2 %v15926_v18  ;;  %v23567_v18 = vadd.f32 %v9605_v30, %v9593_v12  ;;  %v5237_v1 = vsel %vm5211_vm13, %v5196_v20, %v5224_v53  ;;  %v15506_v35 = vor.u32 %v17961_v16, %v15503_v59  ;;  %v18248_v12 = vld [vmem:[%s27192_s3 + $0x1504] sm:$0xf]  ;;  %v16567_v30 = vld [vmem:[%s27192_s3 + $0x1474] sm:$0xf0]  ;;  %v15419_v53 = vld [vmem:[%s27192_s3 + $0xb7c] sm:$0xf0] }
 0x31b   :  { %9820 = vmatpush.bf16.msra.mxu3 %v15198_v42  ;;  %v18129_v42 = vld [vmem:[%s27192_s3 + $0x114c] sm:$0xf]  ;;  %v23590_v33 = vpack.c.bf16 %v5237_v1, %v5237_v1  ;;  %v17940_v16 = vld [vmem:[%s27192_s3 + $0xb64] sm:$0xf]  ;;  %v16091_v44 = vld [vmem:[%s27192_s3 + $0x10bc] sm:$0xf0]  ;;  %v16654_v49 = vor.u32 %v18248_v12, %v16651_v6 }
 0x31c   :  { %v16178_v37 = vor.u32 %v18129_v42, %v16175_v8  ;;  %v18108_v59 = vld [vmem:[%s27192_s3 + $0x10a4] sm:$0xf]  ;;  %v15422_v42 = vor.u32 %v17940_v16, %v15419_v53  ;;  %v14809_v1 = vld [vmem:[%s27192_s3 + $0x698] sm:$0xf]  ;;  %v18087_v6 = vld [vmem:[%s27192_s3 + $0xffc] sm:$0xf] }
 0x31d   :  { %9846 = vmatpush.bf16.msrb.mxu1 %v15646_v10  ;;  %v15531_v10 = vld [vmem:[%s27192_s3 + $0xc5c] sm:$0xf0]  ;;  %16703 = vmatmul.msk.bf16.vlgmr.msra.gmra.mxu0 %vm9579_vm14, %v23590_v33  ;;  %v18220_v8 = vld [vmem:[%s27192_s3 + $0x1424] sm:$0xf]  ;;  %v16094_v40 = vor.u32 %v18108_v59, %v16091_v44  ;;  %v15335_v12 = vld [vmem:[%s27192_s3 + $0xad4] sm:$0xf0] }
 0x31e   :  { %9858 = vmatpush.bf16.msra.mxu2 %v15898_v39  ;;  %v17968_v39 = vld [vmem:[%s27192_s3 + $0xc44] sm:$0xf]  ;;  %9830 = vmatpush.bf16.msra.mxu0 %v15506_v35  ;;  %v18101_v35 = vld [vmem:[%s27192_s3 + $0x106c] sm:$0xf]  ;;  %v16542_v54 = vor.u32 %v18220_v8, %v16539_v47  ;;  %v16455_v16 = vld [vmem:[%s27192_s3 + $0x1394] sm:$0xf0] }
 0x31f   :  { %9821 = vmatpush.bf16.msra.mxu3 %v15170_v36  ;;  %v17954_v36 = vld [vmem:[%s27192_s3 + $0xbd4] sm:$0xf]  ;;  %v15534_v13 = vor.u32 %v17968_v39, %v15531_v10  ;;  %v17933_v10 = vld [vmem:[%s27192_s3 + $0xb2c] sm:$0xf]  ;;  %v16066_v26 = vor.u32 %v18101_v35, %v16063_v48  ;;  %v14725_v53 = vld [vmem:[%s27192_s3 + $0x5f0] sm:$0xf] }
 0x320   :  { %v9607_v62 = vpop.f32.mrf.mxu2  ;;  %v15478_v4 = vor.u32 %v17954_v36, %v15475_v38  ;;  %v17790_v39 = vld [vmem:[%s27192_s3 + $0x6b0] sm:$0xf0]  ;;  %v17769_v59 = vld [vmem:[%s27192_s3 + $0x608] sm:$0xf0]  ;;  %v15979_v47 = vld [vmem:[%s27192_s3 + $0xfdc] sm:$0xf0] }
 0x321   :  { %9847 = vmatpush.bf16.msrb.mxu1 %v15618_v19  ;;  %v15755_v19 = vld [vmem:[%s27192_s3 + $0xe1c] sm:$0xf0]  ;;  %v14810_v36 = vor.u32 %v17790_v39, %v14809_v1  ;;  %v16035_v62 = vld [vmem:[%s27192_s3 + $0x104c] sm:$0xf0]  ;;  %v18185_v1 = vld [vmem:[%s27192_s3 + $0x130c] sm:$0xf] }
 0x322   :  { %9859 = vmatpush.bf16.msra.mxu2 %v15870_v41  ;;  %v18024_v41 = vld [vmem:[%s27192_s3 + $0xe04] sm:$0xf]  ;;  %9831 = vmatpush.bf16.msra.mxu0 %v15478_v4  ;;  %v17629_v35 = vld [vmem:[%s27192_s3 + $0x1a8] sm:$0xf0] }
 0x323   :  { %9822 = vmatpush.bf16.msra.mxu3 %v15142_v51  ;;  %v16595_v51 = vld [vmem:[%s27192_s3 + $0x14ac] sm:$0xf0]  ;;  %v15758_v63 = vor.u32 %v18024_v41, %v15755_v19  ;;  %v17926_v41 = vld [vmem:[%s27192_s3 + $0xaf4] sm:$0xf] }
 0x324   :  { %v16598_v20 = vor.u32 %v18234_v32, %v16595_v51  ;;  %v15363_v19 = vld [vmem:[%s27192_s3 + $0xb0c] sm:$0xf0] }
 0x325   :  { %9848 = vmatpush.bf16.msrb.mxu1 %v15590_v29  ;;  %v16119_v29 = vld [vmem:[%s27192_s3 + $0x10f4] sm:$0xf0] }
 0x326   :  { %9860 = vmatpush.bf16.msra.mxu2 %v15842_v22  ;;  %v18115_v22 = vld [vmem:[%s27192_s3 + $0x10dc] sm:$0xf]  ;;  %9832 = vmatpush.bf16.msra.mxu0 %v15450_v15 }
 0x327   :  { %9823 = vmatpush.bf16.msra.mxu3 %v15114_v2  ;;  %v14837_v2 = vld [vmem:[%s27192_s3 + $0x6d0] sm:$0xf]  ;;  %v16122_v56 = vor.u32 %v18115_v22, %v16119_v29  ;;  %v16038_v29 = vor.u32 %v18094_v45, %v16035_v62  ;;  %v17741_v45 = vld [vmem:[%s27192_s3 + $0x528] sm:$0xf0]  ;;  %v18178_v62 = vld [vmem:[%s27192_s3 + $0x12d4] sm:$0xf] }
 0x329   :  { %9849 = vmatpush.bf16.msrb.mxu1 %v15562_v24  ;;  %v14838_v24 = vor.u32 %v17797_v57, %v14837_v2 }
 0x32a   :  { %9861 = vmatpush.bf16.msra.mxu2 %v15814_v21  ;;  %v16570_v21 = vor.u32 %v18227_v7, %v16567_v30  ;;  %9833 = vmatpush.bf16.msra.mxu0 %v15422_v42  ;;  %v16486_v7 = vor.u32 %v18206_v61, %v16483_v58  ;;  %v18199_v30 = vld [vmem:[%s27192_s3 + $0x137c] sm:$0xf]  ;;  %v18080_v42 = vld [vmem:[%s27192_s3 + $0xfc4] sm:$0xf] }
 0x32b   :  { %9824 = vmatpush.bf16.msra.mxu3 %v15086_v3  ;;  %v15391_v3 = vld [vmem:[%s27192_s3 + $0xb44] sm:$0xf0] }
 0x32c   :  { %v15394_v38 = vor.u32 %v17933_v10, %v15391_v3  ;;  %v16458_v10 = vor.u32 %v18199_v30, %v16455_v16  ;;  %v14165_v3 = vld [vmem:[%s27192_s3 + $0x190] sm:$0xf]  ;;  %v17748_v16 = vld [vmem:[%s27192_s3 + $0x560] sm:$0xf0] }
 0x32d   :  { %9850 = vmatpush.bf16.msrb.mxu1 %v15534_v13  ;;  %v16511_v13 = vld [vmem:[%s27192_s3 + $0x1404] sm:$0xf0]  ;;  %9786 = vmatmul.bf16.vlgmr.msrb.gmra.mxu0 %v22813_v23 }
 0x32e   :  { %9862 = vmatpush.bf16.msra.mxu2 %v15786_v5  ;;  %9825 = vmatmul.bf16.vlgmr.msra.gmra.mxu3 %v22858_v17  ;;  %v18213_v5 = vld [vmem:[%s27192_s3 + $0x13ec] sm:$0xf] }
 0x32f   :  { %9869 = vmatpush.bf16.msrb.mxu3 %v16178_v37  ;;  %v9631_v37 = vpop.f32.mrf.mxu1  ;;  %v16514_v4 = vor.u32 %v18213_v5, %v16511_v13  ;;  %9834 = vmatpush.bf16.msra.mxu0 %v15394_v38  ;;  %v18192_v38 = vld [vmem:[%s27192_s3 + $0x1344] sm:$0xf]  ;;  %v16427_v5 = vld [vmem:[%s27192_s3 + $0x135c] sm:$0xf0]  ;;  %v15982_v13 = vor.u32 %v18080_v42, %v15979_v47 }
 0x330   :  { %9851 = vmatmul.bf16.vlgmr.msrb.gmra.mxu1 %v23061_v50  ;;  %v9644_v32 = vpop.f32.mrf.mxu0  ;;  %v16315_v42 = vld [vmem:[%s27192_s3 + $0x127c] sm:$0xf0]  ;;  %v17608_v47 = vld [vmem:[%s27192_s3 + $0x100] sm:$0xf0] }
 0x331   :  { %9895 = vmatpush.bf16.msra.mxu1 %v16626_v9  ;;  %v17783_v9 = vld [vmem:[%s27192_s3 + $0x678] sm:$0xf0]  ;;  %v9618_v25 = vpop.f32.mrf.mxu3 }
 0x332   :  { %9863 = vmatpush.bf16.msra.mxu2 %v15758_v63  ;;  %v14782_v51 = vor.u32 %v17783_v9, %v14781_v34  ;;  %v14753_v63 = vld [vmem:[%s27192_s3 + $0x628] sm:$0xf]  ;;  %v9619_v22 = vadd.f32 %v9618_v25, %v23567_v18  ;;  %v16007_v18 = vld [vmem:[%s27192_s3 + $0x1014] sm:$0xf0]  ;;  %v17762_v9 = vld [vmem:[%s27192_s3 + $0x5d0] sm:$0xf0]  ;;  %v16430_v25 = vor.u32 %v18192_v38, %v16427_v5 }
 0x333   :  { %9870 = vmatpush.bf16.msrb.mxu3 %v16150_v52  ;;  %v15366_v52 = vor.u32 %v17926_v41, %v15363_v19  ;;  %v14613_v41 = vld [vmem:[%s27192_s3 + $0x510] sm:$0xf]  ;;  %v14166_v19 = vor.u32 %v17629_v35, %v14165_v3  ;;  %v14529_v3 = vld [vmem:[%s27192_s3 + $0x468] sm:$0xf]  ;;  %v17720_v35 = vld [vmem:[%s27192_s3 + $0x480] sm:$0xf0] }
 0x334   :  { %v9632_v15 = vadd.f32 %v9631_v37, %v9619_v22  ;;  %v14726_v37 = vor.u32 %v17769_v59, %v14725_v53  ;;  %v14614_v61 = vor.u32 %v17741_v45, %v14613_v41  ;;  %v17755_v22 = vld [vmem:[%s27192_s3 + $0x598] sm:$0xf0]  ;;  %v14557_v53 = vld [vmem:[%s27192_s3 + $0x4a0] sm:$0xf]  ;;  %v18157_v38 = vld [vmem:[%s27192_s3 + $0x122c] sm:$0xf] }
 0x335   :  { %9896 = vmatpush.bf16.msra.mxu1 %v16598_v20  ;;  %9864 = vmatmul.bf16.vlgmr.msra.gmra.mxu2 %v23091_v60  ;;  %v17919_v20 = vld [vmem:[%s27192_s3 + $0xabc] sm:$0xf]  ;;  %v16287_v5 = vld [vmem:[%s27192_s3 + $0x1244] sm:$0xf0]  ;;  %v14501_v41 = vld [vmem:[%s27192_s3 + $0x430] sm:$0xf] }
 0x336   :  { %9914 = vmatpush.bf16.msrb.mxu2 %v16682_v14  ;;  %v17776_v14 = vld [vmem:[%s27192_s3 + $0x640] sm:$0xf0]  ;;  %9835 = vmatpush.bf16.msra.mxu0 %v15366_v52  ;;  %v15338_v57 = vor.u32 %v17919_v20, %v15335_v12  ;;  %v9645_v44 = vadd.f32 %v9644_v32, %v9632_v15  ;;  %v14137_v32 = vld [vmem:[%s27192_s3 + $0x158] sm:$0xf]  ;;  %v17734_v12 = vld [vmem:[%s27192_s3 + $0x4f0] sm:$0xf0] }
 0x337   :  { %9871 = vmatpush.bf16.msrb.mxu3 %v16122_v56  ;;  %v9633_v2 = vpop.f32.mrf.mxu1  ;;  %v14754_v56 = vor.u32 %v17776_v14, %v14753_v63  ;;  %v14669_v63 = vld [vmem:[%s27192_s3 + $0x580] sm:$0xf]  ;;  %v17727_v59 = vld [vmem:[%s27192_s3 + $0x4b8] sm:$0xf0] }
 0x338   :  { %v9657_v8 = vpop.f32.mrf.mxu2  ;;  %v14109_v15 = vld [vmem:[%s27192_s3 + $0x120] sm:$0xf]  ;;  %v14670_v30 = vor.u32 %v17755_v22, %v14669_v63  ;;  %v14641_v2 = vld [vmem:[%s27192_s3 + $0x548] sm:$0xf] }
 0x339   :  { %9897 = vmatpush.bf16.msra.mxu1 %v16570_v21  ;;  %v17912_v21 = vld [vmem:[%s27192_s3 + $0xa84] sm:$0xf]  ;;  %v23779_v39 = vadd.f32 %v9657_v8, %v9645_v44  ;;  %v9620_v48 = vpop.f32.mrf.mxu3  ;;  %v14081_v8 = vld [vmem:[%s27192_s3 + $0xe8] sm:$0xf] }
 0x33a   :  { %9915 = vmatpush.bf16.msrb.mxu2 %v16654_v49  ;;  %v16010_v49 = vor.u32 %v18087_v6, %v16007_v18  ;;  %9836 = vmatpush.bf16.msra.mxu0 %v15338_v57  ;;  %v18171_v6 = vld [vmem:[%s27192_s3 + $0x129c] sm:$0xf]  ;;  %v16343_v18 = vld [vmem:[%s27192_s3 + $0x12b4] sm:$0xf0] }
 0x33b   :  { %9872 = vmatpush.bf16.msrb.mxu3 %v16094_v40  ;;  %v16399_v40 = vld [vmem:[%s27192_s3 + $0x1324] sm:$0xf0]  ;;  %v16346_v57 = vor.u32 %v18171_v6, %v16343_v18 }
 0x33c   :  { %v16402_v34 = vor.u32 %v18185_v1, %v16399_v40  ;;  %v14642_v1 = vor.u32 %v17748_v16, %v14641_v2  ;;  %v14558_v40 = vor.u32 %v17727_v59, %v14557_v53  ;;  %v17587_v16 = vld [vmem:[%s27192_s3 + $0x58] sm:$0xf0] }
 0x33d   :  { %9898 = vmatpush.bf16.msra.mxu1 %v16542_v54  ;;  %v9646_v54 = vpop.f32.mrf.mxu0 }
 0x33e   :  { %9960 = vmatpush.bf16.msra.mxu2 %v14838_v24  ;;  %v15307_v24 = vld [vmem:[%s27192_s3 + $0xa9c] sm:$0xf0]  ;;  %v14082_v54 = vor.u32 %v17608_v47, %v14081_v8  ;;  %v17993_v47 = vld [vmem:[%s27192_s3 + $0xd08] sm:$0xf0] }
 0x33f   :  { %9873 = vmatpush.bf16.msrb.mxu3 %v16066_v26  ;;  %v14697_v26 = vld [vmem:[%s27192_s3 + $0x5b8] sm:$0xf] }
 0x340   :  { %v14698_v52 = vor.u32 %v17762_v9, %v14697_v26  ;;  %v9659_v14 = vpop.f32.mrf.mxu2  ;;  %v14530_v26 = vor.u32 %v17720_v35, %v14529_v3  ;;  %v13969_v3 = vld [vmem:[%s27192_s3 + $0x8] sm:$0xf]  ;;  %v17580_v35 = vld [vmem:[%s27192_s3 + $0x20] sm:$0xf0] }
 0x341   :  { %9899 = vmatpush.bf16.msra.mxu1 %v16514_v4  ;;  %v16371_v4 = vld [vmem:[%s27192_s3 + $0x12ec] sm:$0xf0]  ;;  %v17706_v14 = vld [vmem:[%s27192_s3 + $0x410] sm:$0xf0] }
 0x342   :  { %9961 = vmatpush.bf16.msra.mxu2 %v14810_v36  ;;  %v15310_v36 = vor.u32 %v17912_v21, %v15307_v24  ;;  %v16374_v58 = vor.u32 %v18178_v62, %v16371_v4  ;;  %v18021_v21 = vld [vmem:[%s27192_s3 + $0xde8] sm:$0xf0]  ;;  %v18164_v24 = vld [vmem:[%s27192_s3 + $0x1264] sm:$0xf]  ;;  %v16290_v62 = vor.u32 %v18157_v38, %v16287_v5 }
 0x343   :  { %9874 = vmatpush.bf16.msrb.mxu3 %v16038_v29  ;;  %v14585_v29 = vld [vmem:[%s27192_s3 + $0x4d8] sm:$0xf]  ;;  %v16318_v48 = vor.u32 %v18164_v24, %v16315_v42  ;;  %v17853_v38 = vld [vmem:[%s27192_s3 + $0x8a8] sm:$0xf0] }
 0x344   :  { %9837 = vmatpush.bf16.msra.mxu0 %v15310_v36  ;;  %v18014_v36 = vld [vmem:[%s27192_s3 + $0xdb0] sm:$0xf0] }
 0x345   :  { %9900 = vmatpush.bf16.msra.mxu1 %v16486_v7  ;;  %16704 = vmatmul.msk.bf16.vlgmr.msrb.gmra.mxu2 %vm9579_vm14, %v23590_v33  ;;  %v17615_v7 = vld [vmem:[%s27192_s3 + $0x138] sm:$0xf0] }
 0x346   :  { %9962 = vmatpush.bf16.msra.mxu2 %v14782_v51  ;;  %v17622_v51 = vld [vmem:[%s27192_s3 + $0x170] sm:$0xf0]  ;;  %v14110_v44 = vor.u32 %v17615_v7, %v14109_v15  ;;  %v15649_v15 = vld [vmem:[%s27192_s3 + $0xd28] sm:$0xf]  ;;  %v18000_v7 = vld [vmem:[%s27192_s3 + $0xd40] sm:$0xf0] }
 0x347   :  { %9875 = vmatpush.bf16.msrb.mxu3 %v16010_v49  ;;  %v14138_v20 = vor.u32 %v17622_v51, %v14137_v32  ;;  %9838 = vmatmul.bf16.vlgmr.msra.gmra.mxu0 %v23057_v43  ;;  %v15733_v49 = vld [vmem:[%s27192_s3 + $0xdd0] sm:$0xf]  ;;  %v18007_v32 = vld [vmem:[%s27192_s3 + $0xd78] sm:$0xf0]  ;;  %v18150_v51 = vld [vmem:[%s27192_s3 + $0x11f4] sm:$0xf] }
 0x348   :  { %9882 = vmatpush.bf16.msrb.mxu0 %v16402_v34  ;;  %v17601_v34 = vld [vmem:[%s27192_s3 + $0xc8] sm:$0xf0] }
 0x349   :  { %9901 = vmatpush.bf16.msra.mxu1 %v16458_v10  ;;  %v15734_v10 = vor.u32 %v18021_v21, %v15733_v49  ;;  %v17699_v49 = vld [vmem:[%s27192_s3 + $0x3d8] sm:$0xf0]  ;;  %v15621_v21 = vld [vmem:[%s27192_s3 + $0xcf0] sm:$0xf] }
 0x34a   :  { %9963 = vmatpush.bf16.msra.mxu2 %v14754_v56  ;;  %v14586_v56 = vor.u32 %v17734_v12, %v14585_v29  ;;  %v14473_v29 = vld [vmem:[%s27192_s3 + $0x3f8] sm:$0xf] }
 0x34b   :  { %9876 = vmatpush.bf16.msrb.mxu3 %v15982_v13  ;;  %v14053_v13 = vld [vmem:[%s27192_s3 + $0xb0] sm:$0xf]  ;;  %v14474_v59 = vor.u32 %v17706_v14, %v14473_v29  ;;  %v17846_v29 = vld [vmem:[%s27192_s3 + $0x870] sm:$0xf0] }
 0x34c   :  { %9883 = vmatpush.bf16.msrb.mxu0 %v16374_v58  ;;  %v14054_v4 = vor.u32 %v17601_v34, %v14053_v13  ;;  %v17594_v58 = vld [vmem:[%s27192_s3 + $0x90] sm:$0xf0]  ;;  %v15622_v34 = vor.u32 %v17993_v47, %v15621_v21 }
 0x34d   :  { %9902 = vmatpush.bf16.msra.mxu1 %v16430_v25  ;;  %v9683_v45 = vpop.f32.mrf.mxu1  ;;  %v15677_v25 = vld [vmem:[%s27192_s3 + $0xd60] sm:$0xf] }
 0x34e   :  { %9964 = vmatpush.bf16.msra.mxu2 %v14726_v37  ;;  %9877 = vmatmul.bf16.vlgmr.msrb.gmra.mxu3 %v23094_v11  ;;  %v15705_v37 = vld [vmem:[%s27192_s3 + $0xd98] sm:$0xf]  ;;  %v15678_v22 = vor.u32 %v18007_v32, %v15677_v25 }
 0x34f   :  { %9921 = vmatpush.bf16.msra.mxu3 %v14166_v19  ;;  %v15706_v9 = vor.u32 %v18014_v36, %v15705_v37  ;;  %v17713_v19 = vld [vmem:[%s27192_s3 + $0x448] sm:$0xf0]  ;;  %v15061_v36 = vld [vmem:[%s27192_s3 + $0x890] sm:$0xf]  ;;  %v15593_v32 = vld [vmem:[%s27192_s3 + $0xcb8] sm:$0xf] }
 0x350   :  { %9903 = vmatmul.bf16.vlgmr.msra.gmra.mxu1 %v23261_v0  ;;  %9884 = vmatpush.bf16.msrb.mxu0 %v16346_v57  ;;  %v14502_v63 = vor.u32 %v17713_v19, %v14501_v41  ;;  %v9696_v12 = vpop.f32.mrf.mxu0  ;;  %v13997_v57 = vld [vmem:[%s27192_s3 + $0x40] sm:$0xf]  ;;  %v17685_v37 = vld [vmem:[%s27192_s3 + $0x368] sm:$0xf0]  ;;  %v13970_v19 = vor.u32 %v17580_v35, %v13969_v3  ;;  %v15062_v25 = vor.u32 %v17853_v38, %v15061_v36  ;;  %v17664_v3 = vld [vmem:[%s27192_s3 + $0x2c0] sm:$0xf0] }
 0x351   :  { %9947 = vmatpush.bf16.msrb.mxu1 %v14614_v61  ;;  %v14025_v61 = vld [vmem:[%s27192_s3 + $0x78] sm:$0xf]  ;;  %v13998_v8 = vor.u32 %v17587_v16, %v13997_v57  ;;  %v14333_v57 = vld [vmem:[%s27192_s3 + $0x2e0] sm:$0xf]  ;;  %v17671_v16 = vld [vmem:[%s27192_s3 + $0x2f8] sm:$0xf0] }
 0x352   :  { %9965 = vmatpush.bf16.msra.mxu2 %v14698_v52  ;;  %v16259_v52 = vld [vmem:[%s27192_s3 + $0x120c] sm:$0xf0]  ;;  %v14026_v18 = vor.u32 %v17594_v58, %v14025_v61  ;;  %v17965_v61 = vld [vmem:[%s27192_s3 + $0xc28] sm:$0xf0]  ;;  %v14361_v58 = vld [vmem:[%s27192_s3 + $0x318] sm:$0xf]  ;;  %v14334_v21 = vor.u32 %v17671_v16, %v14333_v57 }
 0x353   :  { %9922 = vmatpush.bf16.msra.mxu3 %v14138_v20  ;;  %v9670_v20 = vpop.f32.mrf.mxu3  ;;  %v16262_v6 = vor.u32 %v18150_v51, %v16259_v52  ;;  %v17986_v51 = vld [vmem:[%s27192_s3 + $0xcd0] sm:$0xf0]  ;;  %v15509_v52 = vld [vmem:[%s27192_s3 + $0xc10] sm:$0xf]  ;;  %v14977_v35 = vld [vmem:[%s27192_s3 + $0x7e8] sm:$0xf] }
 0x354   :  { %9885 = vmatpush.bf16.msrb.mxu0 %v16318_v48  ;;  %v9671_v2 = vadd.f32 %v9670_v20, %v23779_v39  ;;  %v14445_v39 = vld [vmem:[%s27192_s3 + $0x3c0] sm:$0xf]  ;;  %v14389_v48 = vld [vmem:[%s27192_s3 + $0x350] sm:$0xf]  ;;  %v15594_v20 = vor.u32 %v17986_v51, %v15593_v32  ;;  %v15425_v38 = vld [vmem:[%s27192_s3 + $0xb68] sm:$0xf] }
 0x355   :  { %9948 = vmatpush.bf16.msrb.mxu1 %v14586_v56  ;;  %v16231_v56 = vld [vmem:[%s27192_s3 + $0x11d4] sm:$0xf0]  ;;  %v9685_v24 = vpop.f32.mrf.mxu1  ;;  %v14446_v13 = vor.u32 %v17699_v49, %v14445_v39  ;;  %v15537_v39 = vld [vmem:[%s27192_s3 + $0xc48] sm:$0xf]  ;;  %v15397_v51 = vld [vmem:[%s27192_s3 + $0xb30] sm:$0xf] }
 0x356   :  { %9966 = vmatpush.bf16.msra.mxu2 %v14670_v30  ;;  %v18143_v30 = vld [vmem:[%s27192_s3 + $0x11bc] sm:$0xf]  ;;  %v9684_v53 = vadd.f32 %v9683_v45, %v9671_v2  ;;  %v14417_v45 = vld [vmem:[%s27192_s3 + $0x388] sm:$0xf]  ;;  %v17972_v24 = vld [vmem:[%s27192_s3 + $0xc60] sm:$0xf0] }
 0x357   :  { %9923 = vmatpush.bf16.msra.mxu3 %v14110_v44  ;;  %v15650_v44 = vor.u32 %v18000_v7, %v15649_v15  ;;  %v16234_v42 = vor.u32 %v18143_v30, %v16231_v56  ;;  %v17979_v15 = vld [vmem:[%s27192_s3 + $0xc98] sm:$0xf0]  ;;  %v15481_v7 = vld [vmem:[%s27192_s3 + $0xbd8] sm:$0xf]  ;;  %v17958_v56 = vld [vmem:[%s27192_s3 + $0xbf0] sm:$0xf0] }
 0x358   :  { %9886 = vmatpush.bf16.msrb.mxu0 %v16290_v62  ;;  %v17692_v62 = vld [vmem:[%s27192_s3 + $0x3a0] sm:$0xf0]  ;;  %v15482_v49 = vor.u32 %v17958_v56, %v15481_v7  ;;  %v15369_v7 = vld [vmem:[%s27192_s3 + $0xaf8] sm:$0xf]  ;;  %v16545_v16 = vld [vmem:[%s27192_s3 + $0x1428] sm:$0xf] }
 0x359   :  { %9949 = vmatpush.bf16.msrb.mxu1 %v14558_v40  ;;  %v16203_v40 = vld [vmem:[%s27192_s3 + $0x119c] sm:$0xf0]  ;;  %v14418_v14 = vor.u32 %v17692_v62, %v14417_v45  ;;  %v17657_v45 = vld [vmem:[%s27192_s3 + $0x288] sm:$0xf0]  ;;  %v14949_v62 = vld [vmem:[%s27192_s3 + $0x7b0] sm:$0xf] }
 0x35a   :  { %9967 = vmatpush.bf16.msra.mxu2 %v14642_v1  ;;  %v18136_v1 = vld [vmem:[%s27192_s3 + $0x1184] sm:$0xf] }
 0x35b   :  { %9924 = vmatpush.bf16.msra.mxu3 %v14082_v54  ;;  %v9709_v54 = vpop.f32.mrf.mxu2  ;;  %v16206_v41 = vor.u32 %v18136_v1, %v16203_v40  ;;  %v16629_v1 = vld [vmem:[%s27192_s3 + $0x14d0] sm:$0xf]  ;;  %v18245_v40 = vld [vmem:[%s27192_s3 + $0x14e8] sm:$0xf0] }
 0x35c   :  { %9887 = vmatpush.bf16.msrb.mxu0 %v16262_v6  ;;  %v16630_v36 = vor.u32 %v18245_v40, %v16629_v1 }
 0x35d   :  { %9968 = vmatmul.bf16.vlgmr.msra.gmra.mxu2 %v22822_v27  ;;  %9950 = vmatpush.bf16.msrb.mxu1 %v14530_v26  ;;  %v9672_v26 = vpop.f32.mrf.mxu3 }
 0x35e   :  { %10012 = vmatpush.bf16.msrb.mxu2 %v15734_v10  ;;  %v9697_v10 = vadd.f32 %v9696_v12, %v9684_v53  ;;  %v15510_v12 = vor.u32 %v17965_v61, %v15509_v52  ;;  %v15005_v53 = vld [vmem:[%s27192_s3 + $0x820] sm:$0xf]  ;;  %v17937_v52 = vld [vmem:[%s27192_s3 + $0xb48] sm:$0xf0] }
 0x35f   :  { %9925 = vmatpush.bf16.msra.mxu3 %v14054_v4  ;;  %v14390_v4 = vor.u32 %v17685_v37, %v14389_v48  ;;  %v17832_v48 = vld [vmem:[%s27192_s3 + $0x800] sm:$0xf0] }
 0x360   :  { %v23986_v5 = vadd.f32 %v9709_v54, %v9697_v10  ;;  %9888 = vmatpush.bf16.msrb.mxu0 %v16234_v42  ;;  %v15453_v42 = vld [vmem:[%s27192_s3 + $0xba0] sm:$0xf]  ;;  %v14305_v10 = vld [vmem:[%s27192_s3 + $0x2a8] sm:$0xf]  ;;  %v15538_v54 = vor.u32 %v17972_v24, %v15537_v39  ;;  %v14978_v26 = vor.u32 %v17832_v48, %v14977_v35  ;;  %v17643_v39 = vld [vmem:[%s27192_s3 + $0x218] sm:$0xf0] }
 0x361   :  { %9951 = vmatpush.bf16.msrb.mxu1 %v14502_v63  ;;  %v17678_v63 = vld [vmem:[%s27192_s3 + $0x330] sm:$0xf0]  ;;  %v14193_v35 = vld [vmem:[%s27192_s3 + $0x1c8] sm:$0xf]  ;;  %v17636_v48 = vld [vmem:[%s27192_s3 + $0x1e0] sm:$0xf0] }
 0x362   :  { %10013 = vmatpush.bf16.msrb.mxu2 %v15706_v9  ;;  %v9698_v9 = vpop.f32.mrf.mxu0  ;;  %v14362_v6 = vor.u32 %v17678_v63, %v14361_v58  ;;  %v16573_v63 = vld [vmem:[%s27192_s3 + $0x1460] sm:$0xf] }
 0x363   :  { %9926 = vmatpush.bf16.msra.mxu3 %v14026_v18  ;;  %v15565_v18 = vld [vmem:[%s27192_s3 + $0xc80] sm:$0xf]  ;;  %v9711_v30 = vpop.f32.mrf.mxu2  ;;  %v16601_v9 = vld [vmem:[%s27192_s3 + $0x1498] sm:$0xf] }
 0x364   :  { %9889 = vmatpush.bf16.msrb.mxu0 %v16206_v41  ;;  %v18238_v41 = vld [vmem:[%s27192_s3 + $0x14b0] sm:$0xf0] }
 0x365   :  { %9952 = vmatpush.bf16.msrb.mxu1 %v14474_v59  ;;  %v17839_v59 = vld [vmem:[%s27192_s3 + $0x838] sm:$0xf0]  ;;  %v16602_v32 = vor.u32 %v18238_v41, %v16601_v9  ;;  %v17930_v30 = vld [vmem:[%s27192_s3 + $0xb10] sm:$0xf0]  ;;  %v18077_v9 = vld [vmem:[%s27192_s3 + $0xfa8] sm:$0xf0] }
 0x366   :  { %10014 = vmatpush.bf16.msrb.mxu2 %v15678_v22  ;;  %v15033_v22 = vld [vmem:[%s27192_s3 + $0x858] sm:$0xf]  ;;  %v15006_v47 = vor.u32 %v17839_v59, %v15005_v53  ;;  %v18224_v53 = vld [vmem:[%s27192_s3 + $0x1440] sm:$0xf0]  ;;  %v14221_v59 = vld [vmem:[%s27192_s3 + $0x200] sm:$0xf]  ;;  %v15370_v24 = vor.u32 %v17930_v30, %v15369_v7 }
 0x367   :  { %9927 = vmatpush.bf16.msra.mxu3 %v13998_v8  ;;  %v15034_v2 = vor.u32 %v17846_v29, %v15033_v22  ;;  %9890 = vmatmul.bf16.vlgmr.msrb.gmra.mxu0 %v23259_v46  ;;  %v17951_v8 = vld [vmem:[%s27192_s3 + $0xbb8] sm:$0xf0]  ;;  %v14249_v29 = vld [vmem:[%s27192_s3 + $0x238] sm:$0xf]  ;;  %v14222_v40 = vor.u32 %v17643_v39, %v14221_v59  ;;  %v15229_v59 = vld [vmem:[%s27192_s3 + $0x9e0] sm:$0xf] }
 0x368   :  { %9934 = vmatpush.bf16.msra.mxu0 %v14390_v4  ;;  %v15454_v37 = vor.u32 %v17951_v8, %v15453_v42  ;;  %v17825_v4 = vld [vmem:[%s27192_s3 + $0x7c8] sm:$0xf0]  ;;  %v18231_v22 = vld [vmem:[%s27192_s3 + $0x1478] sm:$0xf0]  ;;  %v16546_v42 = vor.u32 %v18224_v53, %v16545_v16  ;;  %v18182_v53 = vld [vmem:[%s27192_s3 + $0x12f0] sm:$0xf0] }
 0x369   :  { %9953 = vmatpush.bf16.msrb.mxu1 %v14446_v13  ;;  %v17944_v13 = vld [vmem:[%s27192_s3 + $0xb80] sm:$0xf0]  ;;  %v14950_v58 = vor.u32 %v17825_v4, %v14949_v62  ;;  %v17923_v8 = vld [vmem:[%s27192_s3 + $0xad8] sm:$0xf0]  ;;  %v14194_v62 = vor.u32 %v17636_v48, %v14193_v35  ;;  %v15901_v39 = vld [vmem:[%s27192_s3 + $0xf20] sm:$0xf] }
 0x36a   :  { %10015 = vmatpush.bf16.msrb.mxu2 %v15650_v44  ;;  %v15566_v44 = vor.u32 %v17979_v15, %v15565_v18  ;;  %v15398_v18 = vor.u32 %v17937_v52, %v15397_v51  ;;  %v16574_v15 = vor.u32 %v18231_v22, %v16573_v63  ;;  %v16405_v63 = vld [vmem:[%s27192_s3 + $0x1310] sm:$0xf]  ;;  %v18189_v22 = vld [vmem:[%s27192_s3 + $0x1328] sm:$0xf0]  ;;  %v15201_v48 = vld [vmem:[%s27192_s3 + $0x9a8] sm:$0xf] }
 0x36b   :  { %9928 = vmatpush.bf16.msra.mxu3 %v13970_v19  ;;  %v14277_v19 = vld [vmem:[%s27192_s3 + $0x270] sm:$0xf]  ;;  %v16406_v7 = vor.u32 %v18189_v22, %v16405_v63 }
 0x36c   :  { %9935 = vmatpush.bf16.msra.mxu0 %v14362_v6  ;;  %v14278_v61 = vor.u32 %v17657_v45, %v14277_v19  ;;  %v17818_v6 = vld [vmem:[%s27192_s3 + $0x790] sm:$0xf0]  ;;  %v14615_v35 = vld [vmem:[%s27192_s3 + $0x52c] sm:$0xf0] }
 0x36d   :  { %9954 = vmatpush.bf16.msrb.mxu1 %v14418_v14  ;;  %v9735_v14 = vpop.f32.mrf.mxu1 }
 0x36e   :  { %10016 = vmatpush.bf16.msrb.mxu2 %v15622_v34  ;;  %9929 = vmatmul.bf16.vlgmr.msra.gmra.mxu3 %v22622_v55  ;;  %v14306_v34 = vor.u32 %v17664_v3, %v14305_v10  ;;  %v18217_v3 = vld [vmem:[%s27192_s3 + $0x1408] sm:$0xf0] }
 0x36f   :  { %9973 = vmatpush.bf16.msrb.mxu3 %v15062_v25  ;;  %v15426_v25 = vor.u32 %v17944_v13, %v15425_v38  ;;  %v17804_v38 = vld [vmem:[%s27192_s3 + $0x720] sm:$0xf0]  ;;  %v15285_v13 = vld [vmem:[%s27192_s3 + $0xa50] sm:$0xf] }
 0x370   :  { %9955 = vmatmul.bf16.vlgmr.msrb.gmra.mxu1 %v22813_v23  ;;  %9936 = vmatpush.bf16.msra.mxu0 %v14334_v21  ;;  %v17811_v21 = vld [vmem:[%s27192_s3 + $0x758] sm:$0xf0] }
 0x371   :  { %9999 = vmatpush.bf16.msra.mxu1 %v15510_v12  ;;  %v14921_v12 = vld [vmem:[%s27192_s3 + $0x778] sm:$0xf] }
 0x372   :  { %10017 = vmatpush.bf16.msrb.mxu2 %v15594_v20  ;;  %v17650_v20 = vld [vmem:[%s27192_s3 + $0x250] sm:$0xf0]  ;;  %v14922_v57 = vor.u32 %v17818_v6, %v14921_v12 }
 0x373   :  { %9974 = vmatpush.bf16.msrb.mxu3 %v15034_v2  ;;  %v9722_v2 = vpop.f32.mrf.mxu3  ;;  %v14250_v56 = vor.u32 %v17650_v20, %v14249_v29  ;;  %v15257_v29 = vld [vmem:[%s27192_s3 + $0xa18] sm:$0xf]  ;;  %v18070_v12 = vld [vmem:[%s27192_s3 + $0xf70] sm:$0xf0] }
 0x374   :  { %9937 = vmatpush.bf16.msra.mxu0 %v14306_v34  ;;  %v17909_v34 = vld [vmem:[%s27192_s3 + $0xa68] sm:$0xf0]  ;;  %v15929_v20 = vld [vmem:[%s27192_s3 + $0xf58] sm:$0xf] }
 0x375   :  { %10000 = vmatpush.bf16.msra.mxu1 %v15482_v49  ;;  %v14893_v49 = vld [vmem:[%s27192_s3 + $0x740] sm:$0xf]  ;;  %v15286_v51 = vor.u32 %v17909_v34, %v15285_v13  ;;  %v15930_v16 = vor.u32 %v18070_v12, %v15929_v20  ;;  %v18161_v20 = vld [vmem:[%s27192_s3 + $0x1248] sm:$0xf0] }
 0x376   :  { %10018 = vmatpush.bf16.msrb.mxu2 %v15566_v44  ;;  %v9723_v44 = vadd.f32 %v9722_v2, %v23986_v5  ;;  %v15341_v5 = vld [vmem:[%s27192_s3 + $0xac0] sm:$0xf]  ;;  %v14894_v10 = vor.u32 %v17811_v21, %v14893_v49  ;;  %v18063_v49 = vld [vmem:[%s27192_s3 + $0xf38] sm:$0xf0] }
 0x377   :  { %9975 = vmatpush.bf16.msrb.mxu3 %v15006_v47  ;;  %v16517_v47 = vld [vmem:[%s27192_s3 + $0x13f0] sm:$0xf]  ;;  %v15342_v41 = vor.u32 %v17923_v8, %v15341_v5  ;;  %v16461_v2 = vld [vmem:[%s27192_s3 + $0x1380] sm:$0xf]  ;;  %v18196_v8 = vld [vmem:[%s27192_s3 + $0x1360] sm:$0xf0] }
 0x378   :  { %9938 = vmatpush.bf16.msra.mxu0 %v14278_v61  ;;  %v24158_v1 = vadd.f32 %v9735_v14, %v9723_v44  ;;  %v16518_v19 = vor.u32 %v18217_v3, %v16517_v47  ;;  %v16489_v61 = vld [vmem:[%s27192_s3 + $0x13b8] sm:$0xf]  ;;  %v17902_v14 = vld [vmem:[%s27192_s3 + $0xa30] sm:$0xf0]  ;;  %v17895_v44 = vld [vmem:[%s27192_s3 + $0x9f8] sm:$0xf0] }
 0x379   :  { %10001 = vmatpush.bf16.msra.mxu1 %v15454_v37  ;;  %v24169_v37 = vpop.f32.mrf.mxu2  ;;  %v15258_v30 = vor.u32 %v17902_v14, %v15257_v29  ;;  %v15230_v5 = vor.u32 %v17895_v44, %v15229_v59  ;;  %v16349_v47 = vld [vmem:[%s27192_s3 + $0x12a0] sm:$0xf]  ;;  %v17738_v3 = vld [vmem:[%s27192_s3 + $0x514] sm:$0xf]  ;;  %v16293_v14 = vld [vmem:[%s27192_s3 + $0x1230] sm:$0xf] }
 0x37a   :  { %10019 = vmatpush.bf16.msrb.mxu2 %v15538_v54  ;;  %v9737_v54 = vpop.f32.mrf.mxu1  ;;  %v16265_v44 = vld [vmem:[%s27192_s3 + $0x11f8] sm:$0xf] }
 0x37b   :  { %9976 = vmatpush.bf16.msrb.mxu3 %v14978_v26  ;;  %v15957_v26 = vld [vmem:[%s27192_s3 + $0xf90] sm:$0xf]  ;;  %v9724_v45 = vpop.f32.mrf.mxu3  ;;  %v17888_v54 = vld [vmem:[%s27192_s3 + $0x9c0] sm:$0xf0] }
 0x37c   :  { %9939 = vmatpush.bf16.msra.mxu0 %v14250_v56  ;;  %v15958_v52 = vor.u32 %v18077_v9, %v15957_v26  ;;  %v18203_v56 = vld [vmem:[%s27192_s3 + $0x1398] sm:$0xf0]  ;;  %v14618_v26 = vor.u32 %v17738_v3, %v14615_v35  ;;  %v16321_v9 = vld [vmem:[%s27192_s3 + $0x1268] sm:$0xf] }
 0x37d   :  { %10020 = vmatmul.bf16.vlgmr.msrb.gmra.mxu2 %v23061_v50  ;;  %10002 = vmatpush.bf16.msra.mxu1 %v15426_v25  ;;  %v15313_v25 = vld [vmem:[%s27192_s3 + $0xa88] sm:$0xf]  ;;  %v16462_v21 = vor.u32 %v18203_v56, %v16461_v2  ;;  %v15817_v2 = vld [vmem:[%s27192_s3 + $0xe78] sm:$0xf]  ;;  %v18042_v56 = vld [vmem:[%s27192_s3 + $0xe90] sm:$0xf0] }
 0x37e   :  { %10064 = vmatpush.bf16.msra.mxu2 %v16630_v36  ;;  %v14865_v36 = vld [vmem:[%s27192_s3 + $0x708] sm:$0xf] }
 0x37f   :  { %9977 = vmatpush.bf16.msrb.mxu3 %v14950_v58  ;;  %v14866_v4 = vor.u32 %v17804_v38, %v14865_v36  ;;  %v18210_v58 = vld [vmem:[%s27192_s3 + $0x13d0] sm:$0xf0]  ;;  %v15873_v36 = vld [vmem:[%s27192_s3 + $0xee8] sm:$0xf]  ;;  %v18056_v38 = vld [vmem:[%s27192_s3 + $0xf00] sm:$0xf0] }
 0x380   :  { %9940 = vmatpush.bf16.msra.mxu0 %v14222_v40  ;;  %v18175_v40 = vld [vmem:[%s27192_s3 + $0x12b8] sm:$0xf0]  ;;  %v15874_v45 = vor.u32 %v18056_v38, %v15873_v36  ;;  %v17710_v36 = vld [vmem:[%s27192_s3 + $0x434] sm:$0xf] }
 0x381   :  { %10003 = vmatpush.bf16.msra.mxu1 %v15398_v18  ;;  %v16490_v18 = vor.u32 %v18210_v58, %v16489_v61  ;;  %v16350_v34 = vor.u32 %v18175_v40, %v16349_v47  ;;  %v18329_v61 = vld [vmem:[%s27193_s4] sm:$0x7f]  ;;  %v18035_v40 = vld [vmem:[%s27192_s3 + $0xe58] sm:$0xf0] }
 0x382   :  { %10065 = vmatpush.bf16.msra.mxu2 %v16602_v32  ;;  %v17916_v32 = vld [vmem:[%s27192_s3 + $0xaa0] sm:$0xf0]  ;;  %v6038_v58 = vperm.slane %v18329_v61, 1  ;;  %v15789_v47 = vld [vmem:[%s27192_s3 + $0xe40] sm:$0xf] }
 0x383   :  { %9978 = vmatpush.bf16.msrb.mxu3 %v14922_v57  ;;  %v15314_v6 = vor.u32 %v17916_v32, %v15313_v25  ;;  %v16377_v57 = vld [vmem:[%s27192_s3 + $0x12d8] sm:$0xf]  ;;  %v15173_v25 = vld [vmem:[%s27192_s3 + $0x970] sm:$0xf]  ;;  %v17881_v32 = vld [vmem:[%s27192_s3 + $0x988] sm:$0xf0] }
 0x384   :  { %9941 = vmatpush.bf16.msra.mxu0 %v14194_v62  ;;  %v17731_v62 = vld [vmem:[%s27192_s3 + $0x4dc] sm:$0xf]  ;;  %v15174_v12 = vor.u32 %v17881_v32, %v15173_v25  ;;  %v16685_v25 = vld [vmem:[%s27192_s3 + $0x1540] sm:$0xf] }
 0x385   :  { %10004 = vmatpush.bf16.msra.mxu1 %v15370_v24  ;;  %v16433_v24 = vld [vmem:[%s27192_s3 + $0x1348] sm:$0xf]  ;;  %v18259_v32 = vld [vmem:[%s27192_s3 + $0x1558] sm:$0xf0] }
 0x386   :  { %10066 = vmatpush.bf16.msra.mxu2 %v16574_v15  ;;  %v9763_v15 = vpop.f32.mrf.mxu2  ;;  %v16434_v13 = vor.u32 %v18196_v8, %v16433_v24  ;;  %v15818_v24 = vor.u32 %v18042_v56, %v15817_v2  ;;  %v17867_v8 = vld [vmem:[%s27192_s3 + $0x918] sm:$0xf0]  ;;  %v18126_v2 = vld [vmem:[%s27192_s3 + $0x1130] sm:$0xf0]  ;;  %v16657_v56 = vld [vmem:[%s27192_s3 + $0x1508] sm:$0xf] }
 0x387   :  { %9979 = vmatpush.bf16.msrb.mxu3 %v14894_v10  ;;  %9942 = vmatmul.bf16.vlgmr.msra.gmra.mxu0 %v22624_v31  ;;  %v15902_v10 = vor.u32 %v18063_v49, %v15901_v39  ;;  %v14559_v15 = vld [vmem:[%s27192_s3 + $0x4bc] sm:$0xf0]  ;;  %v18154_v39 = vld [vmem:[%s27192_s3 + $0x1210] sm:$0xf0] }
 0x388   :  { %9986 = vmatpush.bf16.msrb.mxu0 %v15286_v51  ;;  %v15845_v51 = vld [vmem:[%s27192_s3 + $0xeb0] sm:$0xf]  ;;  %v16266_v3 = vor.u32 %v18154_v39, %v16265_v44 }
 0x389   :  { %10005 = vmatpush.bf16.msra.mxu1 %v15342_v41  ;;  %v18168_v41 = vld [vmem:[%s27192_s3 + $0x1280] sm:$0xf0]  ;;  %v14839_v44 = vld [vmem:[%s27192_s3 + $0x6ec] sm:$0xf0] }
 0x38a   :  { %10067 = vmatpush.bf16.msra.mxu2 %v16546_v42  ;;  %v16378_v42 = vor.u32 %v18182_v53, %v16377_v57  ;;  %v16322_v22 = vor.u32 %v18168_v41, %v16321_v9  ;;  %v9762_v57 = vadd.f32 %v24169_v37, %v6038_v58  ;;  %v16294_v53 = vor.u32 %v18161_v20, %v16293_v14  ;;  %v17717_v37 = vld [vmem:[%s27192_s3 + $0x46c] sm:$0xf]  ;;  %v17860_v9 = vld [vmem:[%s27192_s3 + $0x8e0] sm:$0xf0] }
 0x38b   :  { %9980 = vmatpush.bf16.msrb.mxu3 %v14866_v4  ;;  %v14587_v4 = vld [vmem:[%s27192_s3 + $0x4f4] sm:$0xf0]  ;;  %v18140_v14 = vld [vmem:[%s27192_s3 + $0x11a0] sm:$0xf0] }
 0x38c   :  { %9987 = vmatpush.bf16.msrb.mxu0 %v15258_v30  ;;  %v14590_v29 = vor.u32 %v17731_v62, %v14587_v4  ;;  %v17874_v30 = vld [vmem:[%s27192_s3 + $0x950] sm:$0xf0]  ;;  %v16181_v62 = vld [vmem:[%s27192_s3 + $0x1150] sm:$0xf]  ;;  %v18133_v4 = vld [vmem:[%s27192_s3 + $0x1168] sm:$0xf0] }
 0x38d   :  { %10006 = vmatpush.bf16.msra.mxu1 %v15314_v6  ;;  %v24303_v63 = vpop.f32.mrf.mxu1  ;;  %v16182_v20 = vor.u32 %v18133_v4, %v16181_v62  ;;  %v15511_v62 = vld [vmem:[%s27192_s3 + $0xc2c] sm:$0xf0] }
 0x38e   :  { %10068 = vmatpush.bf16.msra.mxu2 %v16518_v19  ;;  %9981 = vmatmul.bf16.vlgmr.msrb.gmra.mxu3 %v22856_v28  ;;  %v15202_v19 = vor.u32 %v17888_v54, %v15201_v48  ;;  %v16237_v48 = vld [vmem:[%s27192_s3 + $0x11c0] sm:$0xf]  ;;  %v18147_v54 = vld [vmem:[%s27192_s3 + $0x11d8] sm:$0xf0] }
 0x38f   :  { %10025 = vmatpush.bf16.msra.mxu3 %v15958_v52  ;;  %v18049_v52 = vld [vmem:[%s27192_s3 + $0xec8] sm:$0xf0] }
 0x390   :  { %10007 = vmatmul.bf16.vlgmr.msra.gmra.mxu1 %v23057_v43  ;;  %9988 = vmatpush.bf16.msrb.mxu0 %v15230_v5  ;;  %v15846_v6 = vor.u32 %v18049_v52, %v15845_v51  ;;  %v15117_v5 = vld [vmem:[%s27192_s3 + $0x900] sm:$0xf]  ;;  %v16238_v52 = vor.u32 %v18147_v54, %v16237_v48  ;;  %v17787_v48 = vld [vmem:[%s27192_s3 + $0x69c] sm:$0xf]  ;;  %v14811_v54 = vld [vmem:[%s27192_s3 + $0x6b4] sm:$0xf0] }
 0x391   :  { %10051 = vmatpush.bf16.msrb.mxu1 %v16406_v7  ;;  %v15145_v7 = vld [vmem:[%s27192_s3 + $0x938] sm:$0xf]  ;;  %v15118_v38 = vor.u32 %v17867_v8, %v15117_v5  ;;  %v17675_v5 = vld [vmem:[%s27192_s3 + $0x31c] sm:$0xf] }
 0x392   :  { %10069 = vmatpush.bf16.msra.mxu2 %v16490_v18  ;;  %v17724_v18 = vld [vmem:[%s27192_s3 + $0x4a4] sm:$0xf] }
 0x393   :  { %10026 = vmatpush.bf16.msra.mxu3 %v15930_v16  ;;  %v9774_v16 = vpop.f32.mrf.mxu3  ;;  %v14562_v59 = vor.u32 %v17724_v18, %v14559_v15  ;;  %v14475_v18 = vld [vmem:[%s27192_s3 + $0x414] sm:$0xf0]  ;;  %v17682_v15 = vld [vmem:[%s27192_s3 + $0x354] sm:$0xf] }
 0x394   :  { %9989 = vmatpush.bf16.msrb.mxu0 %v15202_v19  ;;  %v24337_v49 = vadd.f32 %v9774_v16, %v9762_v57  ;;  %v15761_v19 = vld [vmem:[%s27192_s3 + $0xe08] sm:$0xf]  ;;  %v18252_v57 = vld [vmem:[%s27192_s3 + $0x1520] sm:$0xf0] }
 0x395   :  { %10052 = vmatpush.bf16.msrb.mxu1 %v16378_v42  ;;  %v14531_v42 = vld [vmem:[%s27192_s3 + $0x484] sm:$0xf0]  ;;  %v16658_v8 = vor.u32 %v18252_v57, %v16657_v56 }
 0x396   :  { %10070 = vmatpush.bf16.msra.mxu2 %v16462_v21  ;;  %v15146_v21 = vor.u32 %v17874_v30, %v15145_v7  ;;  %v14534_v35 = vor.u32 %v17717_v37, %v14531_v42  ;;  %v14391_v7 = vld [vmem:[%s27192_s3 + $0x36c] sm:$0xf0]  ;;  %v16153_v30 = vld [vmem:[%s27192_s3 + $0x1118] sm:$0xf]  ;;  %v17696_v37 = vld [vmem:[%s27192_s3 + $0x3c4] sm:$0xf] }
 0x397   :  { %10027 = vmatpush.bf16.msra.mxu3 %v15902_v10  ;;  %v9802_v10 = vpop.f32.mrf.mxu1  ;;  %v14447_v42 = vld [vmem:[%s27192_s3 + $0x3dc] sm:$0xf0]  ;;  %v14755_v56 = vld [vmem:[%s27192_s3 + $0x644] sm:$0xf0] }
 0x398   :  { %9990 = vmatpush.bf16.msrb.mxu0 %v15174_v12  ;;  %v24375_v41 = vpop.f32.mrf.mxu2  ;;  %v16686_v12 = vor.u32 %v18259_v32, %v16685_v25  ;;  %v18119_v10 = vld [vmem:[%s27192_s3 + $0x10f8] sm:$0xf0]  ;;  %v14814_v25 = vor.u32 %v17787_v48, %v14811_v54  ;;  %v16097_v32 = vld [vmem:[%s27192_s3 + $0x10a8] sm:$0xf]  ;;  %v14251_v54 = vld [vmem:[%s27192_s3 + $0x254] sm:$0xf0] }
 0x399   :  { %10053 = vmatpush.bf16.msrb.mxu1 %v16350_v34  ;;  %v14503_v34 = vld [vmem:[%s27192_s3 + $0x44c] sm:$0xf0] }
 0x39a   :  { %10071 = vmatpush.bf16.msra.mxu2 %v16434_v13  ;;  %v15790_v13 = vor.u32 %v18035_v40, %v15789_v47  ;;  %v14506_v61 = vor.u32 %v17710_v36, %v14503_v34  ;;  %v14363_v47 = vld [vmem:[%s27192_s3 + $0x334] sm:$0xf0]  ;;  %v16125_v40 = vld [vmem:[%s27192_s3 + $0x10e0] sm:$0xf]  ;;  %v14419_v34 = vld [vmem:[%s27192_s3 + $0x3a4] sm:$0xf0] }
 0x39b   :  { %10028 = vmatpush.bf16.msra.mxu3 %v15874_v45  ;;  %v18028_v45 = vld [vmem:[%s27192_s3 + $0xe20] sm:$0xf0]  ;;  %v9776_v51 = vpop.f32.mrf.mxu3  ;;  %v14366_v36 = vor.u32 %v17675_v5, %v14363_v47  ;;  %v18098_v5 = vld [vmem:[%s27192_s3 + $0x1050] sm:$0xf0] }
 0x39c   :  { %9991 = vmatpush.bf16.msrb.mxu0 %v15146_v21  ;;  %v14394_v21 = vor.u32 %v17682_v15, %v14391_v7  ;;  %v18112_v51 = vld [vmem:[%s27192_s3 + $0x10c0] sm:$0xf0]  ;;  %v16069_v15 = vld [vmem:[%s27192_s3 + $0x1070] sm:$0xf]  ;;  %v18105_v7 = vld [vmem:[%s27192_s3 + $0x1088] sm:$0xf0] }
 0x39d   :  { %10072 = vmatmul.bf16.vlgmr.msra.gmra.mxu2 %v23261_v0  ;;  %10054 = vmatpush.bf16.msrb.mxu1 %v16322_v22  ;;  %v15762_v22 = vor.u32 %v18028_v45, %v15761_v19  ;;  %v14335_v19 = vld [vmem:[%s27192_s3 + $0x2fc] sm:$0xf0]  ;;  %v17962_v45 = vld [vmem:[%s27192_s3 + $0xc14] sm:$0xf] }
 0x39e   :  { %10116 = vmatpush.bf16.msrb.mxu2 %v14618_v26  ;;  %v15089_v26 = vld [vmem:[%s27192_s3 + $0x8c8] sm:$0xf]  ;;  %v17766_v47 = vld [vmem:[%s27192_s3 + $0x5f4] sm:$0xf] }
 0x39f   :  { %10029 = vmatpush.bf16.msra.mxu3 %v15846_v6  ;;  %v15090_v58 = vor.u32 %v17860_v9, %v15089_v26  ;;  %v17703_v6 = vld [vmem:[%s27192_s3 + $0x3fc] sm:$0xf]  ;;  %v17668_v26 = vld [vmem:[%s27192_s3 + $0x2e4] sm:$0xf]  ;;  %v9748_v9 = vpop.f32.mrf.mxu0 }
 0x3a0   :  { %9992 = vmatpush.bf16.msrb.mxu0 %v15118_v38  ;;  %v9815_v39 = vpop.f32.mrf.mxu2  ;;  %v16126_v38 = vor.u32 %v18119_v10, %v16125_v40  ;;  %v24477_v4 = vadd.f32 %v9748_v9, %v24158_v1  ;;  %v14783_v1 = vld [vmem:[%s27192_s3 + $0x67c] sm:$0xf0]  ;;  %v14727_v40 = vld [vmem:[%s27192_s3 + $0x60c] sm:$0xf0] }
 0x3a1   :  { %10055 = vmatpush.bf16.msrb.mxu1 %v16294_v53  ;;  %v14478_v53 = vor.u32 %v17703_v6, %v14475_v18  ;;  %v15483_v6 = vld [vmem:[%s27192_s3 + $0xbf4] sm:$0xf0]  ;;  %v14279_v39 = vld [vmem:[%s27192_s3 + $0x28c] sm:$0xf0] }
 0x3a2   :  { %10117 = vmatpush.bf16.msrb.mxu2 %v14590_v29  ;;  %v16209_v29 = vld [vmem:[%s27192_s3 + $0x1188] sm:$0xf]  ;;  %vm10766_vm3 = vcmp.gt.f32.partialorder %v24477_v4, 0.0 }
 0x3a3   :  { %10030 = vmatpush.bf16.msra.mxu3 %v15818_v24  ;;  %v16210_v16 = vor.u32 %v18140_v14, %v16209_v29  ;;  %v16154_v24 = vor.u32 %v18126_v2, %v16153_v30  ;;  %v17661_v29 = vld [vmem:[%s27192_s3 + $0x2ac] sm:$0xf]  ;;  %v16098_v14 = vor.u32 %v18112_v51, %v16097_v32  ;;  %v17640_v32 = vld [vmem:[%s27192_s3 + $0x204] sm:$0xf] }
 0x3a4   :  { %9993 = vmatpush.bf16.msrb.mxu0 %v15090_v58  ;;  %v14338_v58 = vor.u32 %v17668_v26, %v14335_v19  ;;  %v17773_v2 = vld [vmem:[%s27192_s3 + $0x62c] sm:$0xf]  ;;  %v18091_v26 = vld [vmem:[%s27192_s3 + $0x1018] sm:$0xf0] }
 0x3a5   :  { %10056 = vmatpush.bf16.msrb.mxu1 %v16266_v3  ;;  %v17759_v19 = vld [vmem:[%s27192_s3 + $0x5bc] sm:$0xf] }
 0x3a6   :  { %10118 = vmatpush.bf16.msrb.mxu2 %v14562_v59  ;;  %v17794_v59 = vld [vmem:[%s27192_s3 + $0x6d4] sm:$0xf] }
 0x3a7   :  { %10031 = vmatpush.bf16.msra.mxu3 %v15790_v13  ;;  %9994 = vmatmul.bf16.vlgmr.msrb.gmra.mxu0 %v22858_v17  ;;  %v14842_v3 = vor.u32 %v17794_v59, %v14839_v44  ;;  %v17689_v13 = vld [vmem:[%s27192_s3 + $0x38c] sm:$0xf]  ;;  %v16070_v59 = vor.u32 %v18105_v7, %v16069_v15  ;;  %v9750_v44 = vpop.f32.mrf.mxu0  ;;  %v14167_v15 = vld [vmem:[%s27192_s3 + $0x1ac] sm:$0xf0]  ;;  %v14671_v7 = vld [vmem:[%s27192_s3 + $0x59c] sm:$0xf0] }
 0x3a8   :  { %10038 = vmatpush.bf16.msra.mxu0 %v16182_v20  ;;  %v14307_v20 = vld [vmem:[%s27192_s3 + $0x2c4] sm:$0xf0]  ;;  %v17927_v44 = vld [vmem:[%s27192_s3 + $0xafc] sm:$0xf] }
 0x3a9   :  { %10057 = vmatpush.bf16.msrb.mxu1 %v16238_v52  ;;  %v14422_v52 = vor.u32 %v17689_v13, %v14419_v34  ;;  %v14310_v57 = vor.u32 %v17661_v29, %v14307_v20  ;;  %v14730_v13 = vor.u32 %v17766_v47, %v14727_v40  ;;  %v16013_v34 = vld [vmem:[%s27192_s3 + $0x1000] sm:$0xf]  ;;  %v15985_v20 = vld [vmem:[%s27192_s3 + $0xfc8] sm:$0xf]  ;;  %v14139_v47 = vld [vmem:[%s27192_s3 + $0x174] sm:$0xf0] }
 0x3aa   :  { %10119 = vmatpush.bf16.msrb.mxu2 %v14534_v35  ;;  %v14450_v35 = vor.u32 %v17696_v37, %v14447_v42  ;;  %v14758_v37 = vor.u32 %v17773_v2, %v14755_v56  ;;  %v16041_v42 = vld [vmem:[%s27192_s3 + $0x1038] sm:$0xf]  ;;  %v17745_v40 = vld [vmem:[%s27192_s3 + $0x54c] sm:$0xf] }
 0x3ab   :  { %10032 = vmatpush.bf16.msra.mxu3 %v15762_v22  ;;  %v15514_v22 = vor.u32 %v17962_v45, %v15511_v62  ;;  %v16042_v48 = vor.u32 %v18098_v5, %v16041_v42  ;;  %v14699_v45 = vld [vmem:[%s27192_s3 + $0x5d4] sm:$0xf0]  ;;  %v17619_v42 = vld [vmem:[%s27192_s3 + $0x15c] sm:$0xf] }
 0x3ac   :  { %10039 = vmatpush.bf16.msra.mxu0 %v16154_v24  ;;  %v15455_v24 = vld [vmem:[%s27192_s3 + $0xbbc] sm:$0xf0] }
 0x3ad   :  { %10058 = vmatpush.bf16.msrb.mxu1 %v16210_v16  ;;  %v24509_v30 = vpop.f32.mrf.mxu1 }
 0x3ae   :  { %10120 = vmatpush.bf16.msrb.mxu2 %v14506_v61  ;;  %10033 = vmatmul.bf16.vlgmr.msra.gmra.mxu3 %v23091_v60  ;;  %v17780_v61 = vld [vmem:[%s27192_s3 + $0x664] sm:$0xf] }
 0x3af   :  { %10083 = vmatpush.bf16.msrb.mxu3 %v16686_v12  ;;  %v17955_v12 = vld [vmem:[%s27192_s3 + $0xbdc] sm:$0xf]  ;;  %v14786_v18 = vor.u32 %v17780_v61, %v14783_v1  ;;  %v9787_v61 = vpop.f32.mrf.mxu0  ;;  %v14223_v1 = vld [vmem:[%s27192_s3 + $0x21c] sm:$0xf0] }
 0x3b0   :  { %10059 = vmatmul.bf16.vlgmr.msrb.gmra.mxu1 %v23259_v46  ;;  %10040 = vmatpush.bf16.msra.mxu0 %v16126_v38  ;;  %v15486_v16 = vor.u32 %v17955_v12, %v15483_v6  ;;  %v15427_v38 = vld [vmem:[%s27192_s3 + $0xb84] sm:$0xf0]  ;;  %v9788_v29 = vadd.f32 %v9787_v61, %v24337_v49  ;;  %v18084_v12 = vld [vmem:[%s27192_s3 + $0xfe0] sm:$0xf0]  ;;  %v17626_v6 = vld [vmem:[%s27192_s3 + $0x194] sm:$0xf]  ;;  %v14226_v56 = vor.u32 %v17640_v32, %v14223_v1 }
 0x3b1   :  { %10103 = vmatpush.bf16.msra.mxu1 %v14394_v21  ;;  %v17948_v21 = vld [vmem:[%s27192_s3 + $0xba4] sm:$0xf]  ;;  %v14111_v32 = vld [vmem:[%s27192_s3 + $0x13c] sm:$0xf0]  ;;  %v15707_v61 = vld [vmem:[%s27192_s3 + $0xdb4] sm:$0xf0] }
 0x3b2   :  { %10121 = vmatpush.bf16.msrb.mxu2 %v14478_v53  ;;  %v17654_v53 = vld [vmem:[%s27192_s3 + $0x274] sm:$0xf]  ;;  %v17752_v49 = vld [vmem:[%s27192_s3 + $0x584] sm:$0xf]  ;;  %v9801_v2 = vadd.f32 %v24303_v63, %v9788_v29  ;;  %v15371_v63 = vld [vmem:[%s27192_s3 + $0xb14] sm:$0xf0] }
 0x3b3   :  { %10084 = vmatpush.bf16.msrb.mxu3 %v16658_v8  ;;  %v24536_v8 = vpop.f32.mrf.mxu3  ;;  %v14282_v10 = vor.u32 %v17654_v53, %v14279_v39  ;;  %v15986_v53 = vor.u32 %v18084_v12, %v15985_v20  ;;  %v14170_v39 = vor.u32 %v17626_v6, %v14167_v15  ;;  %v17892_v20 = vld [vmem:[%s27192_s3 + $0x9e4] sm:$0xf]  ;;  %v15231_v12 = vld [vmem:[%s27192_s3 + $0x9fc] sm:$0xf0]  ;;  %v16407_v15 = vld [vmem:[%s27192_s3 + $0x132c] sm:$0xf0] }
 0x3b4   :  { %10041 = vmatpush.bf16.msra.mxu0 %v16098_v14  ;;  %v14702_v14 = vor.u32 %v17759_v19, %v14699_v45  ;;  %v9814_v5 = vadd.f32 %v24375_v41, %v9801_v2  ;;  %v15735_v41 = vld [vmem:[%s27192_s3 + $0xdec] sm:$0xf0]  ;;  %v15343_v19 = vld [vmem:[%s27192_s3 + $0xadc] sm:$0xf0]  ;;  %v18004_v2 = vld [vmem:[%s27192_s3 + $0xd64] sm:$0xf] }
 0x3b5   :  { %10104 = vmatpush.bf16.msra.mxu1 %v14366_v36  ;;  %v17941_v36 = vld [vmem:[%s27192_s3 + $0xb6c] sm:$0xf]  ;;  %v9854_v9 = vpop.f32.mrf.mxu1 }
 0x3b6   :  { %10122 = vmatpush.bf16.msrb.mxu2 %v14450_v35  ;;  %v17647_v35 = vld [vmem:[%s27192_s3 + $0x23c] sm:$0xf]  ;;  %v17920_v9 = vld [vmem:[%s27192_s3 + $0xac4] sm:$0xf] }
 0x3b7   :  { %10129 = vmatpush.bf16.msra.mxu3 %v14842_v3  ;;  %v15458_v3 = vor.u32 %v17948_v21, %v15455_v24  ;;  %v14254_v62 = vor.u32 %v17647_v35, %v14251_v54  ;;  %v14674_v21 = vor.u32 %v17752_v49, %v14671_v7  ;;  %v17906_v24 = vld [vmem:[%s27192_s3 + $0xa54] sm:$0xf]  ;;  %v15346_v1 = vor.u32 %v17920_v9, %v15343_v19  ;;  %v17605_v49 = vld [vmem:[%s27192_s3 + $0xec] sm:$0xf]  ;;  %v14083_v7 = vld [vmem:[%s27192_s3 + $0x104] sm:$0xf0] }
 0x3b8   :  { %10042 = vmatpush.bf16.msra.mxu0 %v16070_v59  ;;  %v24573_v51 = vpop.f32.mrf.mxu2  ;;  %v14195_v59 = vld [vmem:[%s27192_s3 + $0x1e4] sm:$0xf0]  ;;  %v18018_v35 = vld [vmem:[%s27192_s3 + $0xdd4] sm:$0xf]  ;;  %v17591_v9 = vld [vmem:[%s27192_s3 + $0x7c] sm:$0xf] }
 0x3b9   :  { %10105 = vmatpush.bf16.msra.mxu1 %v14338_v58  ;;  %v17934_v58 = vld [vmem:[%s27192_s3 + $0xb34] sm:$0xf]  ;;  %v15738_v45 = vor.u32 %v18018_v35, %v15735_v41  ;;  %v17997_v35 = vld [vmem:[%s27192_s3 + $0xd2c] sm:$0xf]  ;;  %v15651_v41 = vld [vmem:[%s27192_s3 + $0xd44] sm:$0xf0] }
 0x3ba   :  { %10123 = vmatpush.bf16.msrb.mxu2 %v14422_v52  ;;  %v16014_v52 = vor.u32 %v18091_v26, %v16013_v34  ;;  %v14142_v34 = vor.u32 %v17619_v42, %v14139_v47  ;;  %v18179_v42 = vld [vmem:[%s27192_s3 + $0x12dc] sm:$0xf]  ;;  %v17598_v47 = vld [vmem:[%s27192_s3 + $0xb4] sm:$0xf] }
 0x3bb   :  { %10130 = vmatpush.bf16.msra.mxu3 %v14814_v25  ;;  %v15430_v25 = vor.u32 %v17941_v36, %v15427_v38  ;;  %v15374_v36 = vor.u32 %v17927_v44, %v15371_v63 }
 0x3bc   :  { %10043 = vmatpush.bf16.msra.mxu0 %v16042_v48  ;;  %v9827_v48 = vadd.f32 %v24536_v8, %v9814_v5  ;;  %v17899_v8 = vld [vmem:[%s27192_s3 + $0xa1c] sm:$0xf]  ;;  %v16379_v5 = vld [vmem:[%s27192_s3 + $0x12f4] sm:$0xf0] }
 0x3bd   :  { %10124 = vmatmul.bf16.vlgmr.msrb.gmra.mxu2 %v22813_v23  ;;  %10106 = vmatpush.bf16.msra.mxu1 %v14310_v57 }
 0x3be   :  { %10168 = vmatpush.bf16.msra.mxu2 %v15514_v22  ;;  %16705 = vmatmul.msk.bf16.vlgmr.msrb.gmra.mxu3 %vm9579_vm14, %v23590_v33  ;;  %v15399_v22 = vld [vmem:[%s27192_s3 + $0xb4c] sm:$0xf0] }
 0x3bf   :  { %10131 = vmatpush.bf16.msra.mxu3 %v14786_v18  ;;  %v9828_v18 = vpop.f32.mrf.mxu3  ;;  %v15402_v57 = vor.u32 %v17934_v58, %v15399_v22  ;;  %v17913_v58 = vld [vmem:[%s27192_s3 + $0xa8c] sm:$0xf] }
 0x3c0   :  { %10044 = vmatpush.bf16.msra.mxu0 %v16014_v52  ;;  %v9867_v54 = vpop.f32.mrf.mxu2  ;;  %v18011_v52 = vld [vmem:[%s27192_s3 + $0xd9c] sm:$0xf]  ;;  %v18186_v18 = vld [vmem:[%s27192_s3 + $0x1314] sm:$0xf] }
 0x3c1   :  { %10107 = vmatpush.bf16.msra.mxu1 %v14282_v10  ;;  %v14643_v10 = vld [vmem:[%s27192_s3 + $0x564] sm:$0xf0]  ;;  %v15710_v6 = vor.u32 %v18011_v52, %v15707_v61  ;;  %v16410_v44 = vor.u32 %v18186_v18, %v16407_v15  ;;  %v16382_v54 = vor.u32 %v18179_v42, %v16379_v5  ;;  %v13999_v15 = vld [vmem:[%s27192_s3 + $0x5c] sm:$0xf0]  ;;  %v17976_v42 = vld [vmem:[%s27192_s3 + $0xc84] sm:$0xf] }
 0x3c2   :  { %10169 = vmatpush.bf16.msra.mxu2 %v15486_v16  ;;  %v17633_v16 = vld [vmem:[%s27192_s3 + $0x1cc] sm:$0xf]  ;;  %v14646_v26 = vor.u32 %v17745_v40, %v14643_v10  ;;  %v15567_v5 = vld [vmem:[%s27192_s3 + $0xc9c] sm:$0xf0] }
 0x3c3   :  { %10132 = vmatpush.bf16.msra.mxu3 %v14758_v37  ;;  %v15287_v37 = vld [vmem:[%s27192_s3 + $0xa6c] sm:$0xf0] }
 0x3c4   :  { %10045 = vmatpush.bf16.msra.mxu0 %v15986_v53  ;;  %v15290_v38 = vor.u32 %v17906_v24, %v15287_v37  ;;  %v14086_v24 = vor.u32 %v17605_v49, %v14083_v7  ;;  %v17983_v49 = vld [vmem:[%s27192_s3 + $0xcbc] sm:$0xf]  ;;  %v15595_v7 = vld [vmem:[%s27192_s3 + $0xcd4] sm:$0xf0] }
 0x3c5   :  { %10108 = vmatpush.bf16.msra.mxu1 %v14254_v62  ;;  %v15259_v62 = vld [vmem:[%s27192_s3 + $0xa34] sm:$0xf0] }
 0x3c6   :  { %10170 = vmatpush.bf16.msra.mxu2 %v15458_v3  ;;  %v14198_v3 = vor.u32 %v17633_v16, %v14195_v59  ;;  %v15262_v22 = vor.u32 %v17899_v8, %v15259_v62  ;;  %v15234_v59 = vor.u32 %v17892_v20, %v15231_v12  ;;  %v14027_v8 = vld [vmem:[%s27192_s3 + $0x94] sm:$0xf0]  ;;  %v15623_v62 = vld [vmem:[%s27192_s3 + $0xd0c] sm:$0xf0]  ;;  %v18165_v20 = vld [vmem:[%s27192_s3 + $0x126c] sm:$0xf] }
 0x3c7   :  { %10133 = vmatpush.bf16.msra.mxu3 %v14730_v13  ;;  %v9789_v13 = vpop.f32.mrf.mxu0  ;;  %10046 = vmatmul.bf16.vlgmr.msra.gmra.mxu0 %v23094_v11  ;;  %v16323_v12 = vld [vmem:[%s27192_s3 + $0x1284] sm:$0xf0] }
 0x3c8   :  { %10090 = vmatpush.bf16.msrb.mxu0 %v14170_v39  ;;  %v17885_v39 = vld [vmem:[%s27192_s3 + $0x9ac] sm:$0xf] }
 0x3c9   :  { %10109 = vmatpush.bf16.msra.mxu1 %v14226_v56  ;;  %v15679_v56 = vld [vmem:[%s27192_s3 + $0xd7c] sm:$0xf0] }
 0x3ca   :  { %10171 = vmatpush.bf16.msra.mxu2 %v15430_v25  ;;  %v17612_v25 = vld [vmem:[%s27192_s3 + $0x124] sm:$0xf]  ;;  %v15682_v37 = vor.u32 %v18004_v2, %v15679_v56  ;;  %v16326_v56 = vor.u32 %v18165_v20, %v16323_v12  ;;  %v18123_v20 = vld [vmem:[%s27192_s3 + $0x111c] sm:$0xf] }
 0x3cb   :  { %10134 = vmatpush.bf16.msra.mxu3 %v14702_v14  ;;  %v14114_v29 = vor.u32 %v17612_v25, %v14111_v32  ;;  %v15315_v14 = vld [vmem:[%s27192_s3 + $0xaa4] sm:$0xf0] }
 0x3cc   :  { %10091 = vmatpush.bf16.msrb.mxu0 %v14142_v34  ;;  %v15318_v16 = vor.u32 %v17913_v58, %v15315_v14  ;;  %v15654_v34 = vor.u32 %v17997_v35, %v15651_v41  ;;  %v17871_v58 = vld [vmem:[%s27192_s3 + $0x93c] sm:$0xf]  ;;  %v17857_v41 = vld [vmem:[%s27192_s3 + $0x8cc] sm:$0xf] }
 0x3cd   :  { %10110 = vmatpush.bf16.msra.mxu1 %v14198_v3  ;;  %v24717_v10 = vpop.f32.mrf.mxu1  ;;  %v14055_v3 = vld [vmem:[%s27192_s3 + $0xcc] sm:$0xf0] }
 0x3ce   :  { %10172 = vmatpush.bf16.msra.mxu2 %v15402_v57  ;;  %v24699_v57 = vpop.f32.mrf.mxu2  ;;  %v14058_v13 = vor.u32 %v17598_v47, %v14055_v3  ;;  %v17850_v47 = vld [vmem:[%s27192_s3 + $0x894] sm:$0xf] }
 0x3cf   :  { %10135 = vmatpush.bf16.msra.mxu3 %v14674_v21  ;;  %v9839_v53 = vpop.f32.mrf.mxu0  ;;  %v15203_v21 = vld [vmem:[%s27192_s3 + $0x9c4] sm:$0xf0] }
 0x3d0   :  { %10111 = vmatmul.bf16.vlgmr.msra.gmra.mxu1 %v22624_v31  ;;  %10092 = vmatpush.bf16.msrb.mxu0 %v14114_v29  ;;  %v9840_v63 = vadd.f32 %v9839_v53, %v9827_v48  ;;  %v15206_v48 = vor.u32 %v17885_v39, %v15203_v21  ;;  %v14030_v29 = vor.u32 %v17591_v9, %v14027_v8  ;;  %v15119_v53 = vld [vmem:[%s27192_s3 + $0x91c] sm:$0xf0]  ;;  %v16295_v39 = vld [vmem:[%s27192_s3 + $0x124c] sm:$0xf0]  ;;  %v17577_v21 = vld [vmem:[%s27192_s3 + $0xc] sm:$0xf] }
 0x3d1   :  { %10155 = vmatpush.bf16.msrb.mxu1 %v15290_v38  ;;  %v15175_v38 = vld [vmem:[%s27192_s3 + $0x98c] sm:$0xf0]  ;;  %v9878_v19 = vpop.f32.mrf.mxu3  ;;  %v17843_v9 = vld [vmem:[%s27192_s3 + $0x85c] sm:$0xf]  ;;  %v17969_v8 = vld [vmem:[%s27192_s3 + $0xc4c] sm:$0xf] }
 0x3d2   :  { %10173 = vmatpush.bf16.msra.mxu2 %v15374_v36  ;;  %v9853_v40 = vadd.f32 %v24509_v30, %v9840_v63  ;;  %v17878_v36 = vld [vmem:[%s27192_s3 + $0x974] sm:$0xf] }
 0x3d3   :  { %10136 = vmatpush.bf16.msra.mxu3 %v14646_v26  ;;  %v18172_v26 = vld [vmem:[%s27192_s3 + $0x12a4] sm:$0xf]  ;;  %v15178_v61 = vor.u32 %v17878_v36, %v15175_v38  ;;  %v18158_v63 = vld [vmem:[%s27192_s3 + $0x1234] sm:$0xf]  ;;  %v15091_v36 = vld [vmem:[%s27192_s3 + $0x8e4] sm:$0xf0] }
 0x3d4   :  { %v9866_v30 = vadd.f32 %v24573_v51, %v9853_v40  ;;  %10093 = vmatpush.bf16.msrb.mxu0 %v14086_v24  ;;  %v16351_v51 = vld [vmem:[%s27192_s3 + $0x12bc] sm:$0xf0]  ;;  %v15063_v40 = vld [vmem:[%s27192_s3 + $0x8ac] sm:$0xf0]  ;;  %v16298_v35 = vor.u32 %v18158_v63, %v16295_v39  ;;  %v18151_v38 = vld [vmem:[%s27192_s3 + $0x11fc] sm:$0xf] }
 0x3d5   :  { %10156 = vmatpush.bf16.msrb.mxu1 %v15262_v22  ;;  %v15147_v22 = vld [vmem:[%s27192_s3 + $0x954] sm:$0xf0]  ;;  %v9906_v18 = vpop.f32.mrf.mxu1  ;;  %v18116_v63 = vld [vmem:[%s27192_s3 + $0x10e4] sm:$0xf]  ;;  %v16127_v39 = vld [vmem:[%s27192_s3 + $0x10fc] sm:$0xf0] }
 0x3d6   :  { %10174 = vmatpush.bf16.msra.mxu2 %v15346_v1  ;;  %10137 = vmatmul.bf16.vlgmr.msra.gmra.mxu3 %v22822_v27  ;;  %v24754_v25 = vadd.f32 %v9878_v19, %v9866_v30  ;;  %v9919_v32 = vpop.f32.mrf.mxu2  ;;  %v16354_v1 = vor.u32 %v18172_v26, %v16351_v51  ;;  %v15150_v2 = vor.u32 %v17871_v58, %v15147_v22  ;;  %v18130_v26 = vld [vmem:[%s27192_s3 + $0x1154] sm:$0xf]  ;;  %v16183_v51 = vld [vmem:[%s27192_s3 + $0x116c] sm:$0xf0]  ;;  %v15035_v19 = vld [vmem:[%s27192_s3 + $0x874] sm:$0xf0] }
 0x3d7   :  { %10181 = vmatpush.bf16.msrb.mxu3 %v15738_v45  ;;  %v17990_v45 = vld [vmem:[%s27192_s3 + $0xcf4] sm:$0xf]  ;;  %v9841_v52 = vpop.f32.mrf.mxu0  ;;  %v15570_v30 = vor.u32 %v17976_v42, %v15567_v5  ;;  %v15038_v58 = vor.u32 %v17843_v9, %v15035_v19  ;;  %v17836_v18 = vld [vmem:[%s27192_s3 + $0x824] sm:$0xf]  ;;  %v17829_v42 = vld [vmem:[%s27192_s3 + $0x7ec] sm:$0xf] }
 0x3d8   :  { %10094 = vmatpush.bf16.msrb.mxu0 %v14058_v13  ;;  %v15626_v14 = vor.u32 %v17990_v45, %v15623_v62  ;;  %v16267_v13 = vld [vmem:[%s27192_s3 + $0x1214] sm:$0xf0]  ;;  %v15539_v45 = vld [vmem:[%s27192_s3 + $0xc64] sm:$0xf0]  ;;  %v15094_v62 = vor.u32 %v17857_v41, %v15091_v36  ;;  %v18242_v32 = vld [vmem:[%s27192_s3 + $0x14d4] sm:$0xf] }
 0x3d9   :  { %10157 = vmatpush.bf16.msrb.mxu1 %v15234_v59  ;;  %v9880_v24 = vpop.f32.mrf.mxu3  ;;  %v16631_v52 = vld [vmem:[%s27192_s3 + $0x14ec] sm:$0xf0]  ;;  %v15542_v22 = vor.u32 %v17969_v8, %v15539_v45  ;;  %v14979_v5 = vld [vmem:[%s27192_s3 + $0x804] sm:$0xf0]  ;;  %v18109_v36 = vld [vmem:[%s27192_s3 + $0x10ac] sm:$0xf] }
 0x3da   :  { %10175 = vmatpush.bf16.msra.mxu2 %v15318_v16  ;;  %v17864_v16 = vld [vmem:[%s27192_s3 + $0x904] sm:$0xf]  ;;  %v16634_v12 = vor.u32 %v18242_v32, %v16631_v52  ;;  %v14397_v24 = vld [vmem:[%s27192_s3 + $0x358] sm:$0xf]  ;;  %v14951_v19 = vld [vmem:[%s27192_s3 + $0x7cc] sm:$0xf0] }
 0x3db   :  { %10182 = vmatpush.bf16.msrb.mxu3 %v15710_v6  ;;  %v17584_v6 = vld [vmem:[%s27192_s3 + $0x44] sm:$0xf]  ;;  %v15122_v3 = vor.u32 %v17864_v16, %v15119_v53  ;;  %v18137_v16 = vld [vmem:[%s27192_s3 + $0x118c] sm:$0xf]  ;;  %v16547_v45 = vld [vmem:[%s27192_s3 + $0x1444] sm:$0xf0] }
 0x3dc   :  { %10095 = vmatpush.bf16.msrb.mxu0 %v14030_v29  ;;  %v14002_v59 = vor.u32 %v17584_v6, %v13999_v15  ;;  %v18144_v29 = vld [vmem:[%s27192_s3 + $0x11c4] sm:$0xf]  ;;  %v16155_v6 = vld [vmem:[%s27192_s3 + $0x1134] sm:$0xf0]  ;;  %v15007_v15 = vld [vmem:[%s27192_s3 + $0x83c] sm:$0xf0] }
 0x3dd   :  { %10176 = vmatmul.bf16.vlgmr.msra.gmra.mxu2 %v23057_v43  ;;  %10158 = vmatpush.bf16.msrb.mxu1 %v15206_v48  ;;  %v16158_v53 = vor.u32 %v18123_v20, %v16155_v6  ;;  %v18221_v8 = vld [vmem:[%s27192_s3 + $0x142c] sm:$0xf]  ;;  %v17815_v20 = vld [vmem:[%s27192_s3 + $0x77c] sm:$0xf]  ;;  %v18214_v6 = vld [vmem:[%s27192_s3 + $0x13f4] sm:$0xf] }
 0x3de   :  { %10220 = vmatpush.bf16.msrb.mxu2 %v16410_v44  ;;  %v15598_v44 = vor.u32 %v17983_v49, %v15595_v7  ;;  %v18235_v49 = vld [vmem:[%s27192_s3 + $0x149c] sm:$0xf]  ;;  %v16603_v7 = vld [vmem:[%s27192_s3 + $0x14b4] sm:$0xf0] }
 0x3df   :  { %10183 = vmatpush.bf16.msrb.mxu3 %v15682_v37  ;;  %v13971_v37 = vld [vmem:[%s27192_s3 + $0x24] sm:$0xf0] }
 0x3e0   :  { %10096 = vmatpush.bf16.msrb.mxu0 %v14002_v59  ;;  %v24813_v48 = vpop.f32.mrf.mxu2  ;;  %v15010_v59 = vor.u32 %v17836_v18, %v15007_v15  ;;  %v16519_v18 = vld [vmem:[%s27192_s3 + $0x140c] sm:$0xf0] }
 0x3e1   :  { %10159 = vmatpush.bf16.msrb.mxu1 %v15178_v61  ;;  %v16270_v61 = vor.u32 %v18151_v38, %v16267_v13  ;;  %v16099_v38 = vld [vmem:[%s27192_s3 + $0x10c4] sm:$0xf0]  ;;  %v14982_v13 = vor.u32 %v17829_v42, %v14979_v5 }
 0x3e2   :  { %10221 = vmatpush.bf16.msrb.mxu2 %v16382_v54  ;;  %v13974_v54 = vor.u32 %v17577_v21, %v13971_v37  ;;  %v16606_v21 = vor.u32 %v18235_v49, %v16603_v7  ;;  %v17686_v37 = vld [vmem:[%s27192_s3 + $0x370] sm:$0xf0] }
 0x3e3   :  { %10184 = vmatpush.bf16.msrb.mxu3 %v15654_v34  ;;  %v15066_v34 = vor.u32 %v17850_v47, %v15063_v40  ;;  %v18228_v47 = vld [vmem:[%s27192_s3 + $0x1464] sm:$0xf]  ;;  %v16575_v40 = vld [vmem:[%s27192_s3 + $0x147c] sm:$0xf0] }
 0x3e4   :  { %10097 = vmatpush.bf16.msrb.mxu0 %v13974_v54  ;;  %v16130_v54 = vor.u32 %v18116_v63, %v16127_v39  ;;  %v17808_v63 = vld [vmem:[%s27192_s3 + $0x744] sm:$0xf]  ;;  %v14895_v39 = vld [vmem:[%s27192_s3 + $0x75c] sm:$0xf0] }
 0x3e5   :  { %10160 = vmatpush.bf16.msrb.mxu1 %v15150_v2 }
 0x3e6   :  { %10222 = vmatpush.bf16.msrb.mxu2 %v16354_v1  ;;  %v16186_v1 = vor.u32 %v18130_v26, %v16183_v51  ;;  %v14369_v26 = vld [vmem:[%s27192_s3 + $0x320] sm:$0xf]  ;;  %v17822_v51 = vld [vmem:[%s27192_s3 + $0x7b4] sm:$0xf] }
 0x3e7   :  { %10185 = vmatpush.bf16.msrb.mxu3 %v15626_v14  ;;  %v16239_v14 = vld [vmem:[%s27192_s3 + $0x11dc] sm:$0xf0]  ;;  %10098 = vmatmul.bf16.vlgmr.msrb.gmra.mxu0 %v22622_v55 }
 0x3e8   :  { %10142 = vmatpush.bf16.msra.mxu0 %v15066_v34  ;;  %v16242_v2 = vor.u32 %v18144_v29, %v16239_v14  ;;  %v16578_v34 = vor.u32 %v18228_v47, %v16575_v40  ;;  %v16550_v29 = vor.u32 %v18221_v8, %v16547_v45  ;;  %v17672_v14 = vld [vmem:[%s27192_s3 + $0x300] sm:$0xf0]  ;;  %v16015_v40 = vld [vmem:[%s27192_s3 + $0x101c] sm:$0xf0] }
 0x3e9   :  { %10161 = vmatpush.bf16.msrb.mxu1 %v15122_v3  ;;  %v18088_v47 = vld [vmem:[%s27192_s3 + $0x1004] sm:$0xf] }
 0x3ea   :  { %10223 = vmatpush.bf16.msrb.mxu2 %v16326_v56  ;;  %v9971_v56 = vpop.f32.mrf.mxu2 }
 0x3eb   :  { %10186 = vmatpush.bf16.msrb.mxu3 %v15598_v44  ;;  %v16211_v44 = vld [vmem:[%s27192_s3 + $0x11a4] sm:$0xf0]  ;;  %v16043_v56 = vld [vmem:[%s27192_s3 + $0x1054] sm:$0xf0] }
 0x3ec   :  { %10143 = vmatpush.bf16.msra.mxu0 %v15038_v58  ;;  %v16214_v3 = vor.u32 %v18137_v16, %v16211_v44  ;;  %v14954_v58 = vor.u32 %v17822_v51, %v14951_v19  ;;  %v17665_v44 = vld [vmem:[%s27192_s3 + $0x2c8] sm:$0xf0]  ;;  %v16018_v51 = vor.u32 %v18088_v47, %v16015_v40  ;;  %v17735_v47 = vld [vmem:[%s27192_s3 + $0x4f8] sm:$0xf0] }
 0x3ed   :  { %10162 = vmatpush.bf16.msrb.mxu1 %v15094_v62  ;;  %v24931_v62 = vpop.f32.mrf.mxu1  ;;  %v18081_v19 = vld [vmem:[%s27192_s3 + $0xfcc] sm:$0xf] }
 0x3ee   :  { %10224 = vmatpush.bf16.msrb.mxu2 %v16298_v35  ;;  %v9891_v35 = vpop.f32.mrf.mxu0 }
 0x3ef   :  { %10187 = vmatpush.bf16.msrb.mxu3 %v15570_v30  ;;  %v9892_v41 = vadd.f32 %v9891_v35, %v24754_v25  ;;  %v14398_v30 = vor.u32 %v17686_v37, %v14397_v24  ;;  %v17679_v25 = vld [vmem:[%s27192_s3 + $0x338] sm:$0xf0]  ;;  %v16491_v24 = vld [vmem:[%s27192_s3 + $0x13d4] sm:$0xf0] }
 0x3f0   :  { %10163 = vmatmul.bf16.vlgmr.msrb.gmra.mxu1 %v22858_v17  ;;  %10144 = vmatpush.bf16.msra.mxu0 %v15010_v59  ;;  %v14370_v52 = vor.u32 %v17679_v25, %v14369_v26  ;;  %v14313_v59 = vld [vmem:[%s27192_s3 + $0x2b0] sm:$0xf]  ;;  %v18074_v26 = vld [vmem:[%s27192_s3 + $0xf94] sm:$0xf] }
 0x3f1   :  { %10207 = vmatpush.bf16.msra.mxu1 %v16186_v1  ;;  %v9905_v9 = vadd.f32 %v24717_v10, %v9892_v41  ;;  %v16102_v10 = vor.u32 %v18109_v36, %v16099_v38  ;;  %v16071_v1 = vld [vmem:[%s27192_s3 + $0x108c] sm:$0xf0]  ;;  %v14314_v5 = vor.u32 %v17665_v44, %v14313_v59  ;;  %v17801_v36 = vld [vmem:[%s27192_s3 + $0x70c] sm:$0xf]  ;;  %v14867_v38 = vld [vmem:[%s27192_s3 + $0x724] sm:$0xf0] }
 0x3f2   :  { %10225 = vmatpush.bf16.msrb.mxu2 %v16270_v61  ;;  %v18102_v61 = vld [vmem:[%s27192_s3 + $0x1074] sm:$0xf]  ;;  %v15959_v25 = vld [vmem:[%s27192_s3 + $0xfac] sm:$0xf0]  ;;  %v14870_v45 = vor.u32 %v17801_v36, %v14867_v38  ;;  %v17644_v59 = vld [vmem:[%s27192_s3 + $0x220] sm:$0xf0] }
 0x3f3   :  { %10188 = vmatpush.bf16.msrb.mxu3 %v15542_v22  ;;  %v24934_v32 = vadd.f32 %v24699_v57, %v9905_v9  ;;  %v24942_v22 = vpop.f32.mrf.mxu3  ;;  %v14341_v57 = vld [vmem:[%s27192_s3 + $0x2e8] sm:$0xf]  ;;  %v16074_v49 = vor.u32 %v18102_v61, %v16071_v1  ;;  %v14257_v61 = vld [vmem:[%s27192_s3 + $0x240] sm:$0xf]  ;;  %v17651_v1 = vld [vmem:[%s27192_s3 + $0x258] sm:$0xf0] }
 0x3f4   :  { %10145 = vmatpush.bf16.msra.mxu0 %v14982_v13  ;;  %v14342_v7 = vor.u32 %v17672_v14, %v14341_v57  ;;  %v18200_v13 = vld [vmem:[%s27192_s3 + $0x1384] sm:$0xf]  ;;  %v17630_v57 = vld [vmem:[%s27192_s3 + $0x1b0] sm:$0xf0]  ;;  %v18067_v14 = vld [vmem:[%s27192_s3 + $0xf5c] sm:$0xf] }
 0x3f5   :  { %10208 = vmatpush.bf16.msra.mxu1 %v16158_v53  ;;  %v16522_v53 = vor.u32 %v18214_v6, %v16519_v18  ;;  %v9958_v37 = vpop.f32.mrf.mxu1  ;;  %v16435_v6 = vld [vmem:[%s27192_s3 + $0x1364] sm:$0xf0]  ;;  %v14145_v44 = vld [vmem:[%s27192_s3 + $0x160] sm:$0xf]  ;;  %v17616_v38 = vld [vmem:[%s27192_s3 + $0x140] sm:$0xf0] }
 0x3f6   :  { %10226 = vmatpush.bf16.msrb.mxu2 %v16242_v2  ;;  %10189 = vmatmul.bf16.vlgmr.msrb.gmra.mxu3 %v23061_v50  ;;  %v9893_v15 = vpop.f32.mrf.mxu0  ;;  %v18095_v2 = vld [vmem:[%s27192_s3 + $0x103c] sm:$0xf]  ;;  %v25076_v37 = vld [vmem:[%s27193_s4] sm:$0x7f]  ;;  %v14117_v36 = vld [vmem:[%s27192_s3 + $0x128] sm:$0xf] }
 0x3f7   :  { %10233 = vmatpush.bf16.msra.mxu3 %v16634_v12  ;;  %v14923_v12 = vld [vmem:[%s27192_s3 + $0x794] sm:$0xf0]  ;;  %v16046_v42 = vor.u32 %v18095_v2, %v16043_v56  ;;  %vm10767_vm1 = vcmp.gt.f32.partialorder %v24934_v32, 0.0 }
 0x3f8   :  { %10146 = vmatpush.bf16.msra.mxu0 %v14954_v58  ;;  %v14926_v16 = vor.u32 %v17815_v20, %v14923_v12  ;;  %v15962_v58 = vor.u32 %v18074_v26, %v15959_v25  ;;  %v15931_v20 = vld [vmem:[%s27192_s3 + $0xf74] sm:$0xf0]  ;;  %v18193_v12 = vld [vmem:[%s27192_s3 + $0x134c] sm:$0xf]  ;;  %v17910_v26 = vld [vmem:[%s27192_s3 + $0xa70] sm:$0xf0] }
 0x3f9   :  { %10209 = vmatpush.bf16.msra.mxu1 %v16130_v54  ;;  %v14285_v54 = vld [vmem:[%s27192_s3 + $0x278] sm:$0xf]  ;;  %v15934_v56 = vor.u32 %v18067_v14, %v15931_v20  ;;  %v18053_v25 = vld [vmem:[%s27192_s3 + $0xeec] sm:$0xf]  ;;  %v15265_v20 = vld [vmem:[%s27192_s3 + $0xa20] sm:$0xf] }
 0x3fa   :  { %10227 = vmatpush.bf16.msrb.mxu2 %v16214_v3  ;;  %v14898_v3 = vor.u32 %v17808_v63, %v14895_v39  ;;  %v14621_v15 = vld [vmem:[%s27192_s3 + $0x518] sm:$0xf]  ;;  %v17623_v39 = vld [vmem:[%s27192_s3 + $0x178] sm:$0xf0] }
 0x3fb   :  { %10234 = vmatpush.bf16.msra.mxu3 %v16606_v21  ;;  %v18207_v21 = vld [vmem:[%s27192_s3 + $0x13bc] sm:$0xf]  ;;  %v9932_v35 = vpop.f32.mrf.mxu3 }
 0x3fc   :  { %10147 = vmatpush.bf16.msra.mxu0 %v14926_v16  ;;  %v16494_v41 = vor.u32 %v18207_v21, %v16491_v24  ;;  %v16438_v16 = vor.u32 %v18193_v12, %v16435_v6  ;;  %v18060_v21 = vld [vmem:[%s27192_s3 + $0xf24] sm:$0xf]  ;;  %v15903_v24 = vld [vmem:[%s27192_s3 + $0xf3c] sm:$0xf0]  ;;  %v14201_v35 = vld [vmem:[%s27192_s3 + $0x1d0] sm:$0xf] }
 0x3fd   :  { %10228 = vmatmul.bf16.vlgmr.msrb.gmra.mxu2 %v23259_v46  ;;  %10210 = vmatpush.bf16.msra.mxu1 %v16102_v10  ;;  %v17903_v12 = vld [vmem:[%s27192_s3 + $0xa38] sm:$0xf0]  ;;  %v18046_v6 = vld [vmem:[%s27192_s3 + $0xeb4] sm:$0xf] }
 0x3fe   :  { %10272 = vmatpush.bf16.msra.mxu2 %v14398_v30  ;;  %v17658_v30 = vld [vmem:[%s27192_s3 + $0x290] sm:$0xf0] }
 0x3ff   :  { %10235 = vmatpush.bf16.msra.mxu3 %v16578_v34  ;;  %v16463_v34 = vld [vmem:[%s27192_s3 + $0x139c] sm:$0xf0]  ;;  %v14286_v9 = vor.u32 %v17658_v30, %v14285_v54  ;;  %v15906_v54 = vor.u32 %v18060_v21, %v15903_v24  ;;  %v17637_v30 = vld [vmem:[%s27192_s3 + $0x1e8] sm:$0xf0]  ;;  %v15237_v21 = vld [vmem:[%s27192_s3 + $0x9e8] sm:$0xf] }
 0x400   :  { %10148 = vmatpush.bf16.msra.mxu0 %v14898_v3  ;;  %v25020_v8 = vpop.f32.mrf.mxu2  ;;  %v16466_v10 = vor.u32 %v18200_v13, %v16463_v34  ;;  %v15293_v34 = vld [vmem:[%s27192_s3 + $0xa58] sm:$0xf]  ;;  %v18039_v24 = vld [vmem:[%s27192_s3 + $0xe7c] sm:$0xf] }
 0x401   :  { %10211 = vmatpush.bf16.msra.mxu1 %v16074_v49  ;;  %v17742_v49 = vld [vmem:[%s27192_s3 + $0x530] sm:$0xf0] }
 0x402   :  { %10273 = vmatpush.bf16.msra.mxu2 %v14370_v52  ;;  %v15987_v52 = vld [vmem:[%s27192_s3 + $0xfe4] sm:$0xf0]  ;;  %v14622_v63 = vor.u32 %v17742_v49, %v14621_v15  ;;  %v15847_v15 = vld [vmem:[%s27192_s3 + $0xecc] sm:$0xf0] }
 0x403   :  { %10236 = vmatpush.bf16.msra.mxu3 %v16550_v29  ;;  %v14173_v29 = vld [vmem:[%s27192_s3 + $0x198] sm:$0xf]  ;;  %v15990_v18 = vor.u32 %v18081_v19, %v15987_v52  ;;  %v14565_v19 = vld [vmem:[%s27192_s3 + $0x4a8] sm:$0xf]  ;;  %v14537_v49 = vld [vmem:[%s27192_s3 + $0x470] sm:$0xf] }
 0x404   :  { %10149 = vmatpush.bf16.msra.mxu0 %v14870_v45  ;;  %v14174_v2 = vor.u32 %v17630_v57, %v14173_v29  ;;  %v17728_v45 = vld [vmem:[%s27192_s3 + $0x4c0] sm:$0xf0]  ;;  %v9943_v52 = vpop.f32.mrf.mxu0  ;;  %v17609_v29 = vld [vmem:[%s27192_s3 + $0x108] sm:$0xf0] }
 0x405   :  { %10212 = vmatpush.bf16.msra.mxu1 %v16046_v42  ;;  %v6039_v42 = vperm.slane %v25076_v37, 2  ;;  %v14566_v14 = vor.u32 %v17728_v45, %v14565_v19 }
 0x406   :  { %10274 = vmatpush.bf16.msra.mxu2 %v14342_v7  ;;  %v14258_v7 = vor.u32 %v17651_v1, %v14257_v61  ;;  %v14118_v61 = vor.u32 %v17616_v38, %v14117_v36  ;;  %v15294_v1 = vor.u32 %v17910_v26, %v15293_v34  ;;  %v17889_v34 = vld [vmem:[%s27192_s3 + $0x9c8] sm:$0xf0]  ;;  %v18032_v26 = vld [vmem:[%s27192_s3 + $0xe44] sm:$0xf] }
 0x407   :  { %10237 = vmatpush.bf16.msra.mxu3 %v16522_v53  ;;  %v14229_v53 = vld [vmem:[%s27192_s3 + $0x208] sm:$0xf]  ;;  %10150 = vmatmul.bf16.vlgmr.msra.gmra.mxu0 %v22856_v28 }
 0x408   :  { %10194 = vmatpush.bf16.msrb.mxu0 %v15962_v58  ;;  %v14230_v40 = vor.u32 %v17644_v59, %v14229_v53  ;;  %v10023_v3 = vpop.f32.mrf.mxu2  ;;  %v14089_v58 = vld [vmem:[%s27192_s3 + $0xf0] sm:$0xf]  ;;  %v14061_v53 = vld [vmem:[%s27192_s3 + $0xb8] sm:$0xf]  ;;  %v17602_v59 = vld [vmem:[%s27192_s3 + $0xd0] sm:$0xf0] }
 0x409   :  { %10213 = vmatpush.bf16.msra.mxu1 %v16018_v51  ;;  %v9931_v51 = vadd.f32 %v24942_v22, %v6039_v42 }
 0x40a   :  { %10275 = vmatpush.bf16.msra.mxu2 %v14314_v5  ;;  %v14593_v5 = vld [vmem:[%s27192_s3 + $0x4e0] sm:$0xf] }
 0x40b   :  { %10238 = vmatpush.bf16.msra.mxu3 %v16494_v41  ;;  %v14146_v41 = vor.u32 %v17623_v39, %v14145_v44  ;;  %v14594_v13 = vor.u32 %v17735_v47, %v14593_v5  ;;  %v9944_v22 = vadd.f32 %v9943_v52, %v9931_v51  ;;  %v15850_v44 = vor.u32 %v18046_v6, %v15847_v15  ;;  %v15819_v5 = vld [vmem:[%s27192_s3 + $0xe94] sm:$0xf0]  ;;  %v14481_v51 = vld [vmem:[%s27192_s3 + $0x400] sm:$0xf]  ;;  %v14005_v52 = vld [vmem:[%s27192_s3 + $0x48] sm:$0xf] }
 0x40c   :  { %10195 = vmatpush.bf16.msrb.mxu0 %v15934_v56  ;;  %v14090_v56 = vor.u32 %v17609_v29, %v14089_v58  ;;  %v14509_v47 = vld [vmem:[%s27192_s3 + $0x438] sm:$0xf]  ;;  %v9945_v3 = vpop.f32.mrf.mxu0  ;;  %v15822_v36 = vor.u32 %v18039_v24, %v15819_v5  ;;  %v17700_v6 = vld [vmem:[%s27192_s3 + $0x3e0] sm:$0xf0]  ;;  %v16687_v15 = vld [vmem:[%s27192_s3 + $0x155c] sm:$0xf0] }
 0x40d   :  { %10214 = vmatpush.bf16.msra.mxu1 %v15990_v18  ;;  %v9957_v18 = vadd.f32 %v24931_v62, %v9944_v22  ;;  %v17588_v22 = vld [vmem:[%s27192_s3 + $0x60] sm:$0xf0]  ;;  %v15181_v29 = vld [vmem:[%s27192_s3 + $0x978] sm:$0xf]  ;;  %v18249_v24 = vld [vmem:[%s27192_s3 + $0x150c] sm:$0xf] }
 0x40e   :  { %10276 = vmatpush.bf16.msra.mxu2 %v14286_v9  ;;  %v15875_v9 = vld [vmem:[%s27192_s3 + $0xf04] sm:$0xf0] }
 0x40f   :  { %10239 = vmatpush.bf16.msra.mxu3 %v16466_v10  ;;  %v14202_v10 = vor.u32 %v17637_v30, %v14201_v35  ;;  %v15878_v57 = vor.u32 %v18053_v25, %v15875_v9  ;;  %v9970_v62 = vadd.f32 %v24813_v48, %v9957_v18  ;;  %v17896_v48 = vld [vmem:[%s27192_s3 + $0xa00] sm:$0xf0]  ;;  %v14062_v35 = vor.u32 %v17602_v59, %v14061_v53  ;;  %v17595_v30 = vld [vmem:[%s27192_s3 + $0x98] sm:$0xf0]  ;;  %v15791_v25 = vld [vmem:[%s27192_s3 + $0xe5c] sm:$0xf0] }
 0x410   :  { %10215 = vmatmul.bf16.vlgmr.msra.gmra.mxu1 %v23094_v11  ;;  %10196 = vmatpush.bf16.msrb.mxu0 %v15906_v54  ;;  %v14033_v54 = vld [vmem:[%s27192_s3 + $0x80] sm:$0xf]  ;;  %v17707_v9 = vld [vmem:[%s27192_s3 + $0x418] sm:$0xf0]  ;;  %v18256_v18 = vld [vmem:[%s27192_s3 + $0x1544] sm:$0xf] }
 0x411   :  { %10259 = vmatpush.bf16.msrb.mxu1 %v14174_v2  ;;  %v25144_v2 = vpop.f32.mrf.mxu1  ;;  %v14034_v45 = vor.u32 %v17595_v30, %v14033_v54  ;;  %v14482_v58 = vor.u32 %v17707_v9, %v14481_v51  ;;  %v17581_v59 = vld [vmem:[%s27192_s3 + $0x28] sm:$0xf0]  ;;  %v16659_v5 = vld [vmem:[%s27192_s3 + $0x1524] sm:$0xf0]  ;;  %v15041_v9 = vld [vmem:[%s27192_s3 + $0x860] sm:$0xf] }
 0x412   :  { %10277 = vmatpush.bf16.msra.mxu2 %v14258_v7  ;;  %v17721_v7 = vld [vmem:[%s27192_s3 + $0x488] sm:$0xf0] }
 0x413   :  { %10240 = vmatpush.bf16.msra.mxu3 %v16438_v16  ;;  %v15266_v16 = vor.u32 %v17903_v12, %v15265_v20  ;;  %v14538_v39 = vor.u32 %v17721_v7, %v14537_v49  ;;  %v15763_v20 = vld [vmem:[%s27192_s3 + $0xe24] sm:$0xf0]  ;;  %v14006_v49 = vor.u32 %v17588_v22, %v14005_v52  ;;  %v17791_v52 = vld [vmem:[%s27192_s3 + $0x6b8] sm:$0xf0] }
 0x414   :  { %10197 = vmatpush.bf16.msrb.mxu0 %v15878_v57  ;;  %v17882_v57 = vld [vmem:[%s27192_s3 + $0x990] sm:$0xf0]  ;;  %v14453_v12 = vld [vmem:[%s27192_s3 + $0x3c8] sm:$0xf] }
 0x415   :  { %10260 = vmatpush.bf16.msrb.mxu1 %v14146_v41  ;;  %v15238_v41 = vor.u32 %v17896_v48, %v15237_v21  ;;  %v15182_v7 = vor.u32 %v17882_v57, %v15181_v29  ;;  %v14454_v53 = vor.u32 %v17700_v6, %v14453_v12  ;;  %v15069_v21 = vld [vmem:[%s27192_s3 + $0x898] sm:$0xf]  ;;  %v17854_v48 = vld [vmem:[%s27192_s3 + $0x8b0] sm:$0xf0]  ;;  %v15097_v57 = vld [vmem:[%s27192_s3 + $0x8d0] sm:$0xf] }
 0x416   :  { %10278 = vmatpush.bf16.msra.mxu2 %v14230_v40  ;;  %10241 = vmatmul.bf16.vlgmr.msra.gmra.mxu3 %v23261_v0  ;;  %v17714_v40 = vld [vmem:[%s27192_s3 + $0x450] sm:$0xf0]  ;;  %v15070_v30 = vor.u32 %v17854_v48, %v15069_v21  ;;  %v17840_v6 = vld [vmem:[%s27192_s3 + $0x840] sm:$0xf0]  ;;  %v14985_v48 = vld [vmem:[%s27192_s3 + $0x7f0] sm:$0xf] }
 0x417   :  { %10285 = vmatpush.bf16.msrb.mxu3 %v14622_v63  ;;  %v9982_v63 = vpop.f32.mrf.mxu3  ;;  %v14510_v38 = vor.u32 %v17714_v40, %v14509_v47  ;;  %v14425_v47 = vld [vmem:[%s27192_s3 + $0x390] sm:$0xf]  ;;  %v17693_v40 = vld [vmem:[%s27192_s3 + $0x3a8] sm:$0xf0] }
 0x418   :  { %v25163_v42 = vadd.f32 %v9982_v63, %v9970_v62  ;;  %10198 = vmatpush.bf16.msrb.mxu0 %v15850_v44  ;;  %v15153_v44 = vld [vmem:[%s27192_s3 + $0x940] sm:$0xf]  ;;  %v17875_v63 = vld [vmem:[%s27192_s3 + $0x958] sm:$0xf0] }
 0x419   :  { %10261 = vmatpush.bf16.msrb.mxu1 %v14118_v61  ;;  %v10010_v19 = vpop.f32.mrf.mxu1  ;;  %v15794_v61 = vor.u32 %v18032_v26, %v15791_v25  ;;  %v15154_v54 = vor.u32 %v17875_v63, %v15153_v44  ;;  %v15125_v26 = vld [vmem:[%s27192_s3 + $0x908] sm:$0xf]  ;;  %v17868_v25 = vld [vmem:[%s27192_s3 + $0x920] sm:$0xf0] }
 0x41a   :  { %10279 = vmatpush.bf16.msra.mxu2 %v14202_v10  ;;  %v17847_v19 = vld [vmem:[%s27192_s3 + $0x878] sm:$0xf0]  ;;  %v15126_v22 = vor.u32 %v17868_v25, %v15125_v26  ;;  %v17952_v44 = vld [vmem:[%s27192_s3 + $0xbc0] sm:$0xf0] }
 0x41b   :  { %10286 = vmatpush.bf16.msrb.mxu3 %v14594_v13  ;;  %v15209_v13 = vld [vmem:[%s27192_s3 + $0x9b0] sm:$0xf]  ;;  %v15042_v29 = vor.u32 %v17847_v19, %v15041_v9  ;;  %v16133_v9 = vld [vmem:[%s27192_s3 + $0x10e8] sm:$0xf]  ;;  %v18120_v19 = vld [vmem:[%s27192_s3 + $0x1100] sm:$0xf0] }
 0x41c   :  { %v15210_v10 = vor.u32 %v17889_v34, %v15209_v13  ;;  %10199 = vmatpush.bf16.msrb.mxu0 %v15822_v36  ;;  %v15517_v36 = vld [vmem:[%s27192_s3 + $0xc18] sm:$0xf]  ;;  %v16662_v13 = vor.u32 %v18249_v24, %v16659_v5  ;;  %v14426_v34 = vor.u32 %v17693_v40, %v14425_v47  ;;  %v17833_v5 = vld [vmem:[%s27192_s3 + $0x808] sm:$0xf0]  ;;  %v16161_v47 = vld [vmem:[%s27192_s3 + $0x1120] sm:$0xf] }
 0x41d   :  { %10280 = vmatmul.bf16.vlgmr.msra.gmra.mxu2 %v22624_v31  ;;  %10262 = vmatpush.bf16.msrb.mxu1 %v14090_v56  ;;  %v13977_v56 = vld [vmem:[%s27192_s3 + $0x10] sm:$0xf] }
 0x41e   :  { %10324 = vmatpush.bf16.msrb.mxu2 %v15294_v1  ;;  %v13978_v3 = vor.u32 %v17581_v59, %v13977_v56  ;;  %v17784_v56 = vld [vmem:[%s27192_s3 + $0x680] sm:$0xf0]  ;;  %v15461_v59 = vld [vmem:[%s27192_s3 + $0xba8] sm:$0xf] }
 0x41f   :  { %10287 = vmatpush.bf16.msrb.mxu3 %v14566_v14  ;;  %v9984_v1 = vpop.f32.mrf.mxu3  ;;  %v18025_v14 = vld [vmem:[%s27192_s3 + $0xe0c] sm:$0xf] }
 0x420   :  { %10200 = vmatpush.bf16.msrb.mxu0 %v15794_v61  ;;  %v15766_v62 = vor.u32 %v18025_v14, %v15763_v20  ;;  %v15489_v1 = vld [vmem:[%s27192_s3 + $0xbe0] sm:$0xf]  ;;  %v17861_v14 = vld [vmem:[%s27192_s3 + $0x8e8] sm:$0xf0]  ;;  %v15013_v20 = vld [vmem:[%s27192_s3 + $0x828] sm:$0xf] }
 0x421   :  { %10263 = vmatpush.bf16.msrb.mxu1 %v14062_v35  ;;  %v14845_v35 = vld [vmem:[%s27192_s3 + $0x6d8] sm:$0xf] }
 0x422   :  { %10325 = vmatpush.bf16.msrb.mxu2 %v15266_v16  ;;  %v25231_v16 = vpop.f32.mrf.mxu2 }
 0x423   :  { %10288 = vmatpush.bf16.msrb.mxu3 %v14538_v39  ;;  %v16690_v39 = vor.u32 %v18256_v18, %v16687_v15  ;;  %v16189_v18 = vld [vmem:[%s27192_s3 + $0x1158] sm:$0xf]  ;;  %v18134_v15 = vld [vmem:[%s27192_s3 + $0x1170] sm:$0xf0] }
 0x424   :  { %10201 = vmatpush.bf16.msrb.mxu0 %v15766_v62  ;;  %v15098_v62 = vor.u32 %v17861_v14, %v15097_v57  ;;  %v16190_v21 = vor.u32 %v18134_v15, %v16189_v18  ;;  %v14929_v57 = vld [vmem:[%s27192_s3 + $0x780] sm:$0xf] }
 0x425   :  { %10264 = vmatpush.bf16.msrb.mxu1 %v14034_v45  ;;  %v14705_v15 = vld [vmem:[%s27192_s3 + $0x5c0] sm:$0xf] }
 0x426   :  { %10326 = vmatpush.bf16.msrb.mxu2 %v15238_v41  ;;  %v17798_v41 = vld [vmem:[%s27192_s3 + $0x6f0] sm:$0xf0] }
 0x427   :  { %10289 = vmatpush.bf16.msrb.mxu3 %v14510_v38  ;;  %v17966_v38 = vld [vmem:[%s27192_s3 + $0xc30] sm:$0xf0]  ;;  %v14846_v51 = vor.u32 %v17798_v41, %v14845_v35  ;;  %10202 = vmatmul.bf16.vlgmr.msrb.gmra.mxu0 %v23091_v60  ;;  %v14761_v35 = vld [vmem:[%s27192_s3 + $0x630] sm:$0xf]  ;;  %v17777_v41 = vld [vmem:[%s27192_s3 + $0x648] sm:$0xf0] }
 0x428   :  { %10252 = vmatpush.bf16.msra.mxu0 %v16690_v39  ;;  %v15518_v45 = vor.u32 %v17966_v38, %v15517_v36  ;;  %v15014_v39 = vor.u32 %v17840_v6, %v15013_v20  ;;  %v14986_v36 = vor.u32 %v17833_v5, %v14985_v48  ;;  %v14762_v25 = vor.u32 %v17777_v41, %v14761_v35  ;;  %v17819_v20 = vld [vmem:[%s27192_s3 + $0x798] sm:$0xf0]  ;;  %v18113_v6 = vld [vmem:[%s27192_s3 + $0x10c8] sm:$0xf0]  ;;  %v16077_v48 = vld [vmem:[%s27192_s3 + $0x1078] sm:$0xf] }
 0x429   :  { %10265 = vmatpush.bf16.msrb.mxu1 %v14006_v49 }
 0x42a   :  { %10327 = vmatpush.bf16.msrb.mxu2 %v15210_v10  ;;  %v14817_v10 = vld [vmem:[%s27192_s3 + $0x6a0] sm:$0xf]  ;;  %v10075_v61 = vpop.f32.mrf.mxu2 }
 0x42b   :  { %10290 = vmatpush.bf16.msrb.mxu3 %v14482_v58  ;;  %v17959_v58 = vld [vmem:[%s27192_s3 + $0xbf8] sm:$0xf0]  ;;  %v14818_v12 = vor.u32 %v17791_v52, %v14817_v10  ;;  %v14733_v10 = vld [vmem:[%s27192_s3 + $0x5f8] sm:$0xf]  ;;  %v17770_v52 = vld [vmem:[%s27192_s3 + $0x610] sm:$0xf0] }
 0x42c   :  { %10253 = vmatpush.bf16.msra.mxu0 %v16662_v13  ;;  %v15490_v49 = vor.u32 %v17959_v58, %v15489_v1  ;;  %v15405_v61 = vld [vmem:[%s27192_s3 + $0xb38] sm:$0xf]  ;;  %v17938_v1 = vld [vmem:[%s27192_s3 + $0xb50] sm:$0xf0]  ;;  %v14734_v14 = vor.u32 %v17770_v52, %v14733_v10  ;;  %v17917_v10 = vld [vmem:[%s27192_s3 + $0xaa8] sm:$0xf0] }
 0x42d   :  { %10266 = vmatpush.bf16.msrb.mxu1 %v13978_v3  ;;  %v15462_v3 = vor.u32 %v17952_v44, %v15461_v59  ;;  %v15406_v18 = vor.u32 %v17938_v1, %v15405_v61  ;;  %v14901_v44 = vld [vmem:[%s27192_s3 + $0x748] sm:$0xf]  ;;  %v15741_v52 = vld [vmem:[%s27192_s3 + $0xdd8] sm:$0xf] }
 0x42e   :  { %10328 = vmatpush.bf16.msrb.mxu2 %v15182_v7  ;;  %v14789_v7 = vld [vmem:[%s27192_s3 + $0x668] sm:$0xf] }
 0x42f   :  { %10291 = vmatpush.bf16.msrb.mxu3 %v14454_v53  ;;  %v9995_v53 = vpop.f32.mrf.mxu0  ;;  %v14790_v24 = vor.u32 %v17784_v56, %v14789_v7  ;;  %v15377_v56 = vld [vmem:[%s27192_s3 + $0xb00] sm:$0xf] }
 0x430   :  { %10267 = vmatmul.bf16.vlgmr.msrb.gmra.mxu1 %v22622_v55  ;;  %10298 = vmatpush.bf16.msrb.mxu0 %v14846_v51  ;;  %v9996_v63 = vadd.f32 %v9995_v53, %v25163_v42  ;;  %v18127_v42 = vld [vmem:[%s27192_s3 + $0x1138] sm:$0xf0]  ;;  %v17826_v51 = vld [vmem:[%s27192_s3 + $0x7d0] sm:$0xf0]  ;;  %v14930_v53 = vor.u32 %v17819_v20, %v14929_v57  ;;  %v16021_v20 = vld [vmem:[%s27192_s3 + $0x1008] sm:$0xf] }
 0x431   :  { %10311 = vmatpush.bf16.msra.mxu1 %v15070_v30  ;;  %v15433_v30 = vld [vmem:[%s27192_s3 + $0xb70] sm:$0xf]  ;;  %v16162_v38 = vor.u32 %v18127_v42, %v16161_v47  ;;  %v10034_v26 = vpop.f32.mrf.mxu3  ;;  %v14677_v47 = vld [vmem:[%s27192_s3 + $0x588] sm:$0xf]  ;;  %v17756_v42 = vld [vmem:[%s27192_s3 + $0x5a0] sm:$0xf0] }
 0x432   :  { %10329 = vmatpush.bf16.msrb.mxu2 %v15154_v54  ;;  %v10009_v40 = vadd.f32 %v25144_v2, %v9996_v63  ;;  %v25349_v54 = vpop.f32.mrf.mxu1  ;;  %v17945_v2 = vld [vmem:[%s27192_s3 + $0xb88] sm:$0xf0] }
 0x433   :  { %10292 = vmatpush.bf16.msrb.mxu3 %v14426_v34  ;;  %v14957_v34 = vld [vmem:[%s27192_s3 + $0x7b8] sm:$0xf] }
 0x434   :  { %10299 = vmatpush.bf16.msrb.mxu0 %v14818_v12  ;;  %v10022_v13 = vadd.f32 %v25020_v8, %v10009_v40  ;;  %v14958_v58 = vor.u32 %v17826_v51, %v14957_v34  ;;  %v16105_v12 = vld [vmem:[%s27192_s3 + $0x10b0] sm:$0xf]  ;;  %v15349_v40 = vld [vmem:[%s27192_s3 + $0xac8] sm:$0xf]  ;;  %v18099_v34 = vld [vmem:[%s27192_s3 + $0x1058] sm:$0xf0] }
 0x435   :  { %10312 = vmatpush.bf16.msra.mxu1 %v15042_v29  ;;  %v16134_v29 = vor.u32 %v18120_v19, %v16133_v9  ;;  %v16106_v59 = vor.u32 %v18113_v6, %v16105_v12  ;;  %v14649_v9 = vld [vmem:[%s27192_s3 + $0x550] sm:$0xf]  ;;  %v17749_v19 = vld [vmem:[%s27192_s3 + $0x568] sm:$0xf0]  ;;  %v18092_v12 = vld [vmem:[%s27192_s3 + $0x1020] sm:$0xf0] }
 0x436   :  { %10330 = vmatpush.bf16.msrb.mxu2 %v15126_v22  ;;  %10293 = vmatmul.bf16.vlgmr.msrb.gmra.mxu3 %v22813_v23  ;;  %v25371_v8 = vadd.f32 %v10034_v26, %v10022_v13  ;;  %v14678_v13 = vor.u32 %v17756_v42, %v14677_v47  ;;  %v15965_v26 = vld [vmem:[%s27192_s3 + $0xf98] sm:$0xf]  ;;  %v18064_v42 = vld [vmem:[%s27192_s3 + $0xf40] sm:$0xf0] }
 0x437   :  { %10337 = vmatpush.bf16.msra.mxu3 %v15518_v45  ;;  %v15434_v45 = vor.u32 %v17945_v2, %v15433_v30  ;;  %v9997_v22 = vpop.f32.mrf.mxu0  ;;  %16706 = vmatmul.msk.bf16.vlgmr.msra.gmra.mxu0 %vm9579_vm14, %v23590_v33  ;;  %v14873_v30 = vld [vmem:[%s27192_s3 + $0x710] sm:$0xf]  ;;  %v17805_v2 = vld [vmem:[%s27192_s3 + $0x728] sm:$0xf0] }
 0x438   :  { %10300 = vmatpush.bf16.msrb.mxu0 %v14790_v24  ;;  %v18106_v24 = vld [vmem:[%s27192_s3 + $0x1090] sm:$0xf0]  ;;  %v14874_v61 = vor.u32 %v17805_v2, %v14873_v30  ;;  %v18008_v30 = vld [vmem:[%s27192_s3 + $0xd80] sm:$0xf0] }
 0x439   :  { %10313 = vmatpush.bf16.msra.mxu1 %v15014_v39  ;;  %v10036_v63 = vpop.f32.mrf.mxu3  ;;  %v16078_v41 = vor.u32 %v18106_v24, %v16077_v48  ;;  %v18022_v22 = vld [vmem:[%s27192_s3 + $0xdf0] sm:$0xf0]  ;;  %v15993_v48 = vld [vmem:[%s27192_s3 + $0xfd0] sm:$0xf]  ;;  %v18085_v24 = vld [vmem:[%s27192_s3 + $0xfe8] sm:$0xf0] }
 0x43a   :  { %10331 = vmatpush.bf16.msrb.mxu2 %v15098_v62  ;;  %v10062_v7 = vpop.f32.mrf.mxu1  ;;  %v17931_v62 = vld [vmem:[%s27192_s3 + $0xb18] sm:$0xf0]  ;;  %v15994_v2 = vor.u32 %v18085_v24, %v15993_v48  ;;  %v15825_v24 = vld [vmem:[%s27192_s3 + $0xe80] sm:$0xf] }
 0x43b   :  { %10338 = vmatpush.bf16.msra.mxu3 %v15490_v49  ;;  %v17763_v49 = vld [vmem:[%s27192_s3 + $0x5d8] sm:$0xf0]  ;;  %v15378_v5 = vor.u32 %v17931_v62, %v15377_v56  ;;  %v15713_v62 = vld [vmem:[%s27192_s3 + $0xda0] sm:$0xf] }
 0x43c   :  { %10301 = vmatpush.bf16.msrb.mxu0 %v14762_v25  ;;  %v14706_v39 = vor.u32 %v17763_v49, %v14705_v15  ;;  %v18078_v25 = vld [vmem:[%s27192_s3 + $0xfb0] sm:$0xf0]  ;;  %v15742_v15 = vor.u32 %v18022_v22, %v15741_v52  ;;  %v15937_v49 = vld [vmem:[%s27192_s3 + $0xf60] sm:$0xf]  ;;  %v18071_v7 = vld [vmem:[%s27192_s3 + $0xf78] sm:$0xf0] }
 0x43d   :  { %10332 = vmatmul.bf16.vlgmr.msrb.gmra.mxu2 %v22858_v17  ;;  %10314 = vmatpush.bf16.msra.mxu1 %v14986_v36  ;;  %v16049_v36 = vld [vmem:[%s27192_s3 + $0x1040] sm:$0xf]  ;;  %v15966_v57 = vor.u32 %v18078_v25, %v15965_v26  ;;  %v18183_v63 = vld [vmem:[%s27192_s3 + $0x12f8] sm:$0xf0]  ;;  %v17620_v52 = vld [vmem:[%s27192_s3 + $0x164] sm:$0xf] }
 0x43e   :  { %10376 = vmatpush.bf16.msra.mxu2 %v16190_v21  ;;  %v17812_v21 = vld [vmem:[%s27192_s3 + $0x760] sm:$0xf0]  ;;  %v16050_v1 = vor.u32 %v18099_v34, %v16049_v36  ;;  %v16357_v36 = vld [vmem:[%s27192_s3 + $0x12a8] sm:$0xf]  ;;  %v14147_v22 = vld [vmem:[%s27192_s3 + $0x17c] sm:$0xf0] }
 0x43f   :  { %10339 = vmatpush.bf16.msra.mxu3 %v15462_v3  ;;  %v17924_v3 = vld [vmem:[%s27192_s3 + $0xae0] sm:$0xf0]  ;;  %v14902_v35 = vor.u32 %v17812_v21, %v14901_v44  ;;  %v16385_v44 = vld [vmem:[%s27192_s3 + $0x12e0] sm:$0xf]  ;;  %v15938_v21 = vor.u32 %v18071_v7, %v15937_v49  ;;  %v18050_v49 = vld [vmem:[%s27192_s3 + $0xed0] sm:$0xf0] }
 0x440   :  { %10302 = vmatpush.bf16.msrb.mxu0 %v14734_v14  ;;  %v15350_v51 = vor.u32 %v17924_v3, %v15349_v40  ;;  %v14650_v14 = vor.u32 %v17749_v19, %v14649_v9  ;;  %v17627_v40 = vld [vmem:[%s27192_s3 + $0x19c] sm:$0xf]  ;;  %v14175_v3 = vld [vmem:[%s27192_s3 + $0x1b4] sm:$0xf0]  ;;  %v17613_v7 = vld [vmem:[%s27192_s3 + $0x12c] sm:$0xf] }
 0x441   :  { %10315 = vmatpush.bf16.msra.mxu1 %v14958_v58  ;;  %v16413_v58 = vld [vmem:[%s27192_s3 + $0x1318] sm:$0xf]  ;;  %v25485_v6 = vpop.f32.mrf.mxu3  ;;  %v14178_v25 = vor.u32 %v17627_v40, %v14175_v3  ;;  %v15601_v3 = vld [vmem:[%s27192_s3 + $0xcc0] sm:$0xf] }
 0x442   :  { %10377 = vmatpush.bf16.msra.mxu2 %v16162_v38  ;;  %v25444_v38 = vpop.f32.mrf.mxu2 }
 0x443   :  { %10340 = vmatpush.bf16.msra.mxu3 %v15434_v45  ;;  %v15321_v45 = vld [vmem:[%s27192_s3 + $0xa90] sm:$0xf] }
 0x444   :  { %10303 = vmatpush.bf16.msrb.mxu0 %v14706_v39  ;;  %v10047_v34 = vpop.f32.mrf.mxu0 }
 0x445   :  { %10316 = vmatpush.bf16.msra.mxu1 %v14930_v53  ;;  %v18015_v53 = vld [vmem:[%s27192_s3 + $0xdb8] sm:$0xf0]  ;;  %v10048_v9 = vadd.f32 %v10047_v34, %v25371_v8  ;;  %v15657_v8 = vld [vmem:[%s27192_s3 + $0xd30] sm:$0xf] }
 0x446   :  { %10378 = vmatpush.bf16.msra.mxu2 %v16134_v29  ;;  %v18190_v29 = vld [vmem:[%s27192_s3 + $0x1330] sm:$0xf0]  ;;  %v15714_v47 = vor.u32 %v18015_v53, %v15713_v62 }
 0x447   :  { %10341 = vmatpush.bf16.msra.mxu3 %v15406_v18  ;;  %v15322_v18 = vor.u32 %v17917_v10, %v15321_v45  ;;  %v16414_v56 = vor.u32 %v18190_v29, %v16413_v58  ;;  %v18057_v10 = vld [vmem:[%s27192_s3 + $0xf08] sm:$0xf0]  ;;  %v10061_v58 = vadd.f32 %v25349_v54, %v10048_v9  ;;  %v17994_v53 = vld [vmem:[%s27192_s3 + $0xd10] sm:$0xf0]  ;;  %v17599_v9 = vld [vmem:[%s27192_s3 + $0xbc] sm:$0xf] }
 0x448   :  { %10304 = vmatpush.bf16.msrb.mxu0 %v14678_v13  ;;  %v18176_v13 = vld [vmem:[%s27192_s3 + $0x12c0] sm:$0xf0] }
 0x449   :  { %10317 = vmatpush.bf16.msra.mxu1 %v14902_v35  ;;  %v16386_v35 = vor.u32 %v18183_v63, %v16385_v44  ;;  %v10088_v19 = vpop.f32.mrf.mxu3  ;;  %v10074_v54 = vadd.f32 %v25231_v16, %v10061_v58  ;;  %v15629_v16 = vld [vmem:[%s27192_s3 + $0xcf8] sm:$0xf]  ;;  %v18162_v63 = vld [vmem:[%s27192_s3 + $0x1250] sm:$0xf0]  ;;  %v15769_v58 = vld [vmem:[%s27192_s3 + $0xe10] sm:$0xf] }
 0x44a   :  { %10379 = vmatpush.bf16.msra.mxu2 %v16106_v59  ;;  %v16022_v59 = vor.u32 %v18092_v12, %v16021_v20  ;;  %v10127_v39 = vpop.f32.mrf.mxu2  ;;  %v14150_v12 = vor.u32 %v17620_v52, %v14147_v22  ;;  %v16301_v44 = vld [vmem:[%s27192_s3 + $0x1238] sm:$0xf]  ;;  %v17980_v52 = vld [vmem:[%s27192_s3 + $0xca0] sm:$0xf0]  ;;  %v16245_v22 = vld [vmem:[%s27192_s3 + $0x11c8] sm:$0xf] }
 0x44b   :  { %10342 = vmatpush.bf16.msra.mxu3 %v15378_v5  ;;  %v15909_v5 = vld [vmem:[%s27192_s3 + $0xf28] sm:$0xf]  ;;  %v16302_v40 = vor.u32 %v18162_v63, %v16301_v44  ;;  %v14063_v19 = vld [vmem:[%s27192_s3 + $0xd4] sm:$0xf0]  ;;  %v18246_v63 = vld [vmem:[%s27192_s3 + $0x14f0] sm:$0xf0] }
 0x44c   :  { %10305 = vmatpush.bf16.msrb.mxu0 %v14650_v14  ;;  %v15910_v26 = vor.u32 %v18064_v42, %v15909_v5  ;;  %v18169_v14 = vld [vmem:[%s27192_s3 + $0x1288] sm:$0xf0]  ;;  %v10049_v39 = vpop.f32.mrf.mxu0  ;;  %v18043_v5 = vld [vmem:[%s27192_s3 + $0xe98] sm:$0xf0]  ;;  %v14091_v42 = vld [vmem:[%s27192_s3 + $0x10c] sm:$0xf0] }
 0x44d   :  { %10318 = vmatpush.bf16.msra.mxu1 %v14874_v61  ;;  %v16358_v61 = vor.u32 %v18176_v13, %v16357_v36  ;;  %v25558_v29 = vpop.f32.mrf.mxu1  ;;  %v18155_v36 = vld [vmem:[%s27192_s3 + $0x1218] sm:$0xf0]  ;;  %v15826_v13 = vor.u32 %v18043_v5, %v15825_v24  ;;  %v16637_v44 = vld [vmem:[%s27192_s3 + $0x14d8] sm:$0xf] }
 0x44e   :  { %10380 = vmatpush.bf16.msra.mxu2 %v16078_v41  ;;  %v15685_v41 = vld [vmem:[%s27192_s3 + $0xd68] sm:$0xf]  ;;  %v14399_v24 = vld [vmem:[%s27192_s3 + $0x374] sm:$0xf0] }
 0x44f   :  { %10343 = vmatpush.bf16.msra.mxu3 %v15350_v51  ;;  %10306 = vmatmul.bf16.vlgmr.msrb.gmra.mxu0 %v22822_v27  ;;  %v15881_v51 = vld [vmem:[%s27192_s3 + $0xef0] sm:$0xf]  ;;  %v15686_v45 = vor.u32 %v18008_v30, %v15685_v41 }
 0x450   :  { %10350 = vmatpush.bf16.msra.mxu0 %v15742_v15  ;;  %10319 = vmatmul.bf16.vlgmr.msra.gmra.mxu1 %v22856_v28  ;;  %v15882_v20 = vor.u32 %v18057_v10, %v15881_v51  ;;  %v18036_v51 = vld [vmem:[%s27192_s3 + $0xe60] sm:$0xf0]  ;;  %v15573_v10 = vld [vmem:[%s27192_s3 + $0xc88] sm:$0xf] }
 0x451   :  { %10363 = vmatpush.bf16.msrb.mxu1 %v15966_v57  ;;  %v16329_v57 = vld [vmem:[%s27192_s3 + $0x1270] sm:$0xf] }
 0x452   :  { %10381 = vmatpush.bf16.msra.mxu2 %v16050_v1  ;;  %v18001_v1 = vld [vmem:[%s27192_s3 + $0xd48] sm:$0xf0]  ;;  %v16330_v62 = vor.u32 %v18169_v14, %v16329_v57  ;;  %v17592_v14 = vld [vmem:[%s27192_s3 + $0x84] sm:$0xf] }
 0x453   :  { %10344 = vmatpush.bf16.msra.mxu3 %v15322_v18  ;;  %v15853_v18 = vld [vmem:[%s27192_s3 + $0xeb8] sm:$0xf]  ;;  %v15658_v15 = vor.u32 %v18001_v1, %v15657_v8  ;;  %v14066_v1 = vor.u32 %v17599_v9, %v14063_v19  ;;  %v18029_v57 = vld [vmem:[%s27192_s3 + $0xe28] sm:$0xf0]  ;;  %v14371_v9 = vld [vmem:[%s27192_s3 + $0x33c] sm:$0xf0] }
 0x454   :  { %10351 = vmatpush.bf16.msra.mxu0 %v15714_v47  ;;  %v17606_v47 = vld [vmem:[%s27192_s3 + $0xf4] sm:$0xf]  ;;  %v15770_v39 = vor.u32 %v18029_v57, %v15769_v58  ;;  %v17788_v58 = vld [vmem:[%s27192_s3 + $0x6a4] sm:$0xf]  ;;  %v14819_v57 = vld [vmem:[%s27192_s3 + $0x6bc] sm:$0xf0] }
 0x455   :  { %10364 = vmatpush.bf16.msrb.mxu1 %v15938_v21  ;;  %v15854_v21 = vor.u32 %v18050_v49, %v15853_v18  ;;  %v10114_v41 = vpop.f32.mrf.mxu1  ;;  %v14094_v34 = vor.u32 %v17606_v47, %v14091_v42  ;;  %v16693_v18 = vld [vmem:[%s27192_s3 + $0x1548] sm:$0xf]  ;;  %v17585_v47 = vld [vmem:[%s27192_s3 + $0x4c] sm:$0xf] }
 0x456   :  { %10382 = vmatpush.bf16.msra.mxu2 %v16022_v59  ;;  %10345 = vmatmul.bf16.vlgmr.msra.gmra.mxu3 %v23057_v43  ;;  %v25587_v59 = vadd.f32 %v25485_v6, %v10074_v54  ;;  %v15630_v6 = vor.u32 %v17994_v53, %v15629_v16  ;;  %v18260_v54 = vld [vmem:[%s27192_s3 + $0x1560] sm:$0xf0]  ;;  %v18141_v53 = vld [vmem:[%s27192_s3 + $0x11a8] sm:$0xf0]  ;;  %v14007_v42 = vld [vmem:[%s27192_s3 + $0x64] sm:$0xf0] }
 0x457   :  { %10389 = vmatpush.bf16.msrb.mxu3 %v16414_v56  ;;  %v14119_v56 = vld [vmem:[%s27192_s3 + $0x144] sm:$0xf0]  ;;  %v18253_v41 = vld [vmem:[%s27192_s3 + $0x1528] sm:$0xf0] }
 0x458   :  { %10352 = vmatpush.bf16.msra.mxu0 %v15686_v45  ;;  %v14122_v48 = vor.u32 %v17613_v7, %v14119_v56  ;;  %v15545_v7 = vld [vmem:[%s27192_s3 + $0xc50] sm:$0xf]  ;;  %v17973_v56 = vld [vmem:[%s27192_s3 + $0xc68] sm:$0xf0]  ;;  %vm10768_vm15 = vcmp.gt.f32.partialorder %v25587_v59, 0.0 }
 0x459   :  { %10365 = vmatpush.bf16.msrb.mxu1 %v15910_v26  ;;  %v25613_v30 = vpop.f32.mrf.mxu3  ;;  %v15797_v26 = vld [vmem:[%s27192_s3 + $0xe48] sm:$0xf]  ;;  %v15546_v5 = vor.u32 %v17973_v56, %v15545_v7 }
 0x45a   :  { %10383 = vmatpush.bf16.msra.mxu2 %v15994_v2  ;;  %v16273_v2 = vld [vmem:[%s27192_s3 + $0x1200] sm:$0xf]  ;;  %v15798_v8 = vor.u32 %v18036_v51, %v15797_v26  ;;  %v18239_v26 = vld [vmem:[%s27192_s3 + $0x14b8] sm:$0xf0]  ;;  %v17676_v51 = vld [vmem:[%s27192_s3 + $0x324] sm:$0xf] }
 0x45b   :  { %10390 = vmatpush.bf16.msrb.mxu3 %v16386_v35  ;;  %v17987_v35 = vld [vmem:[%s27192_s3 + $0xcd8] sm:$0xf0]  ;;  %v16274_v45 = vor.u32 %v18155_v36, %v16273_v2 }
 0x45c   :  { %10353 = vmatpush.bf16.msra.mxu0 %v15658_v15  ;;  %v17795_v2 = vld [vmem:[%s27192_s3 + $0x6dc] sm:$0xf] }
 0x45d   :  { %10384 = vmatmul.bf16.vlgmr.msra.gmra.mxu2 %v23094_v11  ;;  %10366 = vmatpush.bf16.msrb.mxu1 %v15882_v20  ;;  %v15574_v20 = vor.u32 %v17980_v52, %v15573_v10  ;;  %v13979_v10 = vld [vmem:[%s27192_s3 + $0x2c] sm:$0xf0]  ;;  %v17851_v52 = vld [vmem:[%s27192_s3 + $0x89c] sm:$0xf] }
 0x45e   :  { %10428 = vmatpush.bf16.msrb.mxu2 %v14178_v25  ;;  %v15602_v25 = vor.u32 %v17987_v35, %v15601_v3  ;;  %v16638_v3 = vor.u32 %v18246_v63, %v16637_v44  ;;  %v16665_v35 = vld [vmem:[%s27192_s3 + $0x1510] sm:$0xf]  ;;  %v15043_v44 = vld [vmem:[%s27192_s3 + $0x87c] sm:$0xf0]  ;;  %v17781_v63 = vld [vmem:[%s27192_s3 + $0x66c] sm:$0xf] }
 0x45f   :  { %10391 = vmatpush.bf16.msrb.mxu3 %v16358_v61  ;;  %v18148_v61 = vld [vmem:[%s27192_s3 + $0x11e0] sm:$0xf0]  ;;  %v16666_v19 = vor.u32 %v18253_v41, %v16665_v35 }
 0x460   :  { %10354 = vmatpush.bf16.msra.mxu0 %v15630_v6  ;;  %v25663_v15 = vpop.f32.mrf.mxu2  ;;  %v16246_v49 = vor.u32 %v18148_v61, %v16245_v22  ;;  %v16694_v6 = vor.u32 %v18260_v54, %v16693_v18  ;;  %v18232_v18 = vld [vmem:[%s27192_s3 + $0x1480] sm:$0xf0] }
 0x461   :  { %10367 = vmatpush.bf16.msrb.mxu1 %v15854_v21  ;;  %v10140_v16 = vpop.f32.mrf.mxu3 }
 0x462   :  { %10429 = vmatpush.bf16.msrb.mxu2 %v14150_v12  ;;  %v14035_v12 = vld [vmem:[%s27192_s3 + $0x9c] sm:$0xf0] }
 0x463   :  { %10392 = vmatpush.bf16.msrb.mxu3 %v16330_v62  ;;  %v16217_v62 = vld [vmem:[%s27192_s3 + $0x1190] sm:$0xf]  ;;  %v14038_v21 = vor.u32 %v17592_v14, %v14035_v12  ;;  %v14374_v14 = vor.u32 %v17676_v51, %v14371_v9  ;;  %v16581_v12 = vld [vmem:[%s27192_s3 + $0x1468] sm:$0xf]  ;;  %v17655_v9 = vld [vmem:[%s27192_s3 + $0x27c] sm:$0xf] }
 0x464   :  { %10355 = vmatpush.bf16.msra.mxu0 %v15602_v25  ;;  %v14010_v25 = vor.u32 %v17585_v47, %v14007_v42  ;;  %v10099_v56 = vpop.f32.mrf.mxu0  ;;  %v16582_v16 = vor.u32 %v18232_v18, %v16581_v12  ;;  %v14315_v47 = vld [vmem:[%s27192_s3 + $0x2cc] sm:$0xf0]  ;;  %v14259_v12 = vld [vmem:[%s27192_s3 + $0x25c] sm:$0xf0] }
 0x465   :  { %10368 = vmatpush.bf16.msrb.mxu1 %v15826_v13  ;;  %v14847_v13 = vld [vmem:[%s27192_s3 + $0x6f4] sm:$0xf0] }
 0x466   :  { %10430 = vmatpush.bf16.msrb.mxu2 %v14122_v48  ;;  %v17683_v48 = vld [vmem:[%s27192_s3 + $0x35c] sm:$0xf]  ;;  %v14850_v61 = vor.u32 %v17795_v2, %v14847_v13  ;;  %v17837_v2 = vld [vmem:[%s27192_s3 + $0x82c] sm:$0xf] }
 0x467   :  { %10393 = vmatpush.bf16.msrb.mxu3 %v16302_v40  ;;  %v16218_v40 = vor.u32 %v18141_v53, %v16217_v62  ;;  %v14402_v36 = vor.u32 %v17683_v48, %v14399_v24  ;;  %v14822_v62 = vor.u32 %v17788_v58, %v14819_v57  ;;  %v17844_v53 = vld [vmem:[%s27192_s3 + $0x864] sm:$0xf]  ;;  %v14791_v48 = vld [vmem:[%s27192_s3 + $0x684] sm:$0xf0]  ;;  %v16553_v24 = vld [vmem:[%s27192_s3 + $0x1430] sm:$0xf] }
 0x468   :  { %10356 = vmatpush.bf16.msra.mxu0 %v15574_v20  ;;  %v10179_v22 = vpop.f32.mrf.mxu2  ;;  %v6040_v20 = vperm.slane %v25076_v37, 3  ;;  %v14343_v37 = vld [vmem:[%s27192_s3 + $0x304] sm:$0xf0]  ;;  %v14794_v35 = vor.u32 %v17781_v63, %v14791_v48  ;;  %v14735_v58 = vld [vmem:[%s27192_s3 + $0x614] sm:$0xf0] }
 0x469   :  { %10369 = vmatpush.bf16.msrb.mxu1 %v15798_v8  ;;  %v16497_v57 = vld [vmem:[%s27192_s3 + $0x13c0] sm:$0xf]  ;;  %v16469_v63 = vld [vmem:[%s27192_s3 + $0x1388] sm:$0xf] }
 0x46a   :  { %10431 = vmatpush.bf16.msrb.mxu2 %v14094_v34  ;;  %v16609_v34 = vld [vmem:[%s27192_s3 + $0x14a0] sm:$0xf]  ;;  %v14231_v48 = vld [vmem:[%s27192_s3 + $0x224] sm:$0xf0] }
 0x46b   :  { %10394 = vmatpush.bf16.msrb.mxu3 %v16274_v45  ;;  %v17578_v45 = vld [vmem:[%s27192_s3 + $0x14] sm:$0xf]  ;;  %v16610_v8 = vor.u32 %v18239_v26, %v16609_v34  ;;  %v14763_v34 = vld [vmem:[%s27192_s3 + $0x64c] sm:$0xf0]  ;;  %v16525_v26 = vld [vmem:[%s27192_s3 + $0x13f8] sm:$0xf] }
 0x46c   :  { %10357 = vmatpush.bf16.msra.mxu0 %v15546_v5  ;;  %v13982_v54 = vor.u32 %v17578_v45, %v13979_v10  ;;  %v17662_v5 = vld [vmem:[%s27192_s3 + $0x2b4] sm:$0xf] }
 0x46d   :  { %10370 = vmatpush.bf16.msrb.mxu1 %v15770_v39  ;;  %v10100_v39 = vadd.f32 %v10099_v56, %v6040_v20  ;;  %v14318_v13 = vor.u32 %v17662_v5, %v14315_v47  ;;  %v17648_v20 = vld [vmem:[%s27192_s3 + $0x244] sm:$0xf]  ;;  %v17823_v56 = vld [vmem:[%s27192_s3 + $0x7bc] sm:$0xf] }
 0x46e   :  { %10432 = vmatpush.bf16.msrb.mxu2 %v14066_v1  ;;  %v15071_v1 = vld [vmem:[%s27192_s3 + $0x8b4] sm:$0xf0] }
 0x46f   :  { %10395 = vmatpush.bf16.msrb.mxu3 %v16246_v49  ;;  %10358 = vmatmul.bf16.vlgmr.msra.gmra.mxu0 %v23061_v50  ;;  %v17669_v49 = vld [vmem:[%s27192_s3 + $0x2ec] sm:$0xf]  ;;  %v15074_v7 = vor.u32 %v17851_v52, %v15071_v1  ;;  %v10113_v42 = vadd.f32 %v25558_v29, %v10100_v39  ;;  %v17774_v29 = vld [vmem:[%s27192_s3 + $0x634] sm:$0xf]  ;;  %v10101_v52 = vpop.f32.mrf.mxu0  ;;  %v17767_v1 = vld [vmem:[%s27192_s3 + $0x5fc] sm:$0xf] }
 0x470   :  { %10402 = vmatpush.bf16.msrb.mxu0 %v16638_v3  ;;  %10371 = vmatmul.bf16.vlgmr.msrb.gmra.mxu1 %v23091_v60  ;;  %v15046_v3 = vor.u32 %v17844_v53, %v15043_v44  ;;  %v14766_v22 = vor.u32 %v17774_v29, %v14763_v34  ;;  %v14262_v53 = vor.u32 %v17648_v20, %v14259_v12  ;;  %v14707_v44 = vld [vmem:[%s27192_s3 + $0x5dc] sm:$0xf0]  ;;  %v18204_v39 = vld [vmem:[%s27192_s3 + $0x13a0] sm:$0xf0]  ;;  %v17634_v29 = vld [vmem:[%s27192_s3 + $0x1d4] sm:$0xf] }
 0x471   :  { %10421 = vmatpush.bf16.msra.mxu1 %v16694_v6  ;;  %v18225_v6 = vld [vmem:[%s27192_s3 + $0x1448] sm:$0xf0]  ;;  %v10126_v51 = vadd.f32 %v25444_v38, %v10113_v42  ;;  %v17830_v38 = vld [vmem:[%s27192_s3 + $0x7f4] sm:$0xf]  ;;  %v16470_v47 = vor.u32 %v18204_v39, %v16469_v63  ;;  %v14931_v42 = vld [vmem:[%s27192_s3 + $0x79c] sm:$0xf0] }
 0x472   :  { %10433 = vmatpush.bf16.msrb.mxu2 %v14038_v21  ;;  %v14346_v21 = vor.u32 %v17669_v49, %v14343_v37  ;;  %v16554_v41 = vor.u32 %v18225_v6, %v16553_v24  ;;  %v14738_v37 = vor.u32 %v17767_v1, %v14735_v58  ;;  %v17816_v6 = vld [vmem:[%s27192_s3 + $0x784] sm:$0xf]  ;;  %v14203_v34 = vld [vmem:[%s27192_s3 + $0x1ec] sm:$0xf0]  ;;  %v15743_v20 = vld [vmem:[%s27192_s3 + $0xdf4] sm:$0xf0] }
 0x473   :  { %10396 = vmatpush.bf16.msrb.mxu3 %v16218_v40  ;;  %v25778_v40 = vpop.f32.mrf.mxu1  ;;  %v25807_v10 = vadd.f32 %v25613_v30, %v10126_v51  ;;  %v14651_v58 = vld [vmem:[%s27192_s3 + $0x56c] sm:$0xf0]  ;;  %v17732_v12 = vld [vmem:[%s27192_s3 + $0x4e4] sm:$0xf]  ;;  %v18075_v63 = vld [vmem:[%s27192_s3 + $0xf9c] sm:$0xf] }
 0x474   :  { %10403 = vmatpush.bf16.msrb.mxu0 %v16610_v8  ;;  %v14987_v8 = vld [vmem:[%s27192_s3 + $0x80c] sm:$0xf0]  ;;  %v15967_v39 = vld [vmem:[%s27192_s3 + $0xfb4] sm:$0xf0] }
 0x475   :  { %10422 = vmatpush.bf16.msra.mxu1 %v16666_v19  ;;  %v14287_v19 = vld [vmem:[%s27192_s3 + $0x294] sm:$0xf0]  ;;  %v14990_v49 = vor.u32 %v17830_v38, %v14987_v8  ;;  %v14903_v38 = vld [vmem:[%s27192_s3 + $0x764] sm:$0xf0]  ;;  %v14206_v8 = vor.u32 %v17634_v29, %v14203_v34  ;;  %v18068_v29 = vld [vmem:[%s27192_s3 + $0xf64] sm:$0xf] }
 0x476   :  { %10434 = vmatpush.bf16.msrb.mxu2 %v14010_v25  ;;  %10397 = vmatmul.bf16.vlgmr.msrb.gmra.mxu3 %v23259_v46  ;;  %v18218_v25 = vld [vmem:[%s27192_s3 + $0x1410] sm:$0xf0]  ;;  %v14290_v30 = vor.u32 %v17655_v9, %v14287_v19  ;;  %v14934_v9 = vor.u32 %v17816_v6, %v14931_v42  ;;  %v17907_v19 = vld [vmem:[%s27192_s3 + $0xa5c] sm:$0xf]  ;;  %v15715_v6 = vld [vmem:[%s27192_s3 + $0xdbc] sm:$0xf0] }
 0x477   :  { %10441 = vmatpush.bf16.msra.mxu3 %v14402_v36  ;;  %v15015_v36 = vld [vmem:[%s27192_s3 + $0x844] sm:$0xf0]  ;;  %v15939_v34 = vld [vmem:[%s27192_s3 + $0xf7c] sm:$0xf0] }
 0x478   :  { %10404 = vmatpush.bf16.msrb.mxu0 %v16582_v16  ;;  %v15018_v45 = vor.u32 %v17837_v2, %v15015_v36  ;;  %v17760_v16 = vld [vmem:[%s27192_s3 + $0x5c4] sm:$0xf]  ;;  %v16441_v2 = vld [vmem:[%s27192_s3 + $0x1350] sm:$0xf]  ;;  %v18197_v36 = vld [vmem:[%s27192_s3 + $0x1368] sm:$0xf0] }
 0x479   :  { %10467 = vmatpush.bf16.msrb.mxu1 %v14850_v61  ;;  %v16526_v61 = vor.u32 %v18218_v25, %v16525_v26  ;;  %v14710_v5 = vor.u32 %v17760_v16, %v14707_v44  ;;  %v17739_v26 = vld [vmem:[%s27192_s3 + $0x51c] sm:$0xf]  ;;  %v14623_v25 = vld [vmem:[%s27192_s3 + $0x534] sm:$0xf0]  ;;  %v14875_v16 = vld [vmem:[%s27192_s3 + $0x72c] sm:$0xf0] }
 0x47a   :  { %10435 = vmatpush.bf16.msrb.mxu2 %v13982_v54  ;;  %v25833_v54 = vpop.f32.mrf.mxu3  ;;  %v14626_v1 = vor.u32 %v17739_v26, %v14623_v25  ;;  %v18005_v26 = vld [vmem:[%s27192_s3 + $0xd6c] sm:$0xf] }
 0x47b   :  { %10442 = vmatpush.bf16.msra.mxu3 %v14374_v14  ;;  %v18211_v14 = vld [vmem:[%s27192_s3 + $0x13d8] sm:$0xf0]  ;;  %v10166_v18 = vpop.f32.mrf.mxu1 }
 0x47c   :  { %10405 = vmatpush.bf16.msrb.mxu0 %v16554_v41  ;;  %v14595_v18 = vld [vmem:[%s27192_s3 + $0x4fc] sm:$0xf0] }
 0x47d   :  { %10468 = vmatpush.bf16.msrb.mxu1 %v14822_v62  ;;  %10436 = vmatmul.bf16.vlgmr.msrb.gmra.mxu2 %v22622_v55  ;;  %v14959_v62 = vld [vmem:[%s27192_s3 + $0x7d4] sm:$0xf0]  ;;  %v14598_v44 = vor.u32 %v17732_v12, %v14595_v18  ;;  %v17711_v12 = vld [vmem:[%s27192_s3 + $0x43c] sm:$0xf] }
 0x47e   :  { %10480 = vmatpush.bf16.msra.mxu2 %v15074_v7  ;;  %v16498_v7 = vor.u32 %v18211_v14, %v16497_v57  ;;  %v14962_v24 = vor.u32 %v17823_v56, %v14959_v62  ;;  %v18019_v57 = vld [vmem:[%s27192_s3 + $0xddc] sm:$0xf]  ;;  %v17802_v62 = vld [vmem:[%s27192_s3 + $0x714] sm:$0xf]  ;;  %v14511_v18 = vld [vmem:[%s27192_s3 + $0x454] sm:$0xf0] }
 0x47f   :  { %10443 = vmatpush.bf16.msra.mxu3 %v14346_v21  ;;  %v17641_v21 = vld [vmem:[%s27192_s3 + $0x20c] sm:$0xf]  ;;  %v14878_v42 = vor.u32 %v17802_v62, %v14875_v16  ;;  %v14514_v16 = vor.u32 %v17711_v12, %v14511_v18  ;;  %v15519_v12 = vld [vmem:[%s27192_s3 + $0xc34] sm:$0xf0] }
 0x480   :  { %10406 = vmatpush.bf16.msrb.mxu0 %v16526_v61  ;;  %16707 = vmatmul.msk.bf16.vlgmr.msra.gmra.mxu1 %vm9579_vm14, %v23590_v33  ;;  %v14234_v41 = vor.u32 %v17641_v21, %v14231_v48  ;;  %v17809_v61 = vld [vmem:[%s27192_s3 + $0x74c] sm:$0xf]  ;;  %v18012_v21 = vld [vmem:[%s27192_s3 + $0xda4] sm:$0xf] }
 0x481   :  { %10469 = vmatpush.bf16.msrb.mxu1 %v14794_v35  ;;  %v14679_v35 = vld [vmem:[%s27192_s3 + $0x5a4] sm:$0xf0] }
 0x482   :  { %10481 = vmatpush.bf16.msra.mxu2 %v15046_v3  ;;  %v17753_v3 = vld [vmem:[%s27192_s3 + $0x58c] sm:$0xf]  ;;  %v10192_v51 = vpop.f32.mrf.mxu3 }
 0x483   :  { %10444 = vmatpush.bf16.msra.mxu3 %v14318_v13  ;;  %v25882_v13 = vpop.f32.mrf.mxu2  ;;  %v14682_v52 = vor.u32 %v17753_v3, %v14679_v35  ;;  %v17893_v3 = vld [vmem:[%s27192_s3 + $0x9ec] sm:$0xf]  ;;  %v15239_v35 = vld [vmem:[%s27192_s3 + $0xa04] sm:$0xf0] }
 0x484   :  { %10407 = vmatpush.bf16.msrb.mxu0 %v16498_v7  ;;  %v15267_v7 = vld [vmem:[%s27192_s3 + $0xa3c] sm:$0xf0]  ;;  %v10151_v25 = vpop.f32.mrf.mxu0  ;;  %v15242_v51 = vor.u32 %v17893_v3, %v15239_v35 }
 0x485   :  { %10470 = vmatpush.bf16.msrb.mxu1 %v14766_v22  ;;  %v16442_v22 = vor.u32 %v18197_v36, %v16441_v2  ;;  %v15718_v2 = vor.u32 %v18012_v21, %v15715_v6  ;;  %v14483_v6 = vld [vmem:[%s27192_s3 + $0x41c] sm:$0xf0] }
 0x486   :  { %10482 = vmatpush.bf16.msra.mxu2 %v15018_v45  ;;  %v15295_v45 = vld [vmem:[%s27192_s3 + $0xa74] sm:$0xf0] }
 0x487   :  { %10445 = vmatpush.bf16.msra.mxu3 %v14290_v30  ;;  %v17746_v30 = vld [vmem:[%s27192_s3 + $0x554] sm:$0xf]  ;;  %v15298_v14 = vor.u32 %v17907_v19, %v15295_v45  ;;  %v14539_v45 = vld [vmem:[%s27192_s3 + $0x48c] sm:$0xf0] }
 0x488   :  { %10408 = vmatpush.bf16.msrb.mxu0 %v16470_v47  ;;  %v14654_v56 = vor.u32 %v17746_v30, %v14651_v58  ;;  %v14567_v47 = vld [vmem:[%s27192_s3 + $0x4c4] sm:$0xf0]  ;;  %v17718_v19 = vld [vmem:[%s27192_s3 + $0x474] sm:$0xf] }
 0x489   :  { %10471 = vmatpush.bf16.msrb.mxu1 %v14738_v37  ;;  %v17900_v37 = vld [vmem:[%s27192_s3 + $0xa24] sm:$0xf]  ;;  %v14542_v58 = vor.u32 %v17718_v19, %v14539_v45  ;;  %v15127_v19 = vld [vmem:[%s27192_s3 + $0x924] sm:$0xf0] }
 0x48a   :  { %10483 = vmatpush.bf16.msra.mxu2 %v14990_v49  ;;  %v14906_v49 = vor.u32 %v17809_v61, %v14903_v38  ;;  %v15211_v61 = vld [vmem:[%s27192_s3 + $0x9cc] sm:$0xf0]  ;;  %v15942_v38 = vor.u32 %v18068_v29, %v15939_v34  ;;  %v17984_v29 = vld [vmem:[%s27192_s3 + $0xcc4] sm:$0xf] }
 0x48b   :  { %10446 = vmatpush.bf16.msra.mxu3 %v14262_v53  ;;  %v15746_v53 = vor.u32 %v18019_v57, %v15743_v20  ;;  %v10231_v48 = vpop.f32.mrf.mxu2  ;;  %v15911_v57 = vld [vmem:[%s27192_s3 + $0xf44] sm:$0xf0]  ;;  %v15659_v20 = vld [vmem:[%s27192_s3 + $0xd4c] sm:$0xf0] }
 0x48c   :  { %10409 = vmatpush.bf16.msrb.mxu0 %v16442_v22  ;;  %v17886_v22 = vld [vmem:[%s27192_s3 + $0x9b4] sm:$0xf]  ;;  %v15631_v48 = vld [vmem:[%s27192_s3 + $0xd14] sm:$0xf0] }
 0x48d   :  { %10472 = vmatpush.bf16.msrb.mxu1 %v14710_v5  ;;  %v17725_v5 = vld [vmem:[%s27192_s3 + $0x4ac] sm:$0xf] }
 0x48e   :  { %10484 = vmatpush.bf16.msra.mxu2 %v14962_v24  ;;  %v15270_v24 = vor.u32 %v17900_v37, %v15267_v7  ;;  %v14570_v36 = vor.u32 %v17725_v5, %v14567_v47  ;;  %v15183_v37 = vld [vmem:[%s27192_s3 + $0x994] sm:$0xf0]  ;;  %v15155_v5 = vld [vmem:[%s27192_s3 + $0x95c] sm:$0xf0] }
 0x48f   :  { %10447 = vmatpush.bf16.msra.mxu3 %v14234_v41  ;;  %10410 = vmatmul.bf16.vlgmr.msrb.gmra.mxu0 %v23261_v0  ;;  %v15970_v41 = vor.u32 %v18075_v63, %v15967_v39  ;;  %v17991_v63 = vld [vmem:[%s27192_s3 + $0xcfc] sm:$0xf]  ;;  %v10153_v39 = vpop.f32.mrf.mxu0 }
 0x490   :  { %10454 = vmatpush.bf16.msra.mxu0 %v14626_v1  ;;  %v25988_v1 = vpop.f32.mrf.mxu1  ;;  %v15634_v35 = vor.u32 %v17991_v63, %v15631_v48  ;;  %v15547_v48 = vld [vmem:[%s27192_s3 + $0xc6c] sm:$0xf0] }
 0x491   :  { %10473 = vmatpush.bf16.msrb.mxu1 %v14682_v52  ;;  %v10152_v52 = vadd.f32 %v10151_v25, %v25807_v10  ;;  %v18061_v10 = vld [vmem:[%s27192_s3 + $0xf2c] sm:$0xf] }
 0x492   :  { %10485 = vmatpush.bf16.msra.mxu2 %v14934_v9  ;;  %v15687_v9 = vld [vmem:[%s27192_s3 + $0xd84] sm:$0xf0]  ;;  %v17697_v25 = vld [vmem:[%s27192_s3 + $0x3cc] sm:$0xf] }
 0x493   :  { %10448 = vmatpush.bf16.msra.mxu3 %v14206_v8  ;;  %v10165_v8 = vadd.f32 %v25778_v40, %v10152_v52  ;;  %v15690_v30 = vor.u32 %v18005_v26, %v15687_v9  ;;  %v15214_v40 = vor.u32 %v17886_v22, %v15211_v61  ;;  %v15603_v26 = vld [vmem:[%s27192_s3 + $0xcdc] sm:$0xf0]  ;;  %v17865_v9 = vld [vmem:[%s27192_s3 + $0x90c] sm:$0xf]  ;;  %v18040_v52 = vld [vmem:[%s27192_s3 + $0xe84] sm:$0xf] }
 0x494   :  { %10455 = vmatpush.bf16.msra.mxu0 %v14598_v44  ;;  %v15883_v44 = vld [vmem:[%s27192_s3 + $0xf0c] sm:$0xf0]  ;;  %v15606_v22 = vor.u32 %v17984_v29, %v15603_v26 }
 0x495   :  { %10474 = vmatpush.bf16.msrb.mxu1 %v14654_v56  ;;  %v10178_v7 = vadd.f32 %v25663_v15, %v10165_v8  ;;  %v15914_v56 = vor.u32 %v18061_v10, %v15911_v57  ;;  %v17977_v8 = vld [vmem:[%s27192_s3 + $0xc8c] sm:$0xf]  ;;  %v17690_v10 = vld [vmem:[%s27192_s3 + $0x394] sm:$0xf]  ;;  %v14427_v57 = vld [vmem:[%s27192_s3 + $0x3ac] sm:$0xf0] }
 0x496   :  { %10486 = vmatpush.bf16.msra.mxu2 %v14906_v49  ;;  %10449 = vmatmul.bf16.vlgmr.msra.gmra.mxu3 %v22624_v31  ;;  %v17879_v49 = vld [vmem:[%s27192_s3 + $0x97c] sm:$0xf]  ;;  %v15771_v29 = vld [vmem:[%s27192_s3 + $0xe2c] sm:$0xf0] }
 0x497   :  { %10493 = vmatpush.bf16.msrb.mxu3 %v15298_v14  ;;  %v17998_v14 = vld [vmem:[%s27192_s3 + $0xd34] sm:$0xf]  ;;  %v26026_v15 = vadd.f32 %v25833_v54, %v10178_v7  ;;  %v15186_v21 = vor.u32 %v17879_v49, %v15183_v37  ;;  %v17872_v54 = vld [vmem:[%s27192_s3 + $0x944] sm:$0xf]  ;;  %v18131_v37 = vld [vmem:[%s27192_s3 + $0x115c] sm:$0xf] }
 0x498   :  { %10475 = vmatmul.bf16.vlgmr.msrb.gmra.mxu1 %v22822_v27  ;;  %10456 = vmatpush.bf16.msra.mxu0 %v14570_v36  ;;  %v15662_v62 = vor.u32 %v17998_v14, %v15659_v20  ;;  %v15855_v36 = vld [vmem:[%s27192_s3 + $0xed4] sm:$0xf0]  ;;  %v15158_v34 = vor.u32 %v17872_v54, %v15155_v5  ;;  %v17858_v14 = vld [vmem:[%s27192_s3 + $0x8d4] sm:$0xf]  ;;  %v17963_v20 = vld [vmem:[%s27192_s3 + $0xc1c] sm:$0xf] }
 0x499   :  { %10519 = vmatpush.bf16.msra.mxu1 %v15746_v53  ;;  %v18054_v53 = vld [vmem:[%s27192_s3 + $0xef4] sm:$0xf]  ;;  %v26043_v3 = vpop.f32.mrf.mxu3  ;;  %v16191_v7 = vld [vmem:[%s27192_s3 + $0x1174] sm:$0xf0]  ;;  %v15522_v39 = vor.u32 %v17963_v20, %v15519_v12  ;;  %v17956_v5 = vld [vmem:[%s27192_s3 + $0xbe4] sm:$0xf] }
 0x49a   :  { %10487 = vmatpush.bf16.msra.mxu2 %v14878_v42  ;;  %v15886_v47 = vor.u32 %v18054_v53, %v15883_v44  ;;  %v10218_v42 = vpop.f32.mrf.mxu1  ;;  %v18033_v53 = vld [vmem:[%s27192_s3 + $0xe4c] sm:$0xf]  ;;  %v15799_v44 = vld [vmem:[%s27192_s3 + $0xe64] sm:$0xf0]  ;;  %v16639_v54 = vld [vmem:[%s27192_s3 + $0x14f4] sm:$0xf0] }
 0x49b   :  { %10494 = vmatpush.bf16.msrb.mxu3 %v15270_v24  ;;  %v17704_v24 = vld [vmem:[%s27192_s3 + $0x404] sm:$0xf]  ;;  %v15802_v42 = vor.u32 %v18033_v53, %v15799_v44  ;;  %v15435_v44 = vld [vmem:[%s27192_s3 + $0xb8c] sm:$0xf0] }
 0x49c   :  { %10457 = vmatpush.bf16.msra.mxu0 %v14542_v58  ;;  %v15130_v58 = vor.u32 %v17865_v9, %v15127_v19  ;;  %v18236_v9 = vld [vmem:[%s27192_s3 + $0x14a4] sm:$0xf] }
 0x49d   :  { %10520 = vmatpush.bf16.msra.mxu1 %v15718_v2  ;;  %10488 = vmatmul.bf16.vlgmr.msra.gmra.mxu2 %v22856_v28  ;;  %v18047_v2 = vld [vmem:[%s27192_s3 + $0xebc] sm:$0xf]  ;;  %v26178_v20 = vld [vmem:[%s27193_s4] sm:$0x7f] }
 0x49e   :  { %10532 = vmatpush.bf16.msrb.mxu2 %v15970_v41  ;;  %v14486_v41 = vor.u32 %v17704_v24, %v14483_v6  ;;  %v15858_v45 = vor.u32 %v18047_v2, %v15855_v36  ;;  %v18243_v24 = vld [vmem:[%s27192_s3 + $0x14dc] sm:$0xf]  ;;  %v16194_v6 = vor.u32 %v18131_v37, %v16191_v7  ;;  %v18026_v36 = vld [vmem:[%s27192_s3 + $0xe14] sm:$0xf]  ;;  %v6041_v12 = vperm.slane %v26178_v20, 4 }
 0x49f   :  { %10495 = vmatpush.bf16.msrb.mxu3 %v15242_v51  ;;  %v14455_v51 = vld [vmem:[%s27192_s3 + $0x3e4] sm:$0xf0] }
 0x4a0   :  { %10458 = vmatpush.bf16.msra.mxu0 %v14514_v16  ;;  %v14458_v61 = vor.u32 %v17697_v25, %v14455_v51  ;;  %v26099_v18 = vpop.f32.mrf.mxu2  ;;  %v14430_v16 = vor.u32 %v17690_v10, %v14427_v57  ;;  %v18257_v25 = vld [vmem:[%s27192_s3 + $0x154c] sm:$0xf]  ;;  %v16695_v51 = vld [vmem:[%s27192_s3 + $0x1564] sm:$0xf0]  ;;  %v18250_v10 = vld [vmem:[%s27192_s3 + $0x1514] sm:$0xf] }
 0x4a1   :  { %10521 = vmatpush.bf16.msra.mxu1 %v15690_v30  ;;  %v15575_v30 = vld [vmem:[%s27192_s3 + $0xca4] sm:$0xf0]  ;;  %v16667_v57 = vld [vmem:[%s27192_s3 + $0x152c] sm:$0xf0] }
 0x4a2   :  { %10533 = vmatpush.bf16.msrb.mxu2 %v15942_v38  ;;  %v15827_v38 = vld [vmem:[%s27192_s3 + $0xe9c] sm:$0xf0]  ;;  %v16583_v37 = vld [vmem:[%s27192_s3 + $0x1484] sm:$0xf0] }
 0x4a3   :  { %10496 = vmatpush.bf16.msrb.mxu3 %v15214_v40  ;;  %v15099_v40 = vld [vmem:[%s27192_s3 + $0x8ec] sm:$0xf0]  ;;  %v15830_v49 = vor.u32 %v18040_v52, %v15827_v38  ;;  %v17949_v52 = vld [vmem:[%s27192_s3 + $0xbac] sm:$0xf]  ;;  %v15774_v38 = vor.u32 %v18026_v36, %v15771_v29  ;;  %v17935_v36 = vld [vmem:[%s27192_s3 + $0xb3c] sm:$0xf] }
 0x4a4   :  { %10459 = vmatpush.bf16.msra.mxu0 %v14486_v41  ;;  %v15102_v63 = vor.u32 %v17858_v14, %v15099_v40  ;;  %v16163_v41 = vld [vmem:[%s27192_s3 + $0x113c] sm:$0xf0]  ;;  %v10203_v53 = vpop.f32.mrf.mxu0 }
 0x4a5   :  { %10522 = vmatpush.bf16.msra.mxu1 %v15662_v62  ;;  %v15578_v62 = vor.u32 %v17977_v8, %v15575_v30  ;;  %v18117_v8 = vld [vmem:[%s27192_s3 + $0x10ec] sm:$0xf]  ;;  %v16135_v30 = vld [vmem:[%s27192_s3 + $0x1104] sm:$0xf0] }
 0x4a6   :  { %10534 = vmatpush.bf16.msrb.mxu2 %v15914_v56  ;;  %v10244_v56 = vpop.f32.mrf.mxu3  ;;  %v16138_v7 = vor.u32 %v18117_v8, %v16135_v30 }
 0x4a7   :  { %10497 = vmatpush.bf16.msrb.mxu3 %v15186_v21  ;;  %v17970_v21 = vld [vmem:[%s27192_s3 + $0xc54] sm:$0xf]  ;;  %v14853_v56 = vld [vmem:[%s27192_s3 + $0x6e0] sm:$0xf] }
 0x4a8   :  { %10460 = vmatpush.bf16.msra.mxu0 %v14458_v61  ;;  %v15550_v2 = vor.u32 %v17970_v21, %v15547_v48  ;;  %v10283_v61 = vpop.f32.mrf.mxu2  ;;  %v10204_v21 = vadd.f32 %v10203_v53, %v26026_v15  ;;  %v16670_v48 = vor.u32 %v18250_v10, %v16667_v57  ;;  %v18096_v10 = vld [vmem:[%s27192_s3 + $0x1044] sm:$0xf]  ;;  %v16051_v57 = vld [vmem:[%s27192_s3 + $0x105c] sm:$0xf0]  ;;  %v17921_v53 = vld [vmem:[%s27192_s3 + $0xacc] sm:$0xf] }
 0x4a9   :  { %10523 = vmatpush.bf16.msra.mxu1 %v15634_v35  ;;  %v18124_v35 = vld [vmem:[%s27192_s3 + $0x1124] sm:$0xf] }
 0x4aa   :  { %10535 = vmatpush.bf16.msrb.mxu2 %v15886_v47  ;;  %v15491_v47 = vld [vmem:[%s27192_s3 + $0xbfc] sm:$0xf0]  ;;  %v16166_v19 = vor.u32 %v18124_v35, %v16163_v41  ;;  %v14825_v41 = vld [vmem:[%s27192_s3 + $0x6a8] sm:$0xf] }
 0x4ab   :  { %10498 = vmatpush.bf16.msrb.mxu3 %v15158_v34  ;;  %v16642_v34 = vor.u32 %v18243_v24, %v16639_v54  ;;  %v15494_v26 = vor.u32 %v17956_v5, %v15491_v47  ;;  %v18222_v54 = vld [vmem:[%s27192_s3 + $0x1434] sm:$0xf]  ;;  %v16555_v5 = vld [vmem:[%s27192_s3 + $0x144c] sm:$0xf0]  ;;  %v10217_v47 = vadd.f32 %v25988_v1, %v10204_v21  ;;  %v15407_v1 = vld [vmem:[%s27192_s3 + $0xb54] sm:$0xf0] }
 0x4ac   :  { %10461 = vmatpush.bf16.msra.mxu0 %v14430_v16  ;;  %v17942_v16 = vld [vmem:[%s27192_s3 + $0xb74] sm:$0xf]  ;;  %v10205_v30 = vpop.f32.mrf.mxu0  ;;  %v16023_v21 = vld [vmem:[%s27192_s3 + $0x1024] sm:$0xf0] }
 0x4ad   :  { %10524 = vmatpush.bf16.msra.mxu1 %v15606_v22  ;;  %v15463_v22 = vld [vmem:[%s27192_s3 + $0xbc4] sm:$0xf0]  ;;  %v10268_v15 = vpop.f32.mrf.mxu1 }
 0x4ae   :  { %10536 = vmatpush.bf16.msrb.mxu2 %v15858_v45  ;;  %v16611_v45 = vld [vmem:[%s27192_s3 + $0x14bc] sm:$0xf0]  ;;  %v15466_v40 = vor.u32 %v17949_v52, %v15463_v22  ;;  %v10269_v29 = vadd.f32 %v10268_v15, %v6041_v12  ;;  %v16527_v52 = vld [vmem:[%s27192_s3 + $0x1414] sm:$0xf0]  ;;  %v15410_v22 = vor.u32 %v17935_v36, %v15407_v1  ;;  %v18082_v36 = vld [vmem:[%s27192_s3 + $0xfd4] sm:$0xf] }
 0x4af   :  { %10499 = vmatpush.bf16.msrb.mxu3 %v15130_v58  ;;  %10462 = vmatmul.bf16.vlgmr.msra.gmra.mxu0 %v22813_v23  ;;  %v16698_v58 = vor.u32 %v18257_v25, %v16695_v51  ;;  %v16614_v14 = vor.u32 %v18236_v9, %v16611_v45  ;;  %v10230_v25 = vadd.f32 %v25882_v13, %v10217_v47  ;;  %v18215_v45 = vld [vmem:[%s27192_s3 + $0x13fc] sm:$0xf]  ;;  %v14797_v13 = vld [vmem:[%s27192_s3 + $0x670] sm:$0xf]  ;;  %v16499_v12 = vld [vmem:[%s27192_s3 + $0x13dc] sm:$0xf0] }
 0x4b0   :  { %10506 = vmatpush.bf16.msrb.mxu0 %v15522_v39  ;;  %v16107_v39 = vld [vmem:[%s27192_s3 + $0x10cc] sm:$0xf0]  ;;  %v16558_v51 = vor.u32 %v18222_v54, %v16555_v5  ;;  %v16471_v54 = vld [vmem:[%s27192_s3 + $0x13a4] sm:$0xf0]  ;;  %v14741_v5 = vld [vmem:[%s27192_s3 + $0x600] sm:$0xf] }
 0x4b1   :  { %10525 = vmatpush.bf16.msra.mxu1 %v15578_v62  ;;  %v17799_v62 = vld [vmem:[%s27192_s3 + $0x6f8] sm:$0xf0]  ;;  %v10243_v8 = vadd.f32 %v26043_v3, %v10230_v25  ;;  %v18208_v3 = vld [vmem:[%s27192_s3 + $0x13c4] sm:$0xf]  ;;  %v14181_v25 = vld [vmem:[%s27192_s3 + $0x1a0] sm:$0xf] }
 0x4b2   :  { %10537 = vmatpush.bf16.msrb.mxu2 %v15830_v49  ;;  %v18229_v49 = vld [vmem:[%s27192_s3 + $0x146c] sm:$0xf]  ;;  %v18187_v1 = vld [vmem:[%s27192_s3 + $0x131c] sm:$0xf]  ;;  %v14713_v30 = vld [vmem:[%s27192_s3 + $0x5c8] sm:$0xf] }
 0x4b3   :  { %10500 = vmatpush.bf16.msrb.mxu3 %v15102_v63  ;;  %v18110_v63 = vld [vmem:[%s27192_s3 + $0x10b4] sm:$0xf]  ;;  %v16586_v24 = vor.u32 %v18229_v49, %v16583_v37 }
 0x4b4   :  { %10507 = vmatpush.bf16.msrb.mxu0 %v15494_v26  ;;  %v16110_v35 = vor.u32 %v18110_v63, %v16107_v39  ;;  %v16079_v26 = vld [vmem:[%s27192_s3 + $0x1094] sm:$0xf0]  ;;  %v15351_v63 = vld [vmem:[%s27192_s3 + $0xae4] sm:$0xf0]  ;;  %v18089_v39 = vld [vmem:[%s27192_s3 + $0x100c] sm:$0xf] }
 0x4b5   :  { %10526 = vmatpush.bf16.msra.mxu1 %v15550_v2  ;;  %v17792_v2 = vld [vmem:[%s27192_s3 + $0x6c0] sm:$0xf0]  ;;  %v10270_v49 = vpop.f32.mrf.mxu1  ;;  %v15354_v47 = vor.u32 %v17921_v53, %v15351_v63  ;;  %v16026_v15 = vor.u32 %v18089_v39, %v16023_v21  ;;  %v17757_v53 = vld [vmem:[%s27192_s3 + $0x5a8] sm:$0xf0]  ;;  %v14601_v63 = vld [vmem:[%s27192_s3 + $0x4e8] sm:$0xf] }
 0x4b6   :  { %10538 = vmatpush.bf16.msrb.mxu2 %v15802_v42  ;;  %10501 = vmatmul.bf16.vlgmr.msrb.gmra.mxu3 %v22858_v17  ;;  %v15438_v42 = vor.u32 %v17942_v16, %v15435_v44  ;;  %v14826_v9 = vor.u32 %v17792_v2, %v14825_v41  ;;  %v17778_v16 = vld [vmem:[%s27192_s3 + $0x650] sm:$0xf0]  ;;  %v15323_v41 = vld [vmem:[%s27192_s3 + $0xaac] sm:$0xf0]  ;;  %v10255_v2 = vpop.f32.mrf.mxu0  ;;  %v17736_v21 = vld [vmem:[%s27192_s3 + $0x500] sm:$0xf0] }
 0x4b7   :  { %10545 = vmatpush.bf16.msra.mxu3 %v16194_v6  ;;  %v14854_v6 = vor.u32 %v17799_v62, %v14853_v56  ;;  %v16054_v56 = vor.u32 %v18096_v10, %v16051_v57  ;;  %v14769_v62 = vld [vmem:[%s27192_s3 + $0x638] sm:$0xf]  ;;  %v14629_v10 = vld [vmem:[%s27192_s3 + $0x520] sm:$0xf]  ;;  %v17743_v57 = vld [vmem:[%s27192_s3 + $0x538] sm:$0xf0] }
 0x4b8   :  { %10527 = vmatmul.bf16.vlgmr.msra.gmra.mxu1 %v23061_v50  ;;  %10508 = vmatpush.bf16.msrb.mxu0 %v15466_v40 }
 0x4b9   :  { %10571 = vmatpush.bf16.msrb.mxu1 %v16642_v34  ;;  %v18103_v34 = vld [vmem:[%s27192_s3 + $0x107c] sm:$0xf]  ;;  %v10294_v37 = vpop.f32.mrf.mxu3 }
 0x4ba   :  { %10539 = vmatpush.bf16.msrb.mxu2 %v15774_v38  ;;  %v16082_v61 = vor.u32 %v18103_v34, %v16079_v26  ;;  %v17928_v38 = vld [vmem:[%s27192_s3 + $0xb04] sm:$0xf]  ;;  %v26313_v34 = vadd.f32 %v10255_v2, %v10243_v8  ;;  %v16415_v26 = vld [vmem:[%s27192_s3 + $0x1334] sm:$0xf0]  ;;  %v14573_v2 = vld [vmem:[%s27192_s3 + $0x4b0] sm:$0xf] }
 0x4bb   :  { %10546 = vmatpush.bf16.msra.mxu3 %v16166_v19  ;;  %v10282_v19 = vadd.f32 %v26099_v18, %v10269_v29  ;;  %v17785_v18 = vld [vmem:[%s27192_s3 + $0x688] sm:$0xf0]  ;;  %v15995_v29 = vld [vmem:[%s27192_s3 + $0xfec] sm:$0xf0] }
 0x4bc   :  { %10509 = vmatpush.bf16.msrb.mxu0 %v15438_v42  ;;  %v14798_v40 = vor.u32 %v17785_v18, %v14797_v13  ;;  %v17771_v42 = vld [vmem:[%s27192_s3 + $0x618] sm:$0xf0]  ;;  %v18194_v13 = vld [vmem:[%s27192_s3 + $0x1354] sm:$0xf]  ;;  %v16443_v18 = vld [vmem:[%s27192_s3 + $0x136c] sm:$0xf0] }
 0x4bd   :  { %10572 = vmatpush.bf16.msrb.mxu1 %v16614_v14  ;;  %10540 = vmatmul.bf16.vlgmr.msrb.gmra.mxu2 %v23091_v60  ;;  %v16530_v14 = vor.u32 %v18215_v45, %v16527_v52  ;;  %v26275_v44 = vadd.f32 %v10294_v37, %v10282_v19  ;;  %v14742_v45 = vor.u32 %v17771_v42, %v14741_v5  ;;  %v17617_v5 = vld [vmem:[%s27192_s3 + $0x148] sm:$0xf0]  ;;  %vm10769_vm2 = vcmp.gt.f32.partialorder %v26313_v34, 0.0 }
 0x4be   :  { %10590 = vmatpush.bf16.msra.mxu2 %v16698_v58  ;;  %v15379_v58 = vld [vmem:[%s27192_s3 + $0xb1c] sm:$0xf0]  ;;  %v16446_v49 = vor.u32 %v18194_v13, %v16443_v18  ;;  %v14602_v42 = vor.u32 %v17736_v21, %v14601_v63  ;;  %v14545_v13 = vld [vmem:[%s27192_s3 + $0x478] sm:$0xf]  ;;  %v17722_v18 = vld [vmem:[%s27192_s3 + $0x490] sm:$0xf0] }
 0x4bf   :  { %10547 = vmatpush.bf16.msra.mxu3 %v16138_v7  ;;  %v15382_v7 = vor.u32 %v17928_v38, %v15379_v58  ;;  %v16418_v38 = vor.u32 %v18187_v1, %v16415_v26  ;;  %v17764_v58 = vld [vmem:[%s27192_s3 + $0x5e0] sm:$0xf0]  ;;  %v15749_v1 = vld [vmem:[%s27192_s3 + $0xde0] sm:$0xf]  ;;  %v18023_v26 = vld [vmem:[%s27192_s3 + $0xdf8] sm:$0xf0] }
 0x4c0   :  { %10510 = vmatpush.bf16.msrb.mxu0 %v15410_v22  ;;  %v14714_v37 = vor.u32 %v17764_v58, %v14713_v30  ;;  %v15721_v58 = vld [vmem:[%s27192_s3 + $0xda8] sm:$0xf]  ;;  %v18152_v21 = vld [vmem:[%s27192_s3 + $0x1204] sm:$0xf] }
 0x4c1   :  { %10573 = vmatpush.bf16.msrb.mxu1 %v16586_v24  ;;  %v14770_v24 = vor.u32 %v17778_v16, %v14769_v62  ;;  %v10296_v52 = vpop.f32.mrf.mxu3  ;;  %v14685_v16 = vld [vmem:[%s27192_s3 + $0x590] sm:$0xf] }
 0x4c2   :  { %10591 = vmatpush.bf16.msra.mxu2 %v16670_v48  ;;  %v16502_v48 = vor.u32 %v18208_v3, %v16499_v12  ;;  %v14153_v3 = vld [vmem:[%s27192_s3 + $0x168] sm:$0xf]  ;;  %v17624_v12 = vld [vmem:[%s27192_s3 + $0x180] sm:$0xf0] }
 0x4c3   :  { %10548 = vmatpush.bf16.msra.mxu3 %v16110_v35  ;;  %v17914_v35 = vld [vmem:[%s27192_s3 + $0xa94] sm:$0xf]  ;;  %v14154_v39 = vor.u32 %v17624_v12, %v14153_v3  ;;  %v14069_v3 = vld [vmem:[%s27192_s3 + $0xc0] sm:$0xf]  ;;  %v17603_v12 = vld [vmem:[%s27192_s3 + $0xd8] sm:$0xf0] }
 0x4c4   :  { %10511 = vmatpush.bf16.msrb.mxu0 %v15382_v7  ;;  %v15326_v22 = vor.u32 %v17914_v35, %v15323_v41  ;;  %v10257_v7 = vpop.f32.mrf.mxu0  ;;  %v17750_v41 = vld [vmem:[%s27192_s3 + $0x570] sm:$0xf0]  ;;  %v14070_v63 = vor.u32 %v17603_v12, %v14069_v3  ;;  %v17687_v3 = vld [vmem:[%s27192_s3 + $0x378] sm:$0xf0]  ;;  %v15077_v12 = vld [vmem:[%s27192_s3 + $0x8a0] sm:$0xf] }
 0x4c5   :  { %10574 = vmatpush.bf16.msrb.mxu1 %v16558_v51  ;;  %v17631_v51 = vld [vmem:[%s27192_s3 + $0x1b8] sm:$0xf0] }
 0x4c6   :  { %10636 = vmatpush.bf16.msrb.mxu2 %v14854_v6  ;;  %v18201_v6 = vld [vmem:[%s27192_s3 + $0x138c] sm:$0xf]  ;;  %v14182_v8 = vor.u32 %v17631_v51, %v14181_v25  ;;  %v18166_v25 = vld [vmem:[%s27192_s3 + $0x1274] sm:$0xf]  ;;  %v16331_v51 = vld [vmem:[%s27192_s3 + $0x128c] sm:$0xf0] }
 0x4c7   :  { %10549 = vmatpush.bf16.msra.mxu3 %v16082_v61  ;;  %v16474_v19 = vor.u32 %v18201_v6, %v16471_v54  ;;  %v15998_v61 = vor.u32 %v18082_v36, %v15995_v29  ;;  %v14125_v54 = vld [vmem:[%s27192_s3 + $0x130] sm:$0xf]  ;;  %v17729_v36 = vld [vmem:[%s27192_s3 + $0x4c8] sm:$0xf0] }
 0x4c8   :  { %10512 = vmatpush.bf16.msrb.mxu0 %v15354_v47  ;;  %v14686_v47 = vor.u32 %v17757_v53, %v14685_v16  ;;  %v14126_v29 = vor.u32 %v17617_v5, %v14125_v54 }
 0x4c9   :  { %10575 = vmatpush.bf16.msrb.mxu1 %v16530_v14  ;;  %v18180_v14 = vld [vmem:[%s27192_s3 + $0x12e4] sm:$0xf] }
 0x4ca   :  { %10637 = vmatpush.bf16.msrb.mxu2 %v14826_v9  ;;  %v26324_v9 = vpop.f32.mrf.mxu2 }
 0x4cb   :  { %10550 = vmatpush.bf16.msra.mxu3 %v16054_v56  ;;  %v14630_v56 = vor.u32 %v17743_v57, %v14629_v10  ;;  %v18016_v10 = vld [vmem:[%s27192_s3 + $0xdc0] sm:$0xf0]  ;;  %v18159_v57 = vld [vmem:[%s27192_s3 + $0x123c] sm:$0xf] }
 0x4cc   :  { %10513 = vmatpush.bf16.msrb.mxu0 %v15326_v22  ;;  %v14574_v22 = vor.u32 %v17729_v36, %v14573_v2  ;;  %v15722_v7 = vor.u32 %v18016_v10, %v15721_v58  ;;  %v18002_v36 = vld [vmem:[%s27192_s3 + $0xd50] sm:$0xf0]  ;;  %v16219_v58 = vld [vmem:[%s27192_s3 + $0x11ac] sm:$0xf0]  ;;  %v13985_v10 = vld [vmem:[%s27192_s3 + $0x18] sm:$0xf] }
 0x4cd   :  { %10576 = vmatpush.bf16.msrb.mxu1 %v16502_v48  ;;  %16708 = vmatmul.msk.bf16.vlgmr.msra.gmra.mxu2 %vm9579_vm14, %v23590_v33  ;;  %v18173_v48 = vld [vmem:[%s27192_s3 + $0x12ac] sm:$0xf] }
 0x4ce   :  { %10638 = vmatpush.bf16.msrb.mxu2 %v14798_v40  ;;  %v16387_v40 = vld [vmem:[%s27192_s3 + $0x12fc] sm:$0xf0] }
 0x4cf   :  { %10551 = vmatpush.bf16.msra.mxu3 %v16026_v15  ;;  %v16390_v62 = vor.u32 %v18180_v14, %v16387_v40  ;;  %10514 = vmatmul.bf16.vlgmr.msrb.gmra.mxu0 %v23057_v43  ;;  %v14657_v15 = vld [vmem:[%s27192_s3 + $0x558] sm:$0xf]  ;;  %v10307_v14 = vpop.f32.mrf.mxu0 }
 0x4d0   :  { %10558 = vmatpush.bf16.msra.mxu0 %v16418_v38  ;;  %v14658_v52 = vor.u32 %v17750_v41, %v14657_v15  ;;  %v10320_v38 = vpop.f32.mrf.mxu1  ;;  %v16303_v40 = vld [vmem:[%s27192_s3 + $0x1254] sm:$0xf0]  ;;  %v17708_v15 = vld [vmem:[%s27192_s3 + $0x420] sm:$0xf0] }
 0x4d1   :  { %10577 = vmatpush.bf16.msrb.mxu1 %v16474_v19  ;;  %v14097_v19 = vld [vmem:[%s27192_s3 + $0xf8] sm:$0xf]  ;;  %v16306_v53 = vor.u32 %v18159_v57, %v16303_v40  ;;  %v17582_v57 = vld [vmem:[%s27192_s3 + $0x30] sm:$0xf0] }
 0x4d2   :  { %10639 = vmatpush.bf16.msrb.mxu2 %v14770_v24  ;;  %v16359_v24 = vld [vmem:[%s27192_s3 + $0x12c4] sm:$0xf0]  ;;  %v10335_v6 = vpop.f32.mrf.mxu2 }
 0x4d3   :  { %10552 = vmatpush.bf16.msra.mxu3 %v15998_v61  ;;  %v16362_v35 = vor.u32 %v18173_v48, %v16359_v24  ;;  %v15750_v61 = vor.u32 %v18023_v26, %v15749_v1  ;;  %v16275_v48 = vld [vmem:[%s27192_s3 + $0x121c] sm:$0xf0]  ;;  %v14041_v24 = vld [vmem:[%s27192_s3 + $0x88] sm:$0xf]  ;;  %v17596_v6 = vld [vmem:[%s27192_s3 + $0xa0] sm:$0xf0] }
 0x4d4   :  { %10559 = vmatpush.bf16.msra.mxu0 %v16390_v62  ;;  %v17715_v62 = vld [vmem:[%s27192_s3 + $0x458] sm:$0xf0]  ;;  %v16278_v41 = vor.u32 %v18152_v21, %v16275_v48  ;;  %v14042_v2 = vor.u32 %v17596_v6, %v14041_v24  ;;  %v15609_v21 = vld [vmem:[%s27192_s3 + $0xcc8] sm:$0xf]  ;;  %v17988_v48 = vld [vmem:[%s27192_s3 + $0xce0] sm:$0xf0] }
 0x4d5   :  { %10578 = vmatpush.bf16.msrb.mxu1 %v16446_v49  ;;  %v10308_v49 = vadd.f32 %v10307_v14, %v26275_v44  ;;  %v15693_v44 = vld [vmem:[%s27192_s3 + $0xd70] sm:$0xf]  ;;  %v14405_v14 = vld [vmem:[%s27192_s3 + $0x360] sm:$0xf]  ;;  %v17967_v6 = vld [vmem:[%s27192_s3 + $0xc38] sm:$0xf0] }
 0x4d6   :  { %10640 = vmatpush.bf16.msrb.mxu2 %v14742_v45  ;;  %10553 = vmatmul.bf16.vlgmr.msra.gmra.mxu3 %v23094_v11  ;;  %v17610_v45 = vld [vmem:[%s27192_s3 + $0x110] sm:$0xf0]  ;;  %v15525_v24 = vld [vmem:[%s27192_s3 + $0xc20] sm:$0xf] }
 0x4d7   :  { %10597 = vmatpush.bf16.msrb.mxu3 %v14182_v8  ;;  %v16334_v8 = vor.u32 %v18166_v25, %v16331_v51  ;;  %v14098_v30 = vor.u32 %v17610_v45, %v14097_v19  ;;  %v10321_v16 = vadd.f32 %v10320_v38, %v10308_v49  ;;  %v10309_v26 = vpop.f32.mrf.mxu0  ;;  %v16247_v25 = vld [vmem:[%s27192_s3 + $0x11e4] sm:$0xf0]  ;;  %v14013_v51 = vld [vmem:[%s27192_s3 + $0x50] sm:$0xf]  ;;  %v17589_v19 = vld [vmem:[%s27192_s3 + $0x68] sm:$0xf0] }
 0x4d8   :  { %10579 = vmatmul.bf16.vlgmr.msrb.gmra.mxu1 %v23261_v0  ;;  %10560 = vmatpush.bf16.msra.mxu0 %v16362_v35  ;;  %v14014_v38 = vor.u32 %v17589_v19, %v14013_v51  ;;  %v17855_v49 = vld [vmem:[%s27192_s3 + $0x8b8] sm:$0xf0]  ;;  %v14349_v51 = vld [vmem:[%s27192_s3 + $0x2f0] sm:$0xf]  ;;  %v17673_v19 = vld [vmem:[%s27192_s3 + $0x308] sm:$0xf0] }
 0x4d9   :  { %10623 = vmatpush.bf16.msra.mxu1 %v14630_v56  ;;  %v14517_v56 = vld [vmem:[%s27192_s3 + $0x440] sm:$0xf]  ;;  %v10334_v54 = vadd.f32 %v26324_v9, %v10321_v16  ;;  %v10346_v35 = vpop.f32.mrf.mxu3  ;;  %v15665_v9 = vld [vmem:[%s27192_s3 + $0xd38] sm:$0xf]  ;;  %v13986_v16 = vor.u32 %v17582_v57, %v13985_v10  ;;  %v18247_v10 = vld [vmem:[%s27192_s3 + $0x14f8] sm:$0xf0] }
 0x4da   :  { %10641 = vmatpush.bf16.msrb.mxu2 %v14714_v37  ;;  %v14546_v37 = vor.u32 %v17722_v18, %v14545_v13  ;;  %v14518_v5 = vor.u32 %v17715_v62, %v14517_v56  ;;  %v15637_v13 = vld [vmem:[%s27192_s3 + $0xd00] sm:$0xf]  ;;  %v14321_v57 = vld [vmem:[%s27192_s3 + $0x2b8] sm:$0xf] }
 0x4db   :  { %10598 = vmatpush.bf16.msrb.mxu3 %v14154_v39  ;;  %v18009_v39 = vld [vmem:[%s27192_s3 + $0xd88] sm:$0xf0]  ;;  %v26481_v1 = vadd.f32 %v10346_v35, %v10334_v54  ;;  %v14377_v54 = vld [vmem:[%s27192_s3 + $0x328] sm:$0xf]  ;;  %v15526_v35 = vor.u32 %v17967_v6, %v15525_v24  ;;  %v17659_v24 = vld [vmem:[%s27192_s3 + $0x298] sm:$0xf0] }
 0x4dc   :  { %10561 = vmatpush.bf16.msra.mxu0 %v16334_v8  ;;  %v17995_v8 = vld [vmem:[%s27192_s3 + $0xd18] sm:$0xf0]  ;;  %v14965_v6 = vld [vmem:[%s27192_s3 + $0x7c0] sm:$0xf] }
 0x4dd   :  { %10624 = vmatpush.bf16.msra.mxu1 %v14602_v42  ;;  %v10322_v42 = vpop.f32.mrf.mxu1 }
 0x4de   :  { %10642 = vmatpush.bf16.msrb.mxu2 %v14686_v47  ;;  %v15694_v47 = vor.u32 %v18009_v39, %v15693_v44  ;;  %v14406_v44 = vor.u32 %v17687_v3, %v14405_v14  ;;  %v15078_v39 = vor.u32 %v17855_v49, %v15077_v12  ;;  %v15610_v42 = vor.u32 %v17988_v48, %v15609_v21  ;;  %v17666_v14 = vld [vmem:[%s27192_s3 + $0x2d0] sm:$0xf0]  ;;  %v14993_v3 = vld [vmem:[%s27192_s3 + $0x7f8] sm:$0xf]  ;;  %v14293_v21 = vld [vmem:[%s27192_s3 + $0x280] sm:$0xf] }
 0x4df   :  { %10599 = vmatpush.bf16.msrb.mxu3 %v14126_v29  ;;  %v18145_v29 = vld [vmem:[%s27192_s3 + $0x11cc] sm:$0xf]  ;;  %v17834_v12 = vld [vmem:[%s27192_s3 + $0x810] sm:$0xf0] }
 0x4e0   :  { %10562 = vmatpush.bf16.msra.mxu0 %v16306_v53  ;;  %v16250_v18 = vor.u32 %v18145_v29, %v16247_v25  ;;  %v26519_v40 = vpop.f32.mrf.mxu2  ;;  %v14433_v53 = vld [vmem:[%s27192_s3 + $0x398] sm:$0xf]  ;;  %v17960_v25 = vld [vmem:[%s27192_s3 + $0xc00] sm:$0xf0] }
 0x4e1   :  { %10625 = vmatpush.bf16.msra.mxu1 %v14574_v22  ;;  %v14461_v22 = vld [vmem:[%s27192_s3 + $0x3d0] sm:$0xf]  ;;  %v10348_v56 = vpop.f32.mrf.mxu3 }
 0x4e2   :  { %10643 = vmatpush.bf16.msrb.mxu2 %v14658_v52  ;;  %v15666_v52 = vor.u32 %v18002_v36, %v15665_v9  ;;  %v17981_v9 = vld [vmem:[%s27192_s3 + $0xca8] sm:$0xf0]  ;;  %v15497_v36 = vld [vmem:[%s27192_s3 + $0xbe8] sm:$0xf] }
 0x4e3   :  { %10600 = vmatpush.bf16.msrb.mxu3 %v14098_v30  ;;  %v18138_v30 = vld [vmem:[%s27192_s3 + $0x1194] sm:$0xf] }
 0x4e4   :  { %10563 = vmatpush.bf16.msra.mxu0 %v16278_v41  ;;  %v16222_v62 = vor.u32 %v18138_v30, %v16219_v58  ;;  %v16645_v58 = vld [vmem:[%s27192_s3 + $0x14e0] sm:$0xf] }
 0x4e5   :  { %10644 = vmatmul.bf16.vlgmr.msrb.gmra.mxu2 %v22822_v27  ;;  %10626 = vmatpush.bf16.msra.mxu1 %v14546_v37  ;;  %v14489_v27 = vld [vmem:[%s27192_s3 + $0x408] sm:$0xf]  ;;  %v16646_v56 = vor.u32 %v18247_v10, %v16645_v58  ;;  %v14909_v58 = vld [vmem:[%s27192_s3 + $0x750] sm:$0xf]  ;;  %v17813_v10 = vld [vmem:[%s27192_s3 + $0x768] sm:$0xf0] }
 0x4e6   :  { %10688 = vmatpush.bf16.msra.mxu2 %v15750_v61  ;;  %v14490_v45 = vor.u32 %v17708_v15, %v14489_v27  ;;  %v17701_v61 = vld [vmem:[%s27192_s3 + $0x3e8] sm:$0xf0]  ;;  %v17848_v27 = vld [vmem:[%s27192_s3 + $0x880] sm:$0xf0] }
 0x4e7   :  { %10601 = vmatpush.bf16.msrb.mxu3 %v14070_v63  ;;  %v14462_v37 = vor.u32 %v17701_v61, %v14461_v22  ;;  %v17694_v63 = vld [vmem:[%s27192_s3 + $0x3b0] sm:$0xf0]  ;;  %v15553_v61 = vld [vmem:[%s27192_s3 + $0xc58] sm:$0xf] }
 0x4e8   :  { %10564 = vmatpush.bf16.msra.mxu0 %v16250_v18  ;;  %v14434_v15 = vor.u32 %v17694_v63, %v14433_v53  ;;  %v10387_v29 = vpop.f32.mrf.mxu2  ;;  %v14350_v18 = vor.u32 %v17673_v19, %v14349_v51  ;;  %v14322_v53 = vor.u32 %v17666_v14, %v14321_v57  ;;  %v14994_v63 = vor.u32 %v17834_v12, %v14993_v3  ;;  %v15357_v3 = vld [vmem:[%s27192_s3 + $0xad0] sm:$0xf]  ;;  %v17925_v12 = vld [vmem:[%s27192_s3 + $0xae8] sm:$0xf0] }
 0x4e9   :  { %10627 = vmatpush.bf16.msra.mxu1 %v14518_v5  ;;  %v17680_v5 = vld [vmem:[%s27192_s3 + $0x340] sm:$0xf0] }
 0x4ea   :  { %10689 = vmatpush.bf16.msra.mxu2 %v15722_v7  ;;  %v15638_v7 = vor.u32 %v17995_v8, %v15637_v13  ;;  %v14378_v41 = vor.u32 %v17680_v5, %v14377_v54  ;;  %v15498_v13 = vor.u32 %v17960_v25, %v15497_v36  ;;  %v17953_v8 = vld [vmem:[%s27192_s3 + $0xbc8] sm:$0xf0]  ;;  %v17827_v54 = vld [vmem:[%s27192_s3 + $0x7d8] sm:$0xf0]  ;;  %v17652_v29 = vld [vmem:[%s27192_s3 + $0x260] sm:$0xf0] }
 0x4eb   :  { %10602 = vmatpush.bf16.msrb.mxu3 %v14042_v2  ;;  %v15581_v2 = vld [vmem:[%s27192_s3 + $0xc90] sm:$0xf]  ;;  %v17820_v25 = vld [vmem:[%s27192_s3 + $0x7a0] sm:$0xf0] }
 0x4ec   :  { %10565 = vmatpush.bf16.msra.mxu0 %v16222_v62  ;;  %v15582_v22 = vor.u32 %v17981_v9, %v15581_v2  ;;  %v17946_v62 = vld [vmem:[%s27192_s3 + $0xb90] sm:$0xf0]  ;;  %v18233_v2 = vld [vmem:[%s27192_s3 + $0x1488] sm:$0xf0]  ;;  %v14265_v9 = vld [vmem:[%s27192_s3 + $0x248] sm:$0xf] }
 0x4ed   :  { %10628 = vmatpush.bf16.msra.mxu1 %v14490_v45  ;;  %v15021_v45 = vld [vmem:[%s27192_s3 + $0x830] sm:$0xf] }
 0x4ee   :  { %10690 = vmatpush.bf16.msra.mxu2 %v15694_v47  ;;  %v15049_v47 = vld [vmem:[%s27192_s3 + $0x868] sm:$0xf] }
 0x4ef   :  { %10603 = vmatpush.bf16.msrb.mxu3 %v14014_v38  ;;  %v15050_v26 = vor.u32 %v17848_v27, %v15049_v47  ;;  %10566 = vmatmul.bf16.vlgmr.msra.gmra.mxu0 %v23259_v46  ;;  %v15469_v38 = vld [vmem:[%s27192_s3 + $0xbb0] sm:$0xf] }
 0x4f0   :  { %10610 = vmatpush.bf16.msrb.mxu0 %v14406_v44  ;;  %v16617_v44 = vld [vmem:[%s27192_s3 + $0x14a8] sm:$0xf] }
 0x4f1   :  { %10629 = vmatpush.bf16.msra.mxu1 %v14462_v37  ;;  %v10372_v37 = vpop.f32.mrf.mxu1 }
 0x4f2   :  { %10691 = vmatpush.bf16.msra.mxu2 %v15666_v52  ;;  %v17841_v52 = vld [vmem:[%s27192_s3 + $0x848] sm:$0xf0] }
 0x4f3   :  { %10604 = vmatpush.bf16.msrb.mxu3 %v13986_v16  ;;  %v15022_v30 = vor.u32 %v17841_v52, %v15021_v45  ;;  %v10359_v16 = vpop.f32.mrf.mxu0  ;;  %v17932_v52 = vld [vmem:[%s27192_s3 + $0xb20] sm:$0xf0] }
 0x4f4   :  { %10611 = vmatpush.bf16.msrb.mxu0 %v14378_v41  ;;  %v10360_v48 = vadd.f32 %v10359_v16, %v26481_v1  ;;  %v15413_v1 = vld [vmem:[%s27192_s3 + $0xb40] sm:$0xf]  ;;  %v16589_v41 = vld [vmem:[%s27192_s3 + $0x1470] sm:$0xf] }
 0x4f5   :  { %10630 = vmatpush.bf16.msra.mxu1 %v14434_v15  ;;  %v17939_v15 = vld [vmem:[%s27192_s3 + $0xb58] sm:$0xf0] }
 0x4f6   :  { %10692 = vmatpush.bf16.msra.mxu2 %v15638_v7  ;;  %10605 = vmatmul.bf16.vlgmr.msrb.gmra.mxu3 %v22622_v55  ;;  %v17974_v55 = vld [vmem:[%s27192_s3 + $0xc70] sm:$0xf0]  ;;  %v15470_v7 = vor.u32 %v17953_v8, %v15469_v38  ;;  %v10373_v5 = vadd.f32 %v10372_v37, %v10360_v48  ;;  %v15414_v45 = vor.u32 %v17939_v15, %v15413_v1  ;;  %v14237_v8 = vld [vmem:[%s27192_s3 + $0x210] sm:$0xf]  ;;  %v18079_v48 = vld [vmem:[%s27192_s3 + $0xfb8] sm:$0xf0] }
 0x4f7   :  { %10649 = vmatpush.bf16.msra.mxu3 %v15078_v39  ;;  %v15554_v49 = vor.u32 %v17974_v55, %v15553_v61  ;;  %v18240_v39 = vld [vmem:[%s27192_s3 + $0x14c0] sm:$0xf0]  ;;  %v16561_v55 = vld [vmem:[%s27192_s3 + $0x1438] sm:$0xf]  ;;  %v18226_v38 = vld [vmem:[%s27192_s3 + $0x1450] sm:$0xf0] }
 0x4f8   :  { %10631 = vmatmul.bf16.vlgmr.msra.gmra.mxu1 %v22813_v23  ;;  %10612 = vmatpush.bf16.msrb.mxu0 %v14350_v18  ;;  %v15441_v23 = vld [vmem:[%s27192_s3 + $0xb78] sm:$0xf]  ;;  %v16618_v27 = vor.u32 %v18240_v39, %v16617_v44  ;;  %v10386_v36 = vadd.f32 %v26519_v40, %v10373_v5  ;;  %v15385_v40 = vld [vmem:[%s27192_s3 + $0xb08] sm:$0xf]  ;;  %v16562_v14 = vor.u32 %v18226_v38, %v16561_v55  ;;  %v15301_v44 = vld [vmem:[%s27192_s3 + $0xa60] sm:$0xf] }
 0x4f9   :  { %10675 = vmatpush.bf16.msrb.mxu1 %v15526_v35  ;;  %v15442_v47 = vor.u32 %v17946_v62, %v15441_v23  ;;  %v14966_v35 = vor.u32 %v17827_v54, %v14965_v6  ;;  %v10374_v51 = vpop.f32.mrf.mxu1  ;;  %v10398_v19 = vpop.f32.mrf.mxu3  ;;  %v15386_v57 = vor.u32 %v17932_v52, %v15385_v40  ;;  %v14209_v23 = vld [vmem:[%s27192_s3 + $0x1d8] sm:$0xf]  ;;  %v17638_v62 = vld [vmem:[%s27192_s3 + $0x1f0] sm:$0xf0]  ;;  %v17911_v39 = vld [vmem:[%s27192_s3 + $0xa78] sm:$0xf0]  ;;  %v15358_v54 = vor.u32 %v17925_v12, %v15357_v3 }
 0x4fa   :  { %10693 = vmatpush.bf16.msra.mxu2 %v15610_v42  ;;  %v14294_v42 = vor.u32 %v17659_v24, %v14293_v21  ;;  %v15973_v21 = vld [vmem:[%s27192_s3 + $0xfa0] sm:$0xf]  ;;  %v15329_v1 = vld [vmem:[%s27192_s3 + $0xa98] sm:$0xf]  ;;  %v17918_v15 = vld [vmem:[%s27192_s3 + $0xab0] sm:$0xf0] }
 0x4fb   :  { %10650 = vmatpush.bf16.msra.mxu3 %v15050_v26  ;;  %v14937_v26 = vld [vmem:[%s27192_s3 + $0x788] sm:$0xf]  ;;  %v10361_v61 = vpop.f32.mrf.mxu0  ;;  %v18072_v51 = vld [vmem:[%s27192_s3 + $0xf80] sm:$0xf0] }
 0x4fc   :  { %10613 = vmatpush.bf16.msrb.mxu0 %v14322_v53  ;;  %v14938_v18 = vor.u32 %v17820_v25, %v14937_v26  ;;  %v14881_v53 = vld [vmem:[%s27192_s3 + $0x718] sm:$0xf]  ;;  %v17904_v26 = vld [vmem:[%s27192_s3 + $0xa40] sm:$0xf0]  ;;  %v15945_v25 = vld [vmem:[%s27192_s3 + $0xf68] sm:$0xf] }
 0x4fd   :  { %10676 = vmatpush.bf16.msrb.mxu1 %v15498_v13  ;;  %v14266_v13 = vor.u32 %v17652_v29, %v14265_v9  ;;  %v16421_v9 = vld [vmem:[%s27192_s3 + $0x1320] sm:$0xf]  ;;  %v15273_v29 = vld [vmem:[%s27192_s3 + $0xa28] sm:$0xf]  ;;  %v16477_v61 = vld [vmem:[%s27192_s3 + $0x1390] sm:$0xf]  ;;  %v15946_v55 = vor.u32 %v18072_v51, %v15945_v25 }
 0x4fe   :  { %10694 = vmatpush.bf16.msra.mxu2 %v15582_v22  ;;  %v26674_v22 = vadd.f32 %v10398_v19, %v10386_v36  ;;  %v18191_v36 = vld [vmem:[%s27192_s3 + $0x1338] sm:$0xf0]  ;;  %v15330_v19 = vor.u32 %v17918_v15, %v15329_v1  ;;  %v15274_v52 = vor.u32 %v17904_v26, %v15273_v29  ;;  %v18184_v38 = vld [vmem:[%s27192_s3 + $0x1300] sm:$0xf0]  ;;  %v15161_v29 = vld [vmem:[%s27192_s3 + $0x948] sm:$0xf] }
 0x4ff   :  { %10651 = vmatpush.bf16.msra.mxu3 %v15022_v30  ;;  %v17645_v30 = vld [vmem:[%s27192_s3 + $0x228] sm:$0xf0]  ;;  %v16422_v40 = vor.u32 %v18191_v36, %v16421_v9  ;;  %v18051_v1 = vld [vmem:[%s27192_s3 + $0xed8] sm:$0xf0]  ;;  %v16309_v36 = vld [vmem:[%s27192_s3 + $0x1240] sm:$0xf] }
 0x500   :  { %10614 = vmatpush.bf16.msrb.mxu0 %v14294_v42  ;;  %v14238_v37 = vor.u32 %v17645_v30, %v14237_v8  ;;  %v26712_v16 = vpop.f32.mrf.mxu2  ;;  %v15302_v42 = vor.u32 %v17911_v39, %v15301_v44  ;;  %v15245_v8 = vld [vmem:[%s27192_s3 + $0x9f0] sm:$0xf]  ;;  %v17897_v30 = vld [vmem:[%s27192_s3 + $0xa08] sm:$0xf0]  ;;  %v6042_v44 = vperm.slane %v26178_v20, 5 }
 0x501   :  { %10677 = vmatpush.bf16.msrb.mxu1 %v15470_v7  ;;  %v14910_v7 = vor.u32 %v17813_v10, %v14909_v58  ;;  %v10400_v24 = vpop.f32.mrf.mxu3  ;;  %v26732_v6 = vpop.f32.mrf.mxu1  ;;  %v15917_v10 = vld [vmem:[%s27192_s3 + $0xf30] sm:$0xf]  ;;  %v15246_v12 = vor.u32 %v17897_v30, %v15245_v8  ;;  %v18170_v20 = vld [vmem:[%s27192_s3 + $0x1290] sm:$0xf0]  ;;  %v17876_v25 = vld [vmem:[%s27192_s3 + $0x960] sm:$0xf0] }
 0x502   :  { %10695 = vmatpush.bf16.msra.mxu2 %v15554_v49  ;;  %v16533_v49 = vld [vmem:[%s27192_s3 + $0x1400] sm:$0xf]  ;;  %v10438_v26 = vadd.f32 %v26712_v16, %v6042_v44  ;;  %v15833_v51 = vld [vmem:[%s27192_s3 + $0xe88] sm:$0xf]  ;;  %v15805_v8 = vld [vmem:[%s27192_s3 + $0xe50] sm:$0xf] }
 0x503   :  { %10652 = vmatpush.bf16.msra.mxu3 %v14994_v63  ;;  %v17806_v63 = vld [vmem:[%s27192_s3 + $0x730] sm:$0xf0]  ;;  %v18037_v30 = vld [vmem:[%s27192_s3 + $0xe68] sm:$0xf0] }
 0x504   :  { %10615 = vmatpush.bf16.msrb.mxu0 %v14266_v13  ;;  %v18205_v13 = vld [vmem:[%s27192_s3 + $0x13a8] sm:$0xf0] }
 0x505   :  { %10696 = vmatmul.bf16.vlgmr.msra.gmra.mxu2 %v23061_v50  ;;  %10678 = vmatpush.bf16.msrb.mxu1 %v15442_v47  ;;  %v16590_v50 = vor.u32 %v18233_v2, %v16589_v41  ;;  %v14210_v47 = vor.u32 %v17638_v62, %v14209_v23  ;;  %v16505_v41 = vld [vmem:[%s27192_s3 + $0x13c8] sm:$0xf]  ;;  %v18212_v2 = vld [vmem:[%s27192_s3 + $0x13e0] sm:$0xf0]  ;;  %v17890_v23 = vld [vmem:[%s27192_s3 + $0x9d0] sm:$0xf0] }
 0x506   :  { %10740 = vmatpush.bf16.msrb.mxu2 %v16646_v56  ;;  %v18219_v56 = vld [vmem:[%s27192_s3 + $0x1418] sm:$0xf0]  ;;  %v15889_v62 = vld [vmem:[%s27192_s3 + $0xef8] sm:$0xf]  ;;  %v18261_v44 = vld [vmem:[%s27192_s3 + $0x1568] sm:$0xf0] }
 0x507   :  { %10653 = vmatpush.bf16.msra.mxu3 %v14966_v35  ;;  %v16534_v5 = vor.u32 %v18219_v56, %v16533_v49  ;;  %v15974_v35 = vor.u32 %v18079_v48, %v15973_v21  ;;  %v15217_v56 = vld [vmem:[%s27192_s3 + $0x9b8] sm:$0xf] }
 0x508   :  { %10616 = vmatpush.bf16.msrb.mxu0 %v14238_v37  ;;  %v16365_v37 = vld [vmem:[%s27192_s3 + $0x12b0] sm:$0xf]  ;;  %v18285_v21 = vld [vmem:[%s27194_s5 + $0xb8] sm:$0xff]  ;;  %v15218_v24 = vor.u32 %v17890_v23, %v15217_v56  ;;  %v18030_v56 = vld [vmem:[%s27192_s3 + $0xe30] sm:$0xf0] }
 0x509   :  { %10679 = vmatpush.bf16.msrb.mxu1 %v15414_v45  ;;  %v16506_v45 = vor.u32 %v18212_v2, %v16505_v41  ;;  %v10426_v58 = vpop.f32.mrf.mxu1  ;;  %v18284_v41 = vld [vmem:[%s27194_s5 + $0xb0] sm:$0xff]  ;;  %v16197_v23 = vld [vmem:[%s27192_s3 + $0x1160] sm:$0xf] }
 0x50a   :  { %10741 = vmatpush.bf16.msrb.mxu2 %v16618_v27  ;;  %v14882_v27 = vor.u32 %v17806_v63, %v14881_v53  ;;  %v18058_v53 = vld [vmem:[%s27192_s3 + $0xf10] sm:$0xf0] }
 0x50b   :  { %10654 = vmatpush.bf16.msra.mxu3 %v14938_v18  ;;  %v16393_v18 = vld [vmem:[%s27192_s3 + $0x12e8] sm:$0xf] }
 0x50c   :  { %10617 = vmatpush.bf16.msrb.mxu0 %v14210_v47  ;;  %v16394_v3 = vor.u32 %v18184_v38, %v16393_v18  ;;  %v10411_v39 = vpop.f32.mrf.mxu0  ;;  %v15189_v47 = vld [vmem:[%s27192_s3 + $0x980] sm:$0xf]  ;;  %v18156_v18 = vld [vmem:[%s27192_s3 + $0x1220] sm:$0xf0]  ;;  %v17869_v38 = vld [vmem:[%s27192_s3 + $0x928] sm:$0xf0] }
 0x50d   :  { %10680 = vmatpush.bf16.msrb.mxu1 %v15386_v57  ;;  %v18065_v57 = vld [vmem:[%s27192_s3 + $0xf48] sm:$0xf0]  ;;  %v10412_v48 = vadd.f32 %v10411_v39, %v26674_v22  ;;  %v15861_v22 = vld [vmem:[%s27192_s3 + $0xec0] sm:$0xf] }
 0x50e   :  { %10742 = vmatpush.bf16.msrb.mxu2 %v16590_v50  ;;  %v10439_v50 = vpop.f32.mrf.mxu2  ;;  %v15918_v49 = vor.u32 %v18065_v57, %v15917_v10  ;;  %v15862_v9 = vor.u32 %v18051_v1, %v15861_v22  ;;  %v18282_v57 = vld [vmem:[%s27194_s5 + $0xa0] sm:$0xff]  ;;  %v16673_v22 = vld [vmem:[%s27192_s3 + $0x1518] sm:$0xf]  ;;  %v18254_v1 = vld [vmem:[%s27192_s3 + $0x1530] sm:$0xf0] }
 0x50f   :  { %10655 = vmatpush.bf16.msra.mxu3 %v14910_v7  ;;  %10618 = vmatmul.bf16.vlgmr.msrb.gmra.mxu0 %v22624_v31  ;;  %v16449_v31 = vld [vmem:[%s27192_s3 + $0x1358] sm:$0xf]  ;;  %v18177_v7 = vld [vmem:[%s27192_s3 + $0x12c8] sm:$0xf0]  ;;  %v26839_v15 = vadd.f32 %v26732_v6, %v10412_v48  ;;  %v18163_v6 = vld [vmem:[%s27192_s3 + $0x1258] sm:$0xf0] }
 0x510   :  { %10662 = vmatpush.bf16.msra.mxu0 %v15302_v42 }
 0x511   :  { %10681 = vmatpush.bf16.msrb.mxu1 %v15358_v54  ;;  %v15890_v54 = vor.u32 %v18058_v53, %v15889_v62  ;;  %v18135_v53 = vld [vmem:[%s27192_s3 + $0x1178] sm:$0xf0]  ;;  %vm10770_vm5 = vcmp.gt.f32.partialorder %v26839_v15, 0.0 }
 0x512   :  { %10743 = vmatpush.bf16.msrb.mxu2 %v16562_v14  ;;  %v16478_v14 = vor.u32 %v18205_v13, %v16477_v61  ;;  %v16281_v13 = vld [vmem:[%s27192_s3 + $0x1208] sm:$0xf] }
 0x513   :  { %10656 = vmatpush.bf16.msra.mxu3 %v14882_v27  ;;  %v17883_v27 = vld [vmem:[%s27192_s3 + $0x998] sm:$0xf0]  ;;  %v16282_v10 = vor.u32 %v18156_v18, %v16281_v13  ;;  %v18275_v13 = vld [vmem:[%s27194_s5 + $0x68] sm:$0xff] }
 0x514   :  { %10663 = vmatpush.bf16.msra.mxu0 %v15274_v52  ;;  %v15190_v2 = vor.u32 %v17883_v27, %v15189_v47  ;;  %v10413_v16 = vpop.f32.mrf.mxu0  ;;  %v15162_v52 = vor.u32 %v17876_v25, %v15161_v29  ;;  %v16169_v47 = vld [vmem:[%s27192_s3 + $0x1128] sm:$0xf]  ;;  %v18128_v27 = vld [vmem:[%s27192_s3 + $0x1140] sm:$0xf0]  ;;  %v16141_v29 = vld [vmem:[%s27192_s3 + $0x10f0] sm:$0xf] }
 0x515   :  { %10682 = vmatpush.bf16.msrb.mxu1 %v15330_v19  ;;  %v26841_v42 = vpop.f32.mrf.mxu1  ;;  %v18044_v19 = vld [vmem:[%s27192_s3 + $0xea0] sm:$0xf0]  ;;  %v18293_v25 = vld [vmem:[%s27194_s5 + $0xf8] sm:$0xff]  ;;  %v18114_v16 = vld [vmem:[%s27192_s3 + $0x10d0] sm:$0xf0] }
 0x516   :  { %10744 = vmatpush.bf16.msrb.mxu2 %v16534_v5  ;;  %10657 = vmatmul.bf16.vlgmr.msra.gmra.mxu3 %v22856_v28  ;;  %v18198_v28 = vld [vmem:[%s27192_s3 + $0x1370] sm:$0xf0]  ;;  %v16337_v5 = vld [vmem:[%s27192_s3 + $0x1278] sm:$0xf]  ;;  %v15834_v61 = vor.u32 %v18044_v19, %v15833_v51  ;;  %v18279_v51 = vld [vmem:[%s27194_s5 + $0x88] sm:$0xff] }
 0x517   :  { %10701 = vmatpush.bf16.msrb.mxu3 %v15974_v35  ;;  %v16450_v63 = vor.u32 %v18198_v28, %v16449_v31  ;;  %v16338_v35 = vor.u32 %v18170_v20, %v16337_v5  ;;  %v15806_v31 = vor.u32 %v18037_v30, %v15805_v8  ;;  %v18149_v28 = vld [vmem:[%s27192_s3 + $0x11e8] sm:$0xf0]  ;;  %v16225_v5 = vld [vmem:[%s27192_s3 + $0x1198] sm:$0xf]  ;;  %v18142_v20 = vld [vmem:[%s27192_s3 + $0x11b0] sm:$0xf0] }
 0x518   :  { %10683 = vmatmul.bf16.vlgmr.msrb.gmra.mxu1 %v23057_v43  ;;  %10664 = vmatpush.bf16.msra.mxu0 %v15246_v12  ;;  %v16366_v43 = vor.u32 %v18177_v7, %v16365_v37  ;;  %v17862_v37 = vld [vmem:[%s27192_s3 + $0x8f0] sm:$0xf0]  ;;  %v15777_v7 = vld [vmem:[%s27192_s3 + $0xe18] sm:$0xf] }
 0x519   :  { %10727 = vmatpush.bf16.msra.mxu1 %v16422_v40  ;;  %v16310_v40 = vor.u32 %v18163_v6, %v16309_v36  ;;  %v15778_v48 = vor.u32 %v18030_v56, %v15777_v7  ;;  %v16170_v36 = vor.u32 %v18128_v27, %v16169_v47  ;;  %v16674_v6 = vor.u32 %v18254_v1, %v16673_v22  ;;  %v18276_v19 = vld [vmem:[%s27194_s5 + $0x70] sm:$0xff]  ;;  %v18093_v7 = vld [vmem:[%s27192_s3 + $0x1028] sm:$0xf0]  ;;  %v18289_v56 = vld [vmem:[%s27194_s5 + $0xd8] sm:$0xff] }
 0x51a   :  { %10745 = vmatpush.bf16.msrb.mxu2 %v16506_v45  ;;  %v10450_v45 = vpop.f32.mrf.mxu3  ;;  %v18270_v27 = vld [vmem:[%s27194_s5 + $0x40] sm:$0xff]  ;;  %v18268_v22 = vld [vmem:[%s27194_s5 + $0x30] sm:$0xff]  ;;  %v18309_v1 = vld [vmem:[%s27194_s5 + $0x178] sm:$0xff] }
 0x51b   :  { %10702 = vmatpush.bf16.msrb.mxu3 %v15946_v55  ;;  %v26866_v50 = vadd.f32 %v10450_v45, %v10438_v26  ;;  %v15133_v55 = vld [vmem:[%s27192_s3 + $0x910] sm:$0xf]  ;;  %v18121_v26 = vld [vmem:[%s27192_s3 + $0x1108] sm:$0xf0] }
 0x51c   :  { %10665 = vmatpush.bf16.msra.mxu0 %v15218_v24  ;;  %v15134_v12 = vor.u32 %v17869_v38, %v15133_v55  ;;  %v16198_v24 = vor.u32 %v18135_v53, %v16197_v23  ;;  %v16142_v45 = vor.u32 %v18121_v26, %v16141_v29  ;;  %v16085_v55 = vld [vmem:[%s27192_s3 + $0x1080] sm:$0xf]  ;;  %v18107_v38 = vld [vmem:[%s27192_s3 + $0x1098] sm:$0xf0]  ;;  %v18272_v53 = vld [vmem:[%s27194_s5 + $0x50] sm:$0xff] }
 0x51d   :  { %10728 = vmatpush.bf16.msra.mxu1 %v16394_v3  ;;  %v10478_v58 = vpop.f32.mrf.mxu1  ;;  %v18307_v26 = vld [vmem:[%s27194_s5 + $0x168] sm:$0xff] }
 0x51e   :  { %10746 = vmatpush.bf16.msrb.mxu2 %v16478_v14  ;;  %v16253_v14 = vld [vmem:[%s27192_s3 + $0x11d0] sm:$0xf] }
 0x51f   :  { %10703 = vmatpush.bf16.msrb.mxu3 %v15918_v49  ;;  %v15105_v49 = vld [vmem:[%s27192_s3 + $0x8d8] sm:$0xf]  ;;  %v16254_v39 = vor.u32 %v18149_v28, %v16253_v14  ;;  %v18100_v14 = vld [vmem:[%s27192_s3 + $0x1060] sm:$0xf0] }
 0x520   :  { %10666 = vmatpush.bf16.msra.mxu0 %v15190_v2  ;;  %v26895_v3 = vpop.f32.mrf.mxu2  ;;  %v18280_v2 = vld [vmem:[%s27194_s5 + $0x90] sm:$0xff] }
 0x521   :  { %10729 = vmatpush.bf16.msra.mxu1 %v16366_v43  ;;  %v18281_v43 = vld [vmem:[%s27194_s5 + $0x98] sm:$0xff] }
 0x522   :  { %10747 = vmatpush.bf16.msrb.mxu2 %v16450_v63  ;;  %v10452_v62 = vpop.f32.mrf.mxu3  ;;  %v16701_v63 = vld [vmem:[%s27192_s3 + $0x1550] sm:$0xf] }
 0x523   :  { %10704 = vmatpush.bf16.msrb.mxu3 %v15890_v54  ;;  %v16702_v54 = vor.u32 %v18261_v44, %v16701_v63  ;;  %v16001_v44 = vld [vmem:[%s27192_s3 + $0xfd8] sm:$0xf] }
 0x524   :  { %10667 = vmatpush.bf16.msra.mxu0 %v15162_v52 }
 0x525   :  { %10748 = vmatmul.bf16.vlgmr.msrb.gmra.mxu2 %v23261_v0  ;;  %10730 = vmatpush.bf16.msra.mxu1 %v16338_v35  ;;  %v18283_v0 = vld [vmem:[%s27194_s5 + $0xa8] sm:$0xff] }
 0x526   :  { %11219 = vmatpush.bf16.msra.mxu2 %v18285_v21  ;;  %v15106_v21 = vor.u32 %v17862_v37, %v15105_v49  ;;  %v16029_v37 = vld [vmem:[%s27192_s3 + $0x1010] sm:$0xf] }
 0x527   :  { %10705 = vmatpush.bf16.msrb.mxu3 %v15862_v9  ;;  %v18277_v9 = vld [vmem:[%s27194_s5 + $0x78] sm:$0xff]  ;;  %v16030_v63 = vor.u32 %v18093_v7, %v16029_v37 }
 0x528   :  { %10668 = vmatpush.bf16.msra.mxu0 %v15134_v12  ;;  %v10491_v35 = vpop.f32.mrf.mxu2  ;;  %v18297_v7 = vld [vmem:[%s27194_s5 + $0x118] sm:$0xff] }
 0x529   :  { %10731 = vmatpush.bf16.msra.mxu1 %v16310_v40  ;;  %v18292_v40 = vld [vmem:[%s27194_s5 + $0xf0] sm:$0xff] }
 0x52a   :  { %11220 = vmatpush.bf16.msra.mxu2 %v18284_v41  ;;  %v16226_v41 = vor.u32 %v18142_v20, %v16225_v5  ;;  %v18287_v5 = vld [vmem:[%s27194_s5 + $0xc8] sm:$0xff]  ;;  %v10776_v20 = vmul.f32 0.01, %v26313_v34 }
 0x52b   :  { %10706 = vmatpush.bf16.msrb.mxu3 %v15834_v61 }
 0x52c   :  { %10669 = vmatpush.bf16.msra.mxu0 %v15106_v21  ;;  %v10463_v52 = vpop.f32.mrf.mxu0  ;;  %v18271_v21 = vld [vmem:[%s27194_s5 + $0x48] sm:$0xff] }
 0x52d   :  { %10732 = vmatpush.bf16.msra.mxu1 %v16282_v10  ;;  %v10464_v61 = vadd.f32 %v10463_v52, %v26866_v50  ;;  %v18291_v50 = vld [vmem:[%s27194_s5 + $0xe8] sm:$0xff]  ;;  %v16086_v10 = vor.u32 %v18107_v38, %v16085_v55  ;;  %v18262_v55 = vld [vmem:[%s27194_s5] sm:$0xff] }
 0x52e   :  { %11221 = vmatpush.bf16.msra.mxu2 %v18283_v0  ;;  %v18278_v0 = vld [vmem:[%s27194_s5 + $0x80] sm:$0xff]  ;;  %v18263_v52 = vld [vmem:[%s27194_s5 + $0x8] sm:$0xff] }
 0x52f   :  { %10707 = vmatpush.bf16.msrb.mxu3 %v15806_v31  ;;  %10670 = vmatmul.bf16.vlgmr.msra.gmra.mxu0 %v22858_v17  ;;  %v10775_v17 = vmul.f32 0.01, %v25587_v59  ;;  %v10477_v8 = vadd.f32 %v26841_v42, %v10464_v61  ;;  %v16057_v42 = vld [vmem:[%s27192_s3 + $0x1048] sm:$0xf]  ;;  %v18290_v31 = vld [vmem:[%s27194_s5 + $0xe0] sm:$0xff]  ;;  %v18304_v61 = vld [vmem:[%s27194_s5 + $0x150] sm:$0xff] }
 0x530   :  { %10714 = vmatpush.bf16.msrb.mxu0 %v16198_v24  ;;  %v16058_v49 = vor.u32 %v18100_v14, %v16057_v42  ;;  %v18269_v24 = vld [vmem:[%s27194_s5 + $0x38] sm:$0xff]  ;;  %v18300_v42 = vld [vmem:[%s27194_s5 + $0x130] sm:$0xff]  ;;  %v18302_v14 = vld [vmem:[%s27194_s5 + $0x140] sm:$0xff] }
 0x531   :  { %10733 = vmatpush.bf16.msra.mxu1 %v16254_v39  ;;  %v10782_v18 = vsel %vm10768_vm15, %v25587_v59, %v10775_v17  ;;  %v18274_v59 = vld [vmem:[%s27194_s5 + $0x60] sm:$0xff]  ;;  %v18086_v39 = vld [vmem:[%s27192_s3 + $0xff0] sm:$0xf0] }
 0x532   :  { %11222 = vmatpush.bf16.msra.mxu2 %v18282_v57  ;;  %v10789_v58 = vpack.c.bf16 %v10782_v18, %v10782_v18  ;;  %v27004_v57 = vadd.f32 %v26895_v3, %v10477_v8  ;;  %v18273_v3 = vld [vmem:[%s27194_s5 + $0x58] sm:$0xff] }
 0x533   :  { %10708 = vmatpush.bf16.msrb.mxu3 %v15778_v48  ;;  %v16002_v48 = vor.u32 %v18086_v39, %v16001_v44  ;;  %v18301_v8 = vld [vmem:[%s27194_s5 + $0x138] sm:$0xff] }
 0x534   :  { %10715 = vmatpush.bf16.msrb.mxu0 %v16170_v36  ;;  %v10465_v28 = vpop.f32.mrf.mxu0  ;;  %v18267_v36 = vld [vmem:[%s27194_s5 + $0x28] sm:$0xff] }
 0x535   :  { %10734 = vmatpush.bf16.msra.mxu1 %v16226_v41  ;;  %v26998_v30 = vpop.f32.mrf.mxu1  ;;  %v18286_v41 = vld [vmem:[%s27194_s5 + $0xc0] sm:$0xff] }
 0x536   :  { %11223 = vmatpush.bf16.msra.mxu2 %v18281_v43  ;;  %10709 = vmatmul.bf16.vlgmr.msrb.gmra.mxu3 %v23091_v60  ;;  %v16113_v60 = vld [vmem:[%s27192_s3 + $0x10b8] sm:$0xf]  ;;  %v18288_v43 = vld [vmem:[%s27194_s5 + $0xd0] sm:$0xff]  ;;  %v18298_v28 = vld [vmem:[%s27194_s5 + $0x120] sm:$0xff]  ;;  %s11389_s3 = sshll.u32 %s27198_s9, 4  ;;  %s11390_s3 = int_to_ptr.hbm [resolvable:$true] %s11389_s3 }
 0x537   :  { %10759 = vmatpush.bf16.msra.mxu3 %v16702_v54  ;;  %v10774_v54 = vmul.f32 0.01, %v24934_v32 }
 0x538   :  { %10735 = vmatmul.bf16.vlgmr.msra.gmra.mxu1 %v23259_v46  ;;  %10716 = vmatpush.bf16.msrb.mxu0 %v16142_v45  ;;  %v16114_v46 = vor.u32 %v18114_v16, %v16113_v60  ;;  %v18264_v16 = vld [vmem:[%s27194_s5 + $0x10] sm:$0xff] }
 0x539   :  { %11206 = vmatpush.bf16.msrb.mxu1 %v18277_v9  ;;  %v27012_v12 = vpop.f32.mrf.mxu3  ;;  %v10781_v35 = vsel %vm10767_vm1, %v24934_v32, %v10774_v54  ;;  %v18308_v32 = vld [vmem:[%s27194_s5 + $0x170] sm:$0xff]  ;;  %v18294_v54 = vld [vmem:[%s27194_s5 + $0x100] sm:$0xff] }
 0x53a   :  { %11224 = vmatpush.bf16.msra.mxu2 %v18280_v2  ;;  %v10783_v2 = vsel %vm10769_vm2, %v26313_v34, %v10776_v20  ;;  %v10788_v9 = vpack.c.bf16 %v10781_v35, %v10781_v35  ;;  %v18266_v34 = vld [vmem:[%s27194_s5 + $0x20] sm:$0xff]  ;;  %v10503_v18 = vadd.f32 %v27012_v12, %v27004_v57 }
 0x53b   :  { %10760 = vmatpush.bf16.msra.mxu3 %v16674_v6  ;;  %v10790_v6 = vpack.c.bf16 %v10783_v2, %v10783_v2 }
 0x53c   :  { %10717 = vmatpush.bf16.msrb.mxu0 %v16114_v46 }
 0x53d   :  { %11207 = vmatpush.bf16.msrb.mxu1 %v18276_v19  ;;  %v10530_v23 = vpop.f32.mrf.mxu1  ;;  %v18306_v19 = vld [vmem:[%s27194_s5 + $0x160] sm:$0xff] }
 0x53e   :  { %11225 = vmatpush.bf16.msra.mxu2 %v18279_v51  ;;  %v18265_v51 = vld [vmem:[%s27194_s5 + $0x18] sm:$0xff] }
 0x53f   :  { %11232 = vmatpush.bf16.msrb.mxu3 %v18293_v25 }
 0x540   :  { %10718 = vmatpush.bf16.msrb.mxu0 %v16086_v10  ;;  %v27031_v62 = vpop.f32.mrf.mxu2 }
 0x541   :  { %11208 = vmatpush.bf16.msrb.mxu1 %v18275_v13  ;;  %v10773_v13 = vmul.f32 0.01, %v24477_v4 }
 0x542   :  { %11226 = vmatpush.bf16.msra.mxu2 %v18278_v0 }
 0x543   :  { %11233 = vmatpush.bf16.msrb.mxu3 %v18292_v40  ;;  %v18305_v40 = vld [vmem:[%s27194_s5 + $0x158] sm:$0xff] }
 0x544   :  { %10719 = vmatpush.bf16.msrb.mxu0 %v16058_v49 }
 0x545   :  { %11227 = vmatmul.bf16.vlgmr.msra.gmra.mxu2 %v10789_v58  ;;  %11209 = vmatpush.bf16.msrb.mxu1 %v18274_v59  ;;  %v10780_v58 = vsel %vm10766_vm3, %v24477_v4, %v10773_v13  ;;  %v18299_v4 = vld [vmem:[%s27194_s5 + $0x128] sm:$0xff] }
 0x546   :  { %16709 = vmatmul.msk.bf16.vlgmr.msra.gmra.mxu3 %vm9579_vm14, %v23590_v33  ;;  %v10504_v33 = vpop.f32.mrf.mxu3  ;;  %v10787_v10 = vpack.c.bf16 %v10780_v58, %v10780_v58 }
 0x547   :  { %11234 = vmatpush.bf16.msrb.mxu3 %v18291_v50  ;;  %v18303_v50 = vld [vmem:[%s27194_s5 + $0x148] sm:$0xff] }
 0x548   :  { %10720 = vmatpush.bf16.msrb.mxu0 %v16030_v63  ;;  %v10543_v47 = vpop.f32.mrf.mxu2  ;;  %v18296_v63 = vld [vmem:[%s27194_s5 + $0x110] sm:$0xff] }
 0x549   :  { %11210 = vmatpush.bf16.msrb.mxu1 %v18273_v3 }
 0x54b   :  { %11235 = vmatpush.bf16.msrb.mxu3 %v18290_v31 }
 0x54c   :  { %10721 = vmatpush.bf16.msrb.mxu0 %v16002_v48  ;;  %v10515_v29 = vpop.f32.mrf.mxu0  ;;  %v10777_v48 = vmul.f32 0.01, %v26839_v15 }
 0x54d   :  { %11211 = vmatpush.bf16.msrb.mxu1 %v18272_v53  ;;  %v10516_v38 = vadd.f32 %v10515_v29, %v10503_v18 }
 0x54f   :  { %11236 = vmatpush.bf16.msrb.mxu3 %v18289_v56  ;;  %10722 = vmatmul.bf16.vlgmr.msrb.gmra.mxu0 %v23094_v11  ;;  %v10529_v57 = vadd.f32 %v26998_v30, %v10516_v38 }
 0x550   :  { %11193 = vmatpush.bf16.msra.mxu0 %v18269_v24  ;;  %v10593_v11 = vpop.f32.mrf.mxu2 }
 0x551   :  { %11212 = vmatpush.bf16.msrb.mxu1 %v18271_v21  ;;  %v10542_v12 = vadd.f32 %v27031_v62, %v10529_v57 }
 0x553   :  { %11237 = vmatpush.bf16.msrb.mxu3 %v18288_v43  ;;  %v18295_v43 = vld [vmem:[%s27194_s5 + $0x108] sm:$0xff] }
 0x554   :  { %11194 = vmatpush.bf16.msra.mxu0 %v18268_v22  ;;  %v10517_v60 = vpop.f32.mrf.mxu0 }
 0x555   :  { %11213 = vmatpush.bf16.msrb.mxu1 %v18270_v27  ;;  %v10580_v25 = vpop.f32.mrf.mxu1  ;;  %v18332_v27 = vld [vmem:[%s27193_s4] sm:$0x7f] }
 0x556   :  { %v6043_v22 = vperm.slane %v18332_v27, 6  ;;  %v18311_v27 = vld [vmem:[%s27196_s7] sm:$0xff] }
 0x557   :  { %11238 = vmatpush.bf16.msrb.mxu3 %v18287_v5  ;;  %v10784_v5 = vsel %vm10770_vm5, %v26839_v15, %v10777_v48 }
 0x558   :  { %11214 = vmatmul.bf16.vlgmr.msrb.gmra.mxu1 %v10788_v9  ;;  %11195 = vmatpush.bf16.msra.mxu0 %v18267_v36  ;;  %v10595_v17 = vpop.f32.mrf.mxu2  ;;  %v10791_v47 = vpack.c.bf16 %v10784_v5, %v10784_v5 }
 0x559   :  { %11258 = vmatpush.bf16.msra.mxu1 %v18309_v1  ;;  %v10554_v45 = vpop.f32.mrf.mxu3 }
 0x55a   :  { %v10555_v31 = vadd.f32 %v10554_v45, %v10542_v12 }
 0x55b   :  { %11239 = vmatpush.bf16.msrb.mxu3 %v18286_v41 }
 0x55c   :  { %11196 = vmatpush.bf16.msra.mxu0 %v18266_v34 }
 0x55d   :  { %11259 = vmatpush.bf16.msra.mxu1 %v18308_v32  ;;  %v10582_v0 = vpop.f32.mrf.mxu1 }
 0x55e   :  { %11240 = vmatmul.bf16.vlgmr.msrb.gmra.mxu3 %v10790_v6 }
 0x560   :  { %11197 = vmatpush.bf16.msra.mxu0 %v18265_v51 }
 0x561   :  { %11260 = vmatpush.bf16.msra.mxu1 %v18307_v26  ;;  %v10556_v46 = vpop.f32.mrf.mxu3  ;;  %v18310_v26 = vld [vmem:[%s27194_s5 + $0x180] sm:$0xff] }
 0x562   :  { %11278 = vmatpush.bf16.msrb.mxu2 %v18310_v26 }
 0x564   :  { %11198 = vmatpush.bf16.msra.mxu0 %v18264_v16 }
 0x565   :  { %11261 = vmatpush.bf16.msra.mxu1 %v18306_v19 }
 0x568   :  { %11199 = vmatpush.bf16.msra.mxu0 %v18263_v52  ;;  %v10645_v59 = vpop.f32.mrf.mxu2 }
 0x569   :  { %11262 = vmatpush.bf16.msra.mxu1 %v18305_v40 }
 0x56c   :  { %11200 = vmatpush.bf16.msra.mxu0 %v18262_v55  ;;  %v10567_v3 = vpop.f32.mrf.mxu0 }
 0x56d   :  { %11263 = vmatpush.bf16.msra.mxu1 %v18304_v61  ;;  %v10568_v49 = vadd.f32 %v10567_v3, %v10555_v31  ;;  %v18320_v3 = vld [vmem:[%s27195_s6] ss:$0 sm:$0xff] }
 0x56f   :  { %11201 = vmatmul.bf16.vlgmr.msra.gmra.mxu0 %v10787_v10  ;;  %v10581_v37 = vadd.f32 %v10580_v25, %v10568_v49 }
 0x570   :  { %11245 = vmatpush.bf16.msrb.mxu0 %v18301_v8  ;;  %v10647_v30 = vpop.f32.mrf.mxu2 }
 0x571   :  { %11264 = vmatpush.bf16.msra.mxu1 %v18303_v50  ;;  %v10594_v23 = vadd.f32 %v10593_v11, %v10581_v37 }
 0x573   :  { %vm10771_vm4 = vcmp.gt.f32.partialorder %v10594_v23, 0.0  ;;  %v10778_v53 = vmul.f32 0.01, %v10594_v23 }
 0x574   :  { %11246 = vmatpush.bf16.msrb.mxu0 %v18300_v42  ;;  %v10569_v44 = vpop.f32.mrf.mxu0 }
 0x575   :  { %11265 = vmatpush.bf16.msra.mxu1 %v18302_v14  ;;  %v10632_v56 = vpop.f32.mrf.mxu1  ;;  %v10785_v39 = vsel %vm10771_vm4, %v10594_v23, %v10778_v53  ;;  %v18318_v23 = vld [vmem:[%s27196_s7 + $0x38] sm:$0xff]  ;;  %v18317_v53 = vld [vmem:[%s27196_s7 + $0x30] sm:$0xff]  ;;  %v18316_v44 = vld [vmem:[%s27196_s7 + $0x28] sm:$0xff] }
 0x576   :  { %v10792_v33 = vpack.c.bf16 %v10785_v39, %v10785_v39  ;;  %11356 = vmatpush.bf16.msra.mxu3 %v18318_v23  ;;  %v18315_v39 = vld [vmem:[%s27196_s7 + $0x20] sm:$0xff] }
 0x578   :  { %11247 = vmatpush.bf16.msrb.mxu0 %v18299_v4  ;;  %11266 = vmatmul.bf16.vlgmr.msra.gmra.mxu1 %v10792_v33 }
 0x579   :  { %v10606_v62 = vpop.f32.mrf.mxu3 }
 0x57a   :  { %v10607_v35 = vadd.f32 %v10606_v62, %v6043_v22  ;;  %11357 = vmatpush.bf16.msra.mxu3 %v18317_v53 }
 0x57c   :  { %11248 = vmatpush.bf16.msrb.mxu0 %v18298_v28 }
 0x57d   :  { %v10634_v21 = vpop.f32.mrf.mxu1 }
 0x57e   :  { %11358 = vmatpush.bf16.msra.mxu3 %v18316_v44  ;;  %v18313_v21 = vld [vmem:[%s27196_s7 + $0x10] sm:$0xff] }
 0x580   :  { %11249 = vmatpush.bf16.msrb.mxu0 %v18297_v7 }
 0x581   :  { %v10608_v24 = vpop.f32.mrf.mxu3 }
 0x582   :  { %11359 = vmatpush.bf16.msra.mxu3 %v18315_v39 }
 0x584   :  { %11250 = vmatpush.bf16.msrb.mxu0 %v18296_v63 }
 0x588   :  { %11251 = vmatpush.bf16.msrb.mxu0 %v18295_v43  ;;  %v10697_v20 = vpop.f32.mrf.mxu2  ;;  %v18314_v43 = vld [vmem:[%s27196_s7 + $0x18] sm:$0xff] }
 0x589   :  { %11360 = vmatpush.bf16.msra.mxu3 %v18314_v43 }
 0x58c   :  { %11252 = vmatpush.bf16.msrb.mxu0 %v18294_v54  ;;  %v10619_v41 = vpop.f32.mrf.mxu0 }
 0x58d   :  { %v10620_v2 = vadd.f32 %v10619_v41, %v10607_v35  ;;  %11361 = vmatpush.bf16.msra.mxu3 %v18313_v21 }
 0x58f   :  { %11253 = vmatmul.bf16.vlgmr.msrb.gmra.mxu0 %v10791_v47  ;;  %v10633_v9 = vadd.f32 %v10632_v56, %v10620_v2  ;;  %v18312_v47 = vld [vmem:[%s27196_s7 + $0x8] sm:$0xff]  ;;  %s18359_s7 = smov [#allocation2]  }
 0x590   :  { %v10699_v1 = vpop.f32.mrf.mxu2  ;;  %s11387_s13 = sshll.u32 %s18359_s7, 4  ;;  %s11388_s13 = int_to_ptr.vmem [resolvable:$true] %s11387_s13 }
 0x591   :  { %v10646_v32 = vadd.f32 %v10645_v59, %v10633_v9  ;;  %11362 = vmatpush.bf16.msra.mxu3 %v18312_v47 }
 0x594   :  { %v10621_v11 = vpop.f32.mrf.mxu0 }
 0x595   :  { %v10684_v36 = vpop.f32.mrf.mxu1  ;;  %11363 = vmatpush.bf16.msra.mxu3 %v18311_v27 }
 0x599   :  { %v10658_v6 = vpop.f32.mrf.mxu3 }
 0x59a   :  { %v10659_v51 = vadd.f32 %v10658_v6, %v10646_v32 }
 0x59d   :  { %v10686_v29 = vpop.f32.mrf.mxu1 }
 0x5a1   :  { %v10660_v15 = vpop.f32.mrf.mxu3 }
 0x5a8   :  { %v10749_v34 = vpop.f32.mrf.mxu2 }
 0x5ac   :  { %v10671_v19 = vpop.f32.mrf.mxu0 }
 0x5ad   :  { %v10672_v45 = vadd.f32 %v10671_v19, %v10659_v51 }
 0x5af   :  { %v10685_v17 = vadd.f32 %v10684_v36, %v10672_v45  ;;  %v18321_v36 = vld [vmem:[%s27197_s8] ss:$0 sm:$0xff] }
 0x5b0   :  { %v10751_v25 = vpop.f32.mrf.mxu2 }
 0x5b1   :  { %v10698_v16 = vadd.f32 %v10697_v20, %v10685_v17 }
 0x5b4   :  { %v10673_v0 = vpop.f32.mrf.mxu0 }
 0x5b5   :  { %v10736_v60 = vpop.f32.mrf.mxu1 }
 0x5b9   :  { %v10710_v40 = vpop.f32.mrf.mxu3 }
 0x5ba   :  { %v10711_v55 = vadd.f32 %v10710_v40, %v10698_v16 }
 0x5bd   :  { %v10738_v52 = vpop.f32.mrf.mxu1 }
 0x5c1   :  { %v10712_v61 = vpop.f32.mrf.mxu3 }
 0x5c8   :  { %v11228_v13 = vpop.f32.mrf.mxu2 }
 0x5c9   :  { %v10762_v46 = vpop.f32.mrf.mxu3 }
 0x5cc   :  { %v10723_v38 = vpop.f32.mrf.mxu0 }
 0x5cd   :  { %v10724_v8 = vadd.f32 %v10723_v38, %v10711_v55 }
 0x5cf   :  { %v10737_v58 = vadd.f32 %v10736_v60, %v10724_v8 }
 0x5d0   :  { %v11230_v18 = vpop.f32.mrf.mxu2 }
 0x5d1   :  { %v10764_v50 = vpop.f32.mrf.mxu3  ;;  %v10750_v10 = vadd.f32 %v10749_v34, %v10737_v58 }
 0x5d3   :  { %v10763_v57 = vadd.f32 %v10762_v46, %v10750_v10 }
 0x5d4   :  { %v10725_v42 = vpop.f32.mrf.mxu0 }
 0x5d5   :  { %v11215_v59 = vpop.f32.mrf.mxu1  ;;  %vm10772_vm6 = vcmp.gt.f32.partialorder %v10763_v57, 0.0  ;;  %v10779_v14 = vmul.f32 0.01, %v10763_v57 }
 0x5d7   :  { %v10786_v12 = vsel %vm10772_vm6, %v10763_v57, %v10779_v14 }
 0x5d8   :  { %v10793_v4 = vpack.c.bf16 %v10786_v12, %v10786_v12 }
 0x5da   :  { %16906 = vmatmul.msk.bf16.vlgmr.msrb.gmra.mxu2 %vm4012_vm0, %v10793_v4 }
 0x5dd   :  { %v11217_v30 = vpop.f32.mrf.mxu1 }
 0x5e1   :  { %v11241_v31 = vpop.f32.mrf.mxu3 }
 0x5e9   :  { %v11243_v28 = vpop.f32.mrf.mxu3 }
 0x5ec   :  { %v11202_v49 = vpop.f32.mrf.mxu0 }
 0x5ed   :  { %v11203_v37 = vadd.f32 %v18320_v3, %v11202_v49 }
 0x5ef   :  { %v11216_v7 = vadd.f32 %v11215_v59, %v11203_v37 }
 0x5f1   :  { %v11229_v56 = vadd.f32 %v11228_v13, %v11216_v7 }
 0x5f3   :  { %v11242_v62 = vadd.f32 %v11241_v31, %v11229_v56 }
 0x5f4   :  { %v11204_v63 = vpop.f32.mrf.mxu0 }
 0x5f5   :  { %v11267_v33 = vpop.f32.mrf.mxu1 }
 0x5fd   :  { %v11269_v48 = vpop.f32.mrf.mxu1 }
 0x60c   :  { %v11254_v24 = vpop.f32.mrf.mxu0 }
 0x60d   :  { %v11255_v54 = vadd.f32 %v11254_v24, %v11242_v62 }
 0x60f   :  { %v11268_v5 = vadd.f32 %v11267_v33, %v11255_v54 }
 0x614   :  { %v11256_v20 = vpop.f32.mrf.mxu0 }
 0x65d   :  { %v11280_v22 = vpop.f32.mrf.mxu2 }
 0x65e   :  { %v11281_v1 = vadd.f32 %v11280_v22, %v11268_v5 }
 0x660   :  { %vm11284_vm0 = vcmp.gt.f32.partialorder %v11281_v1, 0.0  ;;  %v11285_v35 = vmul.f32 0.01, %v11281_v1 }
 0x662   :  { %v11286_v41 = vsel %vm11284_vm0, %v11281_v1, %v11285_v35 }
 0x663   :  { %v11287_v2 = vpack.c.bf16 %v11286_v41, %v11286_v41 }
 0x665   :  { %v11282_v9 = vpop.f32.mrf.mxu2  ;;  %11364 = vmatmul.bf16.vlgmr.msra.gmra.mxu3 %v11287_v2 }
 0x6e8   :  { %v11365_v32 = vpop.f32.mrf.mxu3 }
 0x6e9   :  { %v11366_v6 = vadd.f32 %v18321_v36, %v11365_v32 }
 0x6eb   :  { %v11370_v11 = vsel %vm11369_vm7, %v11366_v6, -inf }
 0x6ec   :  { %11371 = vmax.xlane.f32.xlu0 %v11370_v11 }
 0x6f0   :  { %v11367_v29 = vpop.f32.mrf.mxu3 }
 0x75f   :  { %v11372_v15 = vpop.xlane.xlu0 %11371 }
 0x760   :  { %v11373_v34 = vsub.f32 %v11366_v6, %v11372_v15 }
 0x762   :  { %v11374_v26 = vmul.f32 1.442695, %v11373_v34 }
 0x764   :  { %18322 = vpow2.f32 %v11374_v26 }
 0x76a   :  { %v18323_v25 = vpop.eup %18322 }
 0x76b   :  { %v11376_v51 = vsel %vm11369_vm7, %v18323_v25, 0.0 }
 0x76c   :  { %11377 = vadd.xlane.f32.xlu0 %v11376_v51 }
 0x7df   :  { %v11378_v19 = vpop.xlane.xlu0 %11377 }
 0x7e0   :  { %18324 = vrcp.f32 %v11378_v19 }
 0x7e6   :  { %v18325_v45 = vpop.eup %18324 }
 0x7e7   :  { %v11380_v17 = vmul.f32 %v18325_v45, %v18323_v25 }
 0x7e9   :  { %11381 = vst.msk [vmem:[#allocation2] sm:$0xff] %vm11369_vm7, %v11380_v17 }
 0x7ea   :  { %11392 = dma.vmem_to_hbm [thread:$0]  %s11388_s13, 128, %s11390_s3, [#allocation3]  }
 0x7eb   :  { %18357 = dma.done.wait [#allocation3], 128  }
 0x7ec   :  { %18358 = vsyncadd [#allocation3], 4294967168 }
 0x7ed   :  { %11397 = vsyncpa [#allocation3], 1 }

</bundles_post_ra>
